<compile_context>
chip_gen: v5e
topology: v5e:2x2
jax: 0.10.0
libtpu: 0.0.40
codegen_flags: <defaults>
</compile_context>

<pallas_src>
import math

import jax
import jax.numpy as jnp
import numpy as np
from jax.experimental import pallas as pl
from jax.experimental.pallas import tpu as pltpu

# Identical true-f32 matmul lowering for kernel and reference.
jax.config.update("jax_default_matmul_precision", "highest")

# ----------------------------- model dims ------------------------------------
NDIM = 16
N_CENTROIDS = 32
N_DOT = 32
N_HIDDEN = 32
N_HEADS = 4
TIME_EMBED_DIM = 64
MLP_PROJ_DIM = 128
LN_EPS = 1e-5

HD = N_HEADS * N_DOT        # 128  (query width)
HC = N_HEADS * N_CENTROIDS  # 128  (score width)
HH = N_HEADS * N_HIDDEN     # 128  (head-value width)

PACK_W = 4 * NDIM + N_DOT + N_HIDDEN   # 128: [x | g1 | g2 | g3 | mod1 | mod2]
W1_W = HD + HD + HH                    # 384: [q | mod1_rep | mod2_rep]
BIGW_W = W1_W + HC + (HH + HH)         # 768: [W1 | k_bd | (v_bd | ones)]

_HIGH = jax.lax.Precision.HIGHEST


# ----------------------------- Pallas kernel ---------------------------------
def _resblock_kernel(pk_ref, bigw_ref, wo_w_ref, l1_w_ref, l2_w_ref, vecs_ref, out_ref):
    f32 = jnp.float32

    pk = pk_ref[...]                       # (TB, 128) packed per-row stream
    x = pk[:, 0:NDIM]
    g1 = pk[:, NDIM:2 * NDIM]              # gates pre-broadcast to 16 lanes
    g2 = pk[:, 2 * NDIM:3 * NDIM]
    g3 = pk[:, 3 * NDIM:4 * NDIM]

    vecs = vecs_ref[...]                   # (8, 128) bias/affine slab
    wq_b = vecs[0:1, :]                    # (1, 128)
    l1_b = vecs[1:2, :]                    # (1, 128)
    wo_b = vecs[2:3, 0:NDIM]               # (1, 16)
    ln_w = vecs[3:4, 0:NDIM]
    ln_b = vecs[4:5, 0:NDIM]
    l2_b = vecs[5:6, 0:NDIM]

    bigw = bigw_ref[...]                   # (128, 768) packed weight slab
    w1 = bigw[:, 0:W1_W]                   # (128, 384): Wq + mod replication
    k_bd = bigw[:, W1_W:W1_W + HC]         # (128, 128): block-diag key^T, scale baked in
    w2 = bigw[:, W1_W + HC:]               # (128, 256): [block-diag value | per-head ones]

    # ---- fused query projection + mod1/mod2 head replication (single MXU pass)
    proj = jnp.dot(pk, w1, preferred_element_type=f32, precision=_HIGH)   # (TB, 384)
    q = proj[:, 0:HD] + wq_b
    mod1_rep = proj[:, HD:2 * HD]
    mod2_rep = proj[:, 2 * HD:]

    # ---- scores (all heads in one 128-wide pass); 1/sqrt(n_dot) baked into k_bd
    s = jnp.dot(q * mod1_rep, k_bd, preferred_element_type=f32, precision=_HIGH)
    # Global row max cancels in the per-head softmax ratio (exact); only a hazard if
    # one head's scores sit far below the global max (exp underflow) -- not the case
    # at these score scales.
    m = jnp.max(s, axis=-1, keepdims=True)
    p = jnp.exp(s - m)                                                    # (TB, 128)

    # ---- fused [head-values | per-head denominator] in one 256-wide matmul
    hv_den = jnp.dot(p, w2, preferred_element_type=f32, precision=_HIGH)  # (TB, 256)
    hv = hv_den[:, 0:HH]
    den = hv_den[:, HH:]                                                  # denom replicated / head
    r = pl.reciprocal(den, approx=True)
    r = r * (2.0 - den * r)                # one Newton step -> ~1e-8 rel error (EUP + VPU)

    hvn = hv * (r * mod2_rep)
    attn = jnp.dot(hvn, wo_w_ref[...], preferred_element_type=f32,
                   precision=_HIGH) + wo_b                                # (TB, 16)

    # ---- gated residual + LayerNorm
    z = g1 * x + g2 * attn
    mu = jnp.mean(z, axis=-1, keepdims=True)
    zc = z - mu
    var = jnp.mean(zc * zc, axis=-1, keepdims=True)
    zn = zc * jax.lax.rsqrt(var + LN_EPS) * ln_w + ln_b

    # ---- gated ReLU-MLP residual branch
    h1 = jnp.maximum(
        jnp.dot(zn, l1_w_ref[...], preferred_element_type=f32, precision=_HIGH) + l1_b, 0.0)
    h2 = jnp.maximum(
        jnp.dot(h1, l2_w_ref[...], preferred_element_type=f32, precision=_HIGH) + l2_b, 0.0)

    # TODO(synk): if profiling shows the masked 16-lane stores dominate, emit the output
    # transposed as (NDIM, B) for dense 128-lane stores and undo the transpose in the wrapper.
    out_ref[...] = zn + g3 * h2


# ----------------------------- glue + wrapper ---------------------------------
def gaussian_fourier(t, W):
    tp = t[:, None] * W[None, :] * (2.0 * math.pi)
    return jnp.concatenate([jnp.sin(tp), jnp.cos(tp)], axis=-1)


def _round_up(v, m):
    return ((v + m - 1) // m) * m


def _pack_weights(params):
    """Bake every attention-stage matrix into one (128, 768) slab + (8,128) vector slab."""
    f32 = jnp.float32
    scale = 1.0 / math.sqrt(N_DOT)

    cent = params["centroids"]                                            # (C, ndim)
    key = (cent @ params["wk_w"] + params["wk_b"]).reshape(N_CENTROIDS, N_HEADS, N_DOT)
    val = (cent @ params["wv_w"] + params["wv_b"]).reshape(N_CENTROIDS, N_HEADS, N_HIDDEN)

    # W1: packed row -> [q | mod1 replicated per head | mod2 replicated per head]
    w1 = jnp.zeros((PACK_W, W1_W), f32)
    w1 = w1.at[0:NDIM, 0:HD].set(params["wq_w"].astype(f32))
    eye_d = jnp.eye(N_DOT, dtype=f32)
    eye_h = jnp.eye(N_HIDDEN, dtype=f32)
    m1_off = 4 * NDIM                      # lane offset of mod1 in the packed stream
    m2_off = 4 * NDIM + N_DOT              # lane offset of mod2
    for h in range(N_HEADS):
        w1 = w1.at[m1_off:m1_off + N_DOT,
                   HD + h * N_DOT:HD + (h + 1) * N_DOT].set(eye_d)
        w1 = w1.at[m2_off:m2_off + N_HIDDEN,
                   2 * HD + h * N_HIDDEN:2 * HD + (h + 1) * N_HIDDEN].set(eye_h)

    # Block-diagonal (pre-scaled) key matrix and [block-diag value | per-head ones].
    k_bd = jnp.zeros((HD, HC), f32)
    w2 = jnp.zeros((HC, HH + HH), f32)
    for h in range(N_HEADS):
        k_bd = k_bd.at[h * N_DOT:(h + 1) * N_DOT,
                       h * N_CENTROIDS:(h + 1) * N_CENTROIDS].set(key[:, h, :].T * scale)
        w2 = w2.at[h * N_CENTROIDS:(h + 1) * N_CENTROIDS,
                   h * N_HIDDEN:(h + 1) * N_HIDDEN].set(val[:, h, :])
        w2 = w2.at[h * N_CENTROIDS:(h + 1) * N_CENTROIDS,
                   HH + h * N_HIDDEN:HH + (h + 1) * N_HIDDEN].set(1.0)

    bigw = jnp.concatenate([w1, k_bd, w2], axis=1)                        # (128, 768)

    vecs = jnp.zeros((8, 128), f32)
    vecs = vecs.at[0, :HD].set(params["wq_b"])
    vecs = vecs.at[1, :MLP_PROJ_DIM].set(params["lin1_b"])
    vecs = vecs.at[2, :NDIM].set(params["wo_b"])
    vecs = vecs.at[3, :NDIM].set(params["ln1_w"])
    vecs = vecs.at[4, :NDIM].set(params["ln1_b"])
    vecs = vecs.at[5, :NDIM].set(params["lin2_b"])
    return bigw, vecs


def modulated_res_block(params, x, sigma, *, batch_tile=2048):
    B, ndim = x.shape
    assert ndim == NDIM
    assert batch_tile % 8 == 0 and batch_tile >= 8
    f32 = jnp.float32

    # ---- thin glue in plain JAX: time embeddings -> mods / gates ----
    emb_mha = gaussian_fourier(sigma, params["mha_gfp_W"])                # (B, TE)
    mod1 = emb_mha @ params["mod1_w"] + params["mod1_b"]                  # (B, n_dot)
    mod2 = emb_mha @ params["mod2_w"] + params["mod2_b"]                  # (B, n_hidden)

    emb_rb = gaussian_fourier(sigma, params["rb_gfp_W"])                  # (B, TE)
    g1 = emb_rb @ params["gate1_w"] + params["gate1_b"]                   # (B, 1)
    g2 = emb_rb @ params["gate2_w"] + params["gate2_b"]                   # (B, 1)
    g3 = emb_rb @ params["gate3_w"] + params["gate3_b"]                   # (B, 1)

    # ONE lane-dense 128-wide stream per row (no zero pad, no head tiling):
    packed = jnp.concatenate(
        [x.astype(f32),
         jnp.tile(g1, (1, NDIM)).astype(f32),
         jnp.tile(g2, (1, NDIM)).astype(f32),
         jnp.tile(g3, (1, NDIM)).astype(f32),
         mod1.astype(f32),
         mod2.astype(f32)], axis=1)                                       # (B, 128)

    bigw, vecs = _pack_weights(params)

    # ---- batch tiling: clamp to the (8-padded) batch; keep >=2 grid tiles so the
    # "parallel" batch axis can be sharded across v7x's two TensorCores.
    rows = _round_up(B, 8)
    tile = min(batch_tile, rows)
    if tile >= rows and rows >= 16:
        tile = _round_up((rows + 1) // 2, 8)
    n_tiles = -(-B // tile)
    b_pad = n_tiles * tile
    if b_pad != B:
        packed = jnp.pad(packed, ((0, b_pad - B), (0, 0)))   # padded rows finite, discarded

    def full(shape):
        nd = len(shape)
        return pl.BlockSpec(shape, lambda i, _nd=nd: (0,) * _nd)

    out = pl.pallas_call(
        _resblock_kernel,
        out_shape=jax.ShapeDtypeStruct((b_pad, NDIM), f32),
        grid_spec=pltpu.PrefetchScalarGridSpec(
            num_scalar_prefetch=0,
            grid=(n_tiles,),
            in_specs=[
                pl.BlockSpec((tile, PACK_W), lambda i: (i, 0)),   # packed per-row stream
                full((PACK_W, BIGW_W)),                           # [W1 | k_bd | v_bd+ones]
                full(params["wo_w"].shape),                       # (128, 16)
                full(params["lin1_w"].shape),                     # (16, 128)
                full(params["lin2_w"].shape),                     # (128, 16)
                full((8, 128)),                                   # packed bias/affine vectors
            ],
            out_specs=pl.BlockSpec((tile, NDIM), lambda i: (i, 0)),
        ),
        # NOTE: packed layout keeps per-tile VMEM well under every generation's scoped
        # default at these tile sizes; set vmem_limit_bytes only for much larger tiles.
        compiler_params=pltpu.CompilerParams(
            dimension_semantics=("parallel",)),
    )(packed, bigw, params["wo_w"], params["lin1_w"], params["lin2_w"], vecs)

    return out[:B]


# ----------------------------- pure-JAX reference -----------------------------
def reference_forward(params, x, sigma):
    emb_mha = gaussian_fourier(sigma, params["mha_gfp_W"])
    mod1 = emb_mha @ params["mod1_w"] + params["mod1_b"]
    mod2 = emb_mha @ params["mod2_w"] + params["mod2_b"]

    query = (x @ params["wq_w"] + params["wq_b"]).reshape(-1, N_HEADS, N_DOT)
    key = (params["centroids"] @ params["wk_w"] + params["wk_b"]).reshape(
        N_CENTROIDS, N_HEADS, N_DOT)
    value = (params["centroids"] @ params["wv_w"] + params["wv_b"]).reshape(
        N_CENTROIDS, N_HEADS, N_HIDDEN)

    attn = jnp.einsum("Bhd,Chd->hBC", query * mod1[:, None, :], key)
    attn_score = jax.nn.softmax(attn / math.sqrt(N_DOT), axis=-1)
    head_values = jnp.einsum("hBC,Chd->Bhd", attn_score, value)
    head_values = head_values * mod2[:, None, :]
    mha_out = head_values.reshape(x.shape[0], -1) @ params["wo_w"] + params["wo_b"]

    emb_rb = gaussian_fourier(sigma, params["rb_gfp_W"])
    g1 = emb_rb @ params["gate1_w"] + params["gate1_b"]
    g2 = emb_rb @ params["gate2_w"] + params["gate2_b"]
    g3 = emb_rb @ params["gate3_w"] + params["gate3_b"]

    z = g1 * x + g2 * mha_out
    mu = jnp.mean(z, axis=-1, keepdims=True)
    var = jnp.mean((z - mu) ** 2, axis=-1, keepdims=True)
    zn = (z - mu) / jnp.sqrt(var + LN_EPS)
    zn = zn * params["ln1_w"] + params["ln1_b"]

    h1 = jax.nn.relu(zn @ params["lin1_w"] + params["lin1_b"])
    h2 = jax.nn.relu(h1 @ params["lin2_w"] + params["lin2_b"])
    return zn + g3 * h2


# ----------------------------- params ----------------------------------------
def init_params(key):
    ks = jax.random.split(key, 24)

    def lin(kw, kb, fan_in, fan_out):
        s = 1.0 / math.sqrt(fan_in)
        w = jax.random.uniform(kw, (fan_in, fan_out), jnp.float32, -s, s)
        b = jax.random.uniform(kb, (fan_out,), jnp.float32, -s, s)
        return w, b

    p = {}
    p["wq_w"], p["wq_b"] = lin(ks[0], ks[1], NDIM, N_DOT * N_HEADS)
    p["wk_w"], p["wk_b"] = lin(ks[2], ks[3], NDIM, N_DOT * N_HEADS)
    p["wv_w"], p["wv_b"] = lin(ks[4], ks[5], NDIM, N_HIDDEN * N_HEADS)
    p["wo_w"], p["wo_b"] = lin(ks[6], ks[7], N_HIDDEN * N_HEADS, NDIM)

    cent = jax.random.normal(ks[8], (N_CENTROIDS, NDIM), jnp.float32)
    p["centroids"] = cent / jnp.linalg.norm(cent, axis=1, keepdims=True)

    p["mha_gfp_W"] = jax.random.normal(ks[9], (TIME_EMBED_DIM // 2,), jnp.float32) * 30.0
    p["rb_gfp_W"] = jax.random.normal(ks[10], (TIME_EMBED_DIM // 2,), jnp.float32) * 30.0

    p["mod1_w"], p["mod1_b"] = lin(ks[11], ks[12], TIME_EMBED_DIM, N_DOT)
    p["mod2_w"], p["mod2_b"] = lin(ks[13], ks[14], TIME_EMBED_DIM, N_HIDDEN)

    p["gate1_w"], p["gate1_b"] = lin(ks[15], ks[16], TIME_EMBED_DIM, 1)
    p["gate2_w"], p["gate2_b"] = lin(ks[17], ks[18], TIME_EMBED_DIM, 1)
    p["gate3_w"], p["gate3_b"] = lin(ks[19], ks[20], TIME_EMBED_DIM, 1)

    p["ln1_w"] = jnp.ones((NDIM,), jnp.float32)
    p["ln1_b"] = jnp.zeros((NDIM,), jnp.float32)

    p["lin1_w"], p["lin1_b"] = lin(ks[21], ks[22], NDIM, MLP_PROJ_DIM)
    p["lin2_w"], p["lin2_b"] = lin(ks[23], ks[0], MLP_PROJ_DIM, NDIM)
    return p


# ----------------------------- main -------------------------------------------
if __name__ == "__main__":
    key = jax.random.PRNGKey(0)
    kp, kx, ks = jax.random.split(key, 3)

    params = init_params(kp)

    B = 200
    x = jax.random.normal(kx, (B, NDIM), jnp.float32)
    sigma = jax.random.uniform(ks, (B,), jnp.float32, 0.01, 1.0)

    ref = jax.block_until_ready(reference_forward(params, x, sigma))

    # default tile (clamped to the batch, split into 2 parallel tiles)
    out = jax.block_until_ready(modulated_res_block(params, x, sigma))
    assert out.shape == (B, NDIM)
    np.testing.assert_allclose(np.asarray(out), np.asarray(ref), rtol=1e-4, atol=1e-4)

    # multi-tile + remainder-padding path
    out_small = jax.block_until_ready(modulated_res_block(params, x, sigma, batch_tile=64))
    np.testing.assert_allclose(np.asarray(out_small), np.asarray(ref), rtol=1e-4, atol=1e-4)

    print("KERNEL_OK")
</pallas_src>

<mosaic_0001>
module attributes {stable_mosaic.version = 11 : i64} {
  func.func @_resblock_kernel(%arg0: i32, %arg1: memref<104x128xf32, #tpu.memory_space<vmem>>, %arg2: memref<128x768xf32, #tpu.memory_space<vmem>>, %arg3: memref<128x16xf32, #tpu.memory_space<vmem>>, %arg4: memref<16x128xf32, #tpu.memory_space<vmem>>, %arg5: memref<128x16xf32, #tpu.memory_space<vmem>>, %arg6: memref<8x128xf32, #tpu.memory_space<vmem>>, %arg7: memref<104x16xf32, #tpu.memory_space<vmem>>) attributes {dimension_semantics = [#tpu.dimension_semantics<parallel>], iteration_bounds = array<i64: 2>, scalar_prefetch = 0 : i64, scratch_operands = 0 : i64, tpu.core_type = #tpu.core_type<tc>, window_params = [{transform_indices = @transform_0, window_bounds = array<i64: 104, 128>}, {pipeline_mode = #tpu.pipeline_mode<synchronous>, transform_indices = @transform_1, window_bounds = array<i64: 128, 768>}, {pipeline_mode = #tpu.pipeline_mode<synchronous>, transform_indices = @transform_2, window_bounds = array<i64: 128, 16>}, {pipeline_mode = #tpu.pipeline_mode<synchronous>, transform_indices = @transform_3, window_bounds = array<i64: 16, 128>}, {pipeline_mode = #tpu.pipeline_mode<synchronous>, transform_indices = @transform_4, window_bounds = array<i64: 128, 16>}, {pipeline_mode = #tpu.pipeline_mode<synchronous>, transform_indices = @transform_5, window_bounds = array<i64: 8, 128>}, {transform_indices = @transform_6, window_bounds = array<i64: 104, 16>}]} {
    %c0 = arith.constant 0 : index
    %c0_0 = arith.constant 0 : index
    %0 = vector.load %arg1[%c0, %c0_0] : memref<104x128xf32, #tpu.memory_space<vmem>>, vector<104x128xf32>
    %1 = vector.extract_strided_slice %0 {offsets = [0, 0], sizes = [104, 16], strides = [1, 1]} : vector<104x128xf32> to vector<104x16xf32>
    %2 = vector.extract_strided_slice %0 {offsets = [0, 16], sizes = [104, 16], strides = [1, 1]} : vector<104x128xf32> to vector<104x16xf32>
    %3 = vector.extract_strided_slice %0 {offsets = [0, 32], sizes = [104, 16], strides = [1, 1]} : vector<104x128xf32> to vector<104x16xf32>
    %4 = vector.extract_strided_slice %0 {offsets = [0, 48], sizes = [104, 16], strides = [1, 1]} : vector<104x128xf32> to vector<104x16xf32>
    %c0_1 = arith.constant 0 : index
    %c0_2 = arith.constant 0 : index
    %5 = vector.load %arg6[%c0_1, %c0_2] : memref<8x128xf32, #tpu.memory_space<vmem>>, vector<8x128xf32>
    %6 = vector.extract_strided_slice %5 {offsets = [0, 0], sizes = [1, 128], strides = [1, 1]} : vector<8x128xf32> to vector<1x128xf32>
    %7 = vector.extract_strided_slice %5 {offsets = [1, 0], sizes = [1, 128], strides = [1, 1]} : vector<8x128xf32> to vector<1x128xf32>
    %8 = vector.extract_strided_slice %5 {offsets = [2, 0], sizes = [1, 16], strides = [1, 1]} : vector<8x128xf32> to vector<1x16xf32>
    %9 = vector.extract_strided_slice %5 {offsets = [3, 0], sizes = [1, 16], strides = [1, 1]} : vector<8x128xf32> to vector<1x16xf32>
    %10 = vector.extract_strided_slice %5 {offsets = [4, 0], sizes = [1, 16], strides = [1, 1]} : vector<8x128xf32> to vector<1x16xf32>
    %11 = vector.extract_strided_slice %5 {offsets = [5, 0], sizes = [1, 16], strides = [1, 1]} : vector<8x128xf32> to vector<1x16xf32>
    %c0_3 = arith.constant 0 : index
    %c0_4 = arith.constant 0 : index
    %12 = vector.load %arg2[%c0_3, %c0_4] : memref<128x768xf32, #tpu.memory_space<vmem>>, vector<128x768xf32>
    %13 = vector.extract_strided_slice %12 {offsets = [0, 0], sizes = [128, 384], strides = [1, 1]} : vector<128x768xf32> to vector<128x384xf32>
    %14 = vector.extract_strided_slice %12 {offsets = [0, 384], sizes = [128, 128], strides = [1, 1]} : vector<128x768xf32> to vector<128x128xf32>
    %15 = vector.extract_strided_slice %12 {offsets = [0, 512], sizes = [128, 256], strides = [1, 1]} : vector<128x768xf32> to vector<128x256xf32>
    %cst = arith.constant dense<0.000000e+00> : vector<104x384xf32>
    %16 = tpu.matmul %0, %13, %cst {dimension_numbers = #tpu.dot_dimension_numbers<[1], [0], [0], [1], [0, 0, 1, 1], [], []>, precision = #tpu.contract_precision<fp32>} : vector<104x128xf32>, vector<128x384xf32>, vector<104x384xf32> -> vector<104x384xf32>
    %17 = vector.extract_strided_slice %16 {offsets = [0, 0], sizes = [104, 128], strides = [1, 1]} : vector<104x384xf32> to vector<104x128xf32>
    %18 = vector.broadcast %6 : vector<1x128xf32> to vector<104x128xf32>
    %19 = arith.addf %17, %18 : vector<104x128xf32>
    %20 = vector.extract_strided_slice %16 {offsets = [0, 128], sizes = [104, 128], strides = [1, 1]} : vector<104x384xf32> to vector<104x128xf32>
    %21 = vector.extract_strided_slice %16 {offsets = [0, 256], sizes = [104, 128], strides = [1, 1]} : vector<104x384xf32> to vector<104x128xf32>
    %22 = arith.mulf %19, %20 : vector<104x128xf32>
    %cst_5 = arith.constant dense<0.000000e+00> : vector<104x128xf32>
    %23 = tpu.matmul %22, %14, %cst_5 {dimension_numbers = #tpu.dot_dimension_numbers<[1], [0], [0], [1], [0, 0, 1, 1], [], []>, precision = #tpu.contract_precision<fp32>} : vector<104x128xf32>, vector<128x128xf32>, vector<104x128xf32> -> vector<104x128xf32>
    %cst_6 = arith.constant dense<0xFF800000> : vector<104xf32>
    %24 = vector.multi_reduction <maximumf>, %23, %cst_6 [1] : vector<104x128xf32> to vector<104xf32>
    %25 = vector.shape_cast %24 : vector<104xf32> to vector<104x1xf32>
    %26 = vector.broadcast %25 : vector<104x1xf32> to vector<104x128xf32>
    %27 = arith.subf %23, %26 : vector<104x128xf32>
    %28 = math.exp %27 : vector<104x128xf32>
    %cst_7 = arith.constant dense<0.000000e+00> : vector<104x256xf32>
    %29 = tpu.matmul %28, %15, %cst_7 {dimension_numbers = #tpu.dot_dimension_numbers<[1], [0], [0], [1], [0, 0, 1, 1], [], []>, precision = #tpu.contract_precision<fp32>} : vector<104x128xf32>, vector<128x256xf32>, vector<104x256xf32> -> vector<104x256xf32>
    %30 = vector.extract_strided_slice %29 {offsets = [0, 0], sizes = [104, 128], strides = [1, 1]} : vector<104x256xf32> to vector<104x128xf32>
    %31 = vector.extract_strided_slice %29 {offsets = [0, 128], sizes = [104, 128], strides = [1, 1]} : vector<104x256xf32> to vector<104x128xf32>
    %32 = tpu.reciprocal %31 {approx = true} : vector<104x128xf32> -> vector<104x128xf32>
    %33 = arith.mulf %31, %32 : vector<104x128xf32>
    %cst_8 = arith.constant 2.000000e+00 : f32
    %34 = vector.broadcast %cst_8 : f32 to vector<104x128xf32>
    %35 = arith.subf %34, %33 : vector<104x128xf32>
    %36 = arith.mulf %32, %35 : vector<104x128xf32>
    %37 = arith.mulf %36, %21 : vector<104x128xf32>
    %38 = arith.mulf %30, %37 : vector<104x128xf32>
    %c0_9 = arith.constant 0 : index
    %c0_10 = arith.constant 0 : index
    %39 = vector.load %arg3[%c0_9, %c0_10] : memref<128x16xf32, #tpu.memory_space<vmem>>, vector<128x16xf32>
    %cst_11 = arith.constant dense<0.000000e+00> : vector<104x16xf32>
    %40 = tpu.matmul %38, %39, %cst_11 {dimension_numbers = #tpu.dot_dimension_numbers<[1], [0], [0], [1], [0, 0, 1, 1], [], []>, precision = #tpu.contract_precision<fp32>} : vector<104x128xf32>, vector<128x16xf32>, vector<104x16xf32> -> vector<104x16xf32>
    %41 = vector.broadcast %8 : vector<1x16xf32> to vector<104x16xf32>
    %42 = arith.addf %40, %41 : vector<104x16xf32>
    %43 = arith.mulf %2, %1 : vector<104x16xf32>
    %44 = arith.mulf %3, %42 : vector<104x16xf32>
    %45 = arith.addf %43, %44 : vector<104x16xf32>
    %cst_12 = arith.constant dense<0.000000e+00> : vector<104xf32>
    %46 = vector.multi_reduction <add>, %45, %cst_12 [1] : vector<104x16xf32> to vector<104xf32>
    %47 = vector.shape_cast %46 : vector<104xf32> to vector<104x1xf32>
    %cst_13 = arith.constant 1.600000e+01 : f32
    %48 = vector.broadcast %cst_13 : f32 to vector<104x1xf32>
    %49 = arith.divf %47, %48 : vector<104x1xf32>
    %50 = vector.broadcast %49 : vector<104x1xf32> to vector<104x16xf32>
    %51 = arith.subf %45, %50 : vector<104x16xf32>
    %52 = arith.mulf %51, %51 : vector<104x16xf32>
    %cst_14 = arith.constant dense<0.000000e+00> : vector<104xf32>
    %53 = vector.multi_reduction <add>, %52, %cst_14 [1] : vector<104x16xf32> to vector<104xf32>
    %54 = vector.shape_cast %53 : vector<104xf32> to vector<104x1xf32>
    %cst_15 = arith.constant 1.600000e+01 : f32
    %55 = vector.broadcast %cst_15 : f32 to vector<104x1xf32>
    %56 = arith.divf %54, %55 : vector<104x1xf32>
    %cst_16 = arith.constant 9.99999974E-6 : f32
    %57 = vector.broadcast %cst_16 : f32 to vector<104x1xf32>
    %58 = arith.addf %56, %57 : vector<104x1xf32>
    %59 = math.rsqrt %58 : vector<104x1xf32>
    %60 = vector.broadcast %59 : vector<104x1xf32> to vector<104x16xf32>
    %61 = arith.mulf %51, %60 : vector<104x16xf32>
    %62 = vector.broadcast %9 : vector<1x16xf32> to vector<104x16xf32>
    %63 = arith.mulf %61, %62 : vector<104x16xf32>
    %64 = vector.broadcast %10 : vector<1x16xf32> to vector<104x16xf32>
    %65 = arith.addf %63, %64 : vector<104x16xf32>
    %c0_17 = arith.constant 0 : index
    %c0_18 = arith.constant 0 : index
    %66 = vector.load %arg4[%c0_17, %c0_18] : memref<16x128xf32, #tpu.memory_space<vmem>>, vector<16x128xf32>
    %cst_19 = arith.constant dense<0.000000e+00> : vector<104x128xf32>
    %67 = tpu.matmul %65, %66, %cst_19 {dimension_numbers = #tpu.dot_dimension_numbers<[1], [0], [0], [1], [0, 0, 1, 1], [], []>, precision = #tpu.contract_precision<fp32>} : vector<104x16xf32>, vector<16x128xf32>, vector<104x128xf32> -> vector<104x128xf32>
    %68 = vector.broadcast %7 : vector<1x128xf32> to vector<104x128xf32>
    %69 = arith.addf %67, %68 : vector<104x128xf32>
    %cst_20 = arith.constant 0.000000e+00 : f32
    %70 = vector.broadcast %cst_20 : f32 to vector<104x128xf32>
    %71 = arith.maximumf %69, %70 : vector<104x128xf32>
    %c0_21 = arith.constant 0 : index
    %c0_22 = arith.constant 0 : index
    %72 = vector.load %arg5[%c0_21, %c0_22] : memref<128x16xf32, #tpu.memory_space<vmem>>, vector<128x16xf32>
    %cst_23 = arith.constant dense<0.000000e+00> : vector<104x16xf32>
    %73 = tpu.matmul %71, %72, %cst_23 {dimension_numbers = #tpu.dot_dimension_numbers<[1], [0], [0], [1], [0, 0, 1, 1], [], []>, precision = #tpu.contract_precision<fp32>} : vector<104x128xf32>, vector<128x16xf32>, vector<104x16xf32> -> vector<104x16xf32>
    %74 = vector.broadcast %11 : vector<1x16xf32> to vector<104x16xf32>
    %75 = arith.addf %73, %74 : vector<104x16xf32>
    %cst_24 = arith.constant 0.000000e+00 : f32
    %76 = vector.broadcast %cst_24 : f32 to vector<104x16xf32>
    %77 = arith.maximumf %75, %76 : vector<104x16xf32>
    %78 = arith.mulf %4, %77 : vector<104x16xf32>
    %79 = arith.addf %65, %78 : vector<104x16xf32>
    %c0_25 = arith.constant 0 : index
    %c0_26 = arith.constant 0 : index
    %80 = vector.load %arg7[%c0_25, %c0_26] : memref<104x16xf32, #tpu.memory_space<vmem>>, vector<104x16xf32>
    tpu.vector_store %arg7[%c0_25, %c0_26], %79 {strides = array<i32>} : memref<104x16xf32, #tpu.memory_space<vmem>>, vector<104x16xf32>,
    return
  }
  func.func @transform_0(%arg0: i32) -> (i32, i32) {
    %c0_i32 = arith.constant 0 : i32
    %c0_i32_0 = arith.constant 0 : i32
    return %arg0, %c0_i32 : i32, i32
  }
  func.func @transform_1(%arg0: i32) -> (i32, i32) {
    %c0_i32 = arith.constant 0 : i32
    %c0_i32_0 = arith.constant 0 : i32
    %c0_i32_1 = arith.constant 0 : i32
    return %c0_i32, %c0_i32_0 : i32, i32
  }
  func.func @transform_2(%arg0: i32) -> (i32, i32) {
    %c0_i32 = arith.constant 0 : i32
    %c0_i32_0 = arith.constant 0 : i32
    %c0_i32_1 = arith.constant 0 : i32
    return %c0_i32, %c0_i32_0 : i32, i32
  }
  func.func @transform_3(%arg0: i32) -> (i32, i32) {
    %c0_i32 = arith.constant 0 : i32
    %c0_i32_0 = arith.constant 0 : i32
    %c0_i32_1 = arith.constant 0 : i32
    return %c0_i32, %c0_i32_0 : i32, i32
  }
  func.func @transform_4(%arg0: i32) -> (i32, i32) {
    %c0_i32 = arith.constant 0 : i32
    %c0_i32_0 = arith.constant 0 : i32
    %c0_i32_1 = arith.constant 0 : i32
    return %c0_i32, %c0_i32_0 : i32, i32
  }
  func.func @transform_5(%arg0: i32) -> (i32, i32) {
    %c0_i32 = arith.constant 0 : i32
    %c0_i32_0 = arith.constant 0 : i32
    %c0_i32_1 = arith.constant 0 : i32
    return %c0_i32, %c0_i32_0 : i32, i32
  }
  func.func @transform_6(%arg0: i32) -> (i32, i32) {
    %c0_i32 = arith.constant 0 : i32
    %c0_i32_0 = arith.constant 0 : i32
    return %arg0, %c0_i32 : i32, i32
  }
}

</mosaic_0001>

<bundles_post_ra>
// kernel: tpu_custom_call.1
= control target key start
LH: loop header
LB: loop body
LE: loop exit
PB: predicated region body
PF: predicated region fallthrough
CT: control target
= control target key end

     0   :  { %11 = vsyncpa [#allocation3], 0  ;;  %s8071_s21 = smov 0   ;;  %s12670_s0 = inlined_call_operand.vmem [shape: f32[208,128], index: 0, kind: input, shape index: {}]   ;;  %s12671_s1 = inlined_call_operand.hbm [shape: f32[128,768], index: 1, kind: input, shape index: {}]   ;;  %s12672_s2 = inlined_call_operand.vmem [shape: f32[128,16], index: 2, kind: input, shape index: {}]   ;;  %s12673_s3 = inlined_call_operand.vmem [shape: f32[16,128], index: 3, kind: input, shape index: {}]   ;;  %s12674_s4 = inlined_call_operand.vmem [shape: f32[128,16], index: 4, kind: input, shape index: {}]   ;;  %s12675_s5 = inlined_call_operand.vmem [shape: f32[8,128], index: 5, kind: input, shape index: {}]   ;;  %s12676_s6 = inlined_call_operand.vmem [shape: f32[208,16], index: 6, kind: output, shape index: {}]  }
   0x1 LB: > { %s190_s24 = sshll.u32 %s12671_s1, 4  ;;  %s7807_s25 = sadd.s32 4294967295, %s8025_s21   ;;  %s8025_s21 = sphi %s8071_s21, %s17_s21   ;;  %s191_s24 = int_to_ptr.hbm [resolvable:$true] %s190_s24 }
   0x2   : > { %p7809_p0 = scmp.ge.s32.totalorder %s8025_s21, 1  ;;  %p179_p1 = scmp.lt.s32.totalorder %s8025_s21, 3 }
   0x3   : > { %p7858_p2 = scmp.eq.s32.totalorder %s7807_s25, 0  ;;  %s8027_s26 = smov [#allocation2]  }
   0x4   : > { %p180_p3 = pnand %p7809_p0, %p179_p1  ;;  %s192_s27 = sshll.u32 %s8027_s26, 4  ;;  %s193_s27 = int_to_ptr.vmem [resolvable:$true] %s192_s27 }
   0x5   : > { %s8028_s28 = smov 768   ;;  %s8029_s29 = smov 48  }
   0x6   : > { %p7854_p4 = pneg %p180_p3  ;;  %229 = sbr.rel (%p180_p3) target bundleno = 3395 (0xd43), region = 44 }
   0x8   : > { %p7855_p5 = pnand %p7858_p2, %p7854_p4 }
   0xa   : > { %7857 = dma.hbm_to_vmem [thread:$0]  (!%p7855_p5), %s191_s24, 12288, %s193_s27, [#allocation3], %s8028_s28, %s8028_s28, %s8029_s29  }
   0xb   : > { %8020 = dma.done.wait (%p7858_p2), [#allocation3], 12288  }
   0xc   : > { %8022 = vsyncadd (%p7858_p2), [#allocation3], 4294955008  ;;  %s260_s30 = smul.u32 13, %s7807_s25  ;;  %v376_v0 = vld [vmem:[#allocation2 + $0x2d0] sm:$0xff]  ;;  %v370_v1 = vld [vmem:[#allocation2 + $0x2a0] sm:$0xff]  ;;  %s8030_s26 = smov 16  }
   0xd   : > { %v364_v2 = vld [vmem:[#allocation2 + $0x270] sm:$0xff]  ;;  %v8084_v3 = vand.u32 4294901760, %v376_v0  ;;  %v8086_v4 = vand.u32 4294901760, %v370_v1  ;;  %v358_v6 = vld [vmem:[#allocation2 + $0x240] sm:$0xff]  ;;  %s8031_s29 = smov 32   ;;  %s8032_s8 = smov 112  }
   0xe   : > { %p261_p6 = scmp.lt.s32.totalorder %s260_s30, 25  ;;  %v8088_v5 = vand.u32 4294901760, %v364_v2  ;;  %v352_v7 = vld [vmem:[#allocation2 + $0x210] sm:$0xff]  ;;  %v346_v8 = vld [vmem:[#allocation2 + $0x1e0] sm:$0xff]  ;;  %v8090_v9 = vand.u32 4294901760, %v358_v6  ;;  %vm5807_vm0 = vcmask 130048  }
   0xf   : > { %v8092_v10 = vand.u32 4294901760, %v352_v7  ;;  %v8094_v11 = vand.u32 4294901760, %v346_v8  ;;  %v340_v12 = vld [vmem:[#allocation2 + $0x1b0] sm:$0xff]  ;;  %383 = vmatpush.msra.mxu0 %v8084_v3  ;;  %7818 = vmatpush.msra.mxu2 %v8084_v3  ;;  %v8099_v13 = vsub.f32 %v376_v0, %v8084_v3  ;;  %v8102_v14 = vsub.f32 %v370_v1, %v8086_v4  ;;  %v334_v16 = vld [vmem:[#allocation2 + $0x180] sm:$0xff]  ;;  %s8034_s9 = smov 48   ;;  %s8035_s11 = smov 96  }
  0x10   : > { %s13407_s30 = smov (!%p261_p6, %s260_s30), 25  ;;  %v8105_v15 = vsub.f32 %v364_v2, %v8088_v5  ;;  %v8107_v17 = vand.u32 4294901760, %v340_v12  ;;  %v8110_v18 = vsub.f32 %v358_v6, %v8090_v9  ;;  %v328_v23 = vld [vmem:[#allocation2 + $0x150] sm:$0xff]  ;;  %v8121_v24 = vand.u32 4294901760, %v334_v16  ;;  %v322_v30 = vld [vmem:[#allocation2 + $0x120] sm:$0xff] }
  0x11   : > { %v8113_v19 = vsub.f32 %v352_v7, %v8092_v10  ;;  %385 = vmatpush.msra.mxu0 %v8086_v4  ;;  %7819 = vmatpush.msra.mxu2 %v8086_v4  ;;  %v521_v20 = vand.u32 4294901760, %v8099_v13  ;;  %v12691_v21 = vand.u32 4294901760, %v8102_v14  ;;  %s7814_s7 = sshll.u32 %s13407_s30, 3  ;;  %v8125_v26 = vsub.f32 %v346_v8, %v8094_v11  ;;  %v316_v36 = vld [vmem:[#allocation2 + $0xf0] sm:$0xff]  ;;  %v310_v40 = vld [vmem:[#allocation2 + $0xc0] sm:$0xff] }
  0x12   : > { %v12690_v22 = vand.u32 4294901760, %v8105_v15  ;;  %v12687_v25 = vand.u32 4294901760, %v8110_v18  ;;  %v8139_v32 = vand.u32 4294901760, %v328_v23  ;;  %v8142_v33 = vsub.f32 %v340_v12, %v8107_v17  ;;  %s8149_s10 = scalar_lea.vmem %s12670_s0, %s7814_s7  ;;  %v304_v51 = vld [vmem:[#allocation2 + $0x90] sm:$0xff]  ;;  %v298_v54 = vld [vmem:[#allocation2 + $0x60] sm:$0xff]  ;;  %s270_s13 = scalar_lea.vmem %s12676_s6, %s7814_s7 }
  0x13   : > { %387 = vmatpush.msra.mxu0 %v8088_v5  ;;  %7820 = vmatpush.msra.mxu2 %v8088_v5  ;;  %v522_v27 = vsub.f32 %v8099_v13, %v521_v20  ;;  %v528_v28 = vsub.f32 %v8102_v14, %v12691_v21  ;;  %v12686_v29 = vand.u32 4294901760, %v8113_v19  ;;  %v8156_v38 = vand.u32 4294901760, %v322_v30  ;;  %v272_v43 = vld [vmem:[%s8149_s10] sm:$0xff]  ;;  %v279_v48 = vld [vmem:[%s8149_s10 + $0x38] sm:$0xff]  ;;  %v292_v62 = vld [vmem:[#allocation2 + $0x30] sm:$0xff] }
  0x14   : > { %v534_v31 = vsub.f32 %v8105_v15, %v12690_v22  ;;  %v540_v35 = vsub.f32 %v8110_v18, %v12687_v25  ;;  %v12685_v39 = vand.u32 4294901760, %v8125_v26  ;;  %v8160_v41 = vsub.f32 %v334_v16, %v8121_v24  ;;  %v286_v8 = vld [vmem:[#allocation2] sm:$0xff] }
  0x15   : > { %389 = vmatpush.msra.mxu0 %v8090_v9  ;;  %7821 = vmatpush.msra.mxu2 %v8090_v9  ;;  %v523_v34 = vand.u32 4294901760, %v522_v27  ;;  %v529_v37 = vand.u32 4294901760, %v528_v28  ;;  %v546_v42 = vsub.f32 %v8113_v19, %v12686_v29  ;;  %v8168_v45 = vand.u32 4294901760, %v316_v36 }
  0x16   : > { %v535_v44 = vand.u32 4294901760, %v534_v31  ;;  %v12682_v46 = vand.u32 4294901760, %v8142_v33  ;;  %v8172_v47 = vsub.f32 %v328_v23, %v8139_v32  ;;  %v541_v49 = vand.u32 4294901760, %v540_v35  ;;  %v280_v35 = vld [vmem:[%s8149_s10 + $0x40] sm:$0xff] }
  0x17   : > { %391 = vmatpush.msra.mxu0 %v8092_v10  ;;  %7822 = vmatpush.msra.mxu2 %v8092_v10  ;;  %v8177_v50 = vand.u32 4294901760, %v310_v40  ;;  %v552_v52 = vsub.f32 %v8125_v26, %v12685_v39  ;;  %v12681_v53 = vand.u32 4294901760, %v8160_v41  ;;  %v8184_v55 = vsub.f32 %v322_v30, %v8156_v38 }
  0x18   : > { %524 = vmatpush.msra.mxu1 %v523_v34  ;;  %7834 = vmatpush.msra.mxu3 %v523_v34  ;;  %v8186_v56 = vand.u32 4294901760, %v272_v43  ;;  %v547_v57 = vand.u32 4294901760, %v546_v42  ;;  %v8190_v58 = vand.u32 4294901760, %v279_v48  ;;  %v558_v59 = vsub.f32 %v8142_v33, %v12682_v46  ;;  %v273_v34 = vld [vmem:[%s8149_s10 + $0x8] sm:$0xff] }
  0x19   : > { %393 = vmatpush.msra.mxu0 %v8094_v11  ;;  %7823 = vmatpush.msra.mxu2 %v8094_v11  ;;  %v8195_v60 = vand.u32 4294901760, %v304_v51  ;;  %v12680_v61 = vand.u32 4294901760, %v8172_v47  ;;  %v8199_v63 = vsub.f32 %v316_v36, %v8168_v45  ;;  %v8203_v0 = vand.u32 4294901760, %v298_v54 }
  0x1a   : > { %530 = vmatpush.msra.mxu1 %v529_v37  ;;  %7835 = vmatpush.msra.mxu3 %v529_v37  ;;  %12903 = vst [vmem:[#allocation5_spill] sm:$0xff] %v8190_v58  ;;  %v8206_v1 = vsub.f32 %v310_v40, %v8177_v50  ;;  %v553_v2 = vand.u32 4294901760, %v552_v52  ;;  %v564_v6 = vsub.f32 %v8160_v41, %v12681_v53  ;;  %v12679_v7 = vand.u32 4294901760, %v8184_v55  ;;  %v281_v53 = vld [vmem:[%s8149_s10 + $0x48] sm:$0xff] }
  0x1b   : > { %395 = vmatpush.msra.mxu0 %v8107_v17  ;;  %7824 = vmatpush.msra.mxu2 %v8107_v17  ;;  %v8213_v12 = vsub.f32 %v272_v43, %v8186_v56  ;;  %v8217_v16 = vand.u32 4294901760, %v292_v62  ;;  %v8220_v23 = vsub.f32 %v279_v48, %v8190_v58  ;;  %v559_v27 = vand.u32 4294901760, %v558_v59 }
  0x1c   : > { %536 = vmatpush.msra.mxu1 %v535_v44  ;;  %7836 = vmatpush.msra.mxu3 %v535_v44  ;;  %v570_v28 = vsub.f32 %v8172_v47, %v12680_v61  ;;  %v12677_v30 = vand.u32 4294901760, %v8199_v63  ;;  %v8227_v31 = vsub.f32 %v304_v51, %v8195_v60  ;;  %v8233_v36 = vand.u32 4294901760, %v286_v8 }
  0x1d   : > { %397 = vmatpush.msra.mxu0 %v8121_v24  ;;  %7825 = vmatpush.msra.mxu2 %v8121_v24  ;;  %12904 = vst [vmem:[#allocation6_spill] sm:$0xff] %v8213_v12  ;;  %v12678_v37 = vand.u32 4294901760, %v8206_v1  ;;  %v565_v40 = vand.u32 4294901760, %v564_v6  ;;  %v576_v42 = vsub.f32 %v8184_v55, %v12679_v7  ;;  %v8240_v43 = vand.u32 4294901760, %v8213_v12 }
  0x1e   : > { %542 = vmatpush.msra.mxu1 %v541_v49  ;;  %7837 = vmatpush.msra.mxu3 %v541_v49  ;;  %12905 = vst [vmem:[#allocation7_spill] sm:$0xff] %v8220_v23  ;;  %v8243_v44 = vsub.f32 %v298_v54, %v8203_v0  ;;  %v8248_v48 = vand.u32 4294901760, %v8220_v23  ;;  %v8250_v49 = vand.u32 4294901760, %v273_v34  ;;  %v8252_v51 = vand.u32 4294901760, %v280_v35 }
  0x1f   : > { %399 = vmatpush.msra.mxu0 %v8139_v32  ;;  %7826 = vmatpush.msra.mxu2 %v8139_v32  ;;  %12906 = vst [vmem:[#allocation8_spill] sm:$0xff] %v8240_v43  ;;  %v571_v52 = vand.u32 4294901760, %v570_v28  ;;  %v12683_v54 = vand.u32 4294901760, %v8227_v31  ;;  %v8259_v59 = vsub.f32 %v292_v62, %v8217_v16  ;;  %v577_v6 = vand.u32 4294901760, %v576_v42  ;;  %v274_v42 = vld [vmem:[%s8149_s10 + $0x10] sm:$0xff] }
  0x20   : > { %548 = vmatpush.msra.mxu1 %v547_v57  ;;  %7838 = vmatpush.msra.mxu3 %v547_v57  ;;  %12907 = vst [vmem:[#allocation9_spill] sm:$0xff] %v8248_v48  ;;  %v582_v57 = vsub.f32 %v8199_v63, %v12677_v30  ;;  %v12684_v28 = vand.u32 4294901760, %v8243_v44  ;;  %v8270_v62 = vsub.f32 %v286_v8, %v8233_v36  ;;  %v8296_v46 = vand.u32 4294901760, %v274_v42 }
  0x21   : > { %401 = vmatpush.msra.mxu0 %v8156_v38  ;;  %7827 = vmatpush.msra.mxu2 %v8156_v38  ;;  %12908 = vst [vmem:[#allocation10_spill] sm:$0xff] %v8252_v51  ;;  %v473_v30 = vsub.f32 %v8220_v23, %v8248_v48  ;;  %v594_v8 = vsub.f32 %v8227_v31, %v12683_v54  ;;  %v12688_v61 = vand.u32 4294901760, %v8259_v59 }
  0x22   : > { %554 = vmatpush.msra.mxu1 %v553_v2  ;;  %7839 = vmatpush.msra.mxu3 %v553_v2  ;;  %v588_v2 = vsub.f32 %v8206_v1, %v12678_v37  ;;  %v8277_v37 = vsub.f32 %v273_v34, %v8250_v49  ;;  %v583_v7 = vand.u32 4294901760, %v582_v57  ;;  %v12689_v57 = vand.u32 4294901760, %v8270_v62  ;;  %12911 = vst [vmem:[#allocation13_spill] sm:$0xff] %v8296_v46 }
  0x23   : > { %403 = vmatpush.msra.mxu0 %v8168_v45  ;;  %7828 = vmatpush.msra.mxu2 %v8168_v45  ;;  %v8300_v54 = vand.u32 4294901760, %v473_v30  ;;  %v606_v39 = vsub.f32 %v8259_v59, %v12688_v61  ;;  %v8319_v25 = vsub.f32 %v274_v42, %v8296_v46  ;;  %v282_v61 = vld [vmem:[%s8149_s10 + $0x50] sm:$0xff] }
  0x24   : > { %560 = vmatpush.msra.mxu1 %v559_v27  ;;  %7840 = vmatpush.msra.mxu3 %v559_v27  ;;  %v417_v27 = vsub.f32 %v8213_v12, %v8240_v43  ;;  %12909 = vst [vmem:[#allocation11_spill] sm:$0xff] %v8277_v37  ;;  %v589_v34 = vand.u32 4294901760, %v588_v2  ;;  %v8303_v2 = vand.u32 4294901760, %v8277_v37  ;;  %v612_v29 = vsub.f32 %v8270_v62, %v12689_v57 }
  0x25   : > { %405 = vmatpush.msra.mxu0 %v8177_v50  ;;  %7829 = vmatpush.msra.mxu2 %v8177_v50  ;;  %12912 = vst [vmem:[#allocation14_spill] sm:$0xff] %v8300_v54  ;;  %v607_v57 = vand.u32 4294901760, %v606_v39  ;;  %v8337_v21 = vand.u32 4294901760, %v282_v61  ;;  %v8345_v39 = vand.u32 4294901760, %v8319_v25 }
  0x26   : > { %566 = vmatpush.msra.mxu1 %v565_v40  ;;  %7841 = vmatpush.msra.mxu3 %v565_v40  ;;  %v8280_v40 = vsub.f32 %v280_v35, %v8252_v51  ;;  %v8290_v35 = vand.u32 4294901760, %v417_v27  ;;  %12913 = vst [vmem:[#allocation15_spill] sm:$0xff] %v8303_v2  ;;  %v8308_v27 = vand.u32 4294901760, %v281_v53  ;;  %v613_v42 = vand.u32 4294901760, %v612_v29 }
  0x27   : > { %407 = vmatpush.msra.mxu0 %v8195_v60  ;;  %7830 = vmatpush.msra.mxu2 %v8195_v60  ;;  %12915 = vst [vmem:[#allocation17_spill] sm:$0xff] %v8319_v25  ;;  %v12922_v29 = vand.u32 4294901760, %v8105_v15 }
  0x28   : > { %12910 = vst [vmem:[#allocation12_spill] sm:$0xff] %v8280_v40  ;;  %572 = vmatpush.msra.mxu1 %v571_v52  ;;  %7842 = vmatpush.msra.mxu3 %v571_v52  ;;  %v600_v52 = vsub.f32 %v8243_v44, %v12684_v28  ;;  %v595_v28 = vand.u32 4294901760, %v594_v8 }
  0x29   : > { %409 = vmatpush.msra.mxu0 %v8203_v0  ;;  %7831 = vmatpush.msra.mxu2 %v8203_v0  ;;  %12920 = vst [vmem:[#allocation22_spill] sm:$0xff] %v8345_v39 }
  0x2a   : > { %578 = vmatpush.msra.mxu1 %v577_v6  ;;  %7843 = vmatpush.msra.mxu3 %v577_v6  ;;  %v8306_v6 = vand.u32 4294901760, %v8280_v40  ;;  %v601_v30 = vand.u32 4294901760, %v600_v52  ;;  %v275_v52 = vld [vmem:[%s8149_s10 + $0x18] sm:$0xff] }
  0x2b   : > { %411 = vmatpush.msra.mxu0 %v8217_v16  ;;  %7832 = vmatpush.msra.mxu2 %v8217_v16  ;;  %v8335_v22 = vand.u32 4294901760, %v275_v52 }
  0x2c   : > { %12914 = vst [vmem:[#allocation16_spill] sm:$0xff] %v8306_v6  ;;  %584 = vmatpush.msra.mxu1 %v583_v7  ;;  %7844 = vmatpush.msra.mxu3 %v583_v7  ;;  %v425_v7 = vsub.f32 %v8277_v37, %v8303_v2  ;;  %v481_v8 = vsub.f32 %v8280_v40, %v8306_v6 }
  0x2d   : > { %413 = vmatpush.msra.mxu0 %v8233_v36  ;;  %7833 = vmatpush.msra.mxu2 %v8233_v36  ;;  %12917 = vst [vmem:[#allocation19_spill] sm:$0xff] %v8335_v22 }
  0x2e   : > { %590 = vmatpush.msra.mxu1 %v589_v34  ;;  %7845 = vmatpush.msra.mxu3 %v589_v34  ;;  %v8328_v34 = vsub.f32 %v281_v53, %v8308_v27  ;;  %v8341_v53 = vand.u32 4294901760, %v481_v8  ;;  %v12924_v8 = vand.u32 4294901760, %v8110_v18 }
  0x2f   : > { %419 = vmatmul.f32.vlgmr.msra.gmra.mxu0 %v8290_v35  ;;  %475 = vmatmul.f32.vlgmr.msra.gmra.mxu2 %v8300_v54  ;;  %v8339_v54 = vand.u32 4294901760, %v425_v7  ;;  %v283_v7 = vld [vmem:[%s8149_s10 + $0x58] sm:$0xff] }
  0x30   : > { %12916 = vst [vmem:[#allocation18_spill] sm:$0xff] %v8328_v34  ;;  %596 = vmatpush.msra.mxu1 %v595_v28  ;;  %7846 = vmatpush.msra.mxu3 %v595_v28  ;;  %v8356_v28 = vsub.f32 %v275_v52, %v8335_v22 }
  0x31   : > { %670 = vmatpush.msrb.mxu2 %v8099_v13  ;;  %896 = vmatpush.msrb.mxu0 %v521_v20  ;;  %12918 = vst [vmem:[#allocation20_spill] sm:$0xff] %v8339_v54  ;;  %v8348_v13 = vand.u32 4294901760, %v8328_v34  ;;  %v12921_v20 = vand.u32 4294901760, %v8102_v14 }
  0x32   : > { %602 = vmatpush.msra.mxu1 %v601_v30  ;;  %7847 = vmatpush.msra.mxu3 %v601_v30  ;;  %12919 = vst [vmem:[#allocation21_spill] sm:$0xff] %v8341_v53  ;;  %v8365_v30 = vsub.f32 %v282_v61, %v8337_v21 }
  0x33   : > { %673 = vmatpush.msrb.mxu2 %v8102_v14  ;;  %900 = vmatpush.msrb.mxu0 %v12921_v20  ;;  %12923 = vst [vmem:[#allocation23_spill] sm:$0xff] %v8356_v28  ;;  %v433_v14 = vsub.f32 %v8319_v25, %v8345_v39 }
  0x34   : > { %608 = vmatpush.msra.mxu1 %v607_v57  ;;  %7848 = vmatpush.msra.mxu3 %v607_v57  ;;  %v489_v57 = vsub.f32 %v8328_v34, %v8348_v13 }
  0x35   : > { %676 = vmatpush.msrb.mxu2 %v8105_v15  ;;  %904 = vmatpush.msrb.mxu0 %v12922_v29  ;;  %v276_v15 = vld [vmem:[%s8149_s10 + $0x20] sm:$0xff]  ;;  %v8381_v61 = vand.u32 4294901760, %v433_v14  ;;  %v8387_v29 = vand.u32 4294901760, %v8356_v28 }
  0x36   : > { %614 = vmatpush.msra.mxu1 %v613_v42  ;;  %7849 = vmatpush.msra.mxu3 %v613_v42  ;;  %v8375_v52 = vand.u32 4294901760, %v276_v15  ;;  %v8377_v42 = vand.u32 4294901760, %v283_v7  ;;  %v8383_v20 = vand.u32 4294901760, %v489_v57  ;;  %v12931_v57 = vand.u32 4294901760, %v8125_v26 }
  0x37   : > { %427 = vmatmul.f32.gmra.mxu0 %v8339_v54  ;;  %483 = vmatmul.f32.gmra.mxu2 %v8341_v53  ;;  %12926 = vst [vmem:[#allocation25_spill] sm:$0xff] %v8381_v61  ;;  %v12937_v54 = vand.u32 4294901760, %v8160_v41 }
  0x38   : > { %616 = vmatmul.f32.vlgmr.msra.gmra.mxu1 %v8186_v56  ;;  %644 = vmatmul.f32.vlgmr.msra.gmra.mxu3 %v8190_v58  ;;  %12925 = vst [vmem:[#allocation24_spill] sm:$0xff] %v8375_v52  ;;  %v8401_v14 = vsub.f32 %v283_v7, %v8377_v42  ;;  %v284_v7 = vld [vmem:[%s8149_s10 + $0x60] sm:$0xff] }
  0x39   : > { %783 = vmatpush.msrb.mxu3 %v8084_v3  ;;  %679 = vmatpush.msrb.mxu2 %v8110_v18  ;;  %12927 = vst [vmem:[#allocation26_spill] sm:$0xff] %v8383_v20  ;;  %v8390_v18 = vand.u32 4294901760, %v8365_v30 }
  0x3a   : > { %908 = vmatpush.msrb.mxu0 %v12924_v8  ;;  %1011 = vmatpush.msrb.mxu1 %v8084_v3  ;;  %12928 = vst [vmem:[#allocation27_spill] sm:$0xff] %v8387_v29  ;;  %v12929_v8 = vand.u32 4294901760, %v8113_v19  ;;  %v8398_v3 = vsub.f32 %v276_v15, %v8375_v52  ;;  %v277_v15 = vld [vmem:[%s8149_s10 + $0x28] sm:$0xff] }
  0x3b   : > { %785 = vmatpush.msrb.mxu3 %v8086_v4  ;;  %682 = vmatpush.msrb.mxu2 %v8113_v19  ;;  %v497_v19 = vsub.f32 %v8365_v30, %v8390_v18  ;;  %v8433_v53 = vand.u32 4294901760, %v277_v15 }
  0x3c   : > { %912 = vmatpush.msrb.mxu0 %v12929_v8  ;;  %1013 = vmatpush.msrb.mxu1 %v8086_v4  ;;  %12930 = vst [vmem:[#allocation28_spill] sm:$0xff] %v8398_v3  ;;  %v441_v4 = vsub.f32 %v8356_v28, %v8387_v29  ;;  %v12933_v8 = vand.u32 4294901760, %v8142_v33 }
  0x3d   : > { %787 = vmatpush.msrb.mxu3 %v8088_v5  ;;  %685 = vmatpush.msrb.mxu2 %v8125_v26  ;;  %v8422_v26 = vand.u32 4294901760, %v8401_v14  ;;  %12936 = vst [vmem:[#allocation32_spill] sm:$0xff] %v8433_v53 }
  0x3e   : > { %916 = vmatpush.msrb.mxu0 %v12931_v57  ;;  %1015 = vmatpush.msrb.mxu1 %v8088_v5  ;;  %v8419_v5 = vand.u32 4294901760, %v8398_v3  ;;  %v8428_v57 = vand.u32 4294901760, %v441_v4  ;;  %v12941_v4 = vand.u32 4294901760, %v8184_v55 }
  0x3f   : > { %435 = vmatmul.f32.gmra.mxu0 %v8381_v61  ;;  %491 = vmatmul.f32.gmra.mxu2 %v8383_v20  ;;  %v8430_v20 = vand.u32 4294901760, %v497_v19  ;;  %v8435_v61 = vand.u32 4294901760, %v284_v7 }
  0x40   : > { %620 = vmatmul.f32.gmra.mxu1 %v8250_v49  ;;  %648 = vmatmul.f32.gmra.mxu3 %v8252_v51  ;;  %12932 = vst [vmem:[#allocation29_spill] sm:$0xff] %v8419_v5 }
  0x41   : > { %789 = vmatpush.msrb.mxu3 %v8090_v9  ;;  %688 = vmatpush.msrb.mxu2 %v8142_v33  ;;  %12934 = vst [vmem:[#allocation30_spill] sm:$0xff] %v8428_v57  ;;  %v12938_v33 = vand.u32 4294901760, %v8172_v47 }
  0x42   : > { %920 = vmatpush.msrb.mxu0 %v12933_v8  ;;  %1017 = vmatpush.msrb.mxu1 %v8090_v9  ;;  %12935 = vst [vmem:[#allocation31_spill] sm:$0xff] %v8430_v20  ;;  %v449_v9 = vsub.f32 %v8398_v3, %v8419_v5 }
  0x43   : > { %791 = vmatpush.msrb.mxu3 %v8092_v10  ;;  %691 = vmatpush.msrb.mxu2 %v8160_v41  ;;  %v505_v41 = vsub.f32 %v8401_v14, %v8422_v26 }
  0x44   : > { %924 = vmatpush.msrb.mxu0 %v12937_v54  ;;  %1019 = vmatpush.msrb.mxu1 %v8092_v10  ;;  %v8452_v10 = vsub.f32 %v277_v15, %v8433_v53  ;;  %v8455_v54 = vsub.f32 %v284_v7, %v8435_v61 }
  0x45   : > { %793 = vmatpush.msrb.mxu3 %v8094_v11  ;;  %694 = vmatpush.msrb.mxu2 %v8172_v47  ;;  %v278_v47 = vld [vmem:[%s8149_s10 + $0x30] sm:$0xff]  ;;  %v8468_v19 = vand.u32 4294901760, %v505_v41 }
  0x46   : > { %928 = vmatpush.msrb.mxu0 %v12938_v33  ;;  %1021 = vmatpush.msrb.mxu1 %v8094_v11  ;;  %12939 = vst [vmem:[#allocation33_spill] sm:$0xff] %v8452_v10  ;;  %v8462_v11 = vand.u32 4294901760, %v449_v9  ;;  %v8472_v15 = vand.u32 4294901760, %v8452_v10  ;;  %v8475_v7 = vand.u32 4294901760, %v8455_v54  ;;  %v8477_v8 = vand.u32 4294901760, %v278_v47  ;;  %v377_v9 = vld [vmem:[#allocation2 + $0x2d8] sm:$0xff] }
  0x47   : > { %443 = vmatmul.f32.gmra.mxu0 %v8428_v57  ;;  %499 = vmatmul.f32.gmra.mxu2 %v8430_v20  ;;  %12942 = vst [vmem:[#allocation35_spill] sm:$0xff] %v8468_v19  ;;  %v12946_v33 = vand.u32 4294901760, %v8206_v1  ;;  %v8487_v41 = vand.u32 4294901760, %v377_v9 }
  0x48   : > { %624 = vmatmul.f32.gmra.mxu1 %v8296_v46  ;;  %652 = vmatmul.f32.gmra.mxu3 %v8308_v27  ;;  %12940 = vst [vmem:[#allocation34_spill] sm:$0xff] %v8462_v11 }
  0x49   : > { %795 = vmatpush.msrb.mxu3 %v8107_v17  ;;  %697 = vmatpush.msrb.mxu2 %v8184_v55  ;;  %12943 = vst [vmem:[#allocation36_spill] sm:$0xff] %v8472_v15  ;;  %v12945_v55 = vand.u32 4294901760, %v8199_v63 }
  0x4a   : > { %932 = vmatpush.msrb.mxu0 %v12941_v4  ;;  %1023 = vmatpush.msrb.mxu1 %v8107_v17  ;;  %12944 = vst [vmem:[#allocation37_spill] sm:$0xff] %v8477_v8  ;;  %v371_v17 = vld [vmem:[#allocation2 + $0x2a8] sm:$0xff]  ;;  %v8496_v4 = vsub.f32 %v278_v47, %v8477_v8 }
  0x4b   : > { %797 = vmatpush.msrb.mxu3 %v8121_v24  ;;  %700 = vmatpush.msrb.mxu2 %v8199_v63  ;;  %v457_v63 = vsub.f32 %v8452_v10, %v8472_v15 }
  0x4c   : > { %936 = vmatpush.msrb.mxu0 %v12945_v55  ;;  %1025 = vmatpush.msrb.mxu1 %v8121_v24  ;;  %v513_v24 = vsub.f32 %v8455_v54, %v8475_v7  ;;  %12947 = vst [vmem:[#allocation38_spill] sm:$0xff] %v8496_v4  ;;  %v12948_v55 = vand.u32 4294901760, %v8227_v31 }
  0x4d   : > { %799 = vmatpush.msrb.mxu3 %v8139_v32  ;;  %703 = vmatpush.msrb.mxu2 %v8206_v1  ;;  %v365_v1 = vld [vmem:[#allocation2 + $0x278] sm:$0xff] }
  0x4e   : > { %940 = vmatpush.msrb.mxu0 %v12946_v33  ;;  %1027 = vmatpush.msrb.mxu1 %v8139_v32  ;;  %v8500_v32 = vand.u32 4294901760, %v371_v17  ;;  %v8508_v33 = vsub.f32 %v377_v9, %v8487_v41  ;;  %v8510_v47 = vand.u32 4294901760, %v365_v1  ;;  %v8515_v20 = vand.u32 4294901760, %v513_v24 }
  0x4f   : > { %451 = vmatmul.f32.gmra.mxu0 %v8462_v11  ;;  %507 = vmatmul.f32.gmra.mxu2 %v8468_v19  ;;  %v8513_v19 = vand.u32 4294901760, %v457_v63  ;;  %v8519_v11 = vand.u32 4294901760, %v8496_v4  ;;  %v12953_v9 = vand.u32 4294901760, %v8259_v59 }
  0x50   : > { %628 = vmatmul.f32.gmra.mxu1 %v8335_v22  ;;  %656 = vmatmul.f32.gmra.mxu3 %v8337_v21  ;;  %12950 = vst [vmem:[#allocation40_spill] sm:$0xff] %v8515_v20  ;;  %v12710_v63 = vand.u32 4294901760, %v8508_v33  ;;  %v8534_v24 = vsub.f32 %v365_v1, %v8510_v47 }
  0x51   : > { %801 = vmatpush.msrb.mxu3 %v8156_v38  ;;  %706 = vmatpush.msrb.mxu2 %v8227_v31  ;;  %12949 = vst [vmem:[#allocation39_spill] sm:$0xff] %v8513_v19  ;;  %v12952_v31 = vand.u32 4294901760, %v8243_v44 }
  0x52   : > { %944 = vmatpush.msrb.mxu0 %v12948_v55  ;;  %1029 = vmatpush.msrb.mxu1 %v8156_v38  ;;  %12951 = vst [vmem:[#allocation41_spill] sm:$0xff] %v8519_v11  ;;  %v8525_v38 = vsub.f32 %v371_v17, %v8500_v32  ;;  %v12954_v17 = vand.u32 4294901760, %v8270_v62  ;;  %v1235_v1 = vsub.f32 %v8508_v33, %v12710_v63  ;;  %v12709_v55 = vand.u32 4294901760, %v8534_v24 }
  0x53   : > { %803 = vmatpush.msrb.mxu3 %v8168_v45  ;;  %709 = vmatpush.msrb.mxu2 %v8243_v44 }
  0x54   : > { %948 = vmatpush.msrb.mxu0 %v12952_v31  ;;  %1031 = vmatpush.msrb.mxu1 %v8168_v45  ;;  %v465_v45 = vsub.f32 %v8496_v4, %v8519_v11  ;;  %v12708_v44 = vand.u32 4294901760, %v8525_v38 }
  0x55   : > { %805 = vmatpush.msrb.mxu3 %v8177_v50  ;;  %712 = vmatpush.msrb.mxu2 %v8259_v59  ;;  %v359_v59 = vld [vmem:[#allocation2 + $0x248] sm:$0xff] }
  0x56   : > { %952 = vmatpush.msrb.mxu0 %v12953_v9  ;;  %1033 = vmatpush.msrb.mxu1 %v8177_v50  ;;  %v8545_v50 = vand.u32 4294901760, %v359_v59  ;;  %v8555_v31 = vand.u32 4294901760, %v465_v45 }
  0x57   : > { %459 = vmatmul.f32.gmra.mxu0 %v8513_v19  ;;  %515 = vmatmul.f32.gmra.mxu2 %v8515_v20 }
  0x58   : > { %632 = vmatmul.f32.gmra.mxu1 %v8375_v52  ;;  %660 = vmatmul.f32.gmra.mxu3 %v8377_v42  ;;  %12955 = vst [vmem:[#allocation42_spill] sm:$0xff] %v8555_v31  ;;  %v8559_v9 = vsub.f32 %v359_v59, %v8545_v50  ;;  %v353_v59 = vld [vmem:[#allocation2 + $0x218] sm:$0xff] }
  0x59   : > { %807 = vmatpush.msrb.mxu3 %v8195_v60  ;;  %715 = vmatpush.msrb.mxu2 %v8270_v62  ;;  %v1241_v62 = vsub.f32 %v8525_v38, %v12708_v44  ;;  %v347_v44 = vld [vmem:[#allocation2 + $0x1e8] sm:$0xff] }
  0x5a   : > { %956 = vmatpush.msrb.mxu0 %v12954_v17  ;;  %1035 = vmatpush.msrb.mxu1 %v8195_v60  ;;  %v12713_v45 = vand.u32 4294901760, %v8559_v9  ;;  %v1236_v17 = vand.u32 4294901760, %v1235_v1  ;;  %v1247_v60 = vsub.f32 %v8534_v24, %v12709_v55  ;;  %v8583_v55 = vand.u32 4294901760, %v353_v59 }
  0x5b   : > { %1096 = vmatpush.msra.mxu2 %v8487_v41  ;;  %809 = vmatpush.msrb.mxu3 %v8203_v0  ;;  %v8586_v20 = vand.u32 4294901760, %v347_v44 }
  0x5c   : > { %1383 = vmatpush.msra.mxu0 %v8508_v33  ;;  %1037 = vmatpush.msrb.mxu1 %v8203_v0  ;;  %v1242_v0 = vand.u32 4294901760, %v1241_v62  ;;  %v1253_v1 = vsub.f32 %v8559_v9, %v12713_v45  ;;  %v1248_v63 = vand.u32 4294901760, %v1247_v60  ;;  %v8590_v62 = vsub.f32 %v353_v59, %v8583_v55  ;;  %v341_v60 = vld [vmem:[#allocation2 + $0x1b8] sm:$0xff] }
  0x5d   : > { %1098 = vmatpush.msra.mxu2 %v8500_v32  ;;  %811 = vmatpush.msrb.mxu3 %v8217_v16 }
  0x5e   : > { %1386 = vmatpush.msra.mxu0 %v8525_v38  ;;  %1039 = vmatpush.msrb.mxu1 %v8217_v16  ;;  %v1254_v16 = vand.u32 4294901760, %v1253_v1  ;;  %v12715_v45 = vand.u32 4294901760, %v8590_v62 }
  0x5f   : > { %1100 = vmatpush.msra.mxu2 %v8510_v47  ;;  %467 = vmatmul.f32.gmra.mxu0 %v8555_v31 }
  0x60   : > { %718 = vmatmul.f32.vlgmr.msrb.gmra.mxu2 %v8213_v12  ;;  %636 = vmatmul.f32.gmra.mxu1 %v8433_v53 }
  0x61   : > { %664 = vmatmul.f32.gmra.mxu3 %v8435_v61  ;;  %1102 = vmatpush.msra.mxu2 %v8545_v50 }
  0x62   : > { %813 = vmatpush.msrb.mxu3 %v8233_v36  ;;  %1041 = vmatpush.msrb.mxu1 %v8233_v36  ;;  %v1259_v36 = vsub.f32 %v8590_v62, %v12715_v45 }
  0x63   : > { %1389 = vmatpush.msra.mxu0 %v8534_v24  ;;  %1104 = vmatpush.msra.mxu2 %v8583_v55 }
  0x64   : > { %1237 = vmatpush.msra.mxu3 %v1236_v17  ;;  %1496 = vmatpush.msra.mxu1 %v8487_v41  ;;  %v8606_v17 = vsub.f32 %v347_v44, %v8586_v20 }
  0x65   : > { %1392 = vmatpush.msra.mxu0 %v8559_v9  ;;  %1106 = vmatpush.msra.mxu2 %v8586_v20 }
  0x66   : > { %1243 = vmatpush.msra.mxu3 %v1242_v0  ;;  %v8608_v0 = vand.u32 4294901760, %v341_v60  ;;  %v12714_v59 = vand.u32 4294901760, %v8606_v17  ;;  %1498 = vmatpush.msra.mxu1 %v8500_v32 }
  0x67   : > { %958 = vmatmul.f32.vlgmr.msrb.gmra.mxu0 %v8186_v56 }
  0x68   : > { %1249 = vmatpush.msra.mxu3 %v1248_v63  ;;  %723 = vmatmul.f32.gmra.mxu2 %v8277_v37  ;;  %v1260_v63 = vand.u32 4294901760, %v1259_v36  ;;  %v8615_v1 = vsub.f32 %v341_v60, %v8608_v0  ;;  %v1265_v44 = vsub.f32 %v8606_v17, %v12714_v59 }
  0x69   : > { %640 = vmatmul.f32.gmra.mxu1 %v8477_v8  ;;  %817 = vmatmul.f32.vlgmr.msrb.gmra.mxu3 %v8240_v43 }
  0x6a   : > { %1255 = vmatpush.msra.mxu3 %v1254_v16  ;;  %1395 = vmatpush.msra.mxu0 %v8590_v62  ;;  %v12716_v16 = vand.u32 4294901760, %v8615_v1  ;;  %v1266_v36 = vand.u32 4294901760, %v1265_v44 }
  0x6b   : > { %1108 = vmatpush.msra.mxu2 %v8608_v0  ;;  %1500 = vmatpush.msra.mxu1 %v8510_v47 }
  0x6c   : > { %1261 = vmatpush.msra.mxu3 %v1260_v63  ;;  %1398 = vmatpush.msra.mxu0 %v8606_v17  ;;  %v1271_v60 = vsub.f32 %v8615_v1, %v12716_v16  ;;  %v335_v63 = vld [vmem:[#allocation2 + $0x188] sm:$0xff] }
  0x6d   : > { %1502 = vmatpush.msra.mxu1 %v8545_v50  ;;  %v8632_v44 = vand.u32 4294901760, %v335_v63 }
  0x6e   : > { %1401 = vmatpush.msra.mxu0 %v8615_v1  ;;  %1267 = vmatpush.msra.mxu3 %v1266_v36  ;;  %v1272_v59 = vand.u32 4294901760, %v1271_v60  ;;  %v329_v36 = vld [vmem:[#allocation2 + $0x158] sm:$0xff] }
  0x6f   : > { %962 = vmatmul.f32.gmra.mxu0 %v8250_v49  ;;  %1504 = vmatpush.msra.mxu1 %v8583_v55  ;;  %v8637_v45 = vsub.f32 %v335_v63, %v8632_v44  ;;  %v8650_v63 = vand.u32 4294901760, %v329_v36 }
  0x70   : > { %728 = vmatmul.f32.gmra.mxu2 %v8319_v25  ;;  %1273 = vmatpush.msra.mxu3 %v1272_v59 }
  0x71   : > { %823 = vmatmul.f32.gmra.mxu3 %v8303_v2  ;;  %1043 = vmatmul.f32.vlgmr.msrb.gmra.mxu1 %v8186_v56  ;;  %v12719_v16 = vand.u32 4294901760, %v8637_v45  ;;  %v8655_v31 = vsub.f32 %v329_v36, %v8650_v63  ;;  %v323_v36 = vld [vmem:[#allocation2 + $0x128] sm:$0xff] }
  0x72   : > { %1110 = vmatpush.msra.mxu2 %v8632_v44  ;;  %1506 = vmatpush.msra.mxu1 %v8586_v20  ;;  %v311_v2 = vld [vmem:[#allocation2 + $0xc8] sm:$0xff] }
  0x73   : > { %1404 = vmatpush.msra.mxu0 %v8637_v45  ;;  %v1277_v59 = vsub.f32 %v8637_v45, %v12719_v16  ;;  %v12728_v16 = vand.u32 4294901760, %v8655_v31 }
  0x74   : > { %1508 = vmatpush.msra.mxu1 %v8608_v0  ;;  %1112 = vmatpush.msra.mxu2 %v8650_v63 }
  0x75   : > { %v1278_v60 = vand.u32 4294901760, %v1277_v59  ;;  %1407 = vmatpush.msra.mxu0 %v8655_v31  ;;  %v1283_v59 = vsub.f32 %v8655_v31, %v12728_v16 }
  0x76   : > { %1510 = vmatpush.msra.mxu1 %v8632_v44 }
  0x77   : > { %966 = vmatmul.f32.gmra.mxu0 %v8296_v46  ;;  %1279 = vmatpush.msra.mxu3 %v1278_v60  ;;  %v317_v60 = vld [vmem:[#allocation2 + $0xf8] sm:$0xff]  ;;  %v1284_v19 = vand.u32 4294901760, %v1283_v59 }
  0x78   : > { %733 = vmatmul.f32.gmra.mxu2 %v8356_v28  ;;  %1512 = vmatpush.msra.mxu1 %v8650_v63  ;;  %v8669_v28 = vand.u32 4294901760, %v317_v60 }
  0x79   : > { %829 = vmatmul.f32.gmra.mxu3 %v8345_v39  ;;  %1047 = vmatmul.f32.gmra.mxu1 %v8250_v49  ;;  %v8667_v39 = vand.u32 4294901760, %v323_v36 }
  0x7a   : > { %1285 = vmatpush.msra.mxu3 %v1284_v19  ;;  %v8688_v59 = vsub.f32 %v317_v60, %v8669_v28 }
  0x7b   : > { %1114 = vmatpush.msra.mxu2 %v8667_v39  ;;  %1514 = vmatpush.msra.mxu1 %v8667_v39 }
  0x7d   : > { %1116 = vmatpush.msra.mxu2 %v8669_v28  ;;  %1516 = vmatpush.msra.mxu1 %v8669_v28 }
  0x7f   : > { %970 = vmatmul.f32.gmra.mxu0 %v8335_v22 }
  0x80   : > { %738 = vmatmul.f32.gmra.mxu2 %v8398_v3  ;;  %v8673_v3 = vsub.f32 %v323_v36, %v8667_v39 }
  0x81   : > { %835 = vmatmul.f32.gmra.mxu3 %v8387_v29  ;;  %1051 = vmatmul.f32.gmra.mxu1 %v8296_v46  ;;  %v12738_v29 = vand.u32 4294901760, %v8688_v59  ;;  %v8695_v46 = vand.u32 4294901760, %v311_v2 }
  0x82   : > { %v12737_v16 = vand.u32 4294901760, %v8673_v3  ;;  %1410 = vmatpush.msra.mxu0 %v8673_v3 }
  0x83   : > { %v8702_v60 = vsub.f32 %v311_v2, %v8695_v46  ;;  %1118 = vmatpush.msra.mxu2 %v8695_v46  ;;  %1518 = vmatpush.msra.mxu1 %v8695_v46 }
  0x84   : > { %v1289_v19 = vsub.f32 %v8673_v3, %v12737_v16  ;;  %1413 = vmatpush.msra.mxu0 %v8688_v59 }
  0x86   : > { %v1290_v36 = vand.u32 4294901760, %v1289_v19  ;;  %v12741_v19 = vand.u32 4294901760, %v8702_v60  ;;  %1416 = vmatpush.msra.mxu0 %v8702_v60 }
  0x87   : > { %974 = vmatmul.f32.gmra.mxu0 %v8375_v52 }
  0x88   : > { %743 = vmatmul.f32.gmra.mxu2 %v8452_v10  ;;  %1291 = vmatpush.msra.mxu3 %v1290_v36  ;;  %v1295_v10 = vsub.f32 %v8688_v59, %v12738_v29  ;;  %v305_v36 = vld [vmem:[#allocation2 + $0x98] sm:$0xff]  ;;  %v1301_v29 = vsub.f32 %v8702_v60, %v12741_v19 }
  0x89   : > { %841 = vmatmul.f32.gmra.mxu3 %v8419_v5  ;;  %1055 = vmatmul.f32.gmra.mxu1 %v8335_v22 }
  0x8a   : > { %v1296_v16 = vand.u32 4294901760, %v1295_v10  ;;  %v8708_v10 = vand.u32 4294901760, %v305_v36  ;;  %v1302_v2 = vand.u32 4294901760, %v1301_v29 }
  0x8c   : > { %1297 = vmatpush.msra.mxu3 %v1296_v16  ;;  %1120 = vmatpush.msra.mxu2 %v8708_v10  ;;  %v8716_v16 = vsub.f32 %v305_v36, %v8708_v10  ;;  %v299_v36 = vld [vmem:[#allocation2 + $0x68] sm:$0xff] }
  0x8d   : > { %1520 = vmatpush.msra.mxu1 %v8708_v10 }
  0x8e   : > { %1303 = vmatpush.msra.mxu3 %v1302_v2  ;;  %1419 = vmatpush.msra.mxu0 %v8716_v16  ;;  %v293_v2 = vld [vmem:[#allocation2 + $0x38] sm:$0xff] }
  0x8f   : > { %978 = vmatmul.f32.gmra.mxu0 %v8433_v53 }
  0x90   : > { %748 = vmatmul.f32.gmra.mxu2 %v8496_v4  ;;  %v8727_v4 = vand.u32 4294901760, %v299_v36 }
  0x91   : > { %847 = vmatmul.f32.gmra.mxu3 %v8472_v15  ;;  %1059 = vmatmul.f32.gmra.mxu1 %v8375_v52  ;;  %v12746_v15 = vand.u32 4294901760, %v8716_v16 }
  0x92   : > { %1122 = vmatpush.msra.mxu2 %v8727_v4  ;;  %1522 = vmatpush.msra.mxu1 %v8727_v4 }
  0x93   : > { %v1307_v29 = vsub.f32 %v8716_v16, %v12746_v15  ;;  %v8738_v15 = vand.u32 4294901760, %v293_v2 }
  0x95   : > { %v1308_v19 = vand.u32 4294901760, %v1307_v29  ;;  %1124 = vmatpush.msra.mxu2 %v8738_v15  ;;  %1524 = vmatpush.msra.mxu1 %v8738_v15 }
  0x97   : > { %982 = vmatmul.f32.gmra.mxu0 %v8477_v8  ;;  %1309 = vmatpush.msra.mxu3 %v1308_v19 }
  0x98   : > { %753 = vmatmul.f32.gmra.mxu2 %v8220_v23 }
  0x99   : > { %853 = vmatmul.f32.gmra.mxu3 %v8519_v11  ;;  %1063 = vmatmul.f32.gmra.mxu1 %v8433_v53  ;;  %v8732_v11 = vsub.f32 %v299_v36, %v8727_v4  ;;  %v8747_v36 = vsub.f32 %v293_v2, %v8738_v15 }
  0x9b   : > { %v12755_v29 = vand.u32 4294901760, %v8732_v11  ;;  %1422 = vmatpush.msra.mxu0 %v8732_v11 }
  0x9d   : > { %v1313_v19 = vsub.f32 %v8732_v11, %v12755_v29  ;;  %1425 = vmatpush.msra.mxu0 %v8747_v36 }
  0x9f   : > { %986 = vmatmul.f32.gmra.mxu0 %v8190_v58 }
  0xa0   : > { %758 = vmatmul.f32.gmra.mxu2 %v8280_v40  ;;  %v1314_v40 = vand.u32 4294901760, %v1313_v19 }
  0xa1   : > { %859 = vmatmul.f32.gmra.mxu3 %v8248_v48  ;;  %1067 = vmatmul.f32.gmra.mxu1 %v8477_v8  ;;  %v287_v48 = vld [vmem:[#allocation2 + $0x8] sm:$0xff]  ;;  %v12762_v8 = vand.u32 4294901760, %v8747_v36 }
  0xa2   : > { %v8750_v23 = vand.u32 4294901760, %v287_v48  ;;  %1315 = vmatpush.msra.mxu3 %v1314_v40  ;;  %v12957_v40 = vand.u32 4294901760, %v8525_v38 }
  0xa3   : > { %v1319_v2 = vsub.f32 %v8747_v36, %v12762_v8 }
  0xa4   : > { %v8757_v29 = vsub.f32 %v287_v48, %v8750_v23  ;;  %1126 = vmatpush.msra.mxu2 %v8750_v23  ;;  %1526 = vmatpush.msra.mxu1 %v8750_v23 }
  0xa5   : > { %v1320_v5 = vand.u32 4294901760, %v1319_v2  ;;  %v12958_v2 = vand.u32 4294901760, %v8534_v24 }
  0xa6   : > { %v1324_v19 = vand.u32 4294901760, %v8757_v29  ;;  %1428 = vmatpush.msra.mxu0 %v8757_v29 }
  0xa7   : > { %990 = vmatmul.f32.gmra.mxu0 %v8252_v51  ;;  %1321 = vmatpush.msra.mxu3 %v1320_v5 }
  0xa8   : > { %763 = vmatmul.f32.gmra.mxu2 %v8328_v34  ;;  %v12956_v34 = vand.u32 4294901760, %v8508_v33  ;;  %v1325_v48 = vsub.f32 %v8757_v29, %v1324_v19  ;;  %v12960_v33 = vand.u32 4294901760, %v8590_v62 }
  0xa9   : > { %865 = vmatmul.f32.gmra.mxu3 %v8306_v6  ;;  %1071 = vmatmul.f32.gmra.mxu1 %v8190_v58 }
  0xaa   : > { %1609 = vmatpush.msrb.mxu2 %v12956_v34  ;;  %v1326_v8 = vand.u32 4294901760, %v1325_v48  ;;  %v12959_v34 = vand.u32 4294901760, %v8559_v9  ;;  %v12961_v48 = vand.u32 4294901760, %v8606_v17  ;;  %v12963_v9 = vand.u32 4294901760, %v8637_v45 }
  0xac   : > { %v8773_v6 = vpop.f32.mrf.mxu0  ;;  %1613 = vmatpush.msrb.mxu2 %v12957_v40  ;;  %1327 = vmatpush.msra.mxu3 %v1326_v8  ;;  %v12962_v8 = vand.u32 4294901760, %v8615_v1 }
  0xae   : > { %1617 = vmatpush.msrb.mxu2 %v12958_v2  ;;  %1724 = vmatpush.msrb.mxu3 %v8487_v41 }
  0xaf   : > { %994 = vmatmul.f32.gmra.mxu0 %v8308_v27 }
  0xb0   : > { %768 = vmatmul.f32.gmra.mxu2 %v8365_v30  ;;  %1726 = vmatpush.msrb.mxu3 %v8500_v32 }
  0xb1   : > { %871 = vmatmul.f32.gmra.mxu3 %v8348_v13  ;;  %1075 = vmatmul.f32.gmra.mxu1 %v8252_v51 }
  0xb2   : > { %1621 = vmatpush.msrb.mxu2 %v12959_v34  ;;  %v476_v5 = vpop.f32.mrf.mxu2  ;;  %1728 = vmatpush.msrb.mxu3 %v8510_v47 }
  0xb4   : > { %1625 = vmatpush.msrb.mxu2 %v12960_v33  ;;  %v8788_v38 = vpop.f32.mrf.mxu0  ;;  %1730 = vmatpush.msrb.mxu3 %v8545_v50  ;;  %v12964_v50 = vand.u32 4294901760, %v8655_v31 }
  0xb5   : > { %v8791_v24 = vpop.f32.mrf.mxu1 }
  0xb6   : > { %1629 = vmatpush.msrb.mxu2 %v12961_v48  ;;  %1732 = vmatpush.msrb.mxu3 %v8583_v55  ;;  %v12965_v55 = vand.u32 4294901760, %v8673_v3  ;;  %v12968_v3 = vand.u32 4294901760, %v8716_v16  ;;  %v12971_v16 = vld [vmem:[#allocation20_spill] sm:$0xff]  ;;  %v12972_v48 = vld [vmem:[#allocation25_spill] sm:$0xff] }
  0xb7   : > { %998 = vmatmul.f32.gmra.mxu0 %v8337_v21 }
  0xb8   : > { %773 = vmatmul.f32.gmra.mxu2 %v8401_v14  ;;  %1734 = vmatpush.msrb.mxu3 %v8586_v20  ;;  %v12966_v20 = vand.u32 4294901760, %v8688_v59 }
  0xb9   : > { %877 = vmatmul.f32.gmra.mxu3 %v8390_v18  ;;  %1079 = vmatmul.f32.gmra.mxu1 %v8308_v27 }
  0xba   : > { %1633 = vmatpush.msrb.mxu2 %v12962_v8  ;;  %v484_v41 = vpop.f32.mrf.mxu2  ;;  %1736 = vmatpush.msrb.mxu3 %v8608_v0  ;;  %v12967_v0 = vand.u32 4294901760, %v8702_v60 }
  0xbb   : > { %v645_v32 = vpop.f32.mrf.mxu3 }
  0xbc   : > { %1637 = vmatpush.msrb.mxu2 %v12963_v9  ;;  %v8806_v47 = vadd.f32 %v645_v32, %v476_v5  ;;  %v8808_v62 = vpop.f32.mrf.mxu0  ;;  %1738 = vmatpush.msrb.mxu3 %v8632_v44  ;;  %v12974_v32 = vld [vmem:[#allocation15_spill] sm:$0xff] }
  0xbd   : > { %v8810_v17 = vpop.f32.mrf.mxu1 }
  0xbe   : > { %1641 = vmatpush.msrb.mxu2 %v12964_v50  ;;  %1740 = vmatpush.msrb.mxu3 %v8650_v63  ;;  %v12969_v63 = vand.u32 4294901760, %v8732_v11 }
  0xbf   : > { %1002 = vmatmul.f32.gmra.mxu0 %v8377_v42 }
  0xc0   : > { %778 = vmatmul.f32.gmra.mxu2 %v8455_v54  ;;  %1742 = vmatpush.msrb.mxu3 %v8667_v39  ;;  %v12970_v39 = vand.u32 4294901760, %v8747_v36 }
  0xc1   : > { %883 = vmatmul.f32.gmra.mxu3 %v8422_v26  ;;  %1083 = vmatmul.f32.gmra.mxu1 %v8337_v21 }
  0xc2   : > { %1645 = vmatpush.msrb.mxu2 %v12965_v55  ;;  %v492_v45 = vpop.f32.mrf.mxu2  ;;  %1744 = vmatpush.msrb.mxu3 %v8669_v28 }
  0xc3   : > { %v649_v1 = vpop.f32.mrf.mxu3 }
  0xc4   : > { %1649 = vmatpush.msrb.mxu2 %v12966_v20  ;;  %v8825_v31 = vadd.f32 %v649_v1, %v484_v41  ;;  %v8827_v40 = vpop.f32.mrf.mxu0  ;;  %1746 = vmatpush.msrb.mxu3 %v8695_v46  ;;  %v12973_v41 = vld [vmem:[#allocation13_spill] sm:$0xff]  ;;  %v622_v20 = vadd.f32 %v8810_v17, %v8788_v38  ;;  %v12980_v38 = vld [vmem:[#allocation28_spill] sm:$0xff] }
  0xc5   : > { %v8829_v2 = vpop.f32.mrf.mxu1 }
  0xc6   : > { %1653 = vmatpush.msrb.mxu2 %v12967_v0  ;;  %1748 = vmatpush.msrb.mxu3 %v8708_v10  ;;  %v12978_v0 = vld [vmem:[#allocation22_spill] sm:$0xff] }
  0xc7   : > { %1006 = vmatmul.f32.gmra.mxu0 %v8435_v61 }
  0xc8   : > { %1132 = vmatmul.f32.vlgmr.msra.gmra.mxu2 %v8290_v35  ;;  %1750 = vmatpush.msrb.mxu3 %v8727_v4 }
  0xc9   : > { %889 = vmatmul.f32.gmra.mxu3 %v8475_v7  ;;  %1087 = vmatmul.f32.gmra.mxu1 %v8377_v42 }
  0xca   : > { %1657 = vmatpush.msrb.mxu2 %v12968_v3  ;;  %v500_v44 = vpop.f32.mrf.mxu2  ;;  %1752 = vmatpush.msrb.mxu3 %v8738_v15  ;;  %v618_v15 = vadd.f32 %v8791_v24, %v8773_v6  ;;  %v12976_v6 = vld [vmem:[#allocation34_spill] sm:$0xff]  ;;  %v12977_v24 = vld [vmem:[#allocation23_spill] sm:$0xff] }
  0xcb   : > { %v653_v59 = vpop.f32.mrf.mxu3 }
  0xcc   : > { %1661 = vmatpush.msrb.mxu2 %v12969_v63  ;;  %v8844_v60 = vadd.f32 %v653_v59, %v492_v45  ;;  %v8846_v34 = vpop.f32.mrf.mxu0  ;;  %1754 = vmatpush.msrb.mxu3 %v8750_v23 }
  0xcd   : > { %v8848_v5 = vpop.f32.mrf.mxu1 }
  0xce   : > { %1665 = vmatpush.msrb.mxu2 %v12970_v39 }
  0xcf   : > { %1431 = vmatmul.f32.vlgmr.msra.gmra.mxu0 %v8213_v12 }
  0xd0   : > { %1140 = vmatmul.f32.gmra.mxu2 %v12971_v16 }
  0xd1   : > { %1091 = vmatmul.f32.gmra.mxu1 %v8435_v61  ;;  %1329 = vmatmul.f32.vlgmr.msra.gmra.mxu3 %v8186_v56 }
  0xd2   : > { %1669 = vmatpush.msrb.mxu2 %v1324_v19  ;;  %v508_v28 = vpop.f32.mrf.mxu2 }
  0xd3   : > { %v657_v11 = vpop.f32.mrf.mxu3 }
  0xd4   : > { %v8861_v46 = vadd.f32 %v657_v11, %v500_v44  ;;  %v8863_v36 = vpop.f32.mrf.mxu0 }
  0xd5   : > { %v8865_v33 = vpop.f32.mrf.mxu1 }
  0xd7   : > { %1436 = vmatmul.f32.gmra.mxu0 %v8277_v37 }
  0xd8   : > { %1148 = vmatmul.f32.gmra.mxu2 %v12972_v48 }
  0xd9   : > { %1333 = vmatmul.f32.gmra.mxu3 %v8250_v49  ;;  %1530 = vmatmul.f32.vlgmr.msra.gmra.mxu1 %v8240_v43 }
  0xda   : > { %v516_v10 = vpop.f32.mrf.mxu2 }
  0xdb   : > { %v661_v4 = vpop.f32.mrf.mxu3 }
  0xdc   : > { %v8873_v29 = vadd.f32 %v661_v4, %v508_v28  ;;  %v8875_v19 = vpop.f32.mrf.mxu0  ;;  %v12979_v4 = vld [vmem:[#allocation39_spill] sm:$0xff] }
  0xdd   : > { %v8877_v8 = vpop.f32.mrf.mxu1 }
  0xdf   : > { %1441 = vmatmul.f32.gmra.mxu0 %v8319_v25 }
  0xe0   : > { %1156 = vmatmul.f32.gmra.mxu2 %v8428_v57 }
  0xe1   : > { %1337 = vmatmul.f32.gmra.mxu3 %v12973_v41  ;;  %1536 = vmatmul.f32.gmra.mxu1 %v12974_v32  ;;  %v12988_v32 = vld [vmem:[#allocation38_spill] sm:$0xff]  ;;  %v288_v41 = vld [vmem:[#allocation2 + $0x10] sm:$0xff] }
  0xe3   : > { %v719_v23 = vpop.f32.mrf.mxu2 }
  0xe4   : > { %v665_v9 = vpop.f32.mrf.mxu3  ;;  %v720_v50 = vadd.f32 %v719_v23, %v618_v15  ;;  %v959_v45 = vpop.f32.mrf.mxu0  ;;  %v12982_v15 = vld [vmem:[#allocation27_spill] sm:$0xff] }
  0xe5   : > { %v8885_v55 = vadd.f32 %v665_v9, %v516_v10  ;;  %v626_v10 = vadd.f32 %v8829_v2, %v8808_v62  ;;  %v630_v62 = vadd.f32 %v8848_v5, %v8827_v40  ;;  %v12983_v2 = vld [vmem:[#allocation42_spill] sm:$0xff]  ;;  %v366_v5 = vld [vmem:[#allocation2 + $0x280] sm:$0xff] }
  0xe6   : > { %v8887_v1 = vpop.f32.mrf.mxu1 }
  0xe7   : > { %12975 = vst [vmem:[#allocation43_spill] sm:$0xff] %v8885_v55  ;;  %1446 = vmatmul.f32.gmra.mxu0 %v12977_v24  ;;  %v12987_v24 = vld [vmem:[#allocation14_spill] sm:$0xff] }
  0xe8   : > { %1164 = vmatmul.f32.gmra.mxu2 %v12976_v6 }
  0xe9   : > { %1341 = vmatmul.f32.gmra.mxu3 %v8335_v22  ;;  %1542 = vmatmul.f32.gmra.mxu1 %v12978_v0  ;;  %v354_v0 = vld [vmem:[#allocation2 + $0x220] sm:$0xff] }
  0xea   : > { %v8945_v25 = vand.u32 4294901760, %v354_v0 }
  0xeb   : > { %v724_v3 = vpop.f32.mrf.mxu2 }
  0xec   : > { %v725_v44 = vadd.f32 %v724_v3, %v622_v20  ;;  %v818_v59 = vpop.f32.mrf.mxu3  ;;  %v963_v39 = vpop.f32.mrf.mxu0 }
  0xed   : > { %v819_v63 = vadd.f32 %v818_v59, %v720_v50 }
  0xee   : > { %v1044_v28 = vpop.f32.mrf.mxu1 }
  0xef   : > { %v960_v11 = vadd.f32 %v959_v45, %v819_v63  ;;  %1451 = vmatmul.f32.gmra.mxu0 %v12980_v38  ;;  %v378_v63 = vld [vmem:[#allocation2 + $0x2e0] sm:$0xff] }
  0xf0   : > { %1172 = vmatmul.f32.gmra.mxu2 %v12979_v4  ;;  %v12984_v38 = vld [vmem:[#allocation33_spill] sm:$0xff] }
  0xf1   : > { %v8899_v17 = vadd.f32 %v1044_v28, %v960_v11  ;;  %1345 = vmatmul.f32.gmra.mxu3 %v8375_v52  ;;  %1548 = vmatmul.f32.gmra.mxu1 %v12982_v15  ;;  %v8907_v28 = vand.u32 4294901760, %v378_v63  ;;  %v312_v52 = vld [vmem:[#allocation2 + $0xd0] sm:$0xff] }
  0xf3   : > { %12981 = vst [vmem:[#allocation44_spill] sm:$0xff] %v8899_v17  ;;  %v729_v23 = vpop.f32.mrf.mxu2  ;;  %1809 = vmatpush.msrb.mxu0 %v8907_v28  ;;  %2209 = vmatpush.msra.mxu3 %v8907_v28 }
  0xf4   : > { %v730_v9 = vadd.f32 %v729_v23, %v626_v10  ;;  %v824_v20 = vpop.f32.mrf.mxu3  ;;  %v967_v3 = vpop.f32.mrf.mxu0  ;;  %v12986_v10 = vld [vmem:[#allocation29_spill] sm:$0xff] }
  0xf5   : > { %v825_v50 = vadd.f32 %v824_v20, %v725_v44  ;;  %v372_v44 = vld [vmem:[#allocation2 + $0x2b0] sm:$0xff] }
  0xf6   : > { %v1048_v59 = vpop.f32.mrf.mxu1  ;;  %v8917_v23 = vand.u32 4294901760, %v372_v44 }
  0xf7   : > { %v964_v45 = vadd.f32 %v963_v39, %v825_v50  ;;  %1456 = vmatmul.f32.gmra.mxu0 %v12984_v38  ;;  %v8915_v39 = vsub.f32 %v378_v63, %v8907_v28  ;;  %v360_v38 = vld [vmem:[#allocation2 + $0x250] sm:$0xff] }
  0xf8   : > { %1180 = vmatmul.f32.gmra.mxu2 %v12983_v2  ;;  %1811 = vmatpush.msrb.mxu0 %v8917_v23  ;;  %v336_v2 = vld [vmem:[#allocation2 + $0x190] sm:$0xff] }
  0xf9   : > { %v8909_v11 = vadd.f32 %v1048_v59, %v964_v45  ;;  %1349 = vmatmul.f32.gmra.mxu3 %v8433_v53  ;;  %1554 = vmatmul.f32.gmra.mxu1 %v12986_v10  ;;  %v8921_v59 = vand.u32 4294901760, %v366_v5  ;;  %v12764_v45 = vand.u32 4294901760, %v8915_v39  ;;  %v12994_v53 = vld [vmem:[#allocation7_spill] sm:$0xff] }
  0xfa   : > { %2096 = vmatpush.msra.mxu2 %v8915_v39  ;;  %2211 = vmatpush.msra.mxu3 %v8917_v23 }
  0xfb   : > { %12985 = vst [vmem:[#allocation45_spill] sm:$0xff] %v8909_v11  ;;  %v734_v40 = vpop.f32.mrf.mxu2  ;;  %v8925_v11 = vsub.f32 %v372_v44, %v8917_v23  ;;  %1813 = vmatpush.msrb.mxu0 %v8921_v59  ;;  %v8937_v44 = vsub.f32 %v366_v5, %v8921_v59 }
  0xfc   : > { %v735_v20 = vadd.f32 %v734_v40, %v630_v62  ;;  %v830_v50 = vpop.f32.mrf.mxu3  ;;  %v971_v10 = vpop.f32.mrf.mxu0  ;;  %v8930_v62 = vand.u32 4294901760, %v360_v38  ;;  %v1948_v40 = vsub.f32 %v8915_v39, %v12764_v45  ;;  %2213 = vmatpush.msra.mxu3 %v8921_v59 }
  0xfd   : > { %v831_v63 = vadd.f32 %v830_v50, %v730_v9  ;;  %v12767_v15 = vand.u32 4294901760, %v8925_v11  ;;  %2099 = vmatpush.msra.mxu2 %v8925_v11  ;;  %v634_v9 = vadd.f32 %v8865_v33, %v8846_v34  ;;  %v12769_v43 = vand.u32 4294901760, %v8937_v44  ;;  %v12990_v34 = vld [vmem:[#allocation37_spill] sm:$0xff]  ;;  %v12991_v33 = vld [vmem:[#allocation36_spill] sm:$0xff] }
  0xfe   : > { %v1052_v17 = vpop.f32.mrf.mxu1  ;;  %v1949_v45 = vand.u32 4294901760, %v1948_v40  ;;  %1815 = vmatpush.msrb.mxu0 %v8930_v62  ;;  %2215 = vmatpush.msra.mxu3 %v8930_v62 }
  0xff   : > { %v968_v50 = vadd.f32 %v967_v3, %v831_v63  ;;  %1461 = vmatmul.f32.gmra.mxu0 %v12988_v32  ;;  %v1954_v5 = vsub.f32 %v8925_v11, %v12767_v15  ;;  %v348_v3 = vld [vmem:[#allocation2 + $0x1f0] sm:$0xff]  ;;  %v8956_v63 = vsub.f32 %v360_v38, %v8930_v62  ;;  %v1960_v15 = vsub.f32 %v8937_v44, %v12769_v43 }
 0x100   : > { %1188 = vmatmul.f32.gmra.mxu2 %v12987_v24  ;;  %1950 = vmatpush.msrb.mxu1 %v1949_v45  ;;  %v8959_v40 = vand.u32 4294901760, %v348_v3 }
 0x101   : > { %v8951_v37 = vadd.f32 %v1052_v17, %v968_v50  ;;  %1353 = vmatmul.f32.gmra.mxu3 %v12990_v34  ;;  %1560 = vmatmul.f32.gmra.mxu1 %v12991_v33  ;;  %v1955_v32 = vand.u32 4294901760, %v1954_v5  ;;  %v8965_v17 = vsub.f32 %v354_v0, %v8945_v25  ;;  %v12770_v33 = vand.u32 4294901760, %v8956_v63 }
 0x102   : > { %2102 = vmatpush.msra.mxu2 %v8937_v44  ;;  %1817 = vmatpush.msrb.mxu0 %v8945_v25  ;;  %v1961_v12 = vand.u32 4294901760, %v1960_v15  ;;  %v8978_v34 = vsub.f32 %v348_v3, %v8959_v40  ;;  %v8983_v15 = vand.u32 4294901760, %v336_v2  ;;  %v638_v3 = vadd.f32 %v8877_v8, %v8863_v36 }
 0x103   : > { %12989 = vst [vmem:[#allocation46_spill] sm:$0xff] %v8951_v37  ;;  %v739_v50 = vpop.f32.mrf.mxu2  ;;  %v342_v37 = vld [vmem:[#allocation2 + $0x1c0] sm:$0xff]  ;;  %1956 = vmatpush.msrb.mxu1 %v1955_v32  ;;  %v12773_v43 = vand.u32 4294901760, %v8965_v17  ;;  %v1966_v4 = vsub.f32 %v8956_v63, %v12770_v33  ;;  %2217 = vmatpush.msra.mxu3 %v8945_v25 }
 0x104   : > { %v740_v38 = vadd.f32 %v739_v50, %v634_v9  ;;  %v836_v45 = vpop.f32.mrf.mxu3  ;;  %v8971_v5 = vand.u32 4294901760, %v342_v37  ;;  %v975_v24 = vpop.f32.mrf.mxu0  ;;  %2105 = vmatpush.msra.mxu2 %v8956_v63  ;;  %1819 = vmatpush.msrb.mxu0 %v8959_v40  ;;  %12992 = vst [vmem:[#allocation47_spill] sm:$0xff] %v8983_v15  ;;  %v330_v33 = vld [vmem:[#allocation2 + $0x160] sm:$0xff]  ;;  %v12775_v6 = vand.u32 4294901760, %v8978_v34  ;;  %v9002_v36 = vsub.f32 %v336_v2, %v8983_v15 }
 0x105   : > { %v837_v0 = vadd.f32 %v836_v45, %v735_v20  ;;  %1962 = vmatpush.msrb.mxu1 %v1961_v12  ;;  %v1972_v20 = vsub.f32 %v8965_v17, %v12773_v43  ;;  %v1967_v45 = vand.u32 4294901760, %v1966_v4  ;;  %2219 = vmatpush.msra.mxu3 %v8959_v40  ;;  %v12993_v12 = vld [vmem:[#allocation21_spill] sm:$0xff]  ;;  %v8998_v43 = vand.u32 4294901760, %v330_v33 }
 0x106   : > { %v1056_v32 = vpop.f32.mrf.mxu1  ;;  %v8989_v9 = vsub.f32 %v342_v37, %v8971_v5  ;;  %2108 = vmatpush.msra.mxu2 %v8965_v17  ;;  %v12997_v4 = vld [vmem:[#allocation41_spill] sm:$0xff]  ;;  %1821 = vmatpush.msrb.mxu0 %v8971_v5 }
 0x107   : > { %v972_v50 = vadd.f32 %v971_v10, %v837_v0  ;;  %1466 = vmatmul.f32.gmra.mxu0 %v12994_v53  ;;  %12995 = vst [vmem:[#allocation48_spill] sm:$0xff] %v8998_v43  ;;  %v1973_v37 = vand.u32 4294901760, %v1972_v20  ;;  %v324_v10 = vld [vmem:[#allocation2 + $0x130] sm:$0xff]  ;;  %v1978_v0 = vsub.f32 %v8978_v34, %v12775_v6  ;;  %1968 = vmatpush.msrb.mxu1 %v1967_v45  ;;  %v318_v53 = vld [vmem:[#allocation2 + $0x100] sm:$0xff] }
 0x108   : > { %1196 = vmatmul.f32.gmra.mxu2 %v12993_v12  ;;  %v12776_v57 = vand.u32 4294901760, %v8989_v9  ;;  %v9012_v20 = vand.u32 4294901760, %v324_v10  ;;  %2221 = vmatpush.msra.mxu3 %v8971_v5  ;;  %v9024_v12 = vand.u32 4294901760, %v318_v53 }
 0x109   : > { %v9004_v8 = vadd.f32 %v1056_v32, %v972_v50  ;;  %1357 = vmatmul.f32.gmra.mxu3 %v8190_v58  ;;  %1566 = vmatmul.f32.gmra.mxu1 %v12997_v4  ;;  %v12781_v32 = vand.u32 4294901760, %v9002_v36  ;;  %v9019_v50 = vsub.f32 %v330_v33, %v8998_v43  ;;  %v1979_v4 = vand.u32 4294901760, %v1978_v0 }
 0x10a   : > { %12998 = vst [vmem:[#allocation50_spill] sm:$0xff] %v9012_v20  ;;  %v1984_v2 = vsub.f32 %v8989_v9, %v12776_v57  ;;  %2111 = vmatpush.msra.mxu2 %v8978_v34  ;;  %1823 = vmatpush.msrb.mxu0 %v8983_v15  ;;  %v9031_v48 = vsub.f32 %v324_v10, %v9012_v20  ;;  %v306_v10 = vld [vmem:[#allocation2 + $0xa0] sm:$0xff] }
 0x10b   : > { %12996 = vst [vmem:[#allocation49_spill] sm:$0xff] %v9004_v8  ;;  %v744_v8 = vpop.f32.mrf.mxu2  ;;  %1974 = vmatpush.msrb.mxu1 %v1973_v37  ;;  %v1990_v57 = vsub.f32 %v9002_v36, %v12781_v32  ;;  %v12784_v0 = vand.u32 4294901760, %v9019_v50  ;;  %2223 = vmatpush.msra.mxu3 %v8983_v15  ;;  %v9051_v16 = vand.u32 4294901760, %v306_v10 }
 0x10c   : > { %v745_v6 = vadd.f32 %v744_v8, %v638_v3  ;;  %v842_v45 = vpop.f32.mrf.mxu3  ;;  %12999 = vst [vmem:[#allocation51_spill] sm:$0xff] %v9024_v12  ;;  %v979_v58 = vpop.f32.mrf.mxu0  ;;  %2114 = vmatpush.msra.mxu2 %v8989_v9  ;;  %1825 = vmatpush.msrb.mxu0 %v8998_v43  ;;  %v1985_v37 = vand.u32 4294901760, %v1984_v2  ;;  %v9036_v8 = vand.u32 4294901760, %v312_v52  ;;  %v12785_v55 = vand.u32 4294901760, %v9031_v48  ;;  %v13001_v2 = vld [vmem:[#allocation12_spill] sm:$0xff] }
 0x10d   : > { %v843_v33 = vadd.f32 %v842_v45, %v740_v38  ;;  %1980 = vmatpush.msrb.mxu1 %v1979_v4  ;;  %v9039_v38 = vsub.f32 %v318_v53, %v9024_v12  ;;  %v642_v45 = vadd.f32 %v8887_v1, %v8875_v19  ;;  %v1996_v22 = vsub.f32 %v9019_v50, %v12784_v0  ;;  %v13000_v4 = vld [vmem:[#allocation26_spill] sm:$0xff]  ;;  %v300_v0 = vld [vmem:[#allocation2 + $0x70] sm:$0xff]  ;;  %v294_v19 = vld [vmem:[#allocation2 + $0x40] sm:$0xff] }
 0x10e   : > { %v1060_v3 = vpop.f32.mrf.mxu1  ;;  %2117 = vmatpush.msra.mxu2 %v9002_v36  ;;  %2225 = vmatpush.msra.mxu3 %v8998_v43  ;;  %v1991_v53 = vand.u32 4294901760, %v1990_v57  ;;  %v9055_v1 = vsub.f32 %v312_v52, %v9036_v8 }
 0x10f   : > { %v976_v32 = vadd.f32 %v975_v24, %v843_v33  ;;  %1471 = vmatmul.f32.gmra.mxu0 %v13001_v2  ;;  %v13003_v33 = vld [vmem:[#allocation9_spill] sm:$0xff]  ;;  %1986 = vmatpush.msrb.mxu1 %v1985_v37  ;;  %v1997_v57 = vand.u32 4294901760, %v1996_v22  ;;  %v9065_v2 = vand.u32 4294901760, %v300_v0  ;;  %v9074_v37 = vand.u32 4294901760, %v294_v19 }
 0x110   : > { %1204 = vmatmul.f32.gmra.mxu2 %v13000_v4  ;;  %v2002_v4 = vsub.f32 %v9031_v48, %v12785_v55  ;;  %1827 = vmatpush.msrb.mxu0 %v9012_v20  ;;  %v13004_v22 = vand.u32 4294901760, %v9039_v38 }
 0x111   : > { %v9057_v24 = vadd.f32 %v1060_v3, %v976_v32  ;;  %1361 = vmatmul.f32.gmra.mxu3 %v8252_v51  ;;  %1572 = vmatmul.f32.gmra.mxu1 %v13003_v33  ;;  %v9069_v32 = vsub.f32 %v306_v10, %v9051_v16  ;;  %v9080_v43 = vsub.f32 %v300_v0, %v9065_v2 }
 0x112   : > { %2120 = vmatpush.msra.mxu2 %v9019_v50  ;;  %2227 = vmatpush.msra.mxu3 %v9012_v20  ;;  %v2008_v55 = vsub.f32 %v9039_v38, %v13004_v22  ;;  %v2003_v51 = vand.u32 4294901760, %v2002_v4  ;;  %v13006_v22 = vld [vmem:[#allocation31_spill] sm:$0xff] }
 0x113   : > { %13002 = vst [vmem:[#allocation52_spill] sm:$0xff] %v9057_v24  ;;  %v749_v3 = vpop.f32.mrf.mxu2  ;;  %1829 = vmatpush.msrb.mxu0 %v9024_v12  ;;  %1992 = vmatpush.msrb.mxu1 %v1991_v53  ;;  %v9085_v53 = vand.u32 4294901760, %v288_v41  ;;  %v12792_v4 = vand.u32 4294901760, %v9069_v32 }
 0x114   : > { %v750_v24 = vadd.f32 %v749_v3, %v642_v45  ;;  %v848_v33 = vpop.f32.mrf.mxu3  ;;  %v983_v10 = vpop.f32.mrf.mxu0  ;;  %2123 = vmatpush.msra.mxu2 %v9031_v48  ;;  %2229 = vmatpush.msra.mxu3 %v9024_v12  ;;  %v13005_v3 = vand.u32 4294901760, %v9055_v1  ;;  %v13007_v12 = vld [vmem:[#allocation18_spill] sm:$0xff] }
 0x115   : > { %v849_v52 = vadd.f32 %v848_v33, %v745_v6  ;;  %1831 = vmatpush.msrb.mxu0 %v9036_v8  ;;  %1998 = vmatpush.msrb.mxu1 %v1997_v57  ;;  %v9092_v33 = vsub.f32 %v294_v19, %v9074_v37  ;;  %v2009_v57 = vand.u32 4294901760, %v2008_v55  ;;  %v2020_v19 = vsub.f32 %v9069_v32, %v12792_v4 }
 0x116   : > { %v1064_v45 = vpop.f32.mrf.mxu1  ;;  %v2014_v6 = vsub.f32 %v9055_v1, %v13005_v3  ;;  %2126 = vmatpush.msra.mxu2 %v9039_v38  ;;  %2231 = vmatpush.msra.mxu3 %v9036_v8  ;;  %v13009_v3 = vld [vmem:[#allocation16_spill] sm:$0xff]  ;;  %v9109_v55 = vsub.f32 %v288_v41, %v9085_v53 }
 0x117   : > { %v980_v0 = vadd.f32 %v979_v58, %v849_v52  ;;  %1476 = vmatmul.f32.gmra.mxu0 %v13007_v12  ;;  %2004 = vmatpush.msrb.mxu1 %v2003_v51  ;;  %v13010_v51 = vand.u32 4294901760, %v9080_v43 }
 0x118   : > { %1212 = vmatmul.f32.gmra.mxu2 %v13006_v22  ;;  %1833 = vmatpush.msrb.mxu0 %v9051_v16  ;;  %v2015_v58 = vand.u32 4294901760, %v2014_v6 }
 0x119   : > { %v9099_v15 = vadd.f32 %v1064_v45, %v980_v0  ;;  %1365 = vmatmul.f32.gmra.mxu3 %v8308_v27  ;;  %1578 = vmatmul.f32.gmra.mxu1 %v13009_v3  ;;  %v2026_v6 = vsub.f32 %v9080_v43, %v13010_v51 }
 0x11a   : > { %2129 = vmatpush.msra.mxu2 %v9055_v1  ;;  %2233 = vmatpush.msra.mxu3 %v9051_v16 }
 0x11b   : > { %13008 = vst [vmem:[#allocation31_spill] sm:$0xff] %v9099_v15  ;;  %v754_v20 = vpop.f32.mrf.mxu2  ;;  %1835 = vmatpush.msrb.mxu0 %v9065_v2  ;;  %2010 = vmatpush.msrb.mxu1 %v2009_v57  ;;  %v2021_v15 = vand.u32 4294901760, %v2020_v19  ;;  %v12793_v57 = vand.u32 4294901760, %v9109_v55  ;;  %v13014_v19 = vand.u32 4294901760, %v8915_v39 }
 0x11c   : > { %v755_v45 = vadd.f32 %v754_v20, %v8806_v47  ;;  %v854_v0 = vpop.f32.mrf.mxu3  ;;  %v987_v52 = vpop.f32.mrf.mxu0  ;;  %2132 = vmatpush.msra.mxu2 %v9069_v32  ;;  %2235 = vmatpush.msra.mxu3 %v9065_v2  ;;  %v13011_v47 = vand.u32 4294901760, %v9092_v33 }
 0x11d   : > { %v855_v4 = vadd.f32 %v854_v0, %v750_v24  ;;  %1837 = vmatpush.msrb.mxu0 %v9074_v37  ;;  %2016 = vmatpush.msrb.mxu1 %v2015_v58  ;;  %v13012_v24 = vld [vmem:[#allocation35_spill] sm:$0xff]  ;;  %v2027_v0 = vand.u32 4294901760, %v2026_v6 }
 0x11e   : > { %v1068_v41 = vpop.f32.mrf.mxu1  ;;  %v2032_v20 = vsub.f32 %v9092_v33, %v13011_v47  ;;  %2135 = vmatpush.msra.mxu2 %v9080_v43  ;;  %2237 = vmatpush.msra.mxu3 %v9074_v37 }
 0x11f   : > { %v984_v3 = vadd.f32 %v983_v10, %v855_v4  ;;  %1481 = vmatmul.f32.gmra.mxu0 %v8365_v30  ;;  %2022 = vmatpush.msrb.mxu1 %v2021_v15  ;;  %v2038_v10 = vsub.f32 %v9109_v55, %v12793_v57  ;;  %v13015_v15 = vand.u32 4294901760, %v8925_v11  ;;  %v13018_v11 = vand.u32 4294901760, %v8956_v63 }
 0x120   : > { %1220 = vmatmul.f32.gmra.mxu2 %v13012_v24  ;;  %1839 = vmatpush.msrb.mxu0 %v9085_v53  ;;  %v2033_v58 = vand.u32 4294901760, %v2032_v20 }
 0x121   : > { %v9129_v51 = vadd.f32 %v1068_v41, %v984_v3  ;;  %1369 = vmatmul.f32.gmra.mxu3 %v8337_v21  ;;  %1584 = vmatmul.f32.gmra.mxu1 %v8348_v13  ;;  %v2039_v57 = vand.u32 4294901760, %v2038_v10 }
 0x122   : > { %2322 = vmatpush.msra.mxu0 %v13014_v19  ;;  %2138 = vmatpush.msra.mxu2 %v9092_v33  ;;  %v13016_v19 = vand.u32 4294901760, %v8937_v44 }
 0x123   : > { %13013 = vst [vmem:[#allocation18_spill] sm:$0xff] %v9129_v51  ;;  %v759_v4 = vpop.f32.mrf.mxu2  ;;  %2028 = vmatpush.msrb.mxu1 %v2027_v0  ;;  %2239 = vmatpush.msra.mxu3 %v9085_v53  ;;  %v13017_v51 = vld [vmem:[#allocation40_spill] sm:$0xff]  ;;  %v13019_v0 = vand.u32 4294901760, %v8965_v17 }
 0x124   : > { %v760_v3 = vadd.f32 %v759_v4, %v8825_v31  ;;  %v860_v6 = vpop.f32.mrf.mxu3  ;;  %v991_v47 = vpop.f32.mrf.mxu0  ;;  %2326 = vmatpush.msra.mxu0 %v13015_v15  ;;  %2141 = vmatpush.msra.mxu2 %v9109_v55  ;;  %v13027_v15 = vld [vmem:[#allocation47_spill] sm:$0xff] }
 0x125   : > { %v861_v41 = vadd.f32 %v860_v6, %v755_v45  ;;  %2034 = vmatpush.msrb.mxu1 %v2033_v58  ;;  %v13020_v6 = vand.u32 4294901760, %v8978_v34 }
 0x126   : > { %v1072_v20 = vpop.f32.mrf.mxu1  ;;  %2330 = vmatpush.msra.mxu0 %v13016_v19  ;;  %v13028_v19 = vand.u32 4294901760, %v9055_v1 }
 0x127   : > { %v988_v39 = vadd.f32 %v987_v52, %v861_v41  ;;  %1486 = vmatmul.f32.gmra.mxu0 %v8401_v14  ;;  %2040 = vmatpush.msrb.mxu1 %v2039_v57 }
 0x128   : > { %1228 = vmatmul.f32.gmra.mxu2 %v13017_v51  ;;  %2334 = vmatpush.msra.mxu0 %v13018_v11  ;;  %v13029_v11 = vld [vmem:[#allocation48_spill] sm:$0xff] }
 0x129   : > { %v9149_v31 = vadd.f32 %v1072_v20, %v988_v39  ;;  %1373 = vmatmul.f32.gmra.mxu3 %v8377_v42  ;;  %1590 = vmatmul.f32.gmra.mxu1 %v8390_v18 }
 0x12a   : > { %2437 = vmatpush.msra.mxu1 %v8907_v28  ;;  %2338 = vmatpush.msra.mxu0 %v13019_v0  ;;  %v13021_v28 = vand.u32 4294901760, %v8989_v9 }
 0x12b   : > { %v764_v45 = vpop.f32.mrf.mxu2 }
 0x12c   : > { %v765_v44 = vadd.f32 %v764_v45, %v8844_v60  ;;  %v866_v52 = vpop.f32.mrf.mxu3  ;;  %v995_v10 = vpop.f32.mrf.mxu0  ;;  %2439 = vmatpush.msra.mxu1 %v8917_v23  ;;  %2342 = vmatpush.msra.mxu0 %v13020_v6  ;;  %v13030_v45 = vld [vmem:[#allocation13_spill] sm:$0xff] }
 0x12d   : > { %v867_v58 = vadd.f32 %v866_v52, %v760_v3  ;;  %v13035_v52 = vld [vmem:[#allocation43_spill] sm:$0xff] }
 0x12e   : > { %v1076_v4 = vpop.f32.mrf.mxu1  ;;  %2441 = vmatpush.msra.mxu1 %v8921_v59  ;;  %2346 = vmatpush.msra.mxu0 %v13021_v28  ;;  %v13022_v59 = vand.u32 4294901760, %v9002_v36 }
 0x12f   : > { %v992_v57 = vadd.f32 %v991_v47, %v867_v58  ;;  %1491 = vmatmul.f32.gmra.mxu0 %v8455_v54  ;;  %v13023_v47 = vand.u32 4294901760, %v9019_v50  ;;  %v13026_v50 = vand.u32 4294901760, %v9039_v38  ;;  %v13033_v38 = vand.u32 4294901760, %v9069_v32 }
 0x130   : > { %1671 = vmatmul.f32.vlgmr.msrb.gmra.mxu2 %v8186_v56  ;;  %2443 = vmatpush.msra.mxu1 %v8930_v62 }
 0x131   : > { %v9165_v60 = vadd.f32 %v1076_v4, %v992_v57  ;;  %1377 = vmatmul.f32.gmra.mxu3 %v8435_v61  ;;  %1596 = vmatmul.f32.gmra.mxu1 %v8422_v26  ;;  %v13037_v4 = vld [vmem:[#allocation51_spill] sm:$0xff] }
 0x132   : > { %2350 = vmatpush.msra.mxu0 %v13022_v59  ;;  %2445 = vmatpush.msra.mxu1 %v8945_v25  ;;  %v13025_v25 = vand.u32 4294901760, %v9031_v48 }
 0x133   : > { %v769_v23 = vpop.f32.mrf.mxu2 }
 0x134   : > { %v770_v34 = vadd.f32 %v769_v23, %v8861_v46  ;;  %v872_v63 = vpop.f32.mrf.mxu3  ;;  %v999_v3 = vpop.f32.mrf.mxu0  ;;  %2354 = vmatpush.msra.mxu0 %v13023_v47  ;;  %2447 = vmatpush.msra.mxu1 %v8959_v40  ;;  %v13038_v23 = vand.u32 4294901760, %v9092_v33 }
 0x135   : > { %v873_v17 = vadd.f32 %v872_v63, %v765_v44  ;;  %v13034_v44 = vld [vmem:[#allocation50_spill] sm:$0xff]  ;;  %v13040_v63 = vld [vmem:[#allocation25_spill] sm:$0xff] }
 0x136   : > { %v1080_v41 = vpop.f32.mrf.mxu1  ;;  %2358 = vmatpush.msra.mxu0 %v13025_v25  ;;  %2449 = vmatpush.msra.mxu1 %v8971_v5  ;;  %v13031_v5 = vld [vmem:[#allocation20_spill] sm:$0xff]  ;;  %v13044_v25 = vld [vmem:[#allocation30_spill] sm:$0xff] }
 0x137   : > { %v996_v9 = vadd.f32 %v995_v10, %v873_v17  ;;  %1845 = vmatmul.f32.vlgmr.msrb.gmra.mxu0 %v8290_v35  ;;  %v13036_v10 = vand.u32 4294901760, %v9080_v43  ;;  %v13042_v43 = vand.u32 4294901760, %v9109_v55 }
 0x138   : > { %1675 = vmatmul.f32.gmra.mxu2 %v8250_v49  ;;  %2362 = vmatpush.msra.mxu0 %v13026_v50 }
 0x139   : > { %v9181_v46 = vadd.f32 %v1080_v41, %v996_v9  ;;  %1602 = vmatmul.f32.gmra.mxu1 %v8475_v7  ;;  %1756 = vmatmul.f32.vlgmr.msrb.gmra.mxu3 %v8186_v56  ;;  %v13043_v9 = vld [vmem:[#allocation24_spill] sm:$0xff] }
 0x13a   : > { %2451 = vmatpush.msra.mxu1 %v13027_v15  ;;  %2366 = vmatpush.msra.mxu0 %v13028_v19  ;;  %v13047_v15 = vld [vmem:[#allocation34_spill] sm:$0xff] }
 0x13b   : > { %13024 = vst [vmem:[#allocation35_spill] sm:$0xff] %v9181_v46  ;;  %v774_v62 = vpop.f32.mrf.mxu2 }
 0x13c   : > { %v775_v36 = vadd.f32 %v774_v62, %v8873_v29  ;;  %v878_v40 = vpop.f32.mrf.mxu3  ;;  %v1003_v20 = vpop.f32.mrf.mxu0  ;;  %2453 = vmatpush.msra.mxu1 %v13029_v11  ;;  %2370 = vmatpush.msra.mxu0 %v13033_v38  ;;  %v13049_v38 = vld [vmem:[#allocation39_spill] sm:$0xff] }
 0x13d   : > { %v879_v35 = vadd.f32 %v878_v40, %v770_v34  ;;  %v13039_v34 = vld [vmem:[#allocation19_spill] sm:$0xff] }
 0x13e   : > { %v1084_v39 = vpop.f32.mrf.mxu1  ;;  %2455 = vmatpush.msra.mxu1 %v13034_v44  ;;  %2374 = vmatpush.msra.mxu0 %v13036_v10 }
 0x13f   : > { %v1000_v48 = vadd.f32 %v999_v3, %v879_v35  ;;  %1853 = vmatmul.f32.gmra.mxu0 %v13031_v5  ;;  %v13048_v5 = vld [vmem:[#allocation37_spill] sm:$0xff] }
 0x140   : > { %1679 = vmatmul.f32.gmra.mxu2 %v13030_v45  ;;  %2457 = vmatpush.msra.mxu1 %v13037_v4 }
 0x141   : > { %v9197_v29 = vadd.f32 %v1084_v39, %v1000_v48  ;;  %1760 = vmatmul.f32.gmra.mxu3 %v8250_v49  ;;  %2042 = vmatmul.f32.vlgmr.msrb.gmra.mxu1 %v8186_v56 }
 0x142   : > { %2378 = vmatpush.msra.mxu0 %v13038_v23  ;;  %2459 = vmatpush.msra.mxu1 %v9036_v8 }
 0x143   : > { %13032 = vst [vmem:[#allocation40_spill] sm:$0xff] %v9197_v29  ;;  %v779_v1 = vpop.f32.mrf.mxu2 }
 0x144   : > { %v780_v0 = vadd.f32 %v779_v1, %v13035_v52  ;;  %v884_v58 = vpop.f32.mrf.mxu3  ;;  %v1007_v57 = vpop.f32.mrf.mxu0  ;;  %2382 = vmatpush.msra.mxu0 %v13042_v43  ;;  %2461 = vmatpush.msra.mxu1 %v9051_v16 }
 0x145   : > { %v885_v6 = vadd.f32 %v884_v58, %v775_v36 }
 0x146   : > { %v1088_v28 = vpop.f32.mrf.mxu1  ;;  %2463 = vmatpush.msra.mxu1 %v9065_v2 }
 0x147   : > { %v1004_v32 = vadd.f32 %v1003_v20, %v885_v6  ;;  %1861 = vmatmul.f32.gmra.mxu0 %v13040_v63  ;;  %v13050_v6 = vld [vmem:[#allocation5_spill] sm:$0xff] }
 0x148   : > { %1683 = vmatmul.f32.gmra.mxu2 %v13039_v34  ;;  %2465 = vmatpush.msra.mxu1 %v9074_v37  ;;  %v13046_v37 = vld [vmem:[#allocation32_spill] sm:$0xff] }
 0x149   : > { %v9213_v59 = vadd.f32 %v1088_v28, %v1004_v32  ;;  %1764 = vmatmul.f32.gmra.mxu3 %v13030_v45  ;;  %2046 = vmatmul.f32.gmra.mxu1 %v8250_v49 }
 0x14a   : > { %2467 = vmatpush.msra.mxu1 %v9085_v53 }
 0x14b   : > { %13041 = vst [vmem:[#allocation47_spill] sm:$0xff] %v9213_v59  ;;  %v1133_v33 = vpop.f32.mrf.mxu2 }
 0x14c   : > { %v890_v17 = vpop.f32.mrf.mxu3  ;;  %v1432_v3 = vpop.f32.mrf.mxu0 }
 0x14d   : > { %v891_v8 = vadd.f32 %v890_v17, %v780_v0 }
 0x14e   : > { %v1092_v41 = vpop.f32.mrf.mxu1 }
 0x14f   : > { %v1008_v47 = vadd.f32 %v1007_v57, %v891_v8  ;;  %1869 = vmatmul.f32.gmra.mxu0 %v13044_v25  ;;  %v13051_v57 = vld [vmem:[#allocation42_spill] sm:$0xff] }
 0x150   : > { %1687 = vmatmul.f32.gmra.mxu2 %v13043_v9  ;;  %v13052_v8 = vld [vmem:[#allocation10_spill] sm:$0xff] }
 0x151   : > { %v9224_v62 = vadd.f32 %v1092_v41, %v1008_v47  ;;  %1768 = vmatmul.f32.gmra.mxu3 %v13039_v34  ;;  %2050 = vmatmul.f32.gmra.mxu1 %v13030_v45 }
 0x153   : > { %13045 = vst [vmem:[#allocation48_spill] sm:$0xff] %v9224_v62  ;;  %v1141_v16 = vpop.f32.mrf.mxu2  ;;  %v331_v62 = vld [vmem:[#allocation2 + $0x168] sm:$0xff] }
 0x154   : > { %v1330_v2 = vpop.f32.mrf.mxu3  ;;  %v1437_v36 = vpop.f32.mrf.mxu0 }
 0x155   : > { %v1331_v55 = vadd.f32 %v1330_v2, %v1133_v33 }
 0x156   : > { %v1531_v40 = vpop.f32.mrf.mxu1 }
 0x157   : > { %v1433_v50 = vadd.f32 %v1432_v3, %v1331_v55  ;;  %1877 = vmatmul.f32.gmra.mxu0 %v13047_v15  ;;  %v13053_v3 = vld [vmem:[#allocation14_spill] sm:$0xff] }
 0x158   : > { %1691 = vmatmul.f32.gmra.mxu2 %v13046_v37 }
 0x159   : > { %v9231_v35 = vadd.f32 %v1531_v40, %v1433_v50  ;;  %1772 = vmatmul.f32.gmra.mxu3 %v13043_v9  ;;  %2054 = vmatmul.f32.gmra.mxu1 %v13039_v34  ;;  %v13054_v40 = vld [vmem:[#allocation21_spill] sm:$0xff] }
 0x15b   : > { %v1149_v20 = vpop.f32.mrf.mxu2 }
 0x15c   : > { %v1334_v39 = vpop.f32.mrf.mxu3  ;;  %v1442_v53 = vpop.f32.mrf.mxu0 }
 0x15d   : > { %v1335_v19 = vadd.f32 %v1334_v39, %v1141_v16 }
 0x15e   : > { %v1537_v11 = vpop.f32.mrf.mxu1 }
 0x15f   : > { %v1438_v48 = vadd.f32 %v1437_v36, %v1335_v19  ;;  %1885 = vmatmul.f32.gmra.mxu0 %v13049_v38 }
 0x160   : > { %1695 = vmatmul.f32.gmra.mxu2 %v13048_v5 }
 0x161   : > { %v9237_v44 = vadd.f32 %v1537_v11, %v1438_v48  ;;  %1776 = vmatmul.f32.gmra.mxu3 %v13046_v37  ;;  %2058 = vmatmul.f32.gmra.mxu1 %v13043_v9  ;;  %v13055_v48 = vld [vmem:[#allocation26_spill] sm:$0xff] }
 0x163   : > { %v1157_v1 = vpop.f32.mrf.mxu2 }
 0x164   : > { %v1338_v52 = vpop.f32.mrf.mxu3  ;;  %v1447_v58 = vpop.f32.mrf.mxu0 }
 0x165   : > { %v1339_v0 = vadd.f32 %v1338_v52, %v1149_v20 }
 0x166   : > { %v1543_v10 = vpop.f32.mrf.mxu1 }
 0x167   : > { %v1443_v4 = vadd.f32 %v1442_v53, %v1339_v0  ;;  %1893 = vmatmul.f32.gmra.mxu0 %v13051_v57 }
 0x168   : > { %1699 = vmatmul.f32.gmra.mxu2 %v13050_v6 }
 0x169   : > { %v9243_v28 = vadd.f32 %v1543_v10, %v1443_v4  ;;  %1780 = vmatmul.f32.gmra.mxu3 %v13048_v5  ;;  %2062 = vmatmul.f32.gmra.mxu1 %v13046_v37 }
 0x16b   : > { %v1165_v23 = vpop.f32.mrf.mxu2 }
 0x16c   : > { %v1342_v32 = vpop.f32.mrf.mxu3  ;;  %v1452_v43 = vpop.f32.mrf.mxu0 }
 0x16d   : > { %v1343_v63 = vadd.f32 %v1342_v32, %v1157_v1  ;;  %v379_v1 = vld [vmem:[#allocation2 + $0x2e8] sm:$0xff] }
 0x16e   : > { %v1549_v33 = vpop.f32.mrf.mxu1  ;;  %v9265_v52 = vand.u32 4294901760, %v379_v1 }
 0x16f   : > { %v1448_v17 = vadd.f32 %v1447_v58, %v1343_v63  ;;  %1901 = vmatmul.f32.gmra.mxu0 %v13053_v3 }
 0x170   : > { %1703 = vmatmul.f32.gmra.mxu2 %v13052_v8  ;;  %v9269_v10 = vsub.f32 %v379_v1, %v9265_v52  ;;  %2949 = vmatpush.msrb.mxu1 %v9265_v52 }
 0x171   : > { %v9249_v41 = vadd.f32 %v1549_v33, %v1448_v17  ;;  %1784 = vmatmul.f32.gmra.mxu3 %v13050_v6  ;;  %2066 = vmatmul.f32.gmra.mxu1 %v13048_v5  ;;  %v373_v17 = vld [vmem:[#allocation2 + $0x2b8] sm:$0xff] }
 0x172   : > { %2549 = vmatpush.msrb.mxu2 %v9265_v52  ;;  %v12798_v32 = vand.u32 4294901760, %v9269_v10  ;;  %2836 = vmatpush.msrb.mxu0 %v9269_v10 }
 0x173   : > { %v1173_v47 = vpop.f32.mrf.mxu2 }
 0x174   : > { %v1346_v25 = vpop.f32.mrf.mxu3  ;;  %v1457_v2 = vpop.f32.mrf.mxu0 }
 0x175   : > { %v1347_v16 = vadd.f32 %v1346_v25, %v1165_v23 }
 0x176   : > { %v1555_v55 = vpop.f32.mrf.mxu1 }
 0x177   : > { %v1453_v36 = vadd.f32 %v1452_v43, %v1347_v16  ;;  %1909 = vmatmul.f32.gmra.mxu0 %v13054_v40  ;;  %v2688_v43 = vsub.f32 %v9269_v10, %v12798_v32  ;;  %v13065_v32 = vld [vmem:[#allocation22_spill] sm:$0xff] }
 0x178   : > { %1707 = vmatmul.f32.gmra.mxu2 %v8308_v27 }
 0x179   : > { %v9255_v50 = vadd.f32 %v1555_v55, %v1453_v36  ;;  %1788 = vmatmul.f32.gmra.mxu3 %v13052_v8  ;;  %2070 = vmatmul.f32.gmra.mxu1 %v13050_v6  ;;  %v2689_v3 = vand.u32 4294901760, %v2688_v43  ;;  %v367_v36 = vld [vmem:[#allocation2 + $0x288] sm:$0xff] }
 0x17b   : > { %v1181_v15 = vpop.f32.mrf.mxu2  ;;  %2690 = vmatpush.msrb.mxu3 %v2689_v3 }
 0x17c   : > { %v1350_v20 = vpop.f32.mrf.mxu3  ;;  %v1462_v19 = vpop.f32.mrf.mxu0 }
 0x17d   : > { %v1351_v39 = vadd.f32 %v1350_v20, %v1173_v47  ;;  %v9283_v47 = vand.u32 4294901760, %v373_v17  ;;  %v9291_v20 = vand.u32 4294901760, %v367_v36 }
 0x17e   : > { %v1561_v53 = vpop.f32.mrf.mxu1 }
 0x17f   : > { %v1458_v11 = vadd.f32 %v1457_v2, %v1351_v39  ;;  %1917 = vmatmul.f32.gmra.mxu0 %v13055_v48  ;;  %2551 = vmatpush.msrb.mxu2 %v9283_v47  ;;  %v361_v48 = vld [vmem:[#allocation2 + $0x258] sm:$0xff] }
 0x180   : > { %1711 = vmatmul.f32.gmra.mxu2 %v8337_v21  ;;  %2951 = vmatpush.msrb.mxu1 %v9283_v47 }
 0x181   : > { %v9261_v38 = vadd.f32 %v1561_v53, %v1458_v11  ;;  %1792 = vmatmul.f32.gmra.mxu3 %v8308_v27  ;;  %2074 = vmatmul.f32.gmra.mxu1 %v13052_v8  ;;  %v9304_v11 = vsub.f32 %v367_v36, %v9291_v20 }
 0x182   : > { %2553 = vmatpush.msrb.mxu2 %v9291_v20  ;;  %2953 = vmatpush.msrb.mxu1 %v9291_v20 }
 0x183   : > { %v1189_v0 = vpop.f32.mrf.mxu2 }
 0x184   : > { %v1354_v58 = vpop.f32.mrf.mxu3  ;;  %v1467_v57 = vpop.f32.mrf.mxu0 }
 0x185   : > { %v1355_v4 = vadd.f32 %v1354_v58, %v1181_v15  ;;  %v12795_v58 = vand.u32 4294901760, %v9304_v11 }
 0x186   : > { %v1567_v23 = vpop.f32.mrf.mxu1 }
 0x187   : > { %v1463_v63 = vadd.f32 %v1462_v19, %v1355_v4  ;;  %1925 = vmatmul.f32.gmra.mxu0 %v13006_v22  ;;  %v9287_v22 = vsub.f32 %v373_v17, %v9283_v47 }
 0x188   : > { %1715 = vmatmul.f32.gmra.mxu2 %v8377_v42 }
 0x189   : > { %v9279_v33 = vadd.f32 %v1567_v23, %v1463_v63  ;;  %1796 = vmatmul.f32.gmra.mxu3 %v8337_v21  ;;  %2078 = vmatmul.f32.gmra.mxu1 %v8308_v27  ;;  %v12796_v15 = vand.u32 4294901760, %v9287_v22  ;;  %v2700_v63 = vsub.f32 %v9304_v11, %v12795_v58  ;;  %v13060_v58 = vld [vmem:[#allocation17_spill] sm:$0xff] }
 0x18a   : > { %2839 = vmatpush.msrb.mxu0 %v9287_v22 }
 0x18b   : > { %v1197_v25 = vpop.f32.mrf.mxu2  ;;  %v2694_v19 = vsub.f32 %v9287_v22, %v12796_v15 }
 0x18c   : > { %v1358_v16 = vpop.f32.mrf.mxu3  ;;  %v1472_v55 = vpop.f32.mrf.mxu0  ;;  %2842 = vmatpush.msrb.mxu0 %v9304_v11 }
 0x18d   : > { %v1359_v2 = vadd.f32 %v1358_v16, %v1189_v0  ;;  %v2695_v1 = vand.u32 4294901760, %v2694_v19  ;;  %v9307_v0 = vand.u32 4294901760, %v361_v48  ;;  %v2701_v16 = vand.u32 4294901760, %v2700_v63 }
 0x18e   : > { %v1573_v40 = vpop.f32.mrf.mxu1 }
 0x18f   : > { %v1468_v39 = vadd.f32 %v1467_v57, %v1359_v2  ;;  %1933 = vmatmul.f32.gmra.mxu0 %v13012_v24  ;;  %2696 = vmatpush.msrb.mxu3 %v2695_v1  ;;  %v9317_v43 = vsub.f32 %v361_v48, %v9307_v0 }
 0x190   : > { %1719 = vmatmul.f32.gmra.mxu2 %v8435_v61  ;;  %2955 = vmatpush.msrb.mxu1 %v9307_v0 }
 0x191   : > { %v9299_v53 = vadd.f32 %v1573_v40, %v1468_v39  ;;  %1800 = vmatmul.f32.gmra.mxu3 %v8377_v42  ;;  %2082 = vmatmul.f32.gmra.mxu1 %v8337_v21  ;;  %v12794_v2 = vand.u32 4294901760, %v9317_v43 }
 0x192   : > { %2555 = vmatpush.msrb.mxu2 %v9307_v0  ;;  %2845 = vmatpush.msrb.mxu0 %v9317_v43 }
 0x193   : > { %v1205_v24 = vpop.f32.mrf.mxu2  ;;  %v2706_v40 = vsub.f32 %v9317_v43, %v12794_v2  ;;  %2702 = vmatpush.msrb.mxu3 %v2701_v16  ;;  %v13057_v16 = vld [vmem:[#allocation11_spill] sm:$0xff] }
 0x194   : > { %v1362_v4 = vpop.f32.mrf.mxu3  ;;  %v1477_v23 = vpop.f32.mrf.mxu0 }
 0x195   : > { %v1363_v57 = vadd.f32 %v1362_v4, %v1197_v25  ;;  %v13056_v25 = vld [vmem:[#allocation6_spill] sm:$0xff]  ;;  %v2707_v48 = vand.u32 4294901760, %v2706_v40 }
 0x196   : > { %v1579_v17 = vpop.f32.mrf.mxu1 }
 0x197   : > { %v1473_v3 = vadd.f32 %v1472_v55, %v1363_v57  ;;  %1941 = vmatmul.f32.gmra.mxu0 %v13017_v51  ;;  %v355_v55 = vld [vmem:[#allocation2 + $0x228] sm:$0xff]  ;;  %2708 = vmatpush.msrb.mxu3 %v2707_v48 }
 0x198   : > { %2144 = vmatmul.f32.vlgmr.msra.gmra.mxu2 %v13056_v25  ;;  %v9331_v39 = vand.u32 4294901760, %v355_v55 }
 0x199   : > { %v9324_v36 = vadd.f32 %v1579_v17, %v1473_v3  ;;  %1804 = vmatmul.f32.gmra.mxu3 %v8435_v61  ;;  %2086 = vmatmul.f32.gmra.mxu1 %v8377_v42 }
 0x19a   : > { %2557 = vmatpush.msrb.mxu2 %v9331_v39  ;;  %v9335_v51 = vsub.f32 %v355_v55, %v9331_v39  ;;  %2957 = vmatpush.msrb.mxu1 %v9331_v39 }
 0x19b   : > { %v1213_v19 = vpop.f32.mrf.mxu2 }
 0x19c   : > { %v1366_v1 = vpop.f32.mrf.mxu3  ;;  %v1482_v57 = vpop.f32.mrf.mxu0  ;;  %v12797_v17 = vand.u32 4294901760, %v9335_v51  ;;  %2848 = vmatpush.msrb.mxu0 %v9335_v51 }
 0x19d   : > { %v1367_v4 = vadd.f32 %v1366_v1, %v1205_v24  ;;  %v13059_v24 = vld [vmem:[#allocation8_spill] sm:$0xff] }
 0x19e   : > { %v1585_v63 = vpop.f32.mrf.mxu1  ;;  %v2712_v25 = vsub.f32 %v9335_v51, %v12797_v17  ;;  %v343_v17 = vld [vmem:[#allocation2 + $0x1c8] sm:$0xff] }
 0x19f   : > { %v1478_v3 = vadd.f32 %v1477_v23, %v1367_v4  ;;  %2384 = vmatmul.f32.vlgmr.msra.gmra.mxu0 %v8186_v56 }
 0x1a0   : > { %2149 = vmatmul.f32.gmra.mxu2 %v13057_v16  ;;  %v2713_v55 = vand.u32 4294901760, %v2712_v25 }
 0x1a1   : > { %v9345_v40 = vadd.f32 %v1585_v63, %v1478_v3  ;;  %2090 = vmatmul.f32.gmra.mxu1 %v8435_v61  ;;  %2243 = vmatmul.f32.vlgmr.msra.gmra.mxu3 %v13059_v24  ;;  %v13062_v63 = vld [vmem:[#allocation15_spill] sm:$0xff]  ;;  %v349_v3 = vld [vmem:[#allocation2 + $0x1f8] sm:$0xff] }
 0x1a2   : > { %2714 = vmatpush.msrb.mxu3 %v2713_v55  ;;  %v9355_v24 = vand.u32 4294901760, %v349_v3 }
 0x1a3   : > { %13058 = vst [vmem:[#allocation13_spill] sm:$0xff] %v9345_v40  ;;  %v1221_v48 = vpop.f32.mrf.mxu2 }
 0x1a4   : > { %v1370_v1 = vpop.f32.mrf.mxu3  ;;  %v1487_v23 = vpop.f32.mrf.mxu0  ;;  %2559 = vmatpush.msrb.mxu2 %v9355_v24  ;;  %2959 = vmatpush.msrb.mxu1 %v9355_v24 }
 0x1a5   : > { %v1371_v2 = vadd.f32 %v1370_v1, %v1213_v19 }
 0x1a6   : > { %v1591_v4 = vpop.f32.mrf.mxu1 }
 0x1a7   : > { %v1483_v16 = vadd.f32 %v1482_v57, %v1371_v2  ;;  %2388 = vmatmul.f32.gmra.mxu0 %v8250_v49  ;;  %v9359_v2 = vsub.f32 %v349_v3, %v9355_v24 }
 0x1a8   : > { %2154 = vmatmul.f32.gmra.mxu2 %v13060_v58  ;;  %v9361_v58 = vand.u32 4294901760, %v343_v17 }
 0x1a9   : > { %v9351_v15 = vadd.f32 %v1591_v4, %v1483_v16  ;;  %2249 = vmatmul.f32.gmra.mxu3 %v13062_v63  ;;  %2469 = vmatmul.f32.vlgmr.msra.gmra.mxu1 %v8186_v56  ;;  %v12799_v56 = vand.u32 4294901760, %v9359_v2  ;;  %v13063_v63 = vld [vmem:[#allocation23_spill] sm:$0xff] }
 0x1aa   : > { %2561 = vmatpush.msrb.mxu2 %v9361_v58  ;;  %v9367_v4 = vsub.f32 %v343_v17, %v9361_v58  ;;  %2851 = vmatpush.msrb.mxu0 %v9359_v2 }
 0x1ab   : > { %13061 = vst [vmem:[#allocation20_spill] sm:$0xff] %v9351_v15  ;;  %v1229_v25 = vpop.f32.mrf.mxu2  ;;  %2961 = vmatpush.msrb.mxu1 %v9361_v58 }
 0x1ac   : > { %v1374_v55 = vpop.f32.mrf.mxu3  ;;  %v1492_v57 = vpop.f32.mrf.mxu0  ;;  %v12800_v3 = vand.u32 4294901760, %v9367_v4  ;;  %2854 = vmatpush.msrb.mxu0 %v9367_v4 }
 0x1ad   : > { %v1375_v19 = vadd.f32 %v1374_v55, %v1221_v48  ;;  %v2718_v48 = vsub.f32 %v9359_v2, %v12799_v56 }
 0x1ae   : > { %v1597_v1 = vpop.f32.mrf.mxu1 }
 0x1af   : > { %v1488_v16 = vadd.f32 %v1487_v23, %v1375_v19  ;;  %2392 = vmatmul.f32.gmra.mxu0 %v13030_v45  ;;  %v2719_v17 = vand.u32 4294901760, %v2718_v48  ;;  %v2724_v23 = vsub.f32 %v9367_v4, %v12800_v3  ;;  %v9396_v3 = vand.u32 4294901760, %v331_v62 }
 0x1b0   : > { %2159 = vmatmul.f32.gmra.mxu2 %v13063_v63  ;;  %v337_v63 = vld [vmem:[#allocation2 + $0x198] sm:$0xff] }
 0x1b1   : > { %v9377_v55 = vadd.f32 %v1597_v1, %v1488_v16  ;;  %2255 = vmatmul.f32.gmra.mxu3 %v13065_v32  ;;  %2473 = vmatmul.f32.gmra.mxu1 %v8250_v49  ;;  %v2725_v56 = vand.u32 4294901760, %v2724_v23  ;;  %v9385_v29 = vand.u32 4294901760, %v337_v63  ;;  %v285_v49 = vld [vmem:[%s12675_s5] sm:$0xff]  ;;  %v13067_v23 = vld [vmem:[#allocation28_spill] sm:$0xff] }
 0x1b2   : > { %2720 = vmatpush.msrb.mxu3 %v2719_v17 }
 0x1b3   : > { %13064 = vst [vmem:[#allocation50_spill] sm:$0xff] %v9377_v55  ;;  %v1672_v19 = vpop.f32.mrf.mxu2  ;;  %2563 = vmatpush.msrb.mxu2 %v9385_v29  ;;  %v9394_v48 = vsub.f32 %v337_v63, %v9385_v29  ;;  %2963 = vmatpush.msrb.mxu1 %v9385_v29 }
 0x1b4   : > { %v1378_v59 = vpop.f32.mrf.mxu3  ;;  %v9387_v16 = vpop.f32.mrf.mxu0  ;;  %2726 = vmatpush.msrb.mxu3 %v2725_v56  ;;  %v13069_v56 = vld [vmem:[#allocation27_spill] sm:$0xff]  ;;  %v1673_v63 = vadd.f32 %v1672_v19, %v9231_v35 }
 0x1b5   : > { %v1379_v1 = vadd.f32 %v1378_v59, %v1229_v25  ;;  %13066 = vst [vmem:[#allocation43_spill] sm:$0xff] %v9387_v16  ;;  %v12801_v59 = vand.u32 4294901760, %v9394_v48  ;;  %v9402_v25 = vperm.slane %v285_v49, 0  ;;  %2565 = vmatpush.msrb.mxu2 %v9396_v3  ;;  %2857 = vmatpush.msrb.mxu0 %v9394_v48  ;;  %v9415_v49 = vsub.f32 %v331_v62, %v9396_v3 }
 0x1b6   : > { %v1603_v32 = vpop.f32.mrf.mxu1  ;;  %2965 = vmatpush.msrb.mxu1 %v9396_v3 }
 0x1b7   : > { %v1493_v17 = vadd.f32 %v1492_v57, %v1379_v1  ;;  %2396 = vmatmul.f32.gmra.mxu0 %v13039_v34  ;;  %v2730_v57 = vsub.f32 %v9394_v48, %v12801_v59  ;;  %v12802_v15 = vand.u32 4294901760, %v9415_v49 }
 0x1b8   : > { %2164 = vmatmul.f32.gmra.mxu2 %v13067_v23  ;;  %2860 = vmatpush.msrb.mxu0 %v9415_v49 }
 0x1b9   : > { %v9404_v16 = vadd.f32 %v1603_v32, %v1493_v17  ;;  %2261 = vmatmul.f32.gmra.mxu3 %v13069_v56  ;;  %2477 = vmatmul.f32.gmra.mxu1 %v13030_v45  ;;  %v325_v32 = vld [vmem:[#allocation2 + $0x138] sm:$0xff]  ;;  %v2731_v23 = vand.u32 4294901760, %v2730_v57  ;;  %v2736_v19 = vsub.f32 %v9415_v49, %v12802_v15  ;;  %v13073_v57 = vld [vmem:[#allocation33_spill] sm:$0xff] }
 0x1ba   : > { %v9418_v45 = vand.u32 4294901760, %v325_v32  ;;  %v13070_v56 = vld [vmem:[#allocation44_spill] sm:$0xff] }
 0x1bb   : > { %13068 = vst [vmem:[#allocation51_spill] sm:$0xff] %v9404_v16  ;;  %v1676_v1 = vpop.f32.mrf.mxu2  ;;  %v2522_v59 = vadd.f32 %v9402_v25, %v13070_v56  ;;  %2732 = vmatpush.msrb.mxu3 %v2731_v23 }
 0x1bc   : > { %v1757_v17 = vpop.f32.mrf.mxu3  ;;  %v9422_v55 = vpop.f32.mrf.mxu0  ;;  %2567 = vmatpush.msrb.mxu2 %v9418_v45  ;;  %2967 = vmatpush.msrb.mxu1 %v9418_v45  ;;  %v1677_v23 = vadd.f32 %v1676_v1, %v9237_v44 }
 0x1bd   : > { %v1758_v16 = vadd.f32 %v1757_v17, %v1673_v63  ;;  %13071 = vst [vmem:[#allocation19_spill] sm:$0xff] %v9422_v55  ;;  %v13074_v63 = vld [vmem:[#allocation29_spill] sm:$0xff]  ;;  %v2737_v17 = vand.u32 4294901760, %v2736_v19 }
 0x1be   : > { %v9426_v35 = vpop.f32.mrf.mxu1 }
 0x1bf   : > { %13072 = vst [vmem:[#allocation25_spill] sm:$0xff] %v9426_v35  ;;  %v9429_v62 = vmul.f32 %v2522_v59, %v1758_v16  ;;  %2400 = vmatmul.f32.gmra.mxu0 %v13043_v9  ;;  %2738 = vmatpush.msrb.mxu3 %v2737_v17  ;;  %v9441_v16 = vsub.f32 %v325_v32, %v9418_v45  ;;  %v319_v59 = vld [vmem:[#allocation2 + $0x108] sm:$0xff]  ;;  %v13076_v35 = vld [vmem:[#allocation45_spill] sm:$0xff] }
 0x1c0   : > { %2169 = vmatmul.f32.gmra.mxu2 %v13073_v57  ;;  %v9443_v55 = vand.u32 4294901760, %v319_v59  ;;  %v2523_v57 = vadd.f32 %v9402_v25, %v13076_v35  ;;  %v13079_v35 = vld [vmem:[#allocation38_spill] sm:$0xff] }
 0x1c1   : > { %2267 = vmatmul.f32.gmra.mxu3 %v13074_v63  ;;  %2481 = vmatmul.f32.gmra.mxu1 %v13039_v34  ;;  %v12803_v34 = vand.u32 4294901760, %v9441_v16  ;;  %v13080_v63 = vld [vmem:[#allocation36_spill] sm:$0xff] }
 0x1c2   : > { %13075 = vst [vmem:[#allocation24_spill] sm:$0xff] %v9443_v55  ;;  %2863 = vmatpush.msrb.mxu0 %v9441_v16  ;;  %2569 = vmatpush.msrb.mxu2 %v9443_v55  ;;  %v9455_v1 = vsub.f32 %v319_v59, %v9443_v55 }
 0x1c3   : > { %v1680_v56 = vpop.f32.mrf.mxu2  ;;  %2969 = vmatpush.msrb.mxu1 %v9443_v55 }
 0x1c4   : > { %v1761_v15 = vpop.f32.mrf.mxu3  ;;  %v9447_v40 = vpop.f32.mrf.mxu0  ;;  %v12805_v19 = vand.u32 4294901760, %v9455_v1  ;;  %2866 = vmatpush.msrb.mxu0 %v9455_v1 }
 0x1c5   : > { %v1762_v46 = vadd.f32 %v1761_v15, %v1677_v23  ;;  %13077 = vst [vmem:[#allocation30_spill] sm:$0xff] %v9447_v40  ;;  %v2742_v15 = vsub.f32 %v9441_v16, %v12803_v34  ;;  %v1681_v23 = vadd.f32 %v1680_v56, %v9243_v28 }
 0x1c6   : > { %v9451_v44 = vpop.f32.mrf.mxu1 }
 0x1c7   : > { %13078 = vst [vmem:[#allocation32_spill] sm:$0xff] %v9451_v44  ;;  %v9458_v32 = vmul.f32 %v2523_v57, %v1762_v46  ;;  %2404 = vmatmul.f32.gmra.mxu0 %v13046_v37  ;;  %v2743_v17 = vand.u32 4294901760, %v2742_v15  ;;  %v2748_v46 = vsub.f32 %v9455_v1, %v12805_v19  ;;  %v313_v57 = vld [vmem:[#allocation2 + $0xd8] sm:$0xff]  ;;  %v13082_v44 = vld [vmem:[#allocation46_spill] sm:$0xff]  ;;  %v13088_v19 = vld [vmem:[#allocation49_spill] sm:$0xff] }
 0x1c8   : > { %2174 = vmatmul.f32.gmra.mxu2 %v13079_v35  ;;  %v9473_v40 = vand.u32 4294901760, %v313_v57 }
 0x1c9   : > { %2273 = vmatmul.f32.gmra.mxu3 %v13080_v63  ;;  %2485 = vmatmul.f32.gmra.mxu1 %v13043_v9  ;;  %v2749_v34 = vand.u32 4294901760, %v2748_v46  ;;  %v2524_v63 = vadd.f32 %v9402_v25, %v13082_v44  ;;  %v13086_v46 = vld [vmem:[#allocation41_spill] sm:$0xff] }
 0x1ca   : > { %2744 = vmatpush.msrb.mxu3 %v2743_v17  ;;  %13081 = vst [vmem:[#allocation34_spill] sm:$0xff] %v9473_v40  ;;  %2571 = vmatpush.msrb.mxu2 %v9473_v40  ;;  %v9483_v28 = vsub.f32 %v313_v57, %v9473_v40  ;;  %v13085_v17 = vld [vmem:[#allocation7_spill] sm:$0xff] }
 0x1cb   : > { %v1684_v59 = vpop.f32.mrf.mxu2  ;;  %2971 = vmatpush.msrb.mxu1 %v9473_v40 }
 0x1cc   : > { %v1765_v35 = vpop.f32.mrf.mxu3  ;;  %v9477_v15 = vpop.f32.mrf.mxu0  ;;  %2750 = vmatpush.msrb.mxu3 %v2749_v34  ;;  %v12806_v44 = vand.u32 4294901760, %v9483_v28  ;;  %2869 = vmatpush.msrb.mxu0 %v9483_v28 }
 0x1cd   : > { %v1766_v9 = vadd.f32 %v1765_v35, %v1681_v23  ;;  %13083 = vst [vmem:[#allocation37_spill] sm:$0xff] %v9477_v15  ;;  %v1685_v23 = vadd.f32 %v1684_v59, %v9249_v41  ;;  %v307_v35 = vld [vmem:[#allocation2 + $0xa8] sm:$0xff]  ;;  %v2525_v15 = vadd.f32 %v9402_v25, %v13088_v19  ;;  %v13092_v59 = vld [vmem:[#allocation12_spill] sm:$0xff] }
 0x1ce   : > { %v9479_v55 = vpop.f32.mrf.mxu1  ;;  %v2754_v34 = vsub.f32 %v9483_v28, %v12806_v44 }
 0x1cf   : > { %13084 = vst [vmem:[#allocation39_spill] sm:$0xff] %v9479_v55  ;;  %v9485_v56 = vmul.f32 %v2524_v63, %v1766_v9  ;;  %2408 = vmatmul.f32.gmra.mxu0 %v13048_v5 }
 0x1d0   : > { %2179 = vmatmul.f32.gmra.mxu2 %v13085_v17  ;;  %v2755_v9 = vand.u32 4294901760, %v2754_v34  ;;  %v9498_v17 = vand.u32 4294901760, %v307_v35  ;;  %v13093_v34 = vld [vmem:[#allocation9_spill] sm:$0xff] }
 0x1d1   : > { %2279 = vmatmul.f32.gmra.mxu3 %v13086_v46  ;;  %2489 = vmatmul.f32.gmra.mxu1 %v13046_v37 }
 0x1d2   : > { %13087 = vst [vmem:[#allocation5_spill] sm:$0xff] %v9498_v17  ;;  %2756 = vmatpush.msrb.mxu3 %v2755_v9  ;;  %2573 = vmatpush.msrb.mxu2 %v9498_v17  ;;  %v9508_v44 = vsub.f32 %v307_v35, %v9498_v17 }
 0x1d3   : > { %v1688_v57 = vpop.f32.mrf.mxu2  ;;  %2973 = vmatpush.msrb.mxu1 %v9498_v17 }
 0x1d4   : > { %v1769_v63 = vpop.f32.mrf.mxu3  ;;  %v9502_v55 = vpop.f32.mrf.mxu0  ;;  %v12807_v19 = vand.u32 4294901760, %v9508_v44  ;;  %2872 = vmatpush.msrb.mxu0 %v9508_v44 }
 0x1d5   : > { %v1770_v46 = vadd.f32 %v1769_v63, %v1685_v23  ;;  %13089 = vst [vmem:[#allocation42_spill] sm:$0xff] %v9502_v55  ;;  %v301_v23 = vld [vmem:[#allocation2 + $0x78] sm:$0xff] }
 0x1d6   : > { %v9504_v37 = vpop.f32.mrf.mxu1  ;;  %v2760_v35 = vsub.f32 %v9508_v44, %v12807_v19  ;;  %v9521_v63 = vand.u32 4294901760, %v301_v23  ;;  %v13095_v19 = vld [vmem:[#allocation52_spill] sm:$0xff] }
 0x1d7   : > { %13090 = vst [vmem:[#allocation10_spill] sm:$0xff] %v9504_v37  ;;  %v9510_v41 = vmul.f32 %v2525_v15, %v1770_v46  ;;  %2412 = vmatmul.f32.gmra.mxu0 %v13050_v6  ;;  %v1689_v15 = vadd.f32 %v1688_v57, %v9255_v50  ;;  %v295_v46 = vld [vmem:[#allocation2 + $0x48] sm:$0xff]  ;;  %v2526_v37 = vadd.f32 %v9402_v25, %v13095_v19  ;;  %v289_v50 = vld [vmem:[#allocation2 + $0x18] sm:$0xff] }
 0x1d8   : > { %2184 = vmatmul.f32.gmra.mxu2 %v13092_v59  ;;  %13094 = vst [vmem:[#allocation21_spill] sm:$0xff] %v9521_v63  ;;  %v2761_v55 = vand.u32 4294901760, %v2760_v35  ;;  %2975 = vmatpush.msrb.mxu1 %v9521_v63 }
 0x1d9   : > { %13091 = vst [vmem:[#allocation14_spill] sm:$0xff] %v9510_v41  ;;  %2285 = vmatmul.f32.gmra.mxu3 %v13093_v34  ;;  %2493 = vmatmul.f32.gmra.mxu1 %v13048_v5  ;;  %v9527_v34 = vsub.f32 %v301_v23, %v9521_v63  ;;  %v9529_v5 = vand.u32 4294901760, %v295_v46  ;;  %v9543_v41 = vand.u32 4294901760, %v289_v50 }
 0x1da   : > { %2575 = vmatpush.msrb.mxu2 %v9521_v63  ;;  %2762 = vmatpush.msrb.mxu3 %v2761_v55 }
 0x1db   : > { %v1692_v9 = vpop.f32.mrf.mxu2  ;;  %v12812_v35 = vand.u32 4294901760, %v9527_v34  ;;  %v9541_v23 = vsub.f32 %v295_v46, %v9529_v5  ;;  %2875 = vmatpush.msrb.mxu0 %v9527_v34  ;;  %2977 = vmatpush.msrb.mxu1 %v9529_v5  ;;  %v13098_v46 = vld [vmem:[#allocation16_spill] sm:$0xff] }
 0x1dc   : > { %v1773_v59 = vpop.f32.mrf.mxu3  ;;  %v9534_v40 = vpop.f32.mrf.mxu0  ;;  %2577 = vmatpush.msrb.mxu2 %v9529_v5 }
 0x1dd   : > { %v1774_v17 = vadd.f32 %v1773_v59, %v1689_v15  ;;  %13096 = vst [vmem:[#allocation26_spill] sm:$0xff] %v9534_v40  ;;  %v2766_v55 = vsub.f32 %v9527_v34, %v12812_v35  ;;  %v12813_v19 = vand.u32 4294901760, %v9541_v23  ;;  %v9556_v15 = vsub.f32 %v289_v50, %v9543_v41  ;;  %2878 = vmatpush.msrb.mxu0 %v9541_v23 }
 0x1de   : > { %v9536_v57 = vpop.f32.mrf.mxu1  ;;  %2579 = vmatpush.msrb.mxu2 %v9543_v41  ;;  %v1693_v59 = vadd.f32 %v1692_v9, %v9261_v38  ;;  %v13099_v50 = vand.u32 4294901760, %v9269_v10  ;;  %2979 = vmatpush.msrb.mxu1 %v9543_v41  ;;  %v13101_v10 = vand.u32 4294901760, %v9287_v22  ;;  %v13103_v22 = vand.u32 4294901760, %v9317_v43 }
 0x1df   : > { %13097 = vst [vmem:[#allocation6_spill] sm:$0xff] %v9536_v57  ;;  %v9545_v63 = vmul.f32 %v2526_v37, %v1774_v17  ;;  %2416 = vmatmul.f32.gmra.mxu0 %v13052_v8  ;;  %v2767_v17 = vand.u32 4294901760, %v2766_v55  ;;  %v2777_v37 = vand.u32 4294901760, %v9556_v15 }
 0x1e0   : > { %2189 = vmatmul.f32.gmra.mxu2 %v13007_v12  ;;  %v2772_v12 = vsub.f32 %v9541_v23, %v12813_v19  ;;  %2881 = vmatpush.msrb.mxu0 %v9556_v15  ;;  %v13100_v19 = vld [vmem:[#allocation31_spill] sm:$0xff] }
 0x1e1   : > { %2291 = vmatmul.f32.gmra.mxu3 %v13098_v46  ;;  %2497 = vmatmul.f32.gmra.mxu1 %v13050_v6  ;;  %v2778_v46 = vsub.f32 %v9556_v15, %v2777_v37  ;;  %v2527_v40 = vadd.f32 %v9402_v25, %v13100_v19 }
 0x1e2   : > { %3062 = vmatpush.msra.mxu2 %v13099_v50  ;;  %2768 = vmatpush.msrb.mxu3 %v2767_v17  ;;  %v2773_v55 = vand.u32 4294901760, %v2772_v12  ;;  %v13102_v50 = vand.u32 4294901760, %v9304_v11  ;;  %v13104_v11 = vand.u32 4294901760, %v9335_v51  ;;  %v13107_v51 = vand.u32 4294901760, %v9367_v4 }
 0x1e3   : > { %v1696_v35 = vpop.f32.mrf.mxu2  ;;  %v2779_v17 = vand.u32 4294901760, %v2778_v46  ;;  %v9632_v4 = vand.u32 4294901760, %v9458_v32 }
 0x1e4   : > { %v1777_v6 = vpop.f32.mrf.mxu3  ;;  %v9576_v38 = vpop.f32.mrf.mxu0  ;;  %3066 = vmatpush.msra.mxu2 %v13101_v10  ;;  %2774 = vmatpush.msrb.mxu3 %v2773_v55  ;;  %v1697_v19 = vadd.f32 %v1696_v35, %v9279_v33  ;;  %v13106_v33 = vand.u32 4294901760, %v9359_v2 }
 0x1e5   : > { %v1778_v57 = vadd.f32 %v1777_v6, %v1693_v59 }
 0x1e6   : > { %v9580_v9 = vpop.f32.mrf.mxu1  ;;  %3070 = vmatpush.msra.mxu2 %v13102_v50  ;;  %2780 = vmatpush.msrb.mxu3 %v2779_v17  ;;  %v13114_v50 = vld [vmem:[#allocation13_spill] sm:$0xff] }
 0x1e7   : > { %v9582_v12 = vmul.f32 %v2527_v40, %v1778_v57  ;;  %2420 = vmatmul.f32.gmra.mxu0 %v8308_v27 }
 0x1e8   : > { %2194 = vmatmul.f32.gmra.mxu2 %v8365_v30  ;;  %3177 = vmatpush.msra.mxu3 %v9265_v52  ;;  %v13105_v30 = vld [vmem:[#allocation18_spill] sm:$0xff] }
 0x1e9   : > { %2297 = vmatmul.f32.gmra.mxu3 %v8348_v13  ;;  %2501 = vmatmul.f32.gmra.mxu1 %v13052_v8  ;;  %v2528_v57 = vadd.f32 %v9402_v25, %v13105_v30  ;;  %v9602_v8 = vand.u32 4294901760, %v9429_v62  ;;  %v13118_v30 = vld [vmem:[#allocation14_spill] sm:$0xff] }
 0x1ea   : > { %3074 = vmatpush.msra.mxu2 %v13103_v22  ;;  %3179 = vmatpush.msra.mxu3 %v9283_v47 }
 0x1eb   : > { %v1700_v59 = vpop.f32.mrf.mxu2  ;;  %v9617_v47 = vsub.f32 %v9429_v62, %v9602_v8 }
 0x1ec   : > { %v1781_v40 = vpop.f32.mrf.mxu3  ;;  %3078 = vmatpush.msra.mxu2 %v13104_v11  ;;  %v9598_v13 = vpop.f32.mrf.mxu0  ;;  %3181 = vmatpush.msra.mxu3 %v9291_v20  ;;  %v1701_v2 = vadd.f32 %v1700_v59, %v9299_v53  ;;  %v13109_v53 = vand.u32 4294901760, %v9415_v49 }
 0x1ed   : > { %v1782_v6 = vadd.f32 %v1781_v40, %v1697_v19 }
 0x1ee   : > { %v9604_v43 = vpop.f32.mrf.mxu1  ;;  %3082 = vmatpush.msra.mxu2 %v13106_v33  ;;  %3183 = vmatpush.msra.mxu3 %v9307_v0  ;;  %v2582_v0 = vand.u32 4294901760, %v9617_v47 }
 0x1ef   : > { %v9608_v52 = vmul.f32 %v2528_v57, %v1782_v6  ;;  %2424 = vmatmul.f32.gmra.mxu0 %v8337_v21  ;;  %v9694_v57 = vand.u32 4294901760, %v13118_v30 }
 0x1f0   : > { %2199 = vmatmul.f32.gmra.mxu2 %v8401_v14  ;;  %3185 = vmatpush.msra.mxu3 %v9331_v39  ;;  %v13108_v14 = vand.u32 4294901760, %v9394_v48  ;;  %v13110_v48 = vand.u32 4294901760, %v9441_v16 }
 0x1f1   : > { %2303 = vmatmul.f32.gmra.mxu3 %v8390_v18  ;;  %2505 = vmatmul.f32.gmra.mxu1 %v8308_v27  ;;  %v2529_v27 = vadd.f32 %v9402_v25, %v9149_v31  ;;  %v2583_v31 = vsub.f32 %v9617_v47, %v2582_v0 }
 0x1f2   : > { %3086 = vmatpush.msra.mxu2 %v13107_v51  ;;  %3187 = vmatpush.msra.mxu3 %v9355_v24  ;;  %v9650_v24 = vsub.f32 %v9458_v32, %v9632_v4  ;;  %v13119_v51 = vld [vmem:[#allocation34_spill] sm:$0xff] }
 0x1f3   : > { %v1704_v20 = vpop.f32.mrf.mxu2  ;;  %v2584_v17 = vand.u32 4294901760, %v2583_v31  ;;  %v13124_v31 = vld [vmem:[#allocation40_spill] sm:$0xff] }
 0x1f4   : > { %v1785_v35 = vpop.f32.mrf.mxu3  ;;  %3090 = vmatpush.msra.mxu2 %v13108_v14  ;;  %v9628_v62 = vpop.f32.mrf.mxu0  ;;  %3189 = vmatpush.msra.mxu3 %v9361_v58  ;;  %v9664_v58 = vand.u32 4294901760, %v9485_v56  ;;  %v13121_v14 = vld [vmem:[#allocation5_spill] sm:$0xff] }
 0x1f5   : > { %v1786_v18 = vadd.f32 %v1785_v35, %v1701_v2  ;;  %v13120_v2 = vand.u32 4294901760, %v9541_v23  ;;  %v13122_v23 = vld [vmem:[#allocation20_spill] sm:$0xff] }
 0x1f6   : > { %v9634_v55 = vpop.f32.mrf.mxu1  ;;  %3094 = vmatpush.msra.mxu2 %v13109_v53  ;;  %3191 = vmatpush.msra.mxu3 %v9385_v29  ;;  %v13112_v29 = vand.u32 4294901760, %v9483_v28  ;;  %v13113_v28 = vand.u32 4294901760, %v9508_v44 }
 0x1f7   : > { %v9639_v39 = vmul.f32 %v2529_v27, %v1786_v18  ;;  %2428 = vmatmul.f32.gmra.mxu0 %v8377_v42 }
 0x1f8   : > { %2204 = vmatmul.f32.gmra.mxu2 %v8455_v54  ;;  %v1705_v54 = vadd.f32 %v1704_v20, %v9324_v36  ;;  %v2590_v36 = vand.u32 4294901760, %v9650_v24  ;;  %3193 = vmatpush.msra.mxu3 %v9396_v3  ;;  %v9711_v20 = vsub.f32 %v13118_v30, %v9694_v57 }
 0x1f9   : > { %2309 = vmatmul.f32.gmra.mxu3 %v8422_v26  ;;  %2509 = vmatmul.f32.gmra.mxu1 %v8337_v21  ;;  %v13111_v21 = vand.u32 4294901760, %v9455_v1  ;;  %v2530_v26 = vadd.f32 %v9402_v25, %v9165_v60  ;;  %v9679_v60 = vsub.f32 %v9485_v56, %v9664_v58  ;;  %v13117_v56 = vld [vmem:[#allocation35_spill] sm:$0xff] }
 0x1fa   : > { %3098 = vmatpush.msra.mxu2 %v13110_v48  ;;  %v2591_v3 = vsub.f32 %v9650_v24, %v2590_v36  ;;  %3195 = vmatpush.msra.mxu3 %v9418_v45  ;;  %v2531_v40 = vadd.f32 %v9402_v25, %v13117_v56  ;;  %v2532_v48 = vadd.f32 %v9402_v25, %v13124_v31  ;;  %v13131_v31 = vld [vmem:[#allocation19_spill] sm:$0xff] }
 0x1fb   : > { %v1708_v49 = vpop.f32.mrf.mxu2  ;;  %v2598_v33 = vand.u32 4294901760, %v9679_v60 }
 0x1fc   : > { %v1789_v46 = vpop.f32.mrf.mxu3  ;;  %3102 = vmatpush.msra.mxu2 %v13111_v21  ;;  %v9661_v32 = vpop.f32.mrf.mxu0  ;;  %v1709_v22 = vadd.f32 %v1708_v49, %v13114_v50  ;;  %v2592_v6 = vand.u32 4294901760, %v2591_v3  ;;  %v9724_v49 = vand.u32 4294901760, %v9545_v63  ;;  %v13126_v50 = vld [vmem:[#allocation47_spill] sm:$0xff] }
 0x1fd   : > { %v1790_v10 = vadd.f32 %v1789_v46, %v1705_v54  ;;  %v2599_v35 = vsub.f32 %v9679_v60, %v2598_v33 }
 0x1fe   : > { %v9666_v16 = vpop.f32.mrf.mxu1  ;;  %3106 = vmatpush.msra.mxu2 %v13112_v29 }
 0x1ff   : > { %v9672_v1 = vmul.f32 %v2530_v26, %v1790_v10  ;;  %2432 = vmatmul.f32.gmra.mxu0 %v8435_v61  ;;  %v2600_v21 = vand.u32 4294901760, %v2599_v35  ;;  %v2606_v26 = vand.u32 4294901760, %v9711_v20  ;;  %v9740_v10 = vsub.f32 %v9545_v63, %v9724_v49 }
 0x200   : > { %2585 = vmatmul.f32.vlgmr.msrb.gmra.mxu2 %v2584_v17 }
 0x201   : > { %2315 = vmatmul.f32.gmra.mxu3 %v8475_v7  ;;  %2513 = vmatmul.f32.gmra.mxu1 %v8377_v42  ;;  %v13115_v7 = vld [vmem:[#allocation24_spill] sm:$0xff]  ;;  %v13116_v42 = vand.u32 4294901760, %v9527_v34  ;;  %v2607_v17 = vsub.f32 %v9711_v20, %v2606_v26  ;;  %v2614_v63 = vand.u32 4294901760, %v9740_v10 }
 0x202   : > { %3110 = vmatpush.msra.mxu2 %v13113_v28  ;;  %3197 = vmatpush.msra.mxu3 %v13115_v7 }
 0x203   : > { %v1712_v19 = vpop.f32.mrf.mxu2  ;;  %v2615_v30 = vsub.f32 %v9740_v10, %v2614_v63 }
 0x204   : > { %v1793_v59 = vpop.f32.mrf.mxu3  ;;  %3114 = vmatpush.msra.mxu2 %v13116_v42  ;;  %v9696_v45 = vpop.f32.mrf.mxu0  ;;  %3199 = vmatpush.msra.mxu3 %v13119_v51  ;;  %v1713_v27 = vadd.f32 %v1712_v19, %v13122_v23  ;;  %v13127_v42 = vld [vmem:[#allocation43_spill] sm:$0xff]  ;;  %v13130_v23 = vld [vmem:[#allocation48_spill] sm:$0xff] }
 0x205   : > { %v1794_v11 = vadd.f32 %v1793_v59, %v1709_v22  ;;  %v2533_v22 = vadd.f32 %v9402_v25, %v13126_v50  ;;  %v9748_v59 = vand.u32 4294901760, %v9582_v12  ;;  %v9791_v50 = vand.u32 4294901760, %v9639_v39 }
 0x206   : > { %v9698_v44 = vpop.f32.mrf.mxu1  ;;  %3118 = vmatpush.msra.mxu2 %v13120_v2  ;;  %3201 = vmatpush.msra.mxu3 %v13121_v14 }
 0x207   : > { %v9704_v34 = vmul.f32 %v2531_v40, %v1794_v11  ;;  %2884 = vmatmul.f32.vlgmr.msrb.gmra.mxu0 %v9617_v47  ;;  %v9763_v40 = vsub.f32 %v9582_v12, %v9748_v59  ;;  %v2616_v12 = vand.u32 4294901760, %v2615_v30 }
 0x208   : > { %2593 = vmatmul.f32.gmra.mxu2 %v2592_v6  ;;  %v13129_v6 = vld [vmem:[#allocation51_spill] sm:$0xff] }
 0x209   : > { %2517 = vmatmul.f32.gmra.mxu1 %v8435_v61  ;;  %2782 = vmatmul.f32.vlgmr.msrb.gmra.mxu3 %v9602_v8  ;;  %v13123_v61 = vld [vmem:[#allocation21_spill] sm:$0xff] }
 0x20a   : > { %3122 = vmatpush.msra.mxu2 %v2777_v37  ;;  %3203 = vmatpush.msra.mxu3 %v13123_v61 }
 0x20b   : > { %v1716_v18 = vpop.f32.mrf.mxu2 }
 0x20c   : > { %v1797_v53 = vpop.f32.mrf.mxu3  ;;  %3205 = vmatpush.msra.mxu3 %v9529_v5  ;;  %v9732_v37 = vpop.f32.mrf.mxu0  ;;  %v13125_v5 = vld [vmem:[#allocation50_spill] sm:$0xff] }
 0x20d   : > { %v1798_v54 = vadd.f32 %v1797_v53, %v1713_v27  ;;  %v1717_v29 = vadd.f32 %v1716_v18, %v13125_v5  ;;  %v2534_v27 = vadd.f32 %v9402_v25, %v13130_v23  ;;  %v2622_v53 = vand.u32 4294901760, %v9763_v40 }
 0x20e   : > { %v9726_v46 = vpop.f32.mrf.mxu1  ;;  %3207 = vmatpush.msra.mxu3 %v9543_v41  ;;  %v13128_v41 = vld [vmem:[#allocation25_spill] sm:$0xff] }
 0x20f   : > { %v9730_v15 = vmul.f32 %v2532_v48, %v1798_v54  ;;  %2889 = vmatmul.f32.gmra.mxu0 %v9650_v24  ;;  %v2044_v56 = vadd.f32 %v13128_v41, %v13127_v42  ;;  %v9772_v24 = vand.u32 4294901760, %v9608_v52  ;;  %v13132_v48 = vld [vmem:[#allocation32_spill] sm:$0xff]  ;;  %v2637_v41 = vsub.f32 %v9639_v39, %v9791_v50 }
 0x210   : > { %2601 = vmatmul.f32.gmra.mxu2 %v2600_v21  ;;  %v2048_v54 = vadd.f32 %v13132_v48, %v13131_v31  ;;  %v2623_v21 = vsub.f32 %v9763_v40, %v2622_v53 }
 0x211   : > { %2786 = vmatmul.f32.gmra.mxu3 %v9632_v4  ;;  %2983 = vmatmul.f32.vlgmr.msrb.gmra.mxu1 %v2582_v0  ;;  %v2608_v0 = vand.u32 4294901760, %v2607_v17  ;;  %v9787_v25 = vsub.f32 %v9608_v52, %v9772_v24 }
 0x213   : > { %v1720_v3 = vpop.f32.mrf.mxu2 }
 0x214   : > { %v1801_v28 = vpop.f32.mrf.mxu3  ;;  %v9765_v11 = vpop.f32.mrf.mxu0  ;;  %v1721_v51 = vadd.f32 %v1720_v3, %v13129_v6 }
 0x215   : > { %v1802_v19 = vadd.f32 %v1801_v28, %v1717_v29 }
 0x216   : > { %v9750_v47 = vpop.f32.mrf.mxu1 }
 0x217   : > { %v9753_v7 = vmul.f32 %v2533_v22, %v1802_v19  ;;  %2894 = vmatmul.f32.gmra.mxu0 %v9679_v60  ;;  %v2624_v22 = vand.u32 4294901760, %v2623_v21  ;;  %v2630_v19 = vand.u32 4294901760, %v9787_v25 }
 0x218   : > { %2609 = vmatmul.f32.gmra.mxu2 %v2608_v0  ;;  %v13134_v0 = vld [vmem:[#allocation39_spill] sm:$0xff] }
 0x219   : > { %2790 = vmatmul.f32.gmra.mxu3 %v9664_v58  ;;  %2989 = vmatmul.f32.gmra.mxu1 %v2590_v36 }
 0x21b   : > { %v2145_v2 = vpop.f32.mrf.mxu2 }
 0x21c   : > { %v1805_v35 = vpop.f32.mrf.mxu3  ;;  %v2146_v14 = vadd.f32 %v2145_v2, %v2044_v56  ;;  %v2385_v5 = vpop.f32.mrf.mxu0  ;;  %v2631_v56 = vsub.f32 %v9787_v25, %v2630_v19 }
 0x21d   : > { %v1806_v18 = vadd.f32 %v1805_v35, %v1721_v51  ;;  %v9804_v35 = vand.u32 4294901760, %v9672_v1 }
 0x21e   : > { %v9774_v36 = vpop.f32.mrf.mxu1  ;;  %v2632_v23 = vand.u32 4294901760, %v2631_v56 }
 0x21f   : > { %v9777_v61 = vmul.f32 %v2534_v27, %v1806_v18  ;;  %2899 = vmatmul.f32.gmra.mxu0 %v9711_v20  ;;  %v13136_v18 = vld [vmem:[#allocation37_spill] sm:$0xff]  ;;  %v2645_v48 = vsub.f32 %v9672_v1, %v9804_v35 }
 0x220   : > { %2617 = vmatmul.f32.gmra.mxu2 %v2616_v12  ;;  %v13137_v12 = vld [vmem:[#allocation10_spill] sm:$0xff] }
 0x221   : > { %2794 = vmatmul.f32.gmra.mxu3 %v9694_v57  ;;  %2995 = vmatmul.f32.gmra.mxu1 %v2598_v33  ;;  %v13133_v33 = vld [vmem:[#allocation30_spill] sm:$0xff]  ;;  %v2056_v31 = vadd.f32 %v13137_v12, %v13136_v18  ;;  %v9838_v12 = vand.u32 4294901760, %v9753_v7 }
 0x222   : > { %v2052_v42 = vadd.f32 %v13134_v0, %v13133_v33 }
 0x223   : > { %v2150_v17 = vpop.f32.mrf.mxu2 }
 0x224   : > { %v2151_v29 = vadd.f32 %v2150_v17, %v2048_v54  ;;  %v2244_v3 = vpop.f32.mrf.mxu3 }
 0x225   : > { %v2245_v28 = vadd.f32 %v2244_v3, %v2146_v14  ;;  %v2389_v14 = vpop.f32.mrf.mxu0  ;;  %v9817_v3 = vand.u32 4294901760, %v9704_v34 }
 0x226   : > { %v2470_v20 = vpop.f32.mrf.mxu1 }
 0x227   : > { %v2386_v60 = vadd.f32 %v2385_v5, %v2245_v28  ;;  %2904 = vmatmul.f32.gmra.mxu0 %v9740_v10  ;;  %v2638_v10 = vand.u32 4294901760, %v2637_v41  ;;  %v2653_v1 = vsub.f32 %v9704_v34, %v9817_v3 }
 0x228   : > { %2625 = vmatmul.f32.gmra.mxu2 %v2624_v22  ;;  %v13141_v22 = vld [vmem:[#allocation6_spill] sm:$0xff] }
 0x229   : > { %v9797_v52 = vadd.f32 %v2470_v20, %v2386_v60  ;;  %2798 = vmatmul.f32.gmra.mxu3 %v9724_v49  ;;  %3001 = vmatmul.f32.gmra.mxu1 %v2606_v26  ;;  %v2639_v54 = vsub.f32 %v2637_v41, %v2638_v10  ;;  %v2646_v20 = vand.u32 4294901760, %v2645_v48 }
 0x22b   : > { %13135 = vst [vmem:[#allocation11_spill] sm:$0xff] %v9797_v52  ;;  %v2155_v30 = vpop.f32.mrf.mxu2  ;;  %v2640_v28 = vand.u32 4294901760, %v2639_v54 }
 0x22c   : > { %v2156_v6 = vadd.f32 %v2155_v30, %v2052_v42  ;;  %v2250_v51 = vpop.f32.mrf.mxu3  ;;  %v9828_v30 = vand.u32 4294901760, %v9730_v15 }
 0x22d   : > { %v2251_v2 = vadd.f32 %v2250_v51, %v2151_v29  ;;  %v2654_v51 = vand.u32 4294901760, %v2653_v1 }
 0x22e   : > { %v2474_v26 = vpop.f32.mrf.mxu1  ;;  %v2661_v34 = vsub.f32 %v9730_v15, %v9828_v30  ;;  %v2669_v15 = vsub.f32 %v9753_v7, %v9838_v12 }
 0x22f   : > { %v2390_v27 = vadd.f32 %v2389_v14, %v2251_v2  ;;  %2909 = vmatmul.f32.gmra.mxu0 %v9763_v40  ;;  %v13140_v40 = vld [vmem:[#allocation42_spill] sm:$0xff] }
 0x230   : > { %2633 = vmatmul.f32.gmra.mxu2 %v2632_v23  ;;  %v2060_v60 = vadd.f32 %v13141_v22, %v13140_v40  ;;  %v13143_v2 = vld [vmem:[#allocation26_spill] sm:$0xff]  ;;  %v2670_v40 = vand.u32 4294901760, %v2669_v15 }
 0x231   : > { %v9809_v39 = vadd.f32 %v2474_v26, %v2390_v27  ;;  %2802 = vmatmul.f32.gmra.mxu3 %v9748_v59  ;;  %3007 = vmatmul.f32.gmra.mxu1 %v2614_v63  ;;  %v2647_v63 = vsub.f32 %v2645_v48, %v2646_v20  ;;  %v2662_v26 = vand.u32 4294901760, %v2661_v34 }
 0x232   : > { %v2671_v7 = vsub.f32 %v2669_v15, %v2670_v40 }
 0x233   : > { %13138 = vst [vmem:[#allocation8_spill] sm:$0xff] %v9809_v39  ;;  %v2160_v21 = vpop.f32.mrf.mxu2 }
 0x234   : > { %v2161_v17 = vadd.f32 %v2160_v21, %v2056_v31  ;;  %v2256_v5 = vpop.f32.mrf.mxu3 }
 0x235   : > { %v9814_v29 = vadd.f32 %v2256_v5, %v2156_v6  ;;  %v2648_v6 = vand.u32 4294901760, %v2647_v63  ;;  %v9848_v5 = vand.u32 4294901760, %v9777_v61  ;;  %v2672_v63 = vand.u32 4294901760, %v2671_v7 }
 0x237   : > { %13139 = vst [vmem:[#allocation17_spill] sm:$0xff] %v9814_v29  ;;  %2914 = vmatmul.f32.gmra.mxu0 %v9787_v25  ;;  %v2064_v25 = vadd.f32 %v9580_v9, %v13143_v2  ;;  %v2068_v9 = vadd.f32 %v9604_v43, %v9576_v38  ;;  %v2072_v38 = vadd.f32 %v9634_v55, %v9598_v13 }
 0x238   : > { %2641 = vmatmul.f32.gmra.mxu2 %v2640_v28  ;;  %v2677_v43 = vsub.f32 %v9777_v61, %v9848_v5 }
 0x239   : > { %2806 = vmatmul.f32.gmra.mxu3 %v9772_v24  ;;  %3013 = vmatmul.f32.gmra.mxu1 %v2622_v53  ;;  %v2655_v53 = vsub.f32 %v2653_v1, %v2654_v51 }
 0x23b   : > { %v2165_v33 = vpop.f32.mrf.mxu2  ;;  %v2656_v31 = vand.u32 4294901760, %v2655_v53  ;;  %v9872_v53 = vpop.f32.mrf.mxu1 }
 0x23c   : > { %v2166_v0 = vadd.f32 %v2165_v33, %v2060_v60  ;;  %v2262_v42 = vpop.f32.mrf.mxu3  ;;  %v2678_v33 = vand.u32 4294901760, %v2677_v43  ;;  %13150 = vst [vmem:[#allocation29_spill] sm:$0xff] %v9872_v53 }
 0x23d   : > { %v9825_v56 = vadd.f32 %v2262_v42, %v2161_v17 }
 0x23e   : > { %v2679_v13 = vsub.f32 %v2677_v43, %v2678_v33 }
 0x23f   : > { %13142 = vst [vmem:[#allocation15_spill] sm:$0xff] %v9825_v56  ;;  %2919 = vmatmul.f32.gmra.mxu0 %v2637_v41 }
 0x240   : > { %2649 = vmatmul.f32.gmra.mxu2 %v2648_v6  ;;  %v2680_v42 = vand.u32 4294901760, %v2679_v13  ;;  %v2080_v6 = vadd.f32 %v9698_v44, %v9661_v32 }
 0x241   : > { %2810 = vmatmul.f32.gmra.mxu3 %v9791_v50  ;;  %3019 = vmatmul.f32.gmra.mxu1 %v2630_v19  ;;  %v2663_v19 = vsub.f32 %v2661_v34, %v2662_v26 }
 0x243   : > { %v2170_v14 = vpop.f32.mrf.mxu2  ;;  %v2664_v28 = vand.u32 4294901760, %v2663_v19  ;;  %v2092_v19 = vadd.f32 %v9774_v36, %v9765_v11 }
 0x244   : > { %v2171_v23 = vadd.f32 %v2170_v14, %v2064_v25  ;;  %v2268_v27 = vpop.f32.mrf.mxu3  ;;  %v9865_v25 = vpop.f32.mrf.mxu0 }
 0x245   : > { %v9835_v18 = vadd.f32 %v2268_v27, %v2166_v0  ;;  %v2076_v0 = vadd.f32 %v9666_v16, %v9628_v62  ;;  %13148 = vst [vmem:[#allocation44_spill] sm:$0xff] %v9865_v25 }
 0x247   : > { %13144 = vst [vmem:[#allocation23_spill] sm:$0xff] %v9835_v18  ;;  %2924 = vmatmul.f32.gmra.mxu0 %v2645_v48 }
 0x248   : > { %2657 = vmatmul.f32.gmra.mxu2 %v2656_v31  ;;  %v2088_v31 = vadd.f32 %v9750_v47, %v9732_v37 }
 0x249   : > { %2814 = vmatmul.f32.gmra.mxu3 %v9804_v35  ;;  %3025 = vmatmul.f32.gmra.mxu1 %v2638_v10 }
 0x24b   : > { %v2175_v41 = vpop.f32.mrf.mxu2 }
 0x24c   : > { %v2176_v54 = vadd.f32 %v2175_v41, %v2068_v9  ;;  %v2274_v21 = vpop.f32.mrf.mxu3  ;;  %v9877_v27 = vpop.f32.mrf.mxu0 }
 0x24d   : > { %v9845_v17 = vadd.f32 %v2274_v21, %v2171_v23  ;;  %13152 = vst [vmem:[#allocation38_spill] sm:$0xff] %v9877_v27 }
 0x24f   : > { %13145 = vst [vmem:[#allocation22_spill] sm:$0xff] %v9845_v17  ;;  %2929 = vmatmul.f32.gmra.mxu0 %v2653_v1 }
 0x250   : > { %2665 = vmatmul.f32.gmra.mxu2 %v2664_v28 }
 0x251   : > { %2818 = vmatmul.f32.gmra.mxu3 %v9817_v3  ;;  %3031 = vmatmul.f32.gmra.mxu1 %v2646_v20 }
 0x253   : > { %v2180_v10 = vpop.f32.mrf.mxu2 }
 0x254   : > { %v2181_v48 = vadd.f32 %v2180_v10, %v2072_v38  ;;  %v2280_v22 = vpop.f32.mrf.mxu3  ;;  %v9890_v41 = vpop.f32.mrf.mxu0 }
 0x255   : > { %v9855_v60 = vadd.f32 %v2280_v22, %v2176_v54  ;;  %13155 = vst [vmem:[#allocation7_spill] sm:$0xff] %v9890_v41 }
 0x257   : > { %13146 = vst [vmem:[#allocation28_spill] sm:$0xff] %v9855_v60  ;;  %2934 = vmatmul.f32.gmra.mxu0 %v2661_v34  ;;  %v2084_v34 = vadd.f32 %v9726_v46, %v9696_v45  ;;  %v9883_v45 = vpop.f32.mrf.mxu1 }
 0x258   : > { %2673 = vmatmul.f32.gmra.mxu2 %v2672_v63  ;;  %13153 = vst [vmem:[#allocation36_spill] sm:$0xff] %v9883_v45 }
 0x259   : > { %2822 = vmatmul.f32.gmra.mxu3 %v9828_v30  ;;  %3037 = vmatmul.f32.gmra.mxu1 %v2654_v51 }
 0x25b   : > { %v2185_v55 = vpop.f32.mrf.mxu2 }
 0x25c   : > { %v2186_v20 = vadd.f32 %v2185_v55, %v2076_v0  ;;  %v2286_v61 = vpop.f32.mrf.mxu3  ;;  %v9899_v28 = vpop.f32.mrf.mxu0 }
 0x25d   : > { %v9860_v1 = vadd.f32 %v2286_v61, %v2181_v48  ;;  %13158 = vst [vmem:[#allocation12_spill] sm:$0xff] %v9899_v28 }
 0x25f   : > { %13147 = vst [vmem:[#allocation27_spill] sm:$0xff] %v9860_v1  ;;  %2939 = vmatmul.f32.gmra.mxu0 %v2669_v15 }
 0x260   : > { %2681 = vmatmul.f32.gmra.mxu2 %v2680_v42 }
 0x261   : > { %2826 = vmatmul.f32.gmra.mxu3 %v9838_v12  ;;  %3043 = vmatmul.f32.gmra.mxu1 %v2662_v26 }
 0x263   : > { %v2190_v62 = vpop.f32.mrf.mxu2 }
 0x264   : > { %v2191_v16 = vadd.f32 %v2190_v62, %v2080_v6  ;;  %v2292_v2 = vpop.f32.mrf.mxu3  ;;  %v9907_v7 = vpop.f32.mrf.mxu0 }
 0x265   : > { %v9867_v51 = vadd.f32 %v2292_v2, %v2186_v20  ;;  %13161 = vst [vmem:[#allocation16_spill] sm:$0xff] %v9907_v7 }
 0x267   : > { %13149 = vst [vmem:[#allocation33_spill] sm:$0xff] %v9867_v51  ;;  %2944 = vmatmul.f32.gmra.mxu0 %v2677_v43 }
 0x268   : > { %3124 = vmatmul.f32.vlgmr.msra.gmra.mxu2 %v9602_v8 }
 0x269   : > { %2830 = vmatmul.f32.gmra.mxu3 %v9848_v5  ;;  %3049 = vmatmul.f32.gmra.mxu1 %v2670_v40 }
 0x26b   : > { %v2195_v32 = vpop.f32.mrf.mxu2 }
 0x26c   : > { %v2196_v44 = vadd.f32 %v2195_v32, %v2084_v34  ;;  %v2298_v14 = vpop.f32.mrf.mxu3 }
 0x26d   : > { %v9875_v23 = vadd.f32 %v2298_v14, %v2191_v16 }
 0x26f   : > { %13151 = vst [vmem:[#allocation45_spill] sm:$0xff] %v9875_v23 }
 0x270   : > { %3128 = vmatmul.f32.gmra.mxu2 %v9632_v4 }
 0x271   : > { %3055 = vmatmul.f32.gmra.mxu1 %v2678_v33  ;;  %3209 = vmatmul.f32.vlgmr.msra.gmra.mxu3 %v9602_v8  ;;  %v9893_v8 = vpop.f32.mrf.mxu1  ;;  %v9917_v33 = vpop.f32.mrf.mxu0 }
 0x272   : > { %13156 = vst [vmem:[#allocation41_spill] sm:$0xff] %v9893_v8 }
 0x273   : > { %v2200_v46 = vpop.f32.mrf.mxu2  ;;  %13163 = vst [vmem:[#allocation18_spill] sm:$0xff] %v9917_v33 }
 0x274   : > { %v2201_v26 = vadd.f32 %v2200_v46, %v2088_v31  ;;  %v2304_v9 = vpop.f32.mrf.mxu3 }
 0x275   : > { %v9885_v15 = vadd.f32 %v2304_v9, %v2196_v44 }
 0x277   : > { %13154 = vst [vmem:[#allocation46_spill] sm:$0xff] %v9885_v15  ;;  %v380_v15 = vld [vmem:[#allocation2 + $0x2f0] sm:$0xff] }
 0x278   : > { %3132 = vmatmul.f32.gmra.mxu2 %v9664_v58 }
 0x279   : > { %3213 = vmatmul.f32.gmra.mxu3 %v9632_v4  ;;  %v9903_v38 = vpop.f32.mrf.mxu1 }
 0x27a   : > { %13160 = vst [vmem:[#allocation52_spill] sm:$0xff] %v9903_v38 }
 0x27b   : > { %v2205_v37 = vpop.f32.mrf.mxu2 }
 0x27c   : > { %v2206_v47 = vadd.f32 %v2205_v37, %v2092_v19  ;;  %v2310_v54 = vpop.f32.mrf.mxu3 }
 0x27d   : > { %v9895_v21 = vadd.f32 %v2310_v54, %v2201_v26 }
 0x27f   : > { %13157 = vst [vmem:[#allocation49_spill] sm:$0xff] %v9895_v21 }
 0x280   : > { %3136 = vmatmul.f32.gmra.mxu2 %v9694_v57 }
 0x281   : > { %3217 = vmatmul.f32.gmra.mxu3 %v9664_v58  ;;  %v9910_v58 = vpop.f32.mrf.mxu1 }
 0x282   : > { %13162 = vst [vmem:[#allocation31_spill] sm:$0xff] %v9910_v58 }
 0x283   : > { %v2586_v11 = vpop.f32.mrf.mxu2 }
 0x284   : > { %v2316_v36 = vpop.f32.mrf.mxu3 }
 0x285   : > { %v9901_v40 = vadd.f32 %v2316_v36, %v2206_v47 }
 0x287   : > { %13159 = vst [vmem:[#allocation9_spill] sm:$0xff] %v9901_v40 }
 0x288   : > { %3140 = vmatmul.f32.gmra.mxu2 %v9724_v49 }
 0x289   : > { %3221 = vmatmul.f32.gmra.mxu3 %v9694_v57  ;;  %v9921_v57 = vpop.f32.mrf.mxu1 }
 0x28a   : > { %13164 = vst [vmem:[#allocation13_spill] sm:$0xff] %v9921_v57 }
 0x28b   : > { %v2594_v4 = vpop.f32.mrf.mxu2 }
 0x28c   : > { %v2783_v43 = vpop.f32.mrf.mxu3 }
 0x28d   : > { %v2784_v10 = vadd.f32 %v2783_v43, %v2586_v11 }
 0x290   : > { %3144 = vmatmul.f32.gmra.mxu2 %v9748_v59 }
 0x291   : > { %3225 = vmatmul.f32.gmra.mxu3 %v9724_v49  ;;  %v9928_v49 = vpop.f32.mrf.mxu0  ;;  %v9935_v61 = vpop.f32.mrf.mxu1 }
 0x292   : > { %13165 = vst [vmem:[#allocation24_spill] sm:$0xff] %v9928_v49 }
 0x293   : > { %v9913_v48 = vpop.f32.mrf.mxu2  ;;  %13166 = vst [vmem:[#allocation35_spill] sm:$0xff] %v9935_v61  ;;  %v10001_v61 = vand.u32 4294901760, %v380_v15 }
 0x294   : > { %v2787_v22 = vpop.f32.mrf.mxu3 }
 0x295   : > { %v9915_v63 = vadd.f32 %v2787_v22, %v2594_v4  ;;  %v10005_v49 = vsub.f32 %v380_v15, %v10001_v61  ;;  %3327 = vmatpush.msra.mxu0 %v10001_v61  ;;  %3727 = vmatpush.msrb.mxu3 %v10001_v61 }
 0x297   : > { %3614 = vmatpush.msrb.mxu2 %v10005_v49 }
 0x298   : > { %3148 = vmatmul.f32.gmra.mxu2 %v9772_v24 }
 0x299   : > { %3229 = vmatmul.f32.gmra.mxu3 %v9748_v59  ;;  %v9939_v59 = vpop.f32.mrf.mxu0  ;;  %v9945_v62 = vpop.f32.mrf.mxu1 }
 0x29a   : > { %13167 = vst [vmem:[#allocation14_spill] sm:$0xff] %v9939_v59 }
 0x29b   : > { %v9923_v0 = vpop.f32.mrf.mxu2  ;;  %13168 = vst [vmem:[#allocation34_spill] sm:$0xff] %v9945_v62 }
 0x29c   : > { %v9925_v13 = vpop.f32.mrf.mxu3 }
 0x2a0   : > { %3152 = vmatmul.f32.gmra.mxu2 %v9791_v50 }
 0x2a1   : > { %3233 = vmatmul.f32.gmra.mxu3 %v9772_v24  ;;  %v9953_v2 = vpop.f32.mrf.mxu0 }
 0x2a2   : > { %13169 = vst [vmem:[#allocation5_spill] sm:$0xff] %v9953_v2 }
 0x2a3   : > { %v9931_v55 = vpop.f32.mrf.mxu2 }
 0x2a4   : > { %v9933_v20 = vpop.f32.mrf.mxu3 }
 0x2a8   : > { %3156 = vmatmul.f32.gmra.mxu2 %v9804_v35 }
 0x2a9   : > { %3237 = vmatmul.f32.gmra.mxu3 %v9791_v50  ;;  %v9956_v50 = vpop.f32.mrf.mxu1  ;;  %v9963_v44 = vpop.f32.mrf.mxu0 }
 0x2aa   : > { %13170 = vst [vmem:[#allocation20_spill] sm:$0xff] %v9956_v50 }
 0x2ab   : > { %v9941_v42 = vpop.f32.mrf.mxu2  ;;  %13171 = vst [vmem:[#allocation21_spill] sm:$0xff] %v9963_v44 }
 0x2ac   : > { %v9943_v6 = vpop.f32.mrf.mxu3 }
 0x2ad   : > { %v2800_v33 = vadd.f32 %v9943_v6, %v9931_v55 }
 0x2b0   : > { %3160 = vmatmul.f32.gmra.mxu2 %v9817_v3 }
 0x2b1   : > { %3241 = vmatmul.f32.gmra.mxu3 %v9804_v35  ;;  %v9967_v35 = vpop.f32.mrf.mxu1  ;;  %v9974_v46 = vpop.f32.mrf.mxu0 }
 0x2b2   : > { %13172 = vst [vmem:[#allocation40_spill] sm:$0xff] %v9967_v35 }
 0x2b3   : > { %v9949_v24 = vpop.f32.mrf.mxu2  ;;  %13173 = vst [vmem:[#allocation50_spill] sm:$0xff] %v9974_v46 }
 0x2b4   : > { %v9951_v16 = vpop.f32.mrf.mxu3 }
 0x2b8   : > { %3164 = vmatmul.f32.gmra.mxu2 %v9828_v30 }
 0x2b9   : > { %3245 = vmatmul.f32.gmra.mxu3 %v9817_v3  ;;  %v9981_v9 = vpop.f32.mrf.mxu1 }
 0x2ba   : > { %13174 = vst [vmem:[#allocation47_spill] sm:$0xff] %v9981_v9 }
 0x2bb   : > { %v9959_v34 = vpop.f32.mrf.mxu2 }
 0x2bc   : > { %v9961_v32 = vpop.f32.mrf.mxu3 }
 0x2c0   : > { %3168 = vmatmul.f32.gmra.mxu2 %v9838_v12 }
 0x2c1   : > { %3249 = vmatmul.f32.gmra.mxu3 %v9828_v30  ;;  %v2885_v30 = vpop.f32.mrf.mxu0  ;;  %v2984_v47 = vpop.f32.mrf.mxu1 }
 0x2c2   : > { %v2886_v40 = vadd.f32 %v2885_v30, %v2784_v10  ;;  %v2792_v10 = vadd.f32 %v9925_v13, %v9913_v48  ;;  %v374_v30 = vld [vmem:[#allocation2 + $0x2c0] sm:$0xff] }
 0x2c3   : > { %v9969_v14 = vpop.f32.mrf.mxu2 }
 0x2c4   : > { %v9971_v31 = vpop.f32.mrf.mxu3  ;;  %v2985_v35 = vadd.f32 %v2984_v47, %v2886_v40 }
 0x2c8   : > { %3172 = vmatmul.f32.gmra.mxu2 %v9848_v5 }
 0x2c9   : > { %3253 = vmatmul.f32.gmra.mxu3 %v9838_v12  ;;  %v2890_v36 = vpop.f32.mrf.mxu0  ;;  %v2990_v12 = vpop.f32.mrf.mxu1 }
 0x2ca   : > { %v2891_v62 = vadd.f32 %v2890_v36, %v9915_v63 }
 0x2cb   : > { %v9977_v3 = vpop.f32.mrf.mxu2 }
 0x2cc   : > { %v9979_v26 = vpop.f32.mrf.mxu3  ;;  %v2991_v40 = vadd.f32 %v2990_v12, %v2891_v62  ;;  %v10018_v12 = vand.u32 4294901760, %v374_v30 }
 0x2ce   : > { %v10022_v13 = vsub.f32 %v374_v30, %v10018_v12  ;;  %3329 = vmatpush.msra.mxu0 %v10018_v12  ;;  %3729 = vmatpush.msrb.mxu3 %v10018_v12 }
 0x2d0   : > { %3617 = vmatpush.msrb.mxu2 %v10022_v13 }
 0x2d1   : > { %3257 = vmatmul.f32.gmra.mxu3 %v9848_v5  ;;  %v2895_v22 = vpop.f32.mrf.mxu0  ;;  %v2996_v9 = vpop.f32.mrf.mxu1 }
 0x2d2   : > { %v2896_v47 = vadd.f32 %v2895_v22, %v2792_v10  ;;  %v2796_v10 = vadd.f32 %v9933_v20, %v9923_v0 }
 0x2d3   : > { %v9984_v19 = vpop.f32.mrf.mxu2 }
 0x2d4   : > { %v9986_v37 = vpop.f32.mrf.mxu3  ;;  %v2997_v22 = vadd.f32 %v2996_v9, %v2896_v47 }
 0x2d5   : > { %v2820_v38 = vadd.f32 %v9986_v37, %v9977_v3 }
 0x2d9   : > { %v2900_v44 = vpop.f32.mrf.mxu0  ;;  %v3002_v59 = vpop.f32.mrf.mxu1 }
 0x2da   : > { %v2901_v20 = vadd.f32 %v2900_v44, %v2796_v10 }
 0x2db   : > { %v9988_v54 = vpop.f32.mrf.mxu2 }
 0x2dc   : > { %v9990_v11 = vpop.f32.mrf.mxu3  ;;  %v3003_v57 = vadd.f32 %v3002_v59, %v2901_v20 }
 0x2e1   : > { %v2905_v63 = vpop.f32.mrf.mxu0  ;;  %v3008_v48 = vpop.f32.mrf.mxu1 }
 0x2e2   : > { %v2906_v59 = vadd.f32 %v2905_v63, %v2800_v33 }
 0x2e3   : > { %v9992_v4 = vpop.f32.mrf.mxu2 }
 0x2e4   : > { %v9994_v43 = vpop.f32.mrf.mxu3 }
 0x2e9   : > { %v3014_v44 = vpop.f32.mrf.mxu1 }
 0x2eb   : > { %v3125_v46 = vpop.f32.mrf.mxu2 }
 0x2ec   : > { %v9996_v5 = vpop.f32.mrf.mxu3  ;;  %v3126_v21 = vadd.f32 %v3125_v46, %v2985_v35 }
 0x2f1   : > { %v3020_v63 = vpop.f32.mrf.mxu1 }
 0x2f3   : > { %v3129_v50 = vpop.f32.mrf.mxu2 }
 0x2f4   : > { %v3210_v2 = vpop.f32.mrf.mxu3 }
 0x2f5   : > { %v9999_v23 = vadd.f32 %v3210_v2, %v3126_v21  ;;  %v12814_v21 = vand.u32 4294901760, %v10005_v49  ;;  %v3130_v2 = vadd.f32 %v3129_v50, %v2991_v40  ;;  %v368_v50 = vld [vmem:[#allocation2 + $0x290] sm:$0xff] }
 0x2f6   : > { %v10026_v40 = vand.u32 4294901760, %v368_v50 }
 0x2f7   : > { %3261 = vmax.xlane.f32.xlu0 %v9999_v23  ;;  %v3466_v15 = vsub.f32 %v10005_v49, %v12814_v21 }
 0x2f8   : > { %3331 = vmatpush.msra.mxu0 %v10026_v40  ;;  %3731 = vmatpush.msrb.mxu3 %v10026_v40 }
 0x2f9   : > { %v3467_v62 = vand.u32 4294901760, %v3466_v15  ;;  %v10033_v15 = vsub.f32 %v368_v50, %v10026_v40  ;;  %v3026_v58 = vpop.f32.mrf.mxu1 }
 0x2fb   : > { %v3133_v35 = vpop.f32.mrf.mxu2  ;;  %3468 = vmatpush.msra.mxu1 %v3467_v62  ;;  %3620 = vmatpush.msrb.mxu2 %v10033_v15  ;;  %v12817_v0 = vand.u32 4294901760, %v10033_v15  ;;  %v2910_v62 = vpop.f32.mrf.mxu0 }
 0x2fc   : > { %v3214_v46 = vpop.f32.mrf.mxu3 }
 0x2fd   : > { %v10016_v36 = vadd.f32 %v3214_v46, %v3130_v2  ;;  %v12815_v2 = vand.u32 4294901760, %v10022_v13  ;;  %v3134_v46 = vadd.f32 %v3133_v35, %v2997_v22  ;;  %v3478_v51 = vsub.f32 %v10033_v15, %v12817_v0  ;;  %v362_v35 = vld [vmem:[#allocation2 + $0x260] sm:$0xff] }
 0x2ff   : > { %3263 = vmax.xlane.f32.xlu0 %v10016_v36  ;;  %v3472_v9 = vsub.f32 %v10022_v13, %v12815_v2  ;;  %v3479_v22 = vand.u32 4294901760, %v3478_v51  ;;  %v10048_v2 = vand.u32 4294901760, %v362_v35 }
 0x301   : > { %v3473_v50 = vand.u32 4294901760, %v3472_v9  ;;  %v10053_v10 = vsub.f32 %v362_v35, %v10048_v2  ;;  %3333 = vmatpush.msra.mxu0 %v10048_v2  ;;  %3733 = vmatpush.msrb.mxu3 %v10048_v2  ;;  %v3009_v35 = vadd.f32 %v3008_v48, %v2906_v59  ;;  %v350_v48 = vld [vmem:[#allocation2 + $0x200] sm:$0xff] }
 0x303   : > { %v3137_v30 = vpop.f32.mrf.mxu2  ;;  %3474 = vmatpush.msra.mxu1 %v3473_v50  ;;  %3623 = vmatpush.msrb.mxu2 %v10053_v10  ;;  %v12816_v51 = vand.u32 4294901760, %v10053_v10  ;;  %v2915_v6 = vpop.f32.mrf.mxu0  ;;  %v356_v50 = vld [vmem:[#allocation2 + $0x230] sm:$0xff] }
 0x304   : > { %v3218_v47 = vpop.f32.mrf.mxu3 }
 0x305   : > { %v10042_v21 = vadd.f32 %v3218_v47, %v3134_v46  ;;  %3480 = vmatpush.msra.mxu1 %v3479_v22  ;;  %v3138_v46 = vadd.f32 %v3137_v30, %v3003_v57  ;;  %v3484_v55 = vsub.f32 %v10053_v10, %v12816_v51  ;;  %v10065_v30 = vand.u32 4294901760, %v356_v50 }
 0x306   : > { %v2804_v22 = vadd.f32 %v9951_v16, %v9941_v42  ;;  %v10078_v42 = vand.u32 4294901760, %v350_v48 }
 0x307   : > { %3265 = vmax.xlane.f32.xlu1 %v10042_v21  ;;  %v3485_v57 = vand.u32 4294901760, %v3484_v55  ;;  %v10070_v33 = vsub.f32 %v356_v50, %v10065_v30  ;;  %3335 = vmatpush.msra.mxu0 %v10065_v30 }
 0x308   : > { %3735 = vmatpush.msrb.mxu3 %v10065_v30  ;;  %v2911_v59 = vadd.f32 %v2910_v62, %v2804_v22  ;;  %v2808_v62 = vadd.f32 %v9961_v32, %v9949_v24 }
 0x309   : > { %3486 = vmatpush.msra.mxu1 %v3485_v57  ;;  %3626 = vmatpush.msrb.mxu2 %v10070_v33  ;;  %v12818_v55 = vand.u32 4294901760, %v10070_v33 }
 0x30a   : > { %3337 = vmatpush.msra.mxu0 %v10078_v42  ;;  %3737 = vmatpush.msrb.mxu3 %v10078_v42  ;;  %v3015_v57 = vadd.f32 %v3014_v44, %v2911_v59  ;;  %v2916_v1 = vadd.f32 %v2915_v6, %v2808_v62  ;;  %v2812_v6 = vadd.f32 %v9971_v31, %v9959_v34  ;;  %v3032_v34 = vpop.f32.mrf.mxu1 }
 0x30b   : > { %v3141_v9 = vpop.f32.mrf.mxu2  ;;  %v3490_v16 = vsub.f32 %v10070_v33, %v12818_v55 }
 0x30c   : > { %v3222_v47 = vpop.f32.mrf.mxu3 }
 0x30d   : > { %v10059_v20 = vadd.f32 %v3222_v47, %v3138_v46  ;;  %v3142_v46 = vadd.f32 %v3141_v9, %v3009_v35  ;;  %v10085_v9 = vsub.f32 %v350_v48, %v10078_v42  ;;  %v3491_v50 = vand.u32 4294901760, %v3490_v16  ;;  %v344_v16 = vld [vmem:[#allocation2 + $0x1d0] sm:$0xff] }
 0x30e   : > { %v10098_v24 = vand.u32 4294901760, %v344_v16 }
 0x30f   : > { %3267 = vmax.xlane.f32.xlu1 %v10059_v20  ;;  %3629 = vmatpush.msrb.mxu2 %v10085_v9  ;;  %v12819_v35 = vand.u32 4294901760, %v10085_v9 }
 0x310   : > { %3492 = vmatpush.msra.mxu1 %v3491_v50  ;;  %v10102_v32 = vsub.f32 %v344_v16, %v10098_v24  ;;  %3339 = vmatpush.msra.mxu0 %v10098_v24  ;;  %v338_v16 = vld [vmem:[#allocation2 + $0x1a0] sm:$0xff] }
 0x311   : > { %v3496_v48 = vsub.f32 %v10085_v9, %v12819_v35  ;;  %3739 = vmatpush.msrb.mxu3 %v10098_v24 }
 0x312   : > { %3632 = vmatpush.msrb.mxu2 %v10102_v32  ;;  %v3038_v28 = vpop.f32.mrf.mxu1 }
 0x313   : > { %v3145_v47 = vpop.f32.mrf.mxu2  ;;  %v3497_v59 = vand.u32 4294901760, %v3496_v48 }
 0x314   : > { %v3226_v51 = vpop.f32.mrf.mxu3  ;;  %v3146_v22 = vadd.f32 %v3145_v47, %v3015_v57  ;;  %v3021_v47 = vadd.f32 %v3020_v63, %v2916_v1  ;;  %v10115_v63 = vand.u32 4294901760, %v338_v16 }
 0x315   : > { %v10076_v0 = vadd.f32 %v3226_v51, %v3142_v46  ;;  %v2920_v51 = vpop.f32.mrf.mxu0  ;;  %3498 = vmatpush.msra.mxu1 %v3497_v59 }
 0x316   : > { %v2921_v59 = vadd.f32 %v2920_v51, %v2812_v6  ;;  %v10119_v31 = vsub.f32 %v338_v16, %v10115_v63  ;;  %3341 = vmatpush.msra.mxu0 %v10115_v63  ;;  %3741 = vmatpush.msrb.mxu3 %v10115_v63  ;;  %v2816_v6 = vadd.f32 %v9979_v26, %v9969_v14 }
 0x317   : > { %3269 = vmax.xlane.f32.xlu2 %v10076_v0 }
 0x318   : > { %v3027_v51 = vadd.f32 %v3026_v58, %v2921_v59  ;;  %3635 = vmatpush.msrb.mxu2 %v10119_v31 }
 0x31b   : > { %v3149_v46 = vpop.f32.mrf.mxu2 }
 0x31c   : > { %v3230_v55 = vpop.f32.mrf.mxu3  ;;  %v3150_v57 = vadd.f32 %v3149_v46, %v3021_v47  ;;  %v332_v46 = vld [vmem:[#allocation2 + $0x170] sm:$0xff] }
 0x31d   : > { %v10096_v44 = vadd.f32 %v3230_v55, %v3146_v22  ;;  %v12820_v55 = vand.u32 4294901760, %v10102_v32  ;;  %v2925_v50 = vpop.f32.mrf.mxu0  ;;  %v10123_v47 = vand.u32 4294901760, %v332_v46 }
 0x31f   : > { %3271 = vmax.xlane.f32.xlu2 %v10096_v44  ;;  %v3502_v22 = vsub.f32 %v10102_v32, %v12820_v55  ;;  %3343 = vmatpush.msra.mxu0 %v10123_v47 }
 0x320   : > { %3743 = vmatpush.msrb.mxu3 %v10123_v47 }
 0x321   : > { %v3503_v1 = vand.u32 4294901760, %v3502_v22  ;;  %v10130_v22 = vsub.f32 %v332_v46, %v10123_v47 }
 0x323   : > { %v3153_v62 = vpop.f32.mrf.mxu2  ;;  %3504 = vmatpush.msra.mxu1 %v3503_v1  ;;  %3638 = vmatpush.msrb.mxu2 %v10130_v22  ;;  %v12823_v14 = vand.u32 4294901760, %v10130_v22  ;;  %v2926_v1 = vadd.f32 %v2925_v50, %v2816_v6 }
 0x324   : > { %v3234_v48 = vpop.f32.mrf.mxu3 }
 0x325   : > { %v10113_v35 = vadd.f32 %v3234_v48, %v3150_v57  ;;  %v12821_v57 = vand.u32 4294901760, %v10119_v31  ;;  %v3154_v48 = vadd.f32 %v3153_v62, %v3027_v51  ;;  %v2930_v26 = vpop.f32.mrf.mxu0  ;;  %v3514_v7 = vsub.f32 %v10130_v22, %v12823_v14  ;;  %v326_v62 = vld [vmem:[#allocation2 + $0x140] sm:$0xff]  ;;  %v3044_v14 = vpop.f32.mrf.mxu1 }
 0x326   : > { %v3033_v60 = vadd.f32 %v3032_v34, %v2926_v1  ;;  %v320_v34 = vld [vmem:[#allocation2 + $0x110] sm:$0xff] }
 0x327   : > { %3273 = vmax.xlane.f32.xlu0 %v10113_v35  ;;  %v3508_v58 = vsub.f32 %v10119_v31, %v12821_v57  ;;  %v3515_v51 = vand.u32 4294901760, %v3514_v7  ;;  %v10145_v57 = vand.u32 4294901760, %v326_v62  ;;  %v10158_v3 = vand.u32 4294901760, %v320_v34 }
 0x329   : > { %v3509_v46 = vand.u32 4294901760, %v3508_v58  ;;  %v10150_v50 = vsub.f32 %v326_v62, %v10145_v57  ;;  %3345 = vmatpush.msra.mxu0 %v10145_v57  ;;  %3745 = vmatpush.msrb.mxu3 %v10145_v57  ;;  %v308_v62 = vld [vmem:[#allocation2 + $0xb0] sm:$0xff] }
 0x32b   : > { %v3157_v16 = vpop.f32.mrf.mxu2  ;;  %3510 = vmatpush.msra.mxu1 %v3509_v46  ;;  %3641 = vmatpush.msrb.mxu2 %v10150_v50  ;;  %v12822_v7 = vand.u32 4294901760, %v10150_v50 }
 0x32c   : > { %v3238_v59 = vpop.f32.mrf.mxu3  ;;  %v3158_v6 = vadd.f32 %v3157_v16, %v3033_v60  ;;  %v10165_v60 = vsub.f32 %v320_v34, %v10158_v3  ;;  %3347 = vmatpush.msra.mxu0 %v10158_v3  ;;  %v314_v16 = vld [vmem:[#allocation2 + $0xe0] sm:$0xff]  ;;  %3747 = vmatpush.msrb.mxu3 %v10158_v3 }
 0x32d   : > { %v10139_v55 = vadd.f32 %v3238_v59, %v3154_v48  ;;  %3516 = vmatpush.msra.mxu1 %v3515_v51  ;;  %v2931_v59 = vadd.f32 %v2930_v26, %v2820_v38  ;;  %v3520_v37 = vsub.f32 %v10150_v50, %v12822_v7  ;;  %v2935_v46 = vpop.f32.mrf.mxu0  ;;  %v10169_v38 = vand.u32 4294901760, %v314_v16  ;;  %v3050_v45 = vpop.f32.mrf.mxu1 }
 0x32e   : > { %v10171_v26 = vand.u32 4294901760, %v308_v62  ;;  %3644 = vmatpush.msrb.mxu2 %v10165_v60  ;;  %v12824_v34 = vand.u32 4294901760, %v10165_v60 }
 0x32f   : > { %3275 = vmax.xlane.f32.xlu1 %v10139_v55  ;;  %v3521_v51 = vand.u32 4294901760, %v3520_v37  ;;  %v10178_v7 = vsub.f32 %v314_v16, %v10169_v38  ;;  %3349 = vmatpush.msra.mxu0 %v10169_v38 }
 0x330   : > { %v10182_v37 = vsub.f32 %v308_v62, %v10171_v26  ;;  %3749 = vmatpush.msrb.mxu3 %v10169_v38 }
 0x331   : > { %3522 = vmatpush.msra.mxu1 %v3521_v51  ;;  %3647 = vmatpush.msrb.mxu2 %v10178_v7 }
 0x332   : > { %3351 = vmatpush.msra.mxu0 %v10171_v26  ;;  %v12826_v16 = vand.u32 4294901760, %v10182_v37  ;;  %3751 = vmatpush.msrb.mxu3 %v10171_v26 }
 0x333   : > { %v3161_v48 = vpop.f32.mrf.mxu2  ;;  %3650 = vmatpush.msrb.mxu2 %v10182_v37 }
 0x334   : > { %v3242_v58 = vpop.f32.mrf.mxu3 }
 0x335   : > { %v10156_v1 = vadd.f32 %v3242_v58, %v3158_v6  ;;  %v3039_v6 = vadd.f32 %v3038_v28, %v2931_v59  ;;  %v2824_v58 = vadd.f32 %v9990_v11, %v9984_v19  ;;  %v3526_v28 = vsub.f32 %v10165_v60, %v12824_v34 }
 0x336   : > { %v12825_v59 = vand.u32 4294901760, %v10178_v7  ;;  %v3538_v34 = vsub.f32 %v10182_v37, %v12826_v16 }
 0x337   : > { %3277 = vmax.xlane.f32.xlu2 %v10156_v1  ;;  %v3162_v17 = vadd.f32 %v3161_v48, %v3039_v6  ;;  %v2936_v62 = vadd.f32 %v2935_v46, %v2824_v58  ;;  %v3527_v48 = vand.u32 4294901760, %v3526_v28  ;;  %v2828_v28 = vadd.f32 %v9994_v43, %v9988_v54 }
 0x338   : > { %v3532_v6 = vsub.f32 %v10178_v7, %v12825_v59  ;;  %v3539_v46 = vand.u32 4294901760, %v3538_v34  ;;  %v302_v34 = vld [vmem:[#allocation2 + $0x80] sm:$0xff] }
 0x339   : > { %3528 = vmatpush.msra.mxu1 %v3527_v48  ;;  %v3045_v58 = vadd.f32 %v3044_v14, %v2936_v62  ;;  %v2832_v48 = vadd.f32 %v9996_v5, %v9992_v4  ;;  %v10210_v14 = vand.u32 4294901760, %v302_v34  ;;  %v296_v62 = vld [vmem:[#allocation2 + $0x50] sm:$0xff] }
 0x33a   : > { %v3533_v8 = vand.u32 4294901760, %v3532_v6 }
 0x33b   : > { %v3165_v19 = vpop.f32.mrf.mxu2  ;;  %v10213_v43 = vsub.f32 %v302_v34, %v10210_v14  ;;  %3353 = vmatpush.msra.mxu0 %v10210_v14  ;;  %3753 = vmatpush.msrb.mxu3 %v10210_v14 }
 0x33c   : > { %v3246_v11 = vpop.f32.mrf.mxu3  ;;  %3534 = vmatpush.msra.mxu1 %v3533_v8 }
 0x33d   : > { %v10192_v51 = vadd.f32 %v3246_v11, %v3162_v17  ;;  %v2940_v17 = vpop.f32.mrf.mxu0  ;;  %v3166_v11 = vadd.f32 %v3165_v19, %v3045_v58  ;;  %3653 = vmatpush.msrb.mxu2 %v10213_v43 }
 0x33e   : > { %3540 = vmatpush.msra.mxu1 %v3539_v46  ;;  %v2941_v59 = vadd.f32 %v2940_v17, %v2828_v28  ;;  %v290_v17 = vld [vmem:[#allocation2 + $0x20] sm:$0xff] }
 0x33f   : > { %3279 = vmax.xlane.f32.xlu0 %v10192_v51  ;;  %v10227_v5 = vand.u32 4294901760, %v290_v17 }
 0x340   : > { %v3051_v6 = vadd.f32 %v3050_v45, %v2941_v59  ;;  %v3543_v45 = vand.u32 4294901760, %v10213_v43 }
 0x341   : > { %v3554_v28 = vsub.f32 %v290_v17, %v10227_v5  ;;  %v13176_v17 = vand.u32 4294901760, %v10022_v13  ;;  %v13179_v13 = vand.u32 4294901760, %v10070_v33  ;;  %v13186_v33 = vand.u32 4294901760, %v10178_v7 }
 0x342   : > { %v3544_v59 = vsub.f32 %v10213_v43, %v3543_v45 }
 0x343   : > { %v3169_v27 = vpop.f32.mrf.mxu2 }
 0x344   : > { %v3250_v41 = vpop.f32.mrf.mxu3  ;;  %v3170_v8 = vadd.f32 %v3169_v27, %v3051_v6  ;;  %v3545_v6 = vand.u32 4294901760, %v3544_v59  ;;  %v13177_v59 = vand.u32 4294901760, %v10033_v15  ;;  %v13181_v15 = vand.u32 4294901760, %v10102_v32 }
 0x345   : > { %v10205_v18 = vadd.f32 %v3250_v41, %v3166_v11  ;;  %v2945_v54 = vpop.f32.mrf.mxu0  ;;  %v10217_v41 = vand.u32 4294901760, %v296_v62  ;;  %v3056_v11 = vpop.f32.mrf.mxu1 }
 0x346   : > { %v2946_v19 = vadd.f32 %v2945_v54, %v2832_v48  ;;  %v3555_v54 = vand.u32 4294901760, %v3554_v28  ;;  %3546 = vmatpush.msra.mxu1 %v3545_v6 }
 0x347   : > { %3281 = vmax.xlane.f32.xlu1 %v10205_v18  ;;  %v10224_v27 = vsub.f32 %v296_v62, %v10217_v41  ;;  %3355 = vmatpush.msra.mxu0 %v10217_v41 }
 0x348   : > { %3755 = vmatpush.msrb.mxu3 %v10217_v41  ;;  %v3057_v34 = vadd.f32 %v3056_v11, %v2946_v19  ;;  %v3556_v16 = vsub.f32 %v3554_v28, %v3555_v54 }
 0x349   : > { %3656 = vmatpush.msrb.mxu2 %v10224_v27  ;;  %v3549_v58 = vand.u32 4294901760, %v10224_v27  ;;  %3357 = vmatpush.msra.mxu0 %v10227_v5 }
 0x34a   : > { %3757 = vmatpush.msrb.mxu3 %v10227_v5  ;;  %v3557_v19 = vand.u32 4294901760, %v3556_v16 }
 0x34b   : > { %v3173_v48 = vpop.f32.mrf.mxu2  ;;  %v3550_v62 = vsub.f32 %v10224_v27, %v3549_v58  ;;  %3659 = vmatpush.msrb.mxu2 %v3554_v28  ;;  %v363_v27 = vld [vmem:[#allocation2 + $0x268] sm:$0xff] }
 0x34c   : > { %v3254_v46 = vpop.f32.mrf.mxu3  ;;  %v3174_v43 = vadd.f32 %v3173_v48, %v3057_v34  ;;  %v10317_v28 = vand.u32 4294901760, %v363_v27 }
 0x34d   : > { %v10219_v4 = vadd.f32 %v3254_v46, %v3170_v8  ;;  %v13175_v8 = vand.u32 4294901760, %v10005_v49  ;;  %v3551_v46 = vand.u32 4294901760, %v3550_v62  ;;  %v13178_v49 = vand.u32 4294901760, %v10053_v10  ;;  %v381_v10 = vld [vmem:[#allocation2 + $0x2f8] sm:$0xff] }
 0x34f   : > { %3283 = vmax.xlane.f32.xlu2 %v10219_v4  ;;  %3840 = vmatpush.msrb.mxu0 %v13175_v8 }
 0x350   : > { %3552 = vmatpush.msra.mxu1 %v3551_v46  ;;  %v10339_v46 = vsub.f32 %v363_v27, %v10317_v28 }
 0x351   : > { %3844 = vmatpush.msrb.mxu0 %v13176_v17  ;;  %v357_v17 = vld [vmem:[#allocation2 + $0x238] sm:$0xff] }
 0x352   : > { %3558 = vmatpush.msra.mxu1 %v3557_v19 }
 0x353   : > { %3848 = vmatpush.msrb.mxu0 %v13177_v59  ;;  %v10342_v59 = vand.u32 4294901760, %v357_v17 }
 0x354   : > { %v3258_v56 = vpop.f32.mrf.mxu3  ;;  %3955 = vmatpush.msrb.mxu1 %v10001_v61  ;;  %v13182_v61 = vand.u32 4294901760, %v10119_v31 }
 0x355   : > { %v10242_v53 = vadd.f32 %v3258_v56, %v3174_v43  ;;  %3852 = vmatpush.msrb.mxu0 %v13178_v49  ;;  %v13180_v56 = vand.u32 4294901760, %v10085_v9 }
 0x356   : > { %3957 = vmatpush.msrb.mxu1 %v10018_v12  ;;  %v13183_v12 = vand.u32 4294901760, %v10130_v22  ;;  %v375_v22 = vld [vmem:[#allocation2 + $0x2c8] sm:$0xff] }
 0x357   : > { %3285 = vmax.xlane.f32.xlu0 %v10242_v53  ;;  %3856 = vmatpush.msrb.mxu0 %v13179_v13  ;;  %v12831_v13 = vand.u32 4294901760, %v10339_v46 }
 0x358   : > { %3959 = vmatpush.msrb.mxu1 %v10026_v40  ;;  %v13184_v40 = vand.u32 4294901760, %v10150_v50  ;;  %v10290_v50 = vand.u32 4294901760, %v375_v22 }
 0x359   : > { %3860 = vmatpush.msrb.mxu0 %v13180_v56  ;;  %v10352_v56 = vsub.f32 %v357_v17, %v10342_v59 }
 0x35a   : > { %3961 = vmatpush.msrb.mxu1 %v10048_v2  ;;  %v13185_v2 = vand.u32 4294901760, %v10165_v60 }
 0x35b   : > { %3864 = vmatpush.msrb.mxu0 %v13181_v15 }
 0x35c   : > { %3963 = vmatpush.msrb.mxu1 %v10065_v30  ;;  %v10271_v30 = vand.u32 4294901760, %v381_v10 }
 0x35d   : > { %3868 = vmatpush.msrb.mxu0 %v13182_v61 }
 0x35e   : > { %3965 = vmatpush.msrb.mxu1 %v10078_v42  ;;  %4040 = vmatpush.msra.mxu2 %v10271_v30  ;;  %v10278_v42 = vsub.f32 %v381_v10, %v10271_v30  ;;  %v12830_v10 = vand.u32 4294901760, %v10352_v56 }
 0x35f   : > { %3872 = vmatpush.msrb.mxu0 %v13183_v12  ;;  %v4197_v12 = vsub.f32 %v10339_v46, %v12831_v13 }
 0x360   : > { %3967 = vmatpush.msrb.mxu1 %v10098_v24  ;;  %v13187_v24 = vand.u32 4294901760, %v10182_v37  ;;  %4042 = vmatpush.msra.mxu2 %v10290_v50 }
 0x361   : > { %3876 = vmatpush.msrb.mxu0 %v13184_v40 }
 0x362   : > { %3969 = vmatpush.msrb.mxu1 %v10115_v63  ;;  %v12835_v63 = vand.u32 4294901760, %v10278_v42 }
 0x363   : > { %3880 = vmatpush.msrb.mxu0 %v13185_v2 }
 0x364   : > { %3971 = vmatpush.msrb.mxu1 %v10123_v47  ;;  %v4179_v47 = vsub.f32 %v10278_v42, %v12835_v63  ;;  %v321_v63 = vld [vmem:[#allocation2 + $0x118] sm:$0xff] }
 0x365   : > { %3884 = vmatpush.msrb.mxu0 %v13186_v33  ;;  %v4198_v33 = vand.u32 4294901760, %v4197_v12 }
 0x366   : > { %3973 = vmatpush.msrb.mxu1 %v10145_v57  ;;  %v4180_v57 = vand.u32 4294901760, %v4179_v47  ;;  %v351_v47 = vld [vmem:[#allocation2 + $0x208] sm:$0xff] }
 0x367   : > { %3888 = vmatpush.msrb.mxu0 %v13187_v24 }
 0x368   : > { %3975 = vmatpush.msrb.mxu1 %v10158_v3  ;;  %4181 = vmatpush.msra.mxu3 %v4180_v57  ;;  %v10378_v57 = vand.u32 4294901760, %v351_v47 }
 0x369   : > { %3892 = vmatpush.msrb.mxu0 %v3543_v45  ;;  %v369_v45 = vld [vmem:[#allocation2 + $0x298] sm:$0xff] }
 0x36a   : > { %v3262_v9 = vpop.xlane.xlu0 %3261  ;;  %3977 = vmatpush.msrb.mxu1 %v10169_v38 }
 0x36b   : > { %v3287_v32 = vsub.f32 %v9999_v23, %v3262_v9  ;;  %3896 = vmatpush.msrb.mxu0 %v3549_v58  ;;  %v10295_v23 = vsub.f32 %v375_v22, %v10290_v50  ;;  %v10307_v58 = vand.u32 4294901760, %v369_v45 }
 0x36c   : > { %3979 = vmatpush.msrb.mxu1 %v10171_v26 }
 0x36d   : > { %v3300_v31 = vmul.f32 1.442695, %v3287_v32  ;;  %3900 = vmatpush.msrb.mxu0 %v3555_v54  ;;  %v12833_v60 = vand.u32 4294901760, %v10295_v23  ;;  %4044 = vmatpush.msra.mxu2 %v10307_v58  ;;  %v4203_v32 = vsub.f32 %v10352_v56, %v12830_v10 }
 0x36e   : > { %3981 = vmatpush.msrb.mxu1 %v10210_v14 }
 0x36f   : > { %7877 = vpow2.f32 %v3300_v31  ;;  %v4185_v26 = vsub.f32 %v10295_v23, %v12833_v60  ;;  %4046 = vmatpush.msra.mxu2 %v10317_v28  ;;  %v4204_v22 = vand.u32 4294901760, %v4203_v32 }
 0x370   : > { %3983 = vmatpush.msrb.mxu1 %v10217_v41  ;;  %v10315_v41 = vsub.f32 %v369_v45, %v10307_v58 }
 0x371   : > { %v4186_v14 = vand.u32 4294901760, %v4185_v26  ;;  %4048 = vmatpush.msra.mxu2 %v10342_v59 }
 0x372   : > { %v3264_v7 = vpop.xlane.xlu0 %3263  ;;  %3985 = vmatpush.msrb.mxu1 %v10227_v5  ;;  %v12832_v34 = vand.u32 4294901760, %v10315_v41 }
 0x373   : > { %v3288_v3 = vsub.f32 %v10016_v36, %v3264_v7  ;;  %4187 = vmatpush.msra.mxu3 %v4186_v14  ;;  %4050 = vmatpush.msra.mxu2 %v10378_v57 }
 0x374   : > { %v4191_v8 = vsub.f32 %v10315_v41, %v12832_v34 }
 0x375   : > { %v7878_v38 = vpop.eup %7877  ;;  %v3302_v37 = vmul.f32 1.442695, %v3288_v3  ;;  %v10387_v3 = vsub.f32 %v351_v47, %v10378_v57 }
 0x376   : > { %v10304_v16 = vand.u32 4294901760, %v7878_v38  ;;  %v4192_v19 = vand.u32 4294901760, %v4191_v8 }
 0x377   : > { %7879 = vpow2.f32 %v3302_v37  ;;  %v12828_v45 = vand.u32 4294901760, %v10387_v3 }
 0x378   : > { %v10310_v36 = vsub.f32 %v7878_v38, %v10304_v16  ;;  %3560 = vmatmul.f32.vlgmr.msra.gmra.mxu1 %v10304_v16  ;;  %4193 = vmatpush.msra.mxu3 %v4192_v19 }
 0x379   : > { %4440 = vmatpush.msra.mxu1 %v10271_v30 }
 0x37a   : > { %13188 = vst [vmem:[#allocation43_spill] sm:$0xff] %v10310_v36  ;;  %v3266_v11 = vpop.xlane.xlu1 %3265  ;;  %3662 = vmatmul.f32.vlgmr.msrb.gmra.mxu2 %v10310_v36  ;;  %v10321_v5 = vand.u32 4294901760, %v10310_v36  ;;  %4199 = vmatpush.msra.mxu3 %v4198_v33 }
 0x37b   : > { %v3289_v48 = vsub.f32 %v10042_v21, %v3266_v11  ;;  %4442 = vmatpush.msra.mxu1 %v10290_v50 }
 0x37c   : > { %13189 = vst [vmem:[#allocation25_spill] sm:$0xff] %v10321_v5  ;;  %3761 = vmatmul.f32.vlgmr.msrb.gmra.mxu3 %v10321_v5  ;;  %v3361_v6 = vsub.f32 %v10310_v36, %v10321_v5 }
 0x37d   : > { %v7880_v62 = vpop.eup %7879  ;;  %v3304_v54 = vmul.f32 1.442695, %v3289_v48  ;;  %4444 = vmatpush.msra.mxu1 %v10307_v58  ;;  %4205 = vmatpush.msra.mxu3 %v4204_v22  ;;  %v4209_v48 = vsub.f32 %v10387_v3, %v12828_v45 }
 0x37e   : > { %v10334_v43 = vand.u32 4294901760, %v7880_v62  ;;  %v10336_v21 = vand.u32 4294901760, %v3361_v6 }
 0x37f   : > { %7881 = vpow2.f32 %v3304_v54  ;;  %4446 = vmatpush.msra.mxu1 %v10317_v28  ;;  %v4210_v54 = vand.u32 4294901760, %v4209_v48 }
 0x380   : > { %3363 = vmatmul.f32.vlgmr.msra.gmra.mxu0 %v10336_v21  ;;  %3564 = vmatmul.f32.gmra.mxu1 %v10334_v43  ;;  %v10347_v49 = vsub.f32 %v7880_v62, %v10334_v43  ;;  %v345_v62 = vld [vmem:[#allocation2 + $0x1d8] sm:$0xff] }
 0x381   : > { %4327 = vmatpush.msra.mxu0 %v10278_v42  ;;  %4448 = vmatpush.msra.mxu1 %v10342_v59  ;;  %v10409_v8 = vand.u32 4294901760, %v345_v62 }
 0x382   : > { %13190 = vst [vmem:[#allocation51_spill] sm:$0xff] %v10347_v49  ;;  %v3268_v15 = vpop.xlane.xlu1 %3267  ;;  %3667 = vmatmul.f32.gmra.mxu2 %v10347_v49  ;;  %v10356_v61 = vand.u32 4294901760, %v10347_v49  ;;  %4211 = vmatpush.msra.mxu3 %v4210_v54 }
 0x383   : > { %v3290_v40 = vsub.f32 %v10059_v20, %v3268_v15  ;;  %4330 = vmatpush.msra.mxu0 %v10295_v23  ;;  %4450 = vmatpush.msra.mxu1 %v10378_v57  ;;  %v10418_v19 = vsub.f32 %v345_v62, %v10409_v8 }
 0x384   : > { %13191 = vst [vmem:[#allocation48_spill] sm:$0xff] %v10356_v61  ;;  %3767 = vmatmul.f32.gmra.mxu3 %v10356_v61  ;;  %v3369_v2 = vsub.f32 %v10347_v49, %v10356_v61  ;;  %4052 = vmatpush.msra.mxu2 %v10409_v8 }
 0x385   : > { %v7882_v9 = vpop.eup %7881  ;;  %v3306_v24 = vmul.f32 1.442695, %v3290_v40  ;;  %4333 = vmatpush.msra.mxu0 %v10315_v41  ;;  %4452 = vmatpush.msra.mxu1 %v10409_v8 }
 0x386   : > { %v10373_v20 = vand.u32 4294901760, %v7882_v9  ;;  %v10375_v31 = vand.u32 4294901760, %v3369_v2  ;;  %v12827_v2 = vand.u32 4294901760, %v10418_v19 }
 0x387   : > { %7883 = vpow2.f32 %v3306_v24  ;;  %4336 = vmatpush.msra.mxu0 %v10339_v46 }
 0x388   : > { %3371 = vmatmul.f32.gmra.mxu0 %v10375_v31  ;;  %3568 = vmatmul.f32.gmra.mxu1 %v10373_v20  ;;  %v10383_v7 = vsub.f32 %v7882_v9, %v10373_v20  ;;  %v4215_v32 = vsub.f32 %v10418_v19, %v12827_v2 }
 0x389   : > { %4339 = vmatpush.msra.mxu0 %v10352_v56 }
 0x38a   : > { %13192 = vst [vmem:[#allocation19_spill] sm:$0xff] %v10383_v7  ;;  %v3270_v38 = vpop.xlane.xlu2 %3269  ;;  %3672 = vmatmul.f32.gmra.mxu2 %v10383_v7  ;;  %v10391_v37 = vand.u32 4294901760, %v10383_v7 }
 0x38b   : > { %v3291_v26 = vsub.f32 %v10076_v0, %v3270_v38  ;;  %4342 = vmatpush.msra.mxu0 %v10387_v3  ;;  %v333_v38 = vld [vmem:[#allocation2 + $0x178] sm:$0xff] }
 0x38c   : > { %13193 = vst [vmem:[#allocation32_spill] sm:$0xff] %v10391_v37  ;;  %3773 = vmatmul.f32.gmra.mxu3 %v10391_v37  ;;  %v3377_v27 = vsub.f32 %v10383_v7, %v10391_v37  ;;  %v10449_v48 = vand.u32 4294901760, %v333_v38 }
 0x38d   : > { %v7884_v14 = vpop.eup %7883  ;;  %v3308_v11 = vmul.f32 1.442695, %v3291_v26  ;;  %4345 = vmatpush.msra.mxu0 %v10418_v19  ;;  %v4216_v26 = vand.u32 4294901760, %v4215_v32 }
 0x38e   : > { %v10404_v6 = vand.u32 4294901760, %v7884_v14  ;;  %v10406_v0 = vand.u32 4294901760, %v3377_v27 }
 0x38f   : > { %7885 = vpow2.f32 %v3308_v11  ;;  %4217 = vmatpush.msra.mxu3 %v4216_v26  ;;  %v10472_v26 = vsub.f32 %v333_v38, %v10449_v48 }
 0x390   : > { %3379 = vmatmul.f32.gmra.mxu0 %v10406_v0  ;;  %3572 = vmatmul.f32.gmra.mxu1 %v10404_v6  ;;  %v10414_v17 = vsub.f32 %v7884_v14, %v10404_v6 }
 0x392   : > { %13194 = vst [vmem:[#allocation30_spill] sm:$0xff] %v10414_v17  ;;  %v3272_v15 = vpop.xlane.xlu2 %3271  ;;  %3677 = vmatmul.f32.gmra.mxu2 %v10414_v17  ;;  %v10422_v12 = vand.u32 4294901760, %v10414_v17 }
 0x393   : > { %v3292_v40 = vsub.f32 %v10096_v44, %v3272_v15  ;;  %v339_v44 = vld [vmem:[#allocation2 + $0x1a8] sm:$0xff] }
 0x394   : > { %13195 = vst [vmem:[#allocation39_spill] sm:$0xff] %v10422_v12  ;;  %3779 = vmatmul.f32.gmra.mxu3 %v10422_v12  ;;  %v3385_v33 = vsub.f32 %v10414_v17, %v10422_v12  ;;  %v10438_v27 = vand.u32 4294901760, %v339_v44 }
 0x395   : > { %v7886_v9 = vpop.eup %7885  ;;  %v3310_v24 = vmul.f32 1.442695, %v3292_v40 }
 0x396   : > { %v10434_v47 = vand.u32 4294901760, %v7886_v9  ;;  %v10436_v22 = vand.u32 4294901760, %v3385_v33  ;;  %4054 = vmatpush.msra.mxu2 %v10438_v27  ;;  %v10447_v11 = vsub.f32 %v339_v44, %v10438_v27  ;;  %4454 = vmatpush.msra.mxu1 %v10438_v27 }
 0x397   : > { %7887 = vpow2.f32 %v3310_v24 }
 0x398   : > { %3387 = vmatmul.f32.gmra.mxu0 %v10436_v22  ;;  %3576 = vmatmul.f32.gmra.mxu1 %v10434_v47  ;;  %v10443_v14 = vsub.f32 %v7886_v9, %v10434_v47  ;;  %v12829_v40 = vand.u32 4294901760, %v10447_v11 }
 0x399   : > { %4056 = vmatpush.msra.mxu2 %v10449_v48  ;;  %4348 = vmatpush.msra.mxu0 %v10447_v11 }
 0x39a   : > { %13196 = vst [vmem:[#allocation37_spill] sm:$0xff] %v10443_v14  ;;  %3682 = vmatmul.f32.gmra.mxu2 %v10443_v14  ;;  %v3274_v62 = vpop.xlane.xlu0 %3273  ;;  %v10453_v54 = vand.u32 4294901760, %v10443_v14  ;;  %4456 = vmatpush.msra.mxu1 %v10449_v48  ;;  %v4221_v32 = vsub.f32 %v10447_v11, %v12829_v40  ;;  %v12834_v40 = vand.u32 4294901760, %v10472_v26 }
 0x39b   : > { %v3293_v15 = vsub.f32 %v10113_v35, %v3274_v62  ;;  %v327_v62 = vld [vmem:[#allocation2 + $0x148] sm:$0xff]  ;;  %4351 = vmatpush.msra.mxu0 %v10472_v26 }
 0x39c   : > { %13197 = vst [vmem:[#allocation10_spill] sm:$0xff] %v10453_v54  ;;  %3785 = vmatmul.f32.gmra.mxu3 %v10453_v54  ;;  %v3393_v33 = vsub.f32 %v10443_v14, %v10453_v54  ;;  %v4222_v2 = vand.u32 4294901760, %v4221_v32  ;;  %v10474_v45 = vand.u32 4294901760, %v327_v62 }
 0x39d   : > { %v7888_v9 = vpop.eup %7887  ;;  %v3312_v24 = vmul.f32 1.442695, %v3293_v15 }
 0x39e   : > { %v10467_v35 = vand.u32 4294901760, %v7888_v9  ;;  %v10469_v44 = vand.u32 4294901760, %v3393_v33  ;;  %4223 = vmatpush.msra.mxu3 %v4222_v2  ;;  %4058 = vmatpush.msra.mxu2 %v10474_v45 }
 0x39f   : > { %7889 = vpow2.f32 %v3312_v24  ;;  %v4227_v24 = vsub.f32 %v10472_v26, %v12834_v40  ;;  %4458 = vmatpush.msra.mxu1 %v10474_v45  ;;  %v10501_v40 = vsub.f32 %v327_v62, %v10474_v45 }
 0x3a0   : > { %3395 = vmatmul.f32.gmra.mxu0 %v10469_v44  ;;  %3580 = vmatmul.f32.gmra.mxu1 %v10467_v35  ;;  %v10479_v15 = vsub.f32 %v7888_v9, %v10467_v35 }
 0x3a1   : > { %v4228_v32 = vand.u32 4294901760, %v4227_v24  ;;  %v12836_v24 = vand.u32 4294901760, %v10501_v40  ;;  %4354 = vmatpush.msra.mxu0 %v10501_v40 }
 0x3a2   : > { %13198 = vst [vmem:[#allocation42_spill] sm:$0xff] %v10479_v15  ;;  %v3276_v33 = vpop.xlane.xlu1 %3275  ;;  %3687 = vmatmul.f32.gmra.mxu2 %v10479_v15  ;;  %v10485_v38 = vand.u32 4294901760, %v10479_v15 }
 0x3a3   : > { %v3294_v9 = vsub.f32 %v10139_v55, %v3276_v33  ;;  %4229 = vmatpush.msra.mxu3 %v4228_v32  ;;  %v10503_v55 = vand.u32 4294901760, %v321_v63 }
 0x3a4   : > { %13199 = vst [vmem:[#allocation6_spill] sm:$0xff] %v10485_v38  ;;  %3791 = vmatmul.f32.gmra.mxu3 %v10485_v38  ;;  %v3401_v2 = vsub.f32 %v10479_v15, %v10485_v38 }
 0x3a5   : > { %v7890_v10 = vpop.eup %7889  ;;  %v3314_v13 = vmul.f32 1.442695, %v3294_v9  ;;  %4060 = vmatpush.msra.mxu2 %v10503_v55  ;;  %v10513_v9 = vsub.f32 %v321_v63, %v10503_v55  ;;  %4460 = vmatpush.msra.mxu1 %v10503_v55 }
 0x3a6   : > { %v10496_v34 = vand.u32 4294901760, %v7890_v10  ;;  %v10498_v60 = vand.u32 4294901760, %v3401_v2 }
 0x3a7   : > { %7891 = vpow2.f32 %v3314_v13  ;;  %v12839_v32 = vand.u32 4294901760, %v10513_v9  ;;  %4357 = vmatpush.msra.mxu0 %v10513_v9 }
 0x3a8   : > { %3403 = vmatmul.f32.gmra.mxu0 %v10498_v60  ;;  %3584 = vmatmul.f32.gmra.mxu1 %v10496_v34  ;;  %v10508_v33 = vsub.f32 %v7890_v10, %v10496_v34  ;;  %v4233_v10 = vsub.f32 %v10501_v40, %v12836_v24 }
 0x3a9   : > { %v4239_v24 = vsub.f32 %v10513_v9, %v12839_v32 }
 0x3aa   : > { %13200 = vst [vmem:[#allocation26_spill] sm:$0xff] %v10508_v33  ;;  %v3278_v62 = vpop.xlane.xlu2 %3277  ;;  %3692 = vmatmul.f32.gmra.mxu2 %v10508_v33  ;;  %v10518_v13 = vand.u32 4294901760, %v10508_v33  ;;  %v4234_v25 = vand.u32 4294901760, %v4233_v10 }
 0x3ab   : > { %v3295_v2 = vsub.f32 %v10156_v1, %v3278_v62  ;;  %v315_v1 = vld [vmem:[#allocation2 + $0xe8] sm:$0xff]  ;;  %v4240_v62 = vand.u32 4294901760, %v4239_v24  ;;  %v309_v24 = vld [vmem:[#allocation2 + $0xb8] sm:$0xff] }
 0x3ac   : > { %13201 = vst [vmem:[#allocation53_spill] sm:$0xff] %v10518_v13  ;;  %3797 = vmatmul.f32.gmra.mxu3 %v10518_v13  ;;  %v3409_v63 = vsub.f32 %v10508_v33, %v10518_v13  ;;  %v10537_v38 = vand.u32 4294901760, %v315_v1  ;;  %v10555_v32 = vand.u32 4294901760, %v309_v24 }
 0x3ad   : > { %v7892_v29 = vpop.eup %7891  ;;  %v3316_v39 = vmul.f32 1.442695, %v3295_v2  ;;  %4235 = vmatpush.msra.mxu3 %v4234_v25 }
 0x3ae   : > { %v10533_v52 = vand.u32 4294901760, %v7892_v29  ;;  %v10535_v15 = vand.u32 4294901760, %v3409_v63  ;;  %4062 = vmatpush.msra.mxu2 %v10537_v38  ;;  %v10546_v2 = vsub.f32 %v315_v1, %v10537_v38  ;;  %4462 = vmatpush.msra.mxu1 %v10537_v38 }
 0x3af   : > { %7893 = vpow2.f32 %v3316_v39  ;;  %4241 = vmatpush.msra.mxu3 %v4240_v62  ;;  %v303_v62 = vld [vmem:[#allocation2 + $0x88] sm:$0xff] }
 0x3b0   : > { %3411 = vmatmul.f32.gmra.mxu0 %v10535_v15  ;;  %3588 = vmatmul.f32.gmra.mxu1 %v10533_v52  ;;  %v10542_v10 = vsub.f32 %v7892_v29, %v10533_v52  ;;  %v12847_v29 = vand.u32 4294901760, %v10546_v2 }
 0x3b1   : > { %4360 = vmatpush.msra.mxu0 %v10546_v2  ;;  %4064 = vmatpush.msra.mxu2 %v10555_v32 }
 0x3b2   : > { %13202 = vst [vmem:[#allocation54_spill] sm:$0xff] %v10542_v10  ;;  %3697 = vmatmul.f32.gmra.mxu2 %v10542_v10  ;;  %v3280_v25 = vpop.xlane.xlu0 %3279  ;;  %v10550_v39 = vand.u32 4294901760, %v10542_v10  ;;  %v4245_v14 = vsub.f32 %v10546_v2, %v12847_v29  ;;  %4464 = vmatpush.msra.mxu1 %v10555_v32 }
 0x3b3   : > { %v3296_v63 = vsub.f32 %v10192_v51, %v3280_v25  ;;  %v10566_v51 = vsub.f32 %v309_v24, %v10555_v32  ;;  %v10568_v25 = vand.u32 4294901760, %v303_v62 }
 0x3b4   : > { %13203 = vst [vmem:[#allocation55_spill] sm:$0xff] %v10550_v39  ;;  %3803 = vmatmul.f32.gmra.mxu3 %v10550_v39  ;;  %v3417_v1 = vsub.f32 %v10542_v10, %v10550_v39  ;;  %v297_v10 = vld [vmem:[#allocation2 + $0x58] sm:$0xff] }
 0x3b5   : > { %v7894_v33 = vpop.eup %7893  ;;  %v3318_v13 = vmul.f32 1.442695, %v3296_v63  ;;  %v4246_v63 = vand.u32 4294901760, %v4245_v14  ;;  %v12851_v39 = vand.u32 4294901760, %v10566_v51  ;;  %4066 = vmatpush.msra.mxu2 %v10568_v25  ;;  %v10578_v29 = vsub.f32 %v303_v62, %v10568_v25  ;;  %4363 = vmatpush.msra.mxu0 %v10566_v51 }
 0x3b6   : > { %v10571_v54 = vand.u32 4294901760, %v7894_v33  ;;  %v10573_v17 = vand.u32 4294901760, %v3417_v1  ;;  %v10586_v1 = vand.u32 4294901760, %v297_v10  ;;  %4466 = vmatpush.msra.mxu1 %v10568_v25 }
 0x3b7   : > { %7895 = vpow2.f32 %v3318_v13  ;;  %v291_v13 = vld [vmem:[#allocation2 + $0x28] sm:$0xff]  ;;  %4247 = vmatpush.msra.mxu3 %v4246_v63  ;;  %v4251_v14 = vsub.f32 %v10566_v51, %v12851_v39  ;;  %v12855_v62 = vand.u32 4294901760, %v10578_v29  ;;  %4366 = vmatpush.msra.mxu0 %v10578_v29 }
 0x3b8   : > { %3419 = vmatmul.f32.gmra.mxu0 %v10573_v17  ;;  %3592 = vmatmul.f32.gmra.mxu1 %v10571_v54  ;;  %v10584_v24 = vsub.f32 %v7894_v33, %v10571_v54  ;;  %v10592_v12 = vand.u32 4294901760, %v291_v13  ;;  %v10600_v37 = vsub.f32 %v297_v10, %v10586_v1 }
 0x3b9   : > { %v4252_v39 = vand.u32 4294901760, %v4251_v14  ;;  %v4257_v49 = vsub.f32 %v10578_v29, %v12855_v62  ;;  %4068 = vmatpush.msra.mxu2 %v10586_v1  ;;  %4468 = vmatpush.msra.mxu1 %v10586_v1 }
 0x3ba   : > { %13204 = vst [vmem:[#allocation56_spill] sm:$0xff] %v10584_v24  ;;  %v3282_v7 = vpop.xlane.xlu1 %3281  ;;  %3702 = vmatmul.f32.gmra.mxu2 %v10584_v24  ;;  %v10597_v33 = vand.u32 4294901760, %v10584_v24  ;;  %v10609_v61 = vsub.f32 %v291_v13, %v10592_v12  ;;  %v12860_v36 = vand.u32 4294901760, %v10600_v37  ;;  %4369 = vmatpush.msra.mxu0 %v10600_v37 }
 0x3bb   : > { %v3297_v63 = vsub.f32 %v10205_v18, %v3282_v7  ;;  %4253 = vmatpush.msra.mxu3 %v4252_v39  ;;  %v4258_v14 = vand.u32 4294901760, %v4257_v49  ;;  %4070 = vmatpush.msra.mxu2 %v10592_v12 }
 0x3bc   : > { %13205 = vst [vmem:[#allocation57_spill] sm:$0xff] %v10597_v33  ;;  %3809 = vmatmul.f32.gmra.mxu3 %v10597_v33  ;;  %v3425_v10 = vsub.f32 %v10584_v24, %v10597_v33  ;;  %v12859_v62 = vand.u32 4294901760, %v10609_v61  ;;  %v4263_v24 = vsub.f32 %v10600_v37, %v12860_v36  ;;  %v13206_v33 = vand.u32 4294901760, %v10278_v42  ;;  %4372 = vmatpush.msra.mxu0 %v10609_v61 }
 0x3bd   : > { %v7896_v18 = vpop.eup %7895  ;;  %v3320_v7 = vmul.f32 1.442695, %v3297_v63  ;;  %4259 = vmatpush.msra.mxu3 %v4258_v14  ;;  %4470 = vmatpush.msra.mxu1 %v10592_v12 }
 0x3be   : > { %v10618_v5 = vand.u32 4294901760, %v7896_v18  ;;  %v10620_v13 = vand.u32 4294901760, %v3425_v10  ;;  %4553 = vmatpush.msrb.mxu2 %v13206_v33  ;;  %v4269_v49 = vsub.f32 %v10609_v61, %v12859_v62  ;;  %v4264_v63 = vand.u32 4294901760, %v4263_v24 }
 0x3bf   : > { %7897 = vpow2.f32 %v3320_v7  ;;  %v13207_v33 = vand.u32 4294901760, %v10295_v23  ;;  %v13208_v62 = vand.u32 4294901760, %v10315_v41 }
 0x3c0   : > { %3427 = vmatmul.f32.gmra.mxu0 %v10620_v13  ;;  %3596 = vmatmul.f32.gmra.mxu1 %v10618_v5  ;;  %v10635_v39 = vsub.f32 %v7896_v18, %v10618_v5  ;;  %v4270_v42 = vand.u32 4294901760, %v4269_v49  ;;  %v13209_v49 = vand.u32 4294901760, %v10339_v46  ;;  %v13211_v46 = vand.u32 4294901760, %v10387_v3 }
 0x3c1   : > { %4557 = vmatpush.msrb.mxu2 %v13207_v33  ;;  %4265 = vmatpush.msra.mxu3 %v4264_v63  ;;  %v13212_v63 = vand.u32 4294901760, %v10418_v19 }
 0x3c2   : > { %v3284_v10 = vpop.xlane.xlu2 %3283  ;;  %3707 = vmatmul.f32.gmra.mxu2 %v10635_v39  ;;  %v10642_v7 = vand.u32 4294901760, %v10635_v39 }
 0x3c3   : > { %v3298_v14 = vsub.f32 %v10219_v4, %v3284_v10  ;;  %4561 = vmatpush.msrb.mxu2 %v13208_v62  ;;  %4271 = vmatpush.msra.mxu3 %v4270_v42  ;;  %v13210_v4 = vand.u32 4294901760, %v10352_v56  ;;  %v13213_v10 = vand.u32 4294901760, %v10447_v11 }
 0x3c4   : > { %3815 = vmatmul.f32.gmra.mxu3 %v10642_v7  ;;  %v3433_v23 = vsub.f32 %v10635_v39, %v10642_v7 }
 0x3c5   : > { %v7898_v24 = vpop.eup %7897  ;;  %v3322_v18 = vmul.f32 1.442695, %v3298_v14  ;;  %4565 = vmatpush.msrb.mxu2 %v13209_v49  ;;  %4668 = vmatpush.msrb.mxu3 %v10271_v30 }
 0x3c6   : > { %v10652_v33 = vand.u32 4294901760, %v7898_v24  ;;  %v10654_v36 = vand.u32 4294901760, %v3433_v23 }
 0x3c7   : > { %7899 = vpow2.f32 %v3322_v18  ;;  %4569 = vmatpush.msrb.mxu2 %v13210_v4  ;;  %4670 = vmatpush.msrb.mxu3 %v10290_v50 }
 0x3c8   : > { %3435 = vmatmul.f32.gmra.mxu0 %v10654_v36  ;;  %3600 = vmatmul.f32.gmra.mxu1 %v10652_v33  ;;  %v10662_v41 = vsub.f32 %v7898_v24, %v10652_v33 }
 0x3c9   : > { %4573 = vmatpush.msrb.mxu2 %v13211_v46  ;;  %4672 = vmatpush.msrb.mxu3 %v10307_v58  ;;  %v13214_v58 = vand.u32 4294901760, %v10472_v26 }
 0x3ca   : > { %3712 = vmatmul.f32.gmra.mxu2 %v10662_v41  ;;  %v3286_v62 = vpop.xlane.xlu0 %3285  ;;  %v10669_v30 = vand.u32 4294901760, %v10662_v41 }
 0x3cb   : > { %v3299_v56 = vsub.f32 %v10242_v53, %v3286_v62  ;;  %4577 = vmatpush.msrb.mxu2 %v13212_v63  ;;  %4674 = vmatpush.msrb.mxu3 %v10317_v28  ;;  %v13215_v28 = vand.u32 4294901760, %v10501_v40 }
 0x3cc   : > { %3821 = vmatmul.f32.gmra.mxu3 %v10669_v30  ;;  %v3441_v50 = vsub.f32 %v10662_v41, %v10669_v30 }
 0x3cd   : > { %v7900_v3 = vpop.eup %7899  ;;  %v3324_v42 = vmul.f32 1.442695, %v3299_v56  ;;  %4581 = vmatpush.msrb.mxu2 %v13213_v10  ;;  %4676 = vmatpush.msrb.mxu3 %v10342_v59  ;;  %v13216_v59 = vand.u32 4294901760, %v10513_v9 }
 0x3ce   : > { %v10681_v14 = vand.u32 4294901760, %v7900_v3  ;;  %v10683_v53 = vand.u32 4294901760, %v3441_v50 }
 0x3cf   : > { %7901 = vpow2.f32 %v3324_v42  ;;  %4585 = vmatpush.msrb.mxu2 %v13214_v58  ;;  %4678 = vmatpush.msrb.mxu3 %v10378_v57  ;;  %v13217_v57 = vand.u32 4294901760, %v10546_v2 }
 0x3d0   : > { %3443 = vmatmul.f32.gmra.mxu0 %v10683_v53  ;;  %3604 = vmatmul.f32.gmra.mxu1 %v10681_v14  ;;  %v10691_v19 = vsub.f32 %v7900_v3, %v10681_v14 }
 0x3d1   : > { %4589 = vmatpush.msrb.mxu2 %v13215_v28  ;;  %4680 = vmatpush.msrb.mxu3 %v10409_v8  ;;  %v13218_v8 = vand.u32 4294901760, %v10566_v51 }
 0x3d2   : > { %3717 = vmatmul.f32.gmra.mxu2 %v10691_v19  ;;  %v10698_v11 = vand.u32 4294901760, %v10691_v19 }
 0x3d3   : > { %4593 = vmatpush.msrb.mxu2 %v13216_v59  ;;  %4682 = vmatpush.msrb.mxu3 %v10438_v27  ;;  %v13219_v27 = vand.u32 4294901760, %v10578_v29 }
 0x3d4   : > { %3827 = vmatmul.f32.gmra.mxu3 %v10698_v11  ;;  %v3449_v26 = vsub.f32 %v10691_v19, %v10698_v11 }
 0x3d5   : > { %v7902_v23 = vpop.eup %7901  ;;  %4597 = vmatpush.msrb.mxu2 %v13217_v57  ;;  %4684 = vmatpush.msrb.mxu3 %v10449_v48  ;;  %v13220_v48 = vand.u32 4294901760, %v10600_v37 }
 0x3d6   : > { %v10709_v40 = vand.u32 4294901760, %v7902_v23  ;;  %v10711_v24 = vand.u32 4294901760, %v3449_v26 }
 0x3d7   : > { %4601 = vmatpush.msrb.mxu2 %v13218_v8  ;;  %4686 = vmatpush.msrb.mxu3 %v10474_v45  ;;  %v13221_v45 = vand.u32 4294901760, %v10609_v61 }
 0x3d8   : > { %3451 = vmatmul.f32.gmra.mxu0 %v10711_v24  ;;  %3608 = vmatmul.f32.gmra.mxu1 %v10709_v40  ;;  %v10719_v9 = vsub.f32 %v7902_v23, %v10709_v40 }
 0x3d9   : > { %4605 = vmatpush.msrb.mxu2 %v13219_v27  ;;  %4688 = vmatpush.msrb.mxu3 %v10503_v55 }
 0x3da   : > { %3722 = vmatmul.f32.gmra.mxu2 %v10719_v9  ;;  %v10726_v2 = vand.u32 4294901760, %v10719_v9 }
 0x3db   : > { %4609 = vmatpush.msrb.mxu2 %v13220_v48  ;;  %4690 = vmatpush.msrb.mxu3 %v10537_v38 }
 0x3dc   : > { %3833 = vmatmul.f32.gmra.mxu3 %v10726_v2  ;;  %v3457_v51 = vsub.f32 %v10719_v9, %v10726_v2 }
 0x3dd   : > { %4613 = vmatpush.msrb.mxu2 %v13221_v45  ;;  %4692 = vmatpush.msrb.mxu3 %v10555_v32 }
 0x3de   : > { %v10737_v29 = vand.u32 4294901760, %v3457_v51 }
 0x3df   : > { %4694 = vmatpush.msrb.mxu3 %v10568_v25 }
 0x3e0   : > { %3459 = vmatmul.f32.gmra.mxu0 %v10737_v29  ;;  %3987 = vmatmul.f32.vlgmr.msrb.gmra.mxu1 %v10304_v16 }
 0x3e1   : > { %4696 = vmatpush.msrb.mxu3 %v10586_v1 }
 0x3e2   : > { %4076 = vmatmul.f32.vlgmr.msra.gmra.mxu2 %v10336_v21 }
 0x3e3   : > { %4698 = vmatpush.msrb.mxu3 %v10592_v12 }
 0x3e4   : > { %4273 = vmatmul.f32.vlgmr.msra.gmra.mxu3 %v10304_v16 }
 0x3e8   : > { %3902 = vmatmul.f32.vlgmr.msrb.gmra.mxu0 %v10304_v16  ;;  %3991 = vmatmul.f32.gmra.mxu1 %v10334_v43 }
 0x3ea   : > { %4084 = vmatmul.f32.gmra.mxu2 %v10375_v31 }
 0x3ec   : > { %4277 = vmatmul.f32.gmra.mxu3 %v10334_v43 }
 0x3f0   : > { %3906 = vmatmul.f32.gmra.mxu0 %v10334_v43  ;;  %3995 = vmatmul.f32.gmra.mxu1 %v10373_v20 }
 0x3f2   : > { %4092 = vmatmul.f32.gmra.mxu2 %v10406_v0 }
 0x3f4   : > { %4281 = vmatmul.f32.gmra.mxu3 %v10373_v20 }
 0x3f5   : > { %v3561_v21 = vpop.f32.mrf.mxu1 }
 0x3f8   : > { %3910 = vmatmul.f32.gmra.mxu0 %v10373_v20  ;;  %3999 = vmatmul.f32.gmra.mxu1 %v10404_v6 }
 0x3fa   : > { %4100 = vmatmul.f32.gmra.mxu2 %v10436_v22 }
 0x3fc   : > { %4285 = vmatmul.f32.gmra.mxu3 %v10404_v6 }
 0x3fd   : > { %v3364_v61 = vpop.f32.mrf.mxu0  ;;  %v3565_v31 = vpop.f32.mrf.mxu1 }
 0x3fe   : > { %v3562_v37 = vadd.f32 %v3561_v21, %v3364_v61  ;;  %v3663_v12 = vpop.f32.mrf.mxu2 }
 0x3ff   : > { %v3762_v38 = vpop.f32.mrf.mxu3 }
 0x400   : > { %v3664_v55 = vadd.f32 %v3663_v12, %v3562_v37  ;;  %3914 = vmatmul.f32.gmra.mxu0 %v10404_v6  ;;  %4003 = vmatmul.f32.gmra.mxu1 %v10434_v47 }
 0x402   : > { %v10761_v0 = vadd.f32 %v3762_v38, %v3664_v55  ;;  %4108 = vmatmul.f32.gmra.mxu2 %v10469_v44 }
 0x404   : > { %4289 = vmatmul.f32.gmra.mxu3 %v10434_v47 }
 0x405   : > { %v3372_v32 = vpop.f32.mrf.mxu0  ;;  %v3569_v22 = vpop.f32.mrf.mxu1 }
 0x406   : > { %v3566_v25 = vadd.f32 %v3565_v31, %v3372_v32  ;;  %v3668_v1 = vpop.f32.mrf.mxu2 }
 0x407   : > { %v3768_v18 = vpop.f32.mrf.mxu3 }
 0x408   : > { %v3669_v49 = vadd.f32 %v3668_v1, %v3566_v25  ;;  %3918 = vmatmul.f32.gmra.mxu0 %v10434_v47  ;;  %4007 = vmatmul.f32.gmra.mxu1 %v10467_v35 }
 0x40a   : > { %v10767_v4 = vadd.f32 %v3768_v18, %v3669_v49  ;;  %4116 = vmatmul.f32.gmra.mxu2 %v10498_v60 }
 0x40c   : > { %4293 = vmatmul.f32.gmra.mxu3 %v10467_v35 }
 0x40d   : > { %v3380_v46 = vpop.f32.mrf.mxu0  ;;  %v3573_v44 = vpop.f32.mrf.mxu1 }
 0x40e   : > { %v3570_v62 = vadd.f32 %v3569_v22, %v3380_v46  ;;  %v3673_v56 = vpop.f32.mrf.mxu2 }
 0x40f   : > { %v3774_v63 = vpop.f32.mrf.mxu3 }
 0x410   : > { %v3674_v50 = vadd.f32 %v3673_v56, %v3570_v62  ;;  %3922 = vmatmul.f32.gmra.mxu0 %v10467_v35  ;;  %4011 = vmatmul.f32.gmra.mxu1 %v10496_v34 }
 0x412   : > { %v10773_v3 = vadd.f32 %v3774_v63, %v3674_v50  ;;  %4124 = vmatmul.f32.gmra.mxu2 %v10535_v15 }
 0x414   : > { %4297 = vmatmul.f32.gmra.mxu3 %v10496_v34 }
 0x415   : > { %v3388_v42 = vpop.f32.mrf.mxu0  ;;  %v3577_v60 = vpop.f32.mrf.mxu1 }
 0x416   : > { %v3574_v10 = vadd.f32 %v3573_v44, %v3388_v42  ;;  %v3678_v58 = vpop.f32.mrf.mxu2 }
 0x417   : > { %v3780_v28 = vpop.f32.mrf.mxu3 }
 0x418   : > { %v3679_v59 = vadd.f32 %v3678_v58, %v3574_v10  ;;  %3926 = vmatmul.f32.gmra.mxu0 %v10496_v34  ;;  %4015 = vmatmul.f32.gmra.mxu1 %v10533_v52 }
 0x41a   : > { %v10779_v26 = vadd.f32 %v3780_v28, %v3679_v59  ;;  %4132 = vmatmul.f32.gmra.mxu2 %v10573_v17 }
 0x41c   : > { %4301 = vmatmul.f32.gmra.mxu3 %v10533_v52 }
 0x41d   : > { %v3396_v23 = vpop.f32.mrf.mxu0  ;;  %v3581_v15 = vpop.f32.mrf.mxu1 }
 0x41e   : > { %v3578_v57 = vadd.f32 %v3577_v60, %v3396_v23  ;;  %v3683_v8 = vpop.f32.mrf.mxu2 }
 0x41f   : > { %v3786_v27 = vpop.f32.mrf.mxu3 }
 0x420   : > { %v3684_v48 = vadd.f32 %v3683_v8, %v3578_v57  ;;  %3930 = vmatmul.f32.gmra.mxu0 %v10533_v52  ;;  %4019 = vmatmul.f32.gmra.mxu1 %v10571_v54  ;;  %v13226_v8 = vld [vmem:[#allocation25_spill] sm:$0xff] }
 0x422   : > { %v10785_v51 = vadd.f32 %v3786_v27, %v3684_v48  ;;  %4140 = vmatmul.f32.gmra.mxu2 %v10620_v13 }
 0x424   : > { %4305 = vmatmul.f32.gmra.mxu3 %v10571_v54 }
 0x425   : > { %v3404_v45 = vpop.f32.mrf.mxu0  ;;  %v3585_v17 = vpop.f32.mrf.mxu1 }
 0x426   : > { %v3582_v21 = vadd.f32 %v3581_v15, %v3404_v45  ;;  %v3688_v61 = vpop.f32.mrf.mxu2 }
 0x427   : > { %v3792_v31 = vpop.f32.mrf.mxu3 }
 0x428   : > { %v3689_v37 = vadd.f32 %v3688_v61, %v3582_v21  ;;  %3934 = vmatmul.f32.gmra.mxu0 %v10571_v54  ;;  %4023 = vmatmul.f32.gmra.mxu1 %v10618_v5 }
 0x42a   : > { %v10791_v12 = vadd.f32 %v3792_v31, %v3689_v37  ;;  %4148 = vmatmul.f32.gmra.mxu2 %v10654_v36  ;;  %v13228_v31 = vld [vmem:[#allocation43_spill] sm:$0xff]  ;;  %v13229_v37 = vld [vmem:[#allocation48_spill] sm:$0xff] }
 0x42c   : > { %13222 = vst [vmem:[#allocation58_spill] sm:$0xff] %v10791_v12  ;;  %4309 = vmatmul.f32.gmra.mxu3 %v10618_v5 }
 0x42d   : > { %v3412_v38 = vpop.f32.mrf.mxu0  ;;  %v3589_v13 = vpop.f32.mrf.mxu1 }
 0x42e   : > { %v3586_v55 = vadd.f32 %v3585_v17, %v3412_v38  ;;  %v3693_v32 = vpop.f32.mrf.mxu2 }
 0x42f   : > { %v3798_v22 = vpop.f32.mrf.mxu3 }
 0x430   : > { %v3694_v25 = vadd.f32 %v3693_v32, %v3586_v55  ;;  %3938 = vmatmul.f32.gmra.mxu0 %v10618_v5  ;;  %4027 = vmatmul.f32.gmra.mxu1 %v10652_v33 }
 0x432   : > { %v10797_v1 = vadd.f32 %v3798_v22, %v3694_v25  ;;  %4156 = vmatmul.f32.gmra.mxu2 %v10683_v53 }
 0x434   : > { %13223 = vst [vmem:[#allocation59_spill] sm:$0xff] %v10797_v1  ;;  %4313 = vmatmul.f32.gmra.mxu3 %v10652_v33 }
 0x435   : > { %v3420_v18 = vpop.f32.mrf.mxu0  ;;  %v3593_v36 = vpop.f32.mrf.mxu1 }
 0x436   : > { %v3590_v49 = vadd.f32 %v3589_v13, %v3420_v18  ;;  %v3698_v46 = vpop.f32.mrf.mxu2  ;;  %v13231_v18 = vld [vmem:[#allocation51_spill] sm:$0xff] }
 0x437   : > { %v3804_v44 = vpop.f32.mrf.mxu3 }
 0x438   : > { %v3699_v62 = vadd.f32 %v3698_v46, %v3590_v49  ;;  %3942 = vmatmul.f32.gmra.mxu0 %v10652_v33  ;;  %4031 = vmatmul.f32.gmra.mxu1 %v10681_v14 }
 0x43a   : > { %v10803_v56 = vadd.f32 %v3804_v44, %v3699_v62  ;;  %4164 = vmatmul.f32.gmra.mxu2 %v10711_v24 }
 0x43c   : > { %13224 = vst [vmem:[#allocation60_spill] sm:$0xff] %v10803_v56  ;;  %4317 = vmatmul.f32.gmra.mxu3 %v10681_v14 }
 0x43d   : > { %v3428_v63 = vpop.f32.mrf.mxu0  ;;  %v3597_v53 = vpop.f32.mrf.mxu1 }
 0x43e   : > { %v3594_v50 = vadd.f32 %v3593_v36, %v3428_v63  ;;  %v3703_v42 = vpop.f32.mrf.mxu2  ;;  %v13232_v36 = vld [vmem:[#allocation32_spill] sm:$0xff] }
 0x43f   : > { %v3810_v60 = vpop.f32.mrf.mxu3 }
 0x440   : > { %v3704_v10 = vadd.f32 %v3703_v42, %v3594_v50  ;;  %3946 = vmatmul.f32.gmra.mxu0 %v10681_v14  ;;  %4035 = vmatmul.f32.gmra.mxu1 %v10709_v40  ;;  %v13234_v50 = vld [vmem:[#allocation19_spill] sm:$0xff] }
 0x441   : > { %v13235_v42 = vld [vmem:[#allocation39_spill] sm:$0xff] }
 0x442   : > { %v10809_v58 = vadd.f32 %v3810_v60, %v3704_v10  ;;  %4172 = vmatmul.f32.gmra.mxu2 %v10737_v29 }
 0x444   : > { %13225 = vst [vmem:[#allocation61_spill] sm:$0xff] %v10809_v58  ;;  %4321 = vmatmul.f32.gmra.mxu3 %v10709_v40 }
 0x445   : > { %v3436_v28 = vpop.f32.mrf.mxu0  ;;  %v3601_v24 = vpop.f32.mrf.mxu1 }
 0x446   : > { %v3598_v59 = vadd.f32 %v3597_v53, %v3436_v28  ;;  %v3708_v23 = vpop.f32.mrf.mxu2 }
 0x447   : > { %v3816_v15 = vpop.f32.mrf.mxu3 }
 0x448   : > { %v3709_v57 = vadd.f32 %v3708_v23, %v3598_v59  ;;  %3950 = vmatmul.f32.gmra.mxu0 %v10709_v40  ;;  %4474 = vmatmul.f32.vlgmr.msra.gmra.mxu1 %v13226_v8  ;;  %v13238_v8 = vld [vmem:[#allocation10_spill] sm:$0xff] }
 0x44a   : > { %v10815_v27 = vadd.f32 %v3816_v15, %v3709_v57  ;;  %4615 = vmatmul.f32.vlgmr.msrb.gmra.mxu2 %v10304_v16  ;;  %v13237_v57 = vld [vmem:[#allocation30_spill] sm:$0xff] }
 0x44c   : > { %13227 = vst [vmem:[#allocation25_spill] sm:$0xff] %v10815_v27  ;;  %4700 = vmatmul.f32.vlgmr.msrb.gmra.mxu3 %v10304_v16 }
 0x44d   : > { %v3444_v48 = vpop.f32.mrf.mxu0  ;;  %v3605_v29 = vpop.f32.mrf.mxu1 }
 0x44e   : > { %v3602_v45 = vadd.f32 %v3601_v24, %v3444_v48  ;;  %v3713_v17 = vpop.f32.mrf.mxu2  ;;  %v4845_v48 = vld [vmem:[%s12672_s2 + $0x78] sm:$0xff] }
 0x44f   : > { %v3822_v21 = vpop.f32.mrf.mxu3 }
 0x450   : > { %v3714_v61 = vadd.f32 %v3713_v17, %v3602_v45  ;;  %4375 = vmatmul.f32.vlgmr.msra.gmra.mxu0 %v13228_v31  ;;  %4480 = vmatmul.f32.gmra.mxu1 %v13229_v37 }
 0x452   : > { %v10821_v38 = vadd.f32 %v3822_v21, %v3714_v61  ;;  %4619 = vmatmul.f32.gmra.mxu2 %v10334_v43 }
 0x454   : > { %13230 = vst [vmem:[#allocation43_spill] sm:$0xff] %v10821_v38  ;;  %4704 = vmatmul.f32.gmra.mxu3 %v10334_v43  ;;  %v4836_v38 = vld [vmem:[%s12672_s2 + $0x30] sm:$0xff] }
 0x455   : > { %v3452_v13 = vpop.f32.mrf.mxu0  ;;  %v3609_v55 = vpop.f32.mrf.mxu1 }
 0x456   : > { %v3606_v32 = vadd.f32 %v3605_v29, %v3452_v13  ;;  %v3718_v16 = vpop.f32.mrf.mxu2  ;;  %v10847_v29 = vand.u32 4294901760, %v4845_v48 }
 0x457   : > { %v3828_v22 = vpop.f32.mrf.mxu3 }
 0x458   : > { %v3719_v25 = vadd.f32 %v3718_v16, %v3606_v32  ;;  %4380 = vmatmul.f32.gmra.mxu0 %v13231_v18  ;;  %4486 = vmatmul.f32.gmra.mxu1 %v13232_v36  ;;  %v13240_v32 = vld [vmem:[#allocation6_spill] sm:$0xff]  ;;  %v4844_v16 = vld [vmem:[%s12672_s2 + $0x70] sm:$0xff] }
 0x459   : > { %4848 = vmatpush.msrb.mxu0 %v10847_v29  ;;  %5248 = vmatpush.msra.mxu3 %v10847_v29 }
 0x45a   : > { %v10827_v49 = vadd.f32 %v3828_v22, %v3719_v25  ;;  %4623 = vmatmul.f32.gmra.mxu2 %v10373_v20 }
 0x45c   : > { %13233 = vst [vmem:[#allocation48_spill] sm:$0xff] %v10827_v49  ;;  %4708 = vmatmul.f32.gmra.mxu3 %v10373_v20 }
 0x45d   : > { %v3460_v46 = vpop.f32.mrf.mxu0  ;;  %v3988_v44 = vpop.f32.mrf.mxu1 }
 0x45e   : > { %v3610_v62 = vadd.f32 %v3609_v55, %v3460_v46  ;;  %v3723_v43 = vpop.f32.mrf.mxu2 }
 0x45f   : > { %v3834_v63 = vpop.f32.mrf.mxu3 }
 0x460   : > { %v3724_v53 = vadd.f32 %v3723_v43, %v3610_v62  ;;  %4385 = vmatmul.f32.gmra.mxu0 %v13234_v50  ;;  %4492 = vmatmul.f32.gmra.mxu1 %v13235_v42 }
 0x462   : > { %v10833_v60 = vadd.f32 %v3834_v63, %v3724_v53  ;;  %4627 = vmatmul.f32.gmra.mxu2 %v10404_v6  ;;  %v13241_v63 = vld [vmem:[#allocation42_spill] sm:$0xff] }
 0x463   : > { %v4843_v53 = vld [vmem:[%s12672_s2 + $0x68] sm:$0xff] }
 0x464   : > { %13236 = vst [vmem:[#allocation51_spill] sm:$0xff] %v10833_v60  ;;  %4712 = vmatmul.f32.gmra.mxu3 %v10404_v6  ;;  %v10852_v6 = vsub.f32 %v4845_v48, %v10847_v29  ;;  %v10900_v42 = vand.u32 4294901760, %v4843_v53  ;;  %v13244_v48 = vld [vmem:[#allocation26_spill] sm:$0xff] }
 0x465   : > { %v3903_v10 = vpop.f32.mrf.mxu0  ;;  %v3992_v28 = vpop.f32.mrf.mxu1 }
 0x466   : > { %v3904_v20 = vadd.f32 %v3903_v10, %v10761_v0  ;;  %v4077_v24 = vpop.f32.mrf.mxu2  ;;  %v12866_v17 = vand.u32 4294901760, %v10852_v6  ;;  %5135 = vmatpush.msra.mxu2 %v10852_v6  ;;  %v10905_v10 = vsub.f32 %v4843_v53, %v10900_v42  ;;  %v13249_v53 = vld [vmem:[#allocation57_spill] sm:$0xff] }
 0x467   : > { %v4274_v59 = vpop.f32.mrf.mxu3 }
 0x468   : > { %v10838_v23 = vadd.f32 %v3988_v44, %v3904_v20  ;;  %v10840_v15 = vadd.f32 %v4274_v59, %v4077_v24  ;;  %4390 = vmatmul.f32.gmra.mxu0 %v13237_v57  ;;  %4498 = vmatmul.f32.gmra.mxu1 %v13238_v8  ;;  %v4987_v37 = vsub.f32 %v10852_v6, %v12866_v17  ;;  %v12863_v24 = vand.u32 4294901760, %v10905_v10 }
 0x46a   : > { %4631 = vmatmul.f32.gmra.mxu2 %v10434_v47  ;;  %v4988_v22 = vand.u32 4294901760, %v4987_v37  ;;  %v4999_v8 = vsub.f32 %v10905_v10, %v12863_v24 }
 0x46c   : > { %4716 = vmatmul.f32.gmra.mxu3 %v10434_v47  ;;  %v13239_v47 = vld [vmem:[#allocation37_spill] sm:$0xff]  ;;  %4989 = vmatpush.msrb.mxu1 %v4988_v22 }
 0x46d   : > { %v3907_v0 = vpop.f32.mrf.mxu0  ;;  %v10856_v45 = vpop.f32.mrf.mxu1 }
 0x46e   : > { %v3908_v21 = vadd.f32 %v3907_v0, %v10767_v4  ;;  %v4085_v61 = vpop.f32.mrf.mxu2  ;;  %v10873_v4 = vand.u32 4294901760, %v4844_v16  ;;  %v4842_v0 = vld [vmem:[%s12672_s2 + $0x60] sm:$0xff] }
 0x46f   : > { %v4278_v31 = vpop.f32.mrf.mxu3 }
 0x470   : > { %v10864_v13 = vadd.f32 %v3992_v28, %v3908_v21  ;;  %v10866_v55 = vadd.f32 %v4278_v31, %v4085_v61  ;;  %4395 = vmatmul.f32.gmra.mxu0 %v13239_v47  ;;  %4504 = vmatmul.f32.gmra.mxu1 %v13240_v32  ;;  %v10878_v25 = vsub.f32 %v4844_v16, %v10873_v4  ;;  %v5000_v21 = vand.u32 4294901760, %v4999_v8  ;;  %v4841_v31 = vld [vmem:[%s12672_s2 + $0x58] sm:$0xff] }
 0x471   : > { %4850 = vmatpush.msrb.mxu0 %v10873_v4  ;;  %5250 = vmatpush.msra.mxu3 %v10873_v4  ;;  %v10927_v61 = vand.u32 4294901760, %v4842_v0  ;;  %v10937_v47 = vand.u32 4294901760, %v4841_v31 }
 0x472   : > { %4635 = vmatmul.f32.gmra.mxu2 %v10467_v35  ;;  %v12864_v46 = vand.u32 4294901760, %v10878_v25 }
 0x473   : > { %5138 = vmatpush.msra.mxu2 %v10878_v25  ;;  %4852 = vmatpush.msrb.mxu0 %v10900_v42  ;;  %v10935_v37 = vsub.f32 %v4842_v0, %v10927_v61 }
 0x474   : > { %4720 = vmatmul.f32.gmra.mxu3 %v10467_v35  ;;  %v4993_v43 = vsub.f32 %v10878_v25, %v12864_v46  ;;  %v13242_v35 = vld [vmem:[#allocation53_spill] sm:$0xff] }
 0x475   : > { %v10881_v18 = vpop.f32.mrf.mxu0  ;;  %v10883_v36 = vpop.f32.mrf.mxu1  ;;  %5141 = vmatpush.msra.mxu2 %v10905_v10  ;;  %5252 = vmatpush.msra.mxu3 %v10900_v42  ;;  %v12861_v22 = vand.u32 4294901760, %v10935_v37 }
 0x476   : > { %v10888_v44 = vpop.f32.mrf.mxu2  ;;  %v4994_v50 = vand.u32 4294901760, %v4993_v43  ;;  %4854 = vmatpush.msrb.mxu0 %v10927_v61 }
 0x477   : > { %v10890_v62 = vpop.f32.mrf.mxu3  ;;  %5144 = vmatpush.msra.mxu2 %v10935_v37  ;;  %5254 = vmatpush.msra.mxu3 %v10927_v61 }
 0x478   : > { %4400 = vmatmul.f32.gmra.mxu0 %v13241_v63  ;;  %4510 = vmatmul.f32.gmra.mxu1 %v13242_v35  ;;  %v13248_v35 = vld [vmem:[#allocation54_spill] sm:$0xff] }
 0x479   : > { %4995 = vmatpush.msrb.mxu1 %v4994_v50  ;;  %4856 = vmatpush.msrb.mxu0 %v10937_v47  ;;  %v10958_v50 = vsub.f32 %v4841_v31, %v10937_v47 }
 0x47a   : > { %4639 = vmatmul.f32.gmra.mxu2 %v10496_v34  ;;  %5256 = vmatpush.msra.mxu3 %v10937_v47 }
 0x47b   : > { %5001 = vmatpush.msrb.mxu1 %v5000_v21  ;;  %5147 = vmatpush.msra.mxu2 %v10958_v50 }
 0x47c   : > { %4724 = vmatmul.f32.gmra.mxu3 %v10496_v34  ;;  %v13245_v34 = vld [vmem:[#allocation55_spill] sm:$0xff] }
 0x47d   : > { %v10908_v28 = vpop.f32.mrf.mxu0  ;;  %v10910_v20 = vpop.f32.mrf.mxu1 }
 0x47e   : > { %13243 = vst [vmem:[#allocation32_spill] sm:$0xff] %v10910_v20  ;;  %v10915_v59 = vpop.f32.mrf.mxu2 }
 0x47f   : > { %v10917_v57 = vpop.f32.mrf.mxu3 }
 0x480   : > { %4405 = vmatmul.f32.gmra.mxu0 %v13244_v48  ;;  %4516 = vmatmul.f32.gmra.mxu1 %v13245_v34  ;;  %v12862_v48 = vand.u32 4294901760, %v10958_v50  ;;  %v4840_v34 = vld [vmem:[%s12672_s2 + $0x50] sm:$0xff] }
 0x481   : > { %v10966_v0 = vand.u32 4294901760, %v4840_v34 }
 0x482   : > { %4643 = vmatmul.f32.gmra.mxu2 %v10533_v52  ;;  %v5011_v21 = vsub.f32 %v10958_v50, %v12862_v48  ;;  %v13252_v48 = vld [vmem:[#allocation56_spill] sm:$0xff] }
 0x483   : > { %4858 = vmatpush.msrb.mxu0 %v10966_v0  ;;  %5258 = vmatpush.msra.mxu3 %v10966_v0 }
 0x484   : > { %4728 = vmatmul.f32.gmra.mxu3 %v10533_v52  ;;  %v5005_v52 = vsub.f32 %v10935_v37, %v12861_v22 }
 0x485   : > { %v10940_v32 = vpop.f32.mrf.mxu0  ;;  %v10942_v16 = vpop.f32.mrf.mxu1 }
 0x486   : > { %13246 = vst [vmem:[#allocation19_spill] sm:$0xff] %v10940_v32  ;;  %v10947_v43 = vpop.f32.mrf.mxu2  ;;  %v5006_v8 = vand.u32 4294901760, %v5005_v52  ;;  %v13278_v32 = vand.u32 4294901760, %v10878_v25  ;;  %v13281_v25 = vand.u32 4294901760, %v10958_v50 }
 0x487   : > { %13247 = vst [vmem:[#allocation39_spill] sm:$0xff] %v10942_v16  ;;  %v10950_v63 = vpop.f32.mrf.mxu3 }
 0x488   : > { %4410 = vmatmul.f32.gmra.mxu0 %v13248_v35  ;;  %4522 = vmatmul.f32.gmra.mxu1 %v13249_v53  ;;  %v10979_v35 = vsub.f32 %v4840_v34, %v10966_v0  ;;  %v4839_v34 = vld [vmem:[%s12672_s2 + $0x48] sm:$0xff] }
 0x489   : > { %5007 = vmatpush.msrb.mxu1 %v5006_v8  ;;  %v5012_v8 = vand.u32 4294901760, %v5011_v21  ;;  %v10996_v21 = vand.u32 4294901760, %v4839_v34 }
 0x48a   : > { %4647 = vmatmul.f32.gmra.mxu2 %v10571_v54 }
 0x48b   : > { %5150 = vmatpush.msra.mxu2 %v10979_v35  ;;  %5013 = vmatpush.msrb.mxu1 %v5012_v8 }
 0x48c   : > { %4732 = vmatmul.f32.gmra.mxu3 %v10571_v54  ;;  %v12865_v54 = vand.u32 4294901760, %v10979_v35  ;;  %4860 = vmatpush.msrb.mxu0 %v10996_v21 }
 0x48d   : > { %v10973_v31 = vpop.f32.mrf.mxu0  ;;  %v10975_v52 = vpop.f32.mrf.mxu1  ;;  %5260 = vmatpush.msra.mxu3 %v10996_v21 }
 0x48e   : > { %13250 = vst [vmem:[#allocation30_spill] sm:$0xff] %v10973_v31  ;;  %v10982_v53 = vpop.f32.mrf.mxu2  ;;  %v5017_v24 = vsub.f32 %v10979_v35, %v12865_v54 }
 0x48f   : > { %13251 = vst [vmem:[#allocation10_spill] sm:$0xff] %v10975_v52  ;;  %v10984_v22 = vpop.f32.mrf.mxu3 }
 0x490   : > { %4415 = vmatmul.f32.gmra.mxu0 %v13252_v48  ;;  %4528 = vmatmul.f32.gmra.mxu1 %v10642_v7  ;;  %v5018_v46 = vand.u32 4294901760, %v5017_v24  ;;  %v11001_v48 = vsub.f32 %v4839_v34, %v10996_v21 }
 0x492   : > { %4651 = vmatmul.f32.gmra.mxu2 %v10618_v5  ;;  %5019 = vmatpush.msrb.mxu1 %v5018_v46  ;;  %v12867_v54 = vand.u32 4294901760, %v11001_v48 }
 0x493   : > { %5153 = vmatpush.msra.mxu2 %v11001_v48 }
 0x494   : > { %4736 = vmatmul.f32.gmra.mxu3 %v10618_v5  ;;  %v5023_v34 = vsub.f32 %v11001_v48, %v12867_v54  ;;  %v4838_v5 = vld [vmem:[%s12672_s2 + $0x40] sm:$0xff] }
 0x495   : > { %v11005_v7 = vpop.f32.mrf.mxu0  ;;  %v11007_v8 = vpop.f32.mrf.mxu1  ;;  %v11023_v60 = vand.u32 4294901760, %v4838_v5 }
 0x496   : > { %13253 = vst [vmem:[#allocation37_spill] sm:$0xff] %v11005_v7  ;;  %v11011_v17 = vpop.f32.mrf.mxu2  ;;  %v5024_v46 = vand.u32 4294901760, %v5023_v34 }
 0x497   : > { %13254 = vst [vmem:[#allocation6_spill] sm:$0xff] %v11007_v8  ;;  %v11013_v24 = vpop.f32.mrf.mxu3  ;;  %4862 = vmatpush.msrb.mxu0 %v11023_v60  ;;  %v11028_v49 = vsub.f32 %v4838_v5, %v11023_v60  ;;  %5262 = vmatpush.msra.mxu3 %v11023_v60 }
 0x498   : > { %4420 = vmatmul.f32.gmra.mxu0 %v10635_v39  ;;  %4534 = vmatmul.f32.gmra.mxu1 %v10669_v30 }
 0x499   : > { %5025 = vmatpush.msrb.mxu1 %v5024_v46  ;;  %v12868_v54 = vand.u32 4294901760, %v11028_v49  ;;  %5156 = vmatpush.msra.mxu2 %v11028_v49  ;;  %v13284_v50 = vand.u32 4294901760, %v11028_v49 }
 0x49a   : > { %4655 = vmatmul.f32.gmra.mxu2 %v10652_v33 }
 0x49b   : > { %v5029_v5 = vsub.f32 %v11028_v49, %v12868_v54 }
 0x49c   : > { %4740 = vmatmul.f32.gmra.mxu3 %v10652_v33  ;;  %v4837_v33 = vld [vmem:[%s12672_s2 + $0x38] sm:$0xff] }
 0x49d   : > { %v11031_v39 = vpop.f32.mrf.mxu0  ;;  %v11033_v30 = vpop.f32.mrf.mxu1  ;;  %v5030_v27 = vand.u32 4294901760, %v5029_v5 }
 0x49e   : > { %13255 = vst [vmem:[#allocation42_spill] sm:$0xff] %v11031_v39  ;;  %v11038_v34 = vpop.f32.mrf.mxu2 }
 0x49f   : > { %13256 = vst [vmem:[#allocation53_spill] sm:$0xff] %v11033_v30  ;;  %v11040_v46 = vpop.f32.mrf.mxu3  ;;  %v11053_v30 = vand.u32 4294901760, %v4837_v33  ;;  %5031 = vmatpush.msrb.mxu1 %v5030_v27 }
 0x4a0   : > { %13257 = vst [vmem:[#allocation26_spill] sm:$0xff] %v11038_v34  ;;  %4425 = vmatmul.f32.gmra.mxu0 %v10662_v41  ;;  %4540 = vmatmul.f32.gmra.mxu1 %v10698_v11  ;;  %v11060_v11 = vand.u32 4294901760, %v4836_v38 }
 0x4a1   : > { %13258 = vst [vmem:[#allocation55_spill] sm:$0xff] %v11040_v46  ;;  %4864 = vmatpush.msrb.mxu0 %v11053_v30  ;;  %v11058_v41 = vsub.f32 %v4837_v33, %v11053_v30  ;;  %5264 = vmatpush.msra.mxu3 %v11053_v30 }
 0x4a2   : > { %4659 = vmatmul.f32.gmra.mxu2 %v10681_v14 }
 0x4a3   : > { %v12869_v5 = vand.u32 4294901760, %v11058_v41  ;;  %4866 = vmatpush.msrb.mxu0 %v11060_v11  ;;  %5159 = vmatpush.msra.mxu2 %v11058_v41 }
 0x4a4   : > { %4744 = vmatmul.f32.gmra.mxu3 %v10681_v14 }
 0x4a5   : > { %v11063_v54 = vpop.f32.mrf.mxu0  ;;  %v11065_v58 = vpop.f32.mrf.mxu1  ;;  %v5035_v14 = vsub.f32 %v11058_v41, %v12869_v5  ;;  %5266 = vmatpush.msra.mxu3 %v11060_v11 }
 0x4a6   : > { %13259 = vst [vmem:[#allocation54_spill] sm:$0xff] %v11063_v54  ;;  %v11070_v27 = vpop.f32.mrf.mxu2  ;;  %v4835_v54 = vld [vmem:[%s12672_s2 + $0x28] sm:$0xff] }
 0x4a7   : > { %13260 = vst [vmem:[#allocation57_spill] sm:$0xff] %v11065_v58  ;;  %v11073_v33 = vpop.f32.mrf.mxu3  ;;  %v11081_v58 = vsub.f32 %v4836_v38, %v11060_v11  ;;  %v5036_v8 = vand.u32 4294901760, %v5035_v14  ;;  %v11086_v39 = vand.u32 4294901760, %v4835_v54 }
 0x4a8   : > { %13261 = vst [vmem:[#allocation56_spill] sm:$0xff] %v11070_v27  ;;  %4430 = vmatmul.f32.gmra.mxu0 %v10691_v19  ;;  %4546 = vmatmul.f32.gmra.mxu1 %v10726_v2 }
 0x4a9   : > { %13262 = vst [vmem:[#allocation62_spill] sm:$0xff] %v11073_v33  ;;  %v12870_v5 = vand.u32 4294901760, %v11081_v58  ;;  %5037 = vmatpush.msrb.mxu1 %v5036_v8  ;;  %4868 = vmatpush.msrb.mxu0 %v11086_v39  ;;  %v11093_v19 = vsub.f32 %v4835_v54, %v11086_v39 }
 0x4aa   : > { %4663 = vmatmul.f32.gmra.mxu2 %v10709_v40  ;;  %5268 = vmatpush.msra.mxu3 %v11086_v39 }
 0x4ab   : > { %v5041_v2 = vsub.f32 %v11081_v58, %v12870_v5  ;;  %5162 = vmatpush.msra.mxu2 %v11081_v58  ;;  %v12871_v56 = vand.u32 4294901760, %v11093_v19 }
 0x4ac   : > { %4748 = vmatmul.f32.gmra.mxu3 %v10709_v40 }
 0x4ad   : > { %v11100_v38 = vpop.f32.mrf.mxu0  ;;  %v11102_v14 = vpop.f32.mrf.mxu1  ;;  %v5042_v54 = vand.u32 4294901760, %v5041_v2  ;;  %5165 = vmatpush.msra.mxu2 %v11093_v19  ;;  %v5047_v5 = vsub.f32 %v11093_v19, %v12871_v56  ;;  %v4834_v2 = vld [vmem:[%s12672_s2 + $0x20] sm:$0xff] }
 0x4ae   : > { %13263 = vst [vmem:[#allocation63_spill] sm:$0xff] %v11100_v38  ;;  %v11106_v8 = vpop.f32.mrf.mxu2 }
 0x4af   : > { %13264 = vst [vmem:[#allocation64_spill] sm:$0xff] %v11102_v14  ;;  %v11109_v40 = vpop.f32.mrf.mxu3  ;;  %5043 = vmatpush.msrb.mxu1 %v5042_v54  ;;  %v5048_v38 = vand.u32 4294901760, %v5047_v5  ;;  %v4832_v54 = vld [vmem:[%s12672_s2 + $0x10] sm:$0xff] }
 0x4b0   : > { %13265 = vst [vmem:[#allocation65_spill] sm:$0xff] %v11106_v8  ;;  %4435 = vmatmul.f32.gmra.mxu0 %v10719_v9  ;;  %v11126_v8 = vand.u32 4294901760, %v4834_v2  ;;  %v4833_v9 = vld [vmem:[%s12672_s2 + $0x18] sm:$0xff] }
 0x4b1   : > { %13266 = vst [vmem:[#allocation66_spill] sm:$0xff] %v11109_v40  ;;  %5049 = vmatpush.msrb.mxu1 %v5048_v38  ;;  %v11135_v38 = vand.u32 4294901760, %v4833_v9 }
 0x4b2   : > { %4870 = vmatpush.msrb.mxu0 %v11126_v8  ;;  %v11133_v5 = vsub.f32 %v4834_v2, %v11126_v8  ;;  %5270 = vmatpush.msra.mxu3 %v11126_v8  ;;  %v4831_v2 = vld [vmem:[%s12672_s2 + $0x8] sm:$0xff] }
 0x4b3   : > { %v11165_v27 = vand.u32 4294901760, %v4831_v2 }
 0x4b4   : > { %v12872_v56 = vand.u32 4294901760, %v11133_v5  ;;  %4872 = vmatpush.msrb.mxu0 %v11135_v38  ;;  %5168 = vmatpush.msra.mxu2 %v11133_v5 }
 0x4b5   : > { %v11115_v14 = vpop.f32.mrf.mxu0  ;;  %v11117_v52 = vpop.f32.mrf.mxu1  ;;  %5272 = vmatpush.msra.mxu3 %v11135_v38  ;;  %v11182_v12 = vsub.f32 %v4831_v2, %v11165_v27 }
 0x4b6   : > { %13267 = vst [vmem:[#allocation67_spill] sm:$0xff] %v11115_v14  ;;  %v11119_v7 = vpop.f32.mrf.mxu2  ;;  %v11146_v14 = vand.u32 4294901760, %v4832_v54  ;;  %v5053_v1 = vsub.f32 %v11133_v5, %v12872_v56 }
 0x4b7   : > { %13268 = vst [vmem:[#allocation68_spill] sm:$0xff] %v11117_v52  ;;  %v11124_v40 = vpop.f32.mrf.mxu3  ;;  %v11144_v52 = vsub.f32 %v4833_v9, %v11135_v38 }
 0x4b8   : > { %13269 = vst [vmem:[#allocation69_spill] sm:$0xff] %v11119_v7  ;;  %4874 = vmatpush.msrb.mxu0 %v11146_v14  ;;  %v11163_v33 = vsub.f32 %v4832_v54, %v11146_v14  ;;  %5274 = vmatpush.msra.mxu3 %v11146_v14  ;;  %v5054_v9 = vand.u32 4294901760, %v5053_v1 }
 0x4b9   : > { %13270 = vst [vmem:[#allocation70_spill] sm:$0xff] %v11124_v40  ;;  %5171 = vmatpush.msra.mxu2 %v11144_v52 }
 0x4ba   : > { %v12873_v31 = vand.u32 4294901760, %v11163_v33  ;;  %4876 = vmatpush.msrb.mxu0 %v11165_v27  ;;  %5276 = vmatpush.msra.mxu3 %v11165_v27 }
 0x4bb   : > { %5174 = vmatpush.msra.mxu2 %v11163_v33  ;;  %5055 = vmatpush.msrb.mxu1 %v5054_v9 }
 0x4bc   : > { %v5065_v1 = vsub.f32 %v11163_v33, %v12873_v31 }
 0x4bd   : > { %v11153_v40 = vpop.f32.mrf.mxu0  ;;  %v11155_v7 = vpop.f32.mrf.mxu1  ;;  %5177 = vmatpush.msra.mxu2 %v11182_v12 }
 0x4be   : > { %13271 = vst [vmem:[#allocation71_spill] sm:$0xff] %v11153_v40  ;;  %v11168_v16 = vpop.f32.mrf.mxu2  ;;  %v13275_v40 = vand.u32 4294901760, %v11144_v52  ;;  %v5066_v2 = vand.u32 4294901760, %v5065_v1 }
 0x4bf   : > { %13272 = vst [vmem:[#allocation72_spill] sm:$0xff] %v11155_v7  ;;  %v4830_v7 = vld [vmem:[%s12672_s2] sm:$0xff]  ;;  %v11174_v56 = vpop.f32.mrf.mxu3 }
 0x4c0   : > { %13273 = vst [vmem:[#allocation73_spill] sm:$0xff] %v11168_v16  ;;  %v5059_v54 = vsub.f32 %v11144_v52, %v13275_v40  ;;  %v11185_v16 = vand.u32 4294901760, %v4830_v7  ;;  %v12874_v40 = vand.u32 4294901760, %v11182_v12 }
 0x4c1   : > { %13274 = vst [vmem:[#allocation74_spill] sm:$0xff] %v11174_v56 }
 0x4c2   : > { %v5060_v56 = vand.u32 4294901760, %v5059_v54  ;;  %v11194_v46 = vsub.f32 %v4830_v7, %v11185_v16  ;;  %4878 = vmatpush.msrb.mxu0 %v11185_v16  ;;  %5278 = vmatpush.msra.mxu3 %v11185_v16  ;;  %v5071_v9 = vsub.f32 %v11182_v12, %v12874_v40  ;;  %v13276_v54 = vand.u32 4294901760, %v10852_v6 }
 0x4c4   : > { %5061 = vmatpush.msrb.mxu1 %v5060_v56  ;;  %5361 = vmatpush.msra.mxu0 %v13276_v54  ;;  %v5076_v31 = vand.u32 4294901760, %v11194_v46  ;;  %v5072_v20 = vand.u32 4294901760, %v5071_v9  ;;  %v13279_v54 = vand.u32 4294901760, %v10905_v10  ;;  %v13282_v9 = vand.u32 4294901760, %v10979_v35 }
 0x4c5   : > { %5180 = vmatpush.msra.mxu2 %v11194_v46  ;;  %v11205_v34 = vpop.f32.mrf.mxu0  ;;  %v4475_v7 = vpop.f32.mrf.mxu1 }
 0x4c6   : > { %13277 = vst [vmem:[#allocation75_spill] sm:$0xff] %v11205_v34  ;;  %5067 = vmatpush.msrb.mxu1 %v5066_v2  ;;  %5365 = vmatpush.msra.mxu0 %v13278_v32  ;;  %v11209_v56 = vpop.f32.mrf.mxu2  ;;  %v5077_v1 = vsub.f32 %v11194_v46, %v5076_v31  ;;  %v13280_v34 = vand.u32 4294901760, %v10935_v37  ;;  %v13283_v37 = vand.u32 4294901760, %v11001_v48 }
 0x4c7   : > { %v11214_v6 = vpop.f32.mrf.mxu3 }
 0x4c8   : > { %5073 = vmatpush.msrb.mxu1 %v5072_v20  ;;  %5369 = vmatpush.msra.mxu0 %v13279_v54  ;;  %v5078_v40 = vand.u32 4294901760, %v5077_v1  ;;  %v4283_v54 = vadd.f32 %v10890_v62, %v10888_v44 }
 0x4ca   : > { %5373 = vmatpush.msra.mxu0 %v13280_v34  ;;  %5079 = vmatpush.msrb.mxu1 %v5078_v40 }
 0x4cc   : > { %5476 = vmatpush.msra.mxu1 %v10847_v29  ;;  %5377 = vmatpush.msra.mxu0 %v13281_v25 }
 0x4cd   : > { %v4376_v32 = vpop.f32.mrf.mxu0  ;;  %v4481_v2 = vpop.f32.mrf.mxu1 }
 0x4ce   : > { %5478 = vmatpush.msra.mxu1 %v10873_v4  ;;  %5381 = vmatpush.msra.mxu0 %v13282_v9  ;;  %v4377_v10 = vadd.f32 %v4376_v32, %v10840_v15  ;;  %v4616_v20 = vpop.f32.mrf.mxu2  ;;  %v13285_v4 = vand.u32 4294901760, %v11058_v41 }
 0x4cf   : > { %v4701_v1 = vpop.f32.mrf.mxu3 }
 0x4d0   : > { %5480 = vmatpush.msra.mxu1 %v10900_v42  ;;  %5385 = vmatpush.msra.mxu0 %v13283_v37  ;;  %v4476_v29 = vadd.f32 %v4475_v7, %v4377_v10  ;;  %v13286_v42 = vand.u32 4294901760, %v11081_v58  ;;  %v13288_v7 = vand.u32 4294901760, %v11133_v5  ;;  %v13289_v58 = vand.u32 4294901760, %v11144_v52 }
 0x4d1   : > { %v13291_v52 = vand.u32 4294901760, %v11182_v12 }
 0x4d2   : > { %5482 = vmatpush.msra.mxu1 %v10927_v61  ;;  %5389 = vmatpush.msra.mxu0 %v13284_v50  ;;  %v4617_v34 = vadd.f32 %v4616_v20, %v4476_v29 }
 0x4d4   : > { %5484 = vmatpush.msra.mxu1 %v10937_v47  ;;  %5393 = vmatpush.msra.mxu0 %v13285_v4  ;;  %v4702_v15 = vadd.f32 %v4701_v1, %v4617_v34  ;;  %v13287_v47 = vand.u32 4294901760, %v11093_v19  ;;  %v4287_v1 = vadd.f32 %v10917_v57, %v10915_v59  ;;  %v13293_v57 = vld [vmem:[#allocation8_spill] sm:$0xff] }
 0x4d5   : > { %v4381_v35 = vpop.f32.mrf.mxu0  ;;  %v4487_v40 = vpop.f32.mrf.mxu1 }
 0x4d6   : > { %5486 = vmatpush.msra.mxu1 %v10966_v0  ;;  %5397 = vmatpush.msra.mxu0 %v13286_v42  ;;  %7903 = vrcp.f32 %v4702_v15  ;;  %v4382_v61 = vadd.f32 %v4381_v35, %v10866_v55  ;;  %v4620_v48 = vpop.f32.mrf.mxu2  ;;  %v4291_v42 = vadd.f32 %v10950_v63, %v10947_v43 }
 0x4d7   : > { %v4705_v49 = vpop.f32.mrf.mxu3 }
 0x4d8   : > { %5488 = vmatpush.msra.mxu1 %v10996_v21  ;;  %5401 = vmatpush.msra.mxu0 %v13287_v47  ;;  %v4482_v41 = vadd.f32 %v4481_v2, %v4382_v61 }
 0x4da   : > { %5490 = vmatpush.msra.mxu1 %v11023_v60  ;;  %5405 = vmatpush.msra.mxu0 %v13288_v7  ;;  %v4621_v0 = vadd.f32 %v4620_v48, %v4482_v41  ;;  %v13290_v60 = vand.u32 4294901760, %v11163_v33  ;;  %v13292_v33 = vld [vmem:[#allocation11_spill] sm:$0xff]  ;;  %v13294_v48 = vld [vmem:[#allocation17_spill] sm:$0xff] }
 0x4dc   : > { %5492 = vmatpush.msra.mxu1 %v11053_v30  ;;  %5409 = vmatpush.msra.mxu0 %v13289_v58  ;;  %v7904_v55 = vpop.eup %7903  ;;  %v4706_v21 = vadd.f32 %v4705_v49, %v4621_v0 }
 0x4dd   : > { %v4765_v25 = vmul.f32 %v7904_v55, %v4702_v15  ;;  %v4386_v19 = vpop.f32.mrf.mxu0  ;;  %v4493_v32 = vpop.f32.mrf.mxu1 }
 0x4de   : > { %5494 = vmatpush.msra.mxu1 %v11060_v11  ;;  %5413 = vmatpush.msra.mxu0 %v13290_v60  ;;  %7905 = vrcp.f32 %v4706_v21  ;;  %v4387_v5 = vadd.f32 %v4386_v19, %v4283_v54  ;;  %v4624_v2 = vpop.f32.mrf.mxu2  ;;  %v3912_v54 = vadd.f32 %v10881_v18, %v10773_v3 }
 0x4df   : > { %v4778_v30 = vsub.f32 2.0, %v4765_v25  ;;  %v4709_v9 = vpop.f32.mrf.mxu3 }
 0x4e0   : > { %5496 = vmatpush.msra.mxu1 %v11086_v39  ;;  %5417 = vmatpush.msra.mxu0 %v13291_v52  ;;  %v4488_v44 = vadd.f32 %v4487_v40, %v4387_v5  ;;  %v4295_v52 = vadd.f32 %v10984_v22, %v10982_v53 }
 0x4e1   : > { %v4791_v62 = vmul.f32 %v7904_v55, %v4778_v30  ;;  %v3997_v30 = vadd.f32 %v10856_v45, %v3912_v54 }
 0x4e2   : > { %5498 = vmatpush.msra.mxu1 %v11126_v8  ;;  %5421 = vmatpush.msra.mxu0 %v5076_v31  ;;  %v4625_v11 = vadd.f32 %v4624_v2, %v4488_v44 }
 0x4e3   : > { %v4804_v10 = vmul.f32 %v4791_v62, %v13292_v33  ;;  %v13297_v62 = vld [vmem:[#allocation15_spill] sm:$0xff] }
 0x4e4   : > { %5500 = vmatpush.msra.mxu1 %v11135_v38  ;;  %v7906_v20 = vpop.eup %7905  ;;  %v4710_v39 = vadd.f32 %v4709_v9, %v4625_v11  ;;  %v13298_v11 = vld [vmem:[#allocation38_spill] sm:$0xff] }
 0x4e5   : > { %v4817_v12 = vmul.f32 %v4804_v10, %v10838_v23  ;;  %v4766_v37 = vmul.f32 %v7906_v20, %v4706_v21  ;;  %v4391_v29 = vpop.f32.mrf.mxu0  ;;  %v4499_v50 = vpop.f32.mrf.mxu1  ;;  %v2398_v33 = vadd.f32 %v13298_v11, %v13297_v62 }
 0x4e6   : > { %5502 = vmatpush.msra.mxu1 %v11146_v14  ;;  %7907 = vrcp.f32 %v4710_v39  ;;  %v4392_v46 = vadd.f32 %v4391_v29, %v4287_v1  ;;  %v4628_v31 = vpop.f32.mrf.mxu2  ;;  %v3916_v29 = vadd.f32 %v10908_v28, %v10779_v26 }
 0x4e7   : > { %v4779_v8 = vsub.f32 2.0, %v4766_v37  ;;  %v4713_v34 = vpop.f32.mrf.mxu3  ;;  %v11266_v4 = vand.u32 4294901760, %v4817_v12 }
 0x4e8   : > { %5504 = vmatpush.msra.mxu1 %v11165_v27  ;;  %v4494_v38 = vadd.f32 %v4493_v32, %v4392_v46  ;;  %v13295_v27 = vld [vmem:[#allocation44_spill] sm:$0xff]  ;;  %v13296_v32 = vld [vmem:[#allocation29_spill] sm:$0xff] }
 0x4e9   : > { %v4792_v15 = vmul.f32 %v7906_v20, %v4779_v8  ;;  %5081 = vmatmul.f32.vlgmr.msrb.gmra.mxu1 %v11266_v4  ;;  %v4880_v23 = vsub.f32 %v4817_v12, %v11266_v4  ;;  %v2394_v49 = vadd.f32 %v13295_v27, %v13294_v48  ;;  %v13299_v8 = vld [vmem:[#allocation36_spill] sm:$0xff] }
 0x4ea   : > { %v4629_v59 = vadd.f32 %v4628_v31, %v4494_v38  ;;  %5506 = vmatpush.msra.mxu1 %v11185_v16 }
 0x4eb   : > { %v4805_v14 = vmul.f32 %v4792_v15, %v13293_v57  ;;  %5183 = vmatmul.f32.vlgmr.msra.gmra.mxu2 %v4880_v23  ;;  %v4881_v35 = vand.u32 4294901760, %v4880_v23  ;;  %v2479_v60 = vadd.f32 %v13296_v32, %v2394_v49 }
 0x4ec   : > { %v7908_v40 = vpop.eup %7907  ;;  %v4714_v61 = vadd.f32 %v4713_v34, %v4629_v59  ;;  %v2483_v34 = vadd.f32 %v13299_v8, %v2398_v33  ;;  %v4001_v59 = vadd.f32 %v10883_v36, %v3916_v29 }
 0x4ed   : > { %v4767_v47 = vmul.f32 %v7908_v40, %v4710_v39  ;;  %v4396_v41 = vpop.f32.mrf.mxu0  ;;  %v4505_v7 = vpop.f32.mrf.mxu1  ;;  %5282 = vmatmul.f32.vlgmr.msra.gmra.mxu3 %v4881_v35  ;;  %v4882_v0 = vsub.f32 %v4880_v23, %v4881_v35  ;;  %v4818_v58 = vmul.f32 %v4805_v14, %v10864_v13  ;;  %v4299_v14 = vadd.f32 %v11013_v24, %v11011_v17 }
 0x4ee   : > { %7909 = vrcp.f32 %v4714_v61  ;;  %v4397_v16 = vadd.f32 %v4396_v41, %v4291_v42  ;;  %v4632_v55 = vpop.f32.mrf.mxu2  ;;  %v13301_v42 = vld [vmem:[#allocation7_spill] sm:$0xff] }
 0x4ef   : > { %v4780_v21 = vsub.f32 2.0, %v4767_v47  ;;  %v4717_v25 = vpop.f32.mrf.mxu3  ;;  %v4883_v43 = vand.u32 4294901760, %v4882_v0  ;;  %v11280_v63 = vand.u32 4294901760, %v4818_v58  ;;  %v13302_v0 = vld [vmem:[#allocation19_spill] sm:$0xff] }
 0x4f0   : > { %v4500_v19 = vadd.f32 %v4499_v50, %v4397_v16 }
 0x4f1   : > { %v4793_v5 = vmul.f32 %v7908_v40, %v4780_v21  ;;  %4884 = vmatmul.f32.vlgmr.msrb.gmra.mxu0 %v4883_v43  ;;  %5085 = vmatmul.f32.gmra.mxu1 %v11280_v63  ;;  %v4888_v13 = vsub.f32 %v4818_v58, %v11280_v63  ;;  %v13300_v40 = vld [vmem:[#allocation23_spill] sm:$0xff]  ;;  %v3920_v58 = vadd.f32 %v13302_v0, %v10785_v51  ;;  %v13303_v21 = vld [vmem:[#allocation41_spill] sm:$0xff] }
 0x4f2   : > { %v4633_v2 = vadd.f32 %v4632_v55, %v4500_v19 }
 0x4f3   : > { %v4806_v9 = vmul.f32 %v4793_v5, %v2479_v60  ;;  %5188 = vmatmul.f32.gmra.mxu2 %v4888_v13  ;;  %v4889_v3 = vand.u32 4294901760, %v4888_v13  ;;  %v13304_v60 = vld [vmem:[#allocation32_spill] sm:$0xff] }
 0x4f4   : > { %v7910_v18 = vpop.eup %7909  ;;  %v4718_v44 = vadd.f32 %v4717_v25, %v4633_v2  ;;  %v4005_v5 = vadd.f32 %v13304_v60, %v3920_v58  ;;  %v13319_v60 = vld [vmem:[#allocation31_spill] sm:$0xff] }
 0x4f5   : > { %v4768_v10 = vmul.f32 %v7910_v18, %v4714_v61  ;;  %v4401_v20 = vpop.f32.mrf.mxu0  ;;  %v4511_v1 = vpop.f32.mrf.mxu1  ;;  %5288 = vmatmul.f32.gmra.mxu3 %v4889_v3  ;;  %v4890_v39 = vsub.f32 %v4888_v13, %v4889_v3  ;;  %v4819_v12 = vmul.f32 %v4806_v9, %v3997_v30  ;;  %v2402_v61 = vadd.f32 %v13301_v42, %v13300_v40  ;;  %v13305_v30 = vld [vmem:[#allocation26_spill] sm:$0xff]  ;;  %v13306_v9 = vld [vmem:[#allocation55_spill] sm:$0xff]  ;;  %v13313_v40 = vld [vmem:[#allocation56_spill] sm:$0xff] }
 0x4f6   : > { %7911 = vrcp.f32 %v4718_v44  ;;  %v4402_v37 = vadd.f32 %v4401_v20, %v4295_v52  ;;  %v4636_v45 = vpop.f32.mrf.mxu2  ;;  %v4303_v3 = vadd.f32 %v13306_v9, %v13305_v30  ;;  %v13307_v52 = vld [vmem:[#allocation22_spill] sm:$0xff] }
 0x4f7   : > { %v4781_v50 = vsub.f32 2.0, %v4768_v10  ;;  %v4721_v46 = vpop.f32.mrf.mxu3  ;;  %v4891_v31 = vand.u32 4294901760, %v4890_v39  ;;  %v11292_v22 = vand.u32 4294901760, %v4819_v12  ;;  %v2487_v25 = vadd.f32 %v13303_v21, %v2402_v61  ;;  %v13314_v42 = vld [vmem:[#allocation62_spill] sm:$0xff] }
 0x4f8   : > { %v4506_v53 = vadd.f32 %v4505_v7, %v4402_v37  ;;  %v13310_v37 = vld [vmem:[#allocation30_spill] sm:$0xff]  ;;  %v4307_v61 = vadd.f32 %v13314_v42, %v13313_v40 }
 0x4f9   : > { %v4794_v38 = vmul.f32 %v7910_v18, %v4781_v50  ;;  %4892 = vmatmul.f32.gmra.mxu0 %v4891_v31  ;;  %5089 = vmatmul.f32.gmra.mxu1 %v11292_v22  ;;  %v4896_v15 = vsub.f32 %v4819_v12, %v11292_v22  ;;  %v13309_v12 = vld [vmem:[#allocation58_spill] sm:$0xff] }
 0x4fa   : > { %v4637_v23 = vadd.f32 %v4636_v45, %v4506_v53  ;;  %v3924_v45 = vadd.f32 %v13310_v37, %v13309_v12  ;;  %v13320_v9 = vld [vmem:[#allocation10_spill] sm:$0xff] }
 0x4fb   : > { %v4807_v57 = vmul.f32 %v4794_v38, %v2483_v34  ;;  %5193 = vmatmul.f32.gmra.mxu2 %v4896_v15  ;;  %v4897_v26 = vand.u32 4294901760, %v4896_v15  ;;  %v13311_v34 = vld [vmem:[#allocation52_spill] sm:$0xff]  ;;  %v13328_v42 = vld [vmem:[#allocation6_spill] sm:$0xff] }
 0x4fc   : > { %v7912_v28 = vpop.eup %7911  ;;  %v4722_v35 = vadd.f32 %v4721_v46, %v4637_v23 }
 0x4fd   : > { %v4769_v48 = vmul.f32 %v7912_v28, %v4718_v44  ;;  %v4406_v27 = vpop.f32.mrf.mxu0  ;;  %v4517_v49 = vpop.f32.mrf.mxu1  ;;  %5294 = vmatmul.f32.gmra.mxu3 %v4897_v26  ;;  %v4898_v47 = vsub.f32 %v4896_v15, %v4897_v26  ;;  %v4820_v41 = vmul.f32 %v4807_v57, %v4001_v59  ;;  %v13308_v44 = vld [vmem:[#allocation12_spill] sm:$0xff]  ;;  %v13312_v57 = vld [vmem:[#allocation39_spill] sm:$0xff] }
 0x4fe   : > { %7913 = vrcp.f32 %v4722_v35  ;;  %v4407_v7 = vadd.f32 %v4406_v27, %v4299_v14  ;;  %v4640_v36 = vpop.f32.mrf.mxu2  ;;  %v2406_v62 = vadd.f32 %v13308_v44, %v13307_v52  ;;  %v4009_v26 = vadd.f32 %v13312_v57, %v3924_v45  ;;  %v13315_v27 = vld [vmem:[#allocation28_spill] sm:$0xff] }
 0x4ff   : > { %v4782_v16 = vsub.f32 2.0, %v4769_v48  ;;  %v4725_v55 = vpop.f32.mrf.mxu3  ;;  %v4899_v54 = vand.u32 4294901760, %v4898_v47  ;;  %v11304_v17 = vand.u32 4294901760, %v4820_v41 }
 0x500   : > { %v4512_v24 = vadd.f32 %v4511_v1, %v4407_v7  ;;  %v2491_v38 = vadd.f32 %v13311_v34, %v2406_v62  ;;  %v13321_v62 = vld [vmem:[#allocation65_spill] sm:$0xff] }
 0x501   : > { %v4795_v43 = vmul.f32 %v7912_v28, %v4782_v16  ;;  %4900 = vmatmul.f32.gmra.mxu0 %v4899_v54  ;;  %5093 = vmatmul.f32.gmra.mxu1 %v11304_v17  ;;  %v4904_v19 = vsub.f32 %v4820_v41, %v11304_v17  ;;  %v13318_v54 = vld [vmem:[#allocation37_spill] sm:$0xff] }
 0x502   : > { %v4641_v32 = vadd.f32 %v4640_v36, %v4512_v24 }
 0x503   : > { %v4808_v13 = vmul.f32 %v4795_v43, %v2487_v25  ;;  %5198 = vmatmul.f32.gmra.mxu2 %v4904_v19  ;;  %v4905_v51 = vand.u32 4294901760, %v4904_v19 }
 0x504   : > { %v7914_v2 = vpop.eup %7913  ;;  %v4726_v18 = vadd.f32 %v4725_v55, %v4641_v32  ;;  %v13317_v55 = vld [vmem:[#allocation59_spill] sm:$0xff] }
 0x505   : > { %v4770_v11 = vmul.f32 %v7914_v2, %v4722_v35  ;;  %v4411_v33 = vpop.f32.mrf.mxu0  ;;  %5300 = vmatmul.f32.gmra.mxu3 %v4905_v51  ;;  %v4906_v10 = vsub.f32 %v4904_v19, %v4905_v51  ;;  %v4821_v20 = vmul.f32 %v4808_v13, %v4005_v5  ;;  %v4523_v50 = vpop.f32.mrf.mxu1  ;;  %v3928_v24 = vadd.f32 %v13318_v54, %v13317_v55 }
 0x506   : > { %7915 = vrcp.f32 %v4726_v18  ;;  %v4412_v1 = vadd.f32 %v4411_v33, %v4303_v3  ;;  %v4644_v39 = vpop.f32.mrf.mxu2 }
 0x507   : > { %v4783_v29 = vsub.f32 2.0, %v4770_v11  ;;  %v4729_v46 = vpop.f32.mrf.mxu3  ;;  %v4907_v31 = vand.u32 4294901760, %v4906_v10  ;;  %v11316_v53 = vand.u32 4294901760, %v4821_v20  ;;  %v4013_v3 = vadd.f32 %v13320_v9, %v3928_v24  ;;  %v13322_v11 = vld [vmem:[#allocation66_spill] sm:$0xff] }
 0x508   : > { %v4518_v8 = vadd.f32 %v4517_v49, %v4412_v1  ;;  %v13316_v49 = vld [vmem:[#allocation16_spill] sm:$0xff]  ;;  %v4311_v33 = vadd.f32 %v13322_v11, %v13321_v62  ;;  %v13324_v1 = vld [vmem:[#allocation18_spill] sm:$0xff] }
 0x509   : > { %v4796_v15 = vmul.f32 %v7914_v2, %v4783_v29  ;;  %4908 = vmatmul.f32.gmra.mxu0 %v4907_v31  ;;  %5097 = vmatmul.f32.gmra.mxu1 %v11316_v53  ;;  %v4912_v23 = vsub.f32 %v4821_v20, %v11316_v53  ;;  %v2410_v47 = vadd.f32 %v13316_v49, %v13315_v27  ;;  %v13323_v20 = vld [vmem:[#allocation27_spill] sm:$0xff]  ;;  %v13325_v31 = vld [vmem:[#allocation60_spill] sm:$0xff] }
 0x50a   : > { %v4645_v59 = vadd.f32 %v4644_v39, %v4518_v8  ;;  %v2414_v39 = vadd.f32 %v13324_v1, %v13323_v20  ;;  %v13326_v8 = vld [vmem:[#allocation42_spill] sm:$0xff] }
 0x50b   : > { %v4809_v28 = vmul.f32 %v4796_v15, %v2491_v38  ;;  %5203 = vmatmul.f32.gmra.mxu2 %v4912_v23  ;;  %v4913_v14 = vand.u32 4294901760, %v4912_v23  ;;  %v2495_v5 = vadd.f32 %v13319_v60, %v2410_v47  ;;  %v3932_v34 = vadd.f32 %v13326_v8, %v13325_v31  ;;  %v13333_v60 = vld [vmem:[#allocation61_spill] sm:$0xff] }
 0x50c   : > { %v7916_v35 = vpop.eup %7915  ;;  %v4730_v48 = vadd.f32 %v4729_v46, %v4645_v59 }
 0x50d   : > { %v4771_v41 = vmul.f32 %v7916_v35, %v4726_v18  ;;  %v4416_v7 = vpop.f32.mrf.mxu0  ;;  %5306 = vmatmul.f32.gmra.mxu3 %v4913_v14  ;;  %v4914_v36 = vsub.f32 %v4912_v23, %v4913_v14  ;;  %v4822_v0 = vmul.f32 %v4809_v28, %v4009_v26  ;;  %v4529_v51 = vpop.f32.mrf.mxu1  ;;  %v13327_v26 = vld [vmem:[#allocation13_spill] sm:$0xff] }
 0x50e   : > { %7917 = vrcp.f32 %v4730_v48  ;;  %v4417_v58 = vadd.f32 %v4416_v7, %v4307_v61  ;;  %v4648_v16 = vpop.f32.mrf.mxu2  ;;  %v2499_v28 = vadd.f32 %v13327_v26, %v2414_v39  ;;  %v4017_v61 = vadd.f32 %v13328_v42, %v3932_v34  ;;  %v13330_v7 = vld [vmem:[#allocation70_spill] sm:$0xff]  ;;  %v13341_v26 = vld [vmem:[#allocation25_spill] sm:$0xff] }
 0x50f   : > { %v4784_v21 = vsub.f32 2.0, %v4771_v41  ;;  %v4733_v25 = vpop.f32.mrf.mxu3  ;;  %v4915_v43 = vand.u32 4294901760, %v4914_v36  ;;  %v11328_v19 = vand.u32 4294901760, %v4822_v0  ;;  %v13329_v41 = vld [vmem:[#allocation69_spill] sm:$0xff] }
 0x510   : > { %v4524_v32 = vadd.f32 %v4523_v50, %v4417_v58  ;;  %v4315_v36 = vadd.f32 %v13330_v7, %v13329_v41  ;;  %v13331_v58 = vld [vmem:[#allocation33_spill] sm:$0xff] }
 0x511   : > { %v4797_v13 = vmul.f32 %v7916_v35, %v4784_v21  ;;  %4916 = vmatmul.f32.gmra.mxu0 %v4915_v43  ;;  %5101 = vmatmul.f32.gmra.mxu1 %v11328_v19  ;;  %v4920_v2 = vsub.f32 %v4822_v0, %v11328_v19 }
 0x512   : > { %v4649_v30 = vadd.f32 %v4648_v16, %v4524_v32  ;;  %v13332_v16 = vld [vmem:[#allocation24_spill] sm:$0xff] }
 0x513   : > { %v4810_v18 = vmul.f32 %v4797_v13, %v2495_v5  ;;  %5208 = vmatmul.f32.gmra.mxu2 %v4920_v2  ;;  %v4921_v52 = vand.u32 4294901760, %v4920_v2  ;;  %v2418_v55 = vadd.f32 %v13332_v16, %v13331_v58  ;;  %v13334_v5 = vld [vmem:[#allocation54_spill] sm:$0xff] }
 0x514   : > { %v7918_v44 = vpop.eup %7917  ;;  %v4734_v10 = vadd.f32 %v4733_v25, %v4649_v30  ;;  %v3936_v13 = vadd.f32 %v13334_v5, %v13333_v60  ;;  %v11375_v60 = vld [vmem:[%s8149_s10] sm:$0xff]  ;;  %v11380_v5 = vld [vmem:[%s8149_s10 + $0x38] sm:$0xff] }
 0x515   : > { %v4772_v12 = vmul.f32 %v7918_v44, %v4730_v48  ;;  %v4421_v37 = vpop.f32.mrf.mxu0  ;;  %5312 = vmatmul.f32.gmra.mxu3 %v4921_v52  ;;  %v4922_v45 = vsub.f32 %v4920_v2, %v4921_v52  ;;  %v4823_v29 = vmul.f32 %v4810_v18, %v4013_v3  ;;  %v4535_v27 = vpop.f32.mrf.mxu1  ;;  %v13335_v18 = vld [vmem:[#allocation35_spill] sm:$0xff]  ;;  %5573 = vrot.lane.b32.xlu0 %v11375_v60, %s8030_s26 }
 0x516   : > { %7919 = vrcp.f32 %v4734_v10  ;;  %v4422_v50 = vadd.f32 %v4421_v37, %v4311_v33  ;;  %v4652_v46 = vpop.f32.mrf.mxu2  ;;  %v2503_v52 = vadd.f32 %v13335_v18, %v2418_v55  ;;  %v13336_v33 = vld [vmem:[#allocation53_spill] sm:$0xff]  ;;  %v13338_v37 = vld [vmem:[#allocation74_spill] sm:$0xff]  ;;  %5587 = vrot.lane.b32.xlu1 %v11380_v5, %s8030_s26  ;;  %v13348_v18 = vld [vmem:[#allocation67_spill] sm:$0xff] }
 0x517   : > { %v4785_v38 = vsub.f32 2.0, %v4772_v12  ;;  %v4737_v15 = vpop.f32.mrf.mxu3  ;;  %v4923_v23 = vand.u32 4294901760, %v4922_v45  ;;  %v11340_v59 = vand.u32 4294901760, %v4823_v29  ;;  %v13337_v12 = vld [vmem:[#allocation73_spill] sm:$0xff] }
 0x518   : > { %v4530_v57 = vadd.f32 %v4529_v51, %v4422_v50  ;;  %v4319_v45 = vadd.f32 %v13338_v37, %v13337_v12  ;;  %v13339_v50 = vld [vmem:[#allocation45_spill] sm:$0xff] }
 0x519   : > { %v4798_v14 = vmul.f32 %v7918_v44, %v4785_v38  ;;  %4924 = vmatmul.f32.gmra.mxu0 %v4923_v23  ;;  %5105 = vmatmul.f32.gmra.mxu1 %v11340_v59  ;;  %v4928_v35 = vsub.f32 %v4823_v29, %v11340_v59 }
 0x51a   : > { %v4653_v40 = vadd.f32 %v4652_v46, %v4530_v57  ;;  %v13340_v46 = vld [vmem:[#allocation14_spill] sm:$0xff] }
 0x51b   : > { %v4811_v48 = vmul.f32 %v4798_v14, %v2499_v28  ;;  %5213 = vmatmul.f32.gmra.mxu2 %v4928_v35  ;;  %v4929_v49 = vand.u32 4294901760, %v4928_v35  ;;  %v2422_v31 = vadd.f32 %v13340_v46, %v13339_v50  ;;  %v13342_v28 = vld [vmem:[#allocation63_spill] sm:$0xff] }
 0x51c   : > { %v7920_v47 = vpop.eup %7919  ;;  %v4738_v0 = vadd.f32 %v4737_v15, %v4653_v40  ;;  %v3940_v14 = vadd.f32 %v13342_v28, %v13341_v26 }
 0x51d   : > { %v4773_v54 = vmul.f32 %v7920_v47, %v4734_v10  ;;  %v4426_v24 = vpop.f32.mrf.mxu0  ;;  %5318 = vmatmul.f32.gmra.mxu3 %v4929_v49  ;;  %v4930_v21 = vsub.f32 %v4928_v35, %v4929_v49  ;;  %v4824_v25 = vmul.f32 %v4811_v48, %v4017_v61  ;;  %v4021_v10 = vadd.f32 %v13336_v33, %v3936_v13  ;;  %v4541_v34 = vpop.f32.mrf.mxu1 }
 0x51e   : > { %7921 = vrcp.f32 %v4738_v0  ;;  %v4427_v43 = vadd.f32 %v4426_v24, %v4315_v36  ;;  %v4656_v32 = vpop.f32.mrf.mxu2  ;;  %v13345_v24 = vld [vmem:[#allocation46_spill] sm:$0xff] }
 0x51f   : > { %v4786_v51 = vsub.f32 2.0, %v4773_v54  ;;  %v4741_v2 = vpop.f32.mrf.mxu3  ;;  %v4931_v30 = vand.u32 4294901760, %v4930_v21  ;;  %v11352_v9 = vand.u32 4294901760, %v4824_v25  ;;  %v13346_v21 = vld [vmem:[#allocation5_spill] sm:$0xff] }
 0x520   : > { %v4536_v3 = vadd.f32 %v4535_v27, %v4427_v43  ;;  %v13343_v27 = vld [vmem:[#allocation34_spill] sm:$0xff]  ;;  %v4323_v43 = vadd.f32 %v11214_v6, %v11209_v56  ;;  %v13347_v6 = vld [vmem:[#allocation43_spill] sm:$0xff] }
 0x521   : > { %v4799_v44 = vmul.f32 %v7920_v47, %v4786_v51  ;;  %4932 = vmatmul.f32.gmra.mxu0 %v4931_v30  ;;  %5109 = vmatmul.f32.gmra.mxu1 %v11352_v9  ;;  %v4936_v62 = vsub.f32 %v4824_v25, %v11352_v9  ;;  %v2507_v49 = vadd.f32 %v13343_v27, %v2422_v31 }
 0x522   : > { %v4657_v11 = vadd.f32 %v4656_v32, %v4536_v3  ;;  %v2426_v25 = vadd.f32 %v13346_v21, %v13345_v24  ;;  %v11385_v3 = vld [vmem:[%s8149_s10 + $0x30] sm:$0xff] }
 0x523   : > { %v4812_v20 = vmul.f32 %v4799_v44, %v2503_v52  ;;  %5218 = vmatmul.f32.gmra.mxu2 %v4936_v62  ;;  %v4937_v1 = vand.u32 4294901760, %v4936_v62  ;;  %5585 = vrot.lane.b32.xlu2 %v11385_v3, %s8030_s26  ;;  %v3944_v52 = vadd.f32 %v13348_v18, %v13347_v6  ;;  %v11413_v21 = vld [vmem:[%s8149_s10 + $0x10] sm:$0xff] }
 0x524   : > { %v7922_v39 = vpop.eup %7921  ;;  %v4742_v29 = vadd.f32 %v4741_v2, %v4657_v11 }
 0x525   : > { %v4774_v8 = vmul.f32 %v7922_v39, %v4738_v0  ;;  %v4431_v38 = vpop.f32.mrf.mxu0  ;;  %5324 = vmatmul.f32.gmra.mxu3 %v4937_v1  ;;  %v4938_v15 = vsub.f32 %v4936_v62, %v4937_v1  ;;  %v4825_v23 = vmul.f32 %v4812_v20, %v4021_v10  ;;  %v13344_v0 = vld [vmem:[#allocation57_spill] sm:$0xff]  ;;  %v4547_v62 = vpop.f32.mrf.mxu1  ;;  %v13349_v20 = vld [vmem:[#allocation20_spill] sm:$0xff] }
 0x526   : > { %7923 = vrcp.f32 %v4742_v29  ;;  %v4432_v57 = vadd.f32 %v4431_v38, %v4319_v45  ;;  %v4660_v40 = vpop.f32.mrf.mxu2  ;;  %v4025_v58 = vadd.f32 %v13344_v0, %v3940_v14  ;;  %v2511_v1 = vadd.f32 %v13349_v20, %v2426_v25  ;;  %v13357_v25 = vld [vmem:[#allocation9_spill] sm:$0xff] }
 0x527   : > { %v4787_v35 = vsub.f32 2.0, %v4774_v8  ;;  %v4939_v42 = vand.u32 4294901760, %v4938_v15  ;;  %v11364_v61 = vand.u32 4294901760, %v4825_v23  ;;  %v4745_v41 = vpop.f32.mrf.mxu3  ;;  %v11398_v15 = vld [vmem:[%s8149_s10 + $0x8] sm:$0xff] }
 0x528   : > { %v4542_v48 = vadd.f32 %v4541_v34, %v4432_v57  ;;  %5575 = vrot.lane.b32.xlu0 %v11398_v15, %s8030_s26  ;;  %v13352_v57 = vld [vmem:[#allocation21_spill] sm:$0xff] }
 0x529   : > { %v4800_v47 = vmul.f32 %v7922_v39, %v4787_v35  ;;  %4940 = vmatmul.f32.gmra.mxu0 %v4939_v42  ;;  %5113 = vmatmul.f32.gmra.mxu1 %v11364_v61  ;;  %v4944_v7 = vsub.f32 %v4825_v23, %v11364_v61  ;;  %v13351_v23 = vld [vmem:[#allocation49_spill] sm:$0xff]  ;;  %v13354_v42 = vld [vmem:[#allocation71_spill] sm:$0xff] }
 0x52a   : > { %v4661_v36 = vadd.f32 %v4660_v40, %v4542_v48  ;;  %v2430_v26 = vadd.f32 %v13352_v57, %v13351_v23  ;;  %v13353_v40 = vld [vmem:[#allocation48_spill] sm:$0xff] }
 0x52b   : > { %v4813_v16 = vmul.f32 %v4800_v47, %v2507_v49  ;;  %5223 = vmatmul.f32.gmra.mxu2 %v4944_v7  ;;  %v4945_v55 = vand.u32 4294901760, %v4944_v7  ;;  %v3948_v48 = vadd.f32 %v13354_v42, %v13353_v40 }
 0x52c   : > { %v7924_v54 = vpop.eup %7923  ;;  %v4746_v32 = vadd.f32 %v4745_v41, %v4661_v36  ;;  %v13355_v41 = vld [vmem:[#allocation40_spill] sm:$0xff] }
 0x52d   : > { %v4775_v13 = vmul.f32 %v7924_v54, %v4742_v29  ;;  %v4436_v51 = vpop.f32.mrf.mxu0  ;;  %5330 = vmatmul.f32.gmra.mxu3 %v4945_v55  ;;  %v4946_v2 = vsub.f32 %v4944_v7, %v4945_v55  ;;  %v4826_v30 = vmul.f32 %v4813_v16, %v4025_v58  ;;  %v13350_v29 = vld [vmem:[#allocation64_spill] sm:$0xff]  ;;  %v2515_v7 = vadd.f32 %v13355_v41, %v2430_v26  ;;  %v11443_v26 = vld [vmem:[%s8149_s10 + $0x28] sm:$0xff] }
 0x52e   : > { %7925 = vrcp.f32 %v4746_v32  ;;  %v4437_v56 = vadd.f32 %v4436_v51, %v4323_v43  ;;  %v4664_v12 = vpop.f32.mrf.mxu2  ;;  %v4029_v50 = vadd.f32 %v13350_v29, %v3944_v52  ;;  %v13356_v58 = vld [vmem:[#allocation68_spill] sm:$0xff]  ;;  %v13358_v43 = vld [vmem:[#allocation50_spill] sm:$0xff] }
 0x52f   : > { %v4788_v44 = vsub.f32 2.0, %v4775_v13  ;;  %v4947_v11 = vand.u32 4294901760, %v4946_v2  ;;  %v11391_v33 = vand.u32 4294901760, %v4826_v30  ;;  %v4749_v31 = vpop.f32.mrf.mxu3  ;;  %v4033_v16 = vadd.f32 %v13356_v58, %v3948_v48 }
 0x530   : > { %v4548_v10 = vadd.f32 %v4547_v62, %v4437_v56  ;;  %5577 = vrot.lane.b32.xlu0 %v11413_v21, %s8030_s26  ;;  %v13360_v56 = vld [vmem:[#allocation75_spill] sm:$0xff] }
 0x531   : > { %v4801_v39 = vmul.f32 %v7924_v54, %v4788_v44  ;;  %4948 = vmatmul.f32.gmra.mxu0 %v4947_v11  ;;  %5117 = vmatmul.f32.gmra.mxu1 %v11391_v33  ;;  %v4952_v37 = vsub.f32 %v4826_v30, %v11391_v33  ;;  %v13359_v30 = vld [vmem:[#allocation51_spill] sm:$0xff] }
 0x532   : > { %v4665_v45 = vadd.f32 %v4664_v12, %v4548_v10  ;;  %v3952_v6 = vadd.f32 %v13360_v56, %v13359_v30  ;;  %v13361_v62 = vld [vmem:[#allocation47_spill] sm:$0xff] }
 0x533   : > { %v4814_v46 = vmul.f32 %v4801_v39, %v2511_v1  ;;  %5228 = vmatmul.f32.gmra.mxu2 %v4952_v37  ;;  %v4953_v8 = vand.u32 4294901760, %v4952_v37  ;;  %v13362_v1 = vld [vmem:[#allocation72_spill] sm:$0xff] }
 0x534   : > { %v7926_v34 = vpop.eup %7925  ;;  %v4750_v38 = vadd.f32 %v4749_v31, %v4665_v45  ;;  %v4037_v39 = vadd.f32 %v13362_v1, %v3952_v6  ;;  %v11428_v45 = vld [vmem:[%s8149_s10 + $0x18] sm:$0xff] }
 0x535   : > { %v4776_v28 = vmul.f32 %v7926_v34, %v4746_v32  ;;  %5336 = vmatmul.f32.gmra.mxu3 %v4953_v8  ;;  %v4954_v14 = vsub.f32 %v4952_v37, %v4953_v8  ;;  %v4827_v35 = vmul.f32 %v4814_v46, %v4029_v50  ;;  %v2434_v32 = vadd.f32 %v13358_v43, %v13357_v25  ;;  %v11521_v25 = vld [vmem:[%s12675_s5] sm:$0xff] }
 0x536   : > { %7927 = vrcp.f32 %v4750_v38  ;;  %v11524_v43 = vperm.slane %v11521_v25, 2 }
 0x537   : > { %v4789_v27 = vsub.f32 2.0, %v4776_v28  ;;  %v4955_v49 = vand.u32 4294901760, %v4954_v14  ;;  %v11406_v47 = vand.u32 4294901760, %v4827_v35  ;;  %v2519_v11 = vadd.f32 %v13361_v62, %v2434_v32  ;;  %v11450_v28 = vld [vmem:[%s8149_s10 + $0x40] sm:$0xff]  ;;  %v11457_v14 = vld [vmem:[%s8149_s10 + $0x48] sm:$0xff] }
 0x538   : > { %5579 = vrot.lane.b32.xlu0 %v11428_v45, %s8030_s26 }
 0x539   : > { %v4802_v36 = vmul.f32 %v7926_v34, %v4789_v27  ;;  %4956 = vmatmul.f32.gmra.mxu0 %v4955_v49  ;;  %5121 = vmatmul.f32.gmra.mxu1 %v11406_v47  ;;  %v4960_v0 = vsub.f32 %v4827_v35, %v11406_v47 }
 0x53b   : > { %v4815_v55 = vmul.f32 %v4802_v36, %v2515_v7  ;;  %5233 = vmatmul.f32.gmra.mxu2 %v4960_v0  ;;  %v4961_v54 = vand.u32 4294901760, %v4960_v0 }
 0x53c   : > { %v7928_v24 = vpop.eup %7927 }
 0x53d   : > { %v4777_v13 = vmul.f32 %v7928_v24, %v4750_v38  ;;  %5342 = vmatmul.f32.gmra.mxu3 %v4961_v54  ;;  %v4962_v51 = vsub.f32 %v4960_v0, %v4961_v54  ;;  %v4828_v2 = vmul.f32 %v4815_v55, %v4033_v16  ;;  %v11437_v38 = vld [vmem:[%s8149_s10 + $0x20] sm:$0xff] }
 0x53f   : > { %v4790_v18 = vsub.f32 2.0, %v4777_v13  ;;  %v4963_v52 = vand.u32 4294901760, %v4962_v51  ;;  %v11421_v44 = vand.u32 4294901760, %v4828_v2 }
 0x540   : > { %5581 = vrot.lane.b32.xlu0 %v11437_v38, %s8030_s26 }
 0x541   : > { %v4803_v10 = vmul.f32 %v7928_v24, %v4790_v18  ;;  %4964 = vmatmul.f32.gmra.mxu0 %v4963_v52  ;;  %5125 = vmatmul.f32.gmra.mxu1 %v11421_v44  ;;  %v4968_v20 = vsub.f32 %v4828_v2, %v11421_v44 }
 0x543   : > { %v4816_v12 = vmul.f32 %v4803_v10, %v2519_v11  ;;  %5238 = vmatmul.f32.gmra.mxu2 %v4968_v20  ;;  %v4969_v37 = vand.u32 4294901760, %v4968_v20 }
 0x545   : > { %5348 = vmatmul.f32.gmra.mxu3 %v4969_v37  ;;  %v4970_v29 = vsub.f32 %v4968_v20, %v4969_v37  ;;  %v4829_v50 = vmul.f32 %v4816_v12, %v4037_v39 }
 0x547   : > { %v4971_v46 = vand.u32 4294901760, %v4970_v29  ;;  %v11432_v31 = vand.u32 4294901760, %v4829_v50 }
 0x548   : > { %5583 = vrot.lane.b32.xlu0 %v11443_v26, %s8030_s26 }
 0x549   : > { %4972 = vmatmul.f32.gmra.mxu0 %v4971_v46  ;;  %5129 = vmatmul.f32.gmra.mxu1 %v11432_v31  ;;  %v4976_v8 = vsub.f32 %v4829_v50, %v11432_v31 }
 0x54b   : > { %5243 = vmatmul.f32.gmra.mxu2 %v4976_v8  ;;  %v4977_v34 = vand.u32 4294901760, %v4976_v8 }
 0x54d   : > { %5354 = vmatmul.f32.gmra.mxu3 %v4977_v34  ;;  %v4978_v23 = vsub.f32 %v4976_v8, %v4977_v34 }
 0x54f   : > { %v4979_v57 = vand.u32 4294901760, %v4978_v23 }
 0x550   : > { %5589 = vrot.lane.b32.xlu0 %v11450_v28, %s8030_s26 }
 0x551   : > { %4980 = vmatmul.f32.gmra.mxu0 %v4979_v57  ;;  %5508 = vmatmul.f32.vlgmr.msra.gmra.mxu1 %v11266_v4 }
 0x558   : > { %5591 = vrot.lane.b32.xlu0 %v11457_v14, %s8030_s26 }
 0x559   : > { %5423 = vmatmul.f32.vlgmr.msra.gmra.mxu0 %v11266_v4  ;;  %5512 = vmatmul.f32.gmra.mxu1 %v11280_v63 }
 0x561   : > { %5427 = vmatmul.f32.gmra.mxu0 %v11280_v63  ;;  %5516 = vmatmul.f32.gmra.mxu1 %v11292_v22 }
 0x566   : > { %v5082_v35 = vpop.f32.mrf.mxu1 }
 0x569   : > { %5431 = vmatmul.f32.gmra.mxu0 %v11292_v22  ;;  %5520 = vmatmul.f32.gmra.mxu1 %v11304_v17 }
 0x56e   : > { %v4885_v4 = vpop.f32.mrf.mxu0  ;;  %v5086_v40 = vpop.f32.mrf.mxu1 }
 0x56f   : > { %v5184_v16 = vpop.f32.mrf.mxu2  ;;  %v4886_v2 = vadd.f32 %v4885_v4, %v11524_v43  ;;  %v6153_v4 = vperm.slane %v11521_v25, 3 }
 0x570   : > { %v5283_v55 = vpop.f32.mrf.mxu3 }
 0x571   : > { %5435 = vmatmul.f32.gmra.mxu0 %v11304_v17  ;;  %5524 = vmatmul.f32.gmra.mxu1 %v11316_v53  ;;  %v5083_v56 = vadd.f32 %v5082_v35, %v4886_v2 }
 0x576   : > { %v4893_v42 = vpop.f32.mrf.mxu0  ;;  %v11465_v63 = vpop.f32.mrf.mxu1 }
 0x577   : > { %v5189_v24 = vpop.f32.mrf.mxu2  ;;  %v4894_v62 = vadd.f32 %v4893_v42, %v11524_v43 }
 0x578   : > { %v5289_v32 = vpop.f32.mrf.mxu3 }
 0x579   : > { %5439 = vmatmul.f32.gmra.mxu0 %v11316_v53  ;;  %5528 = vmatmul.f32.gmra.mxu1 %v11328_v19  ;;  %v5087_v10 = vadd.f32 %v5086_v40, %v4894_v62 }
 0x57b   : > { %v5190_v37 = vadd.f32 %v5189_v24, %v5087_v10 }
 0x57e   : > { %v4901_v48 = vpop.f32.mrf.mxu0  ;;  %v11469_v27 = vpop.f32.mrf.mxu1 }
 0x57f   : > { %v5194_v30 = vpop.f32.mrf.mxu2  ;;  %v4902_v29 = vadd.f32 %v4901_v48, %v11524_v43 }
 0x580   : > { %v5295_v52 = vpop.f32.mrf.mxu3 }
 0x581   : > { %5443 = vmatmul.f32.gmra.mxu0 %v11328_v19  ;;  %5532 = vmatmul.f32.gmra.mxu1 %v11340_v59  ;;  %v5091_v8 = vadd.f32 %v11465_v63, %v4902_v29 }
 0x583   : > { %v5195_v40 = vadd.f32 %v5194_v30, %v5091_v8 }
 0x585   : > { %v5296_v48 = vadd.f32 %v5295_v52, %v5195_v40 }
 0x586   : > { %v11473_v22 = vpop.f32.mrf.mxu0  ;;  %v11475_v49 = vpop.f32.mrf.mxu1 }
 0x587   : > { %v5199_v20 = vpop.f32.mrf.mxu2  ;;  %v4910_v63 = vadd.f32 %v11473_v22, %v11524_v43 }
 0x588   : > { %v5301_v50 = vpop.f32.mrf.mxu3 }
 0x589   : > { %5447 = vmatmul.f32.gmra.mxu0 %v11340_v59  ;;  %5536 = vmatmul.f32.gmra.mxu1 %v11352_v9  ;;  %v5095_v30 = vadd.f32 %v11469_v27, %v4910_v63  ;;  %v11555_v27 = vld [vmem:[%s8149_s10 + $0x60] sm:$0xff] }
 0x58b   : > { %v5200_v10 = vadd.f32 %v5199_v20, %v5095_v30 }
 0x58e   : > { %v11479_v17 = vpop.f32.mrf.mxu0  ;;  %v11481_v53 = vpop.f32.mrf.mxu1 }
 0x58f   : > { %v5204_v57 = vpop.f32.mrf.mxu2  ;;  %v4918_v2 = vadd.f32 %v11479_v17, %v11524_v43 }
 0x591   : > { %5451 = vmatmul.f32.gmra.mxu0 %v11352_v9  ;;  %5540 = vmatmul.f32.gmra.mxu1 %v11364_v61  ;;  %v5099_v52 = vadd.f32 %v11475_v49, %v4918_v2 }
 0x593   : > { %v5205_v17 = vadd.f32 %v5204_v57, %v5099_v52 }
 0x596   : > { %v11485_v41 = vpop.f32.mrf.mxu0  ;;  %v11487_v19 = vpop.f32.mrf.mxu1 }
 0x599   : > { %5455 = vmatmul.f32.gmra.mxu0 %v11364_v61  ;;  %5544 = vmatmul.f32.gmra.mxu1 %v11391_v33 }
 0x59e   : > { %v11491_v7 = vpop.f32.mrf.mxu0  ;;  %v11493_v59 = vpop.f32.mrf.mxu1 }
 0x5a1   : > { %5459 = vmatmul.f32.gmra.mxu0 %v11391_v33  ;;  %5548 = vmatmul.f32.gmra.mxu1 %v11406_v47 }
 0x5a6   : > { %v11497_v36 = vpop.f32.mrf.mxu0  ;;  %v11499_v9 = vpop.f32.mrf.mxu1 }
 0x5a9   : > { %5463 = vmatmul.f32.gmra.mxu0 %v11406_v47  ;;  %5552 = vmatmul.f32.gmra.mxu1 %v11421_v44 }
 0x5ae   : > { %v11503_v0 = vpop.f32.mrf.mxu0  ;;  %v11505_v61 = vpop.f32.mrf.mxu1 }
 0x5af   : > { %v4950_v52 = vadd.f32 %v11503_v0, %v11524_v43 }
 0x5b1   : > { %5467 = vmatmul.f32.gmra.mxu0 %v11421_v44  ;;  %5556 = vmatmul.f32.gmra.mxu1 %v11432_v31  ;;  %v5185_v44 = vadd.f32 %v5184_v16, %v5083_v56  ;;  %v5307_v16 = vpop.f32.mrf.mxu3  ;;  %v5209_v56 = vpop.f32.mrf.mxu2 }
 0x5b2   : > { %v5308_v49 = vadd.f32 %v5307_v16, %v5205_v17 }
 0x5b3   : > { %v5284_v11 = vadd.f32 %v5283_v55, %v5185_v44  ;;  %v11547_v44 = vld [vmem:[%s8149_s10 + $0x58] sm:$0xff] }
 0x5b6   : > { %v11509_v58 = vpop.f32.mrf.mxu0  ;;  %v11511_v33 = vpop.f32.mrf.mxu1 }
 0x5b9   : > { %5471 = vmatmul.f32.gmra.mxu0 %v11432_v31  ;;  %v5290_v31 = vadd.f32 %v5289_v32, %v5190_v37  ;;  %v5313_v22 = vpop.f32.mrf.mxu3  ;;  %v11560_v37 = vld [vmem:[%s8149_s10 + $0x50] sm:$0xff] }
 0x5be   : > { %v11514_v54 = vpop.f32.mrf.mxu0  ;;  %v11516_v47 = vpop.f32.mrf.mxu1 }
 0x5c6   : > { %v11526_v13 = vpop.f32.mrf.mxu0  ;;  %v11528_v51 = vpop.f32.mrf.mxu1 }
 0x5ce   : > { %v11531_v6 = vpop.f32.mrf.mxu0  ;;  %v5509_v18 = vpop.f32.mrf.mxu1 }
 0x5d6   : > { %v5424_v1 = vpop.f32.mrf.mxu0  ;;  %v5513_v39 = vpop.f32.mrf.mxu1 }
 0x5d7   : > { %v5425_v12 = vadd.f32 %v5424_v1, %v5284_v11  ;;  %v4926_v1 = vadd.f32 %v11485_v41, %v11524_v43  ;;  %v5319_v41 = vpop.f32.mrf.mxu3 }
 0x5d9   : > { %v5510_v46 = vadd.f32 %v5509_v18, %v5425_v12  ;;  %v5214_v12 = vpop.f32.mrf.mxu2  ;;  %v5103_v29 = vadd.f32 %v11481_v53, %v4926_v1 }
 0x5db   : > { %5638 = vrot.lane.b32.xlu1 %v5510_v46, %s8031_s29 }
 0x5de   : > { %v5428_v34 = vpop.f32.mrf.mxu0  ;;  %v5517_v23 = vpop.f32.mrf.mxu1 }
 0x5df   : > { %v5429_v35 = vadd.f32 %v5428_v34, %v5290_v31  ;;  %v4934_v34 = vadd.f32 %v11491_v7, %v11524_v43 }
 0x5e1   : > { %v5514_v42 = vadd.f32 %v5513_v39, %v5429_v35  ;;  %v5302_v39 = vadd.f32 %v5301_v50, %v5200_v10  ;;  %v5210_v50 = vadd.f32 %v5209_v56, %v5103_v29  ;;  %v5219_v40 = vpop.f32.mrf.mxu2  ;;  %v11578_v10 = vpop.permute.xlu0 %5573  ;;  %v6171_v29 = vperm.slane %v11521_v25, 4 }
 0x5e3   : > { %5640 = vrot.lane.b32.xlu2 %v5514_v42, %s8031_s29  ;;  %6155 = vrot.lane.b32.xlu1 %v6153_v4, %s8030_s26  ;;  %v5314_v35 = vadd.f32 %v5313_v22, %v5210_v50  ;;  %v5107_v4 = vadd.f32 %v11487_v19, %v4934_v34 }
 0x5e6   : > { %v5432_v55 = vpop.f32.mrf.mxu0  ;;  %v5521_v24 = vpop.f32.mrf.mxu1 }
 0x5e7   : > { %v5433_v32 = vadd.f32 %v5432_v55, %v5296_v48  ;;  %v5215_v48 = vadd.f32 %v5214_v12, %v5107_v4  ;;  %v4942_v55 = vadd.f32 %v11497_v36, %v11524_v43  ;;  %v4958_v12 = vadd.f32 %v11509_v58, %v11524_v43 }
 0x5e8   : > { %v4966_v58 = vadd.f32 %v11514_v54, %v11524_v43 }
 0x5e9   : > { %v5518_v18 = vadd.f32 %v5517_v23, %v5433_v32  ;;  %v5325_v32 = vpop.f32.mrf.mxu3  ;;  %v5320_v7 = vadd.f32 %v5319_v41, %v5215_v48  ;;  %v5224_v30 = vpop.f32.mrf.mxu2 }
 0x5ea   : > { %v11586_v41 = vpop.permute.xlu0 %5575 }
 0x5eb   : > { %5642 = vrot.lane.b32.xlu0 %v5518_v18, %s8031_s29  ;;  %5595 = vrot.lane.b32.xlu2 %v11547_v44, %s8030_s26 }
 0x5ee   : > { %v5436_v62 = vpop.f32.mrf.mxu0  ;;  %v5525_v11 = vpop.f32.mrf.mxu1 }
 0x5ef   : > { %v5437_v20 = vadd.f32 %v5436_v62, %v5302_v39 }
 0x5f1   : > { %v5522_v23 = vadd.f32 %v5521_v24, %v5437_v20  ;;  %v5111_v24 = vadd.f32 %v11493_v59, %v4942_v55  ;;  %v5331_v62 = vpop.f32.mrf.mxu3  ;;  %v5229_v0 = vpop.f32.mrf.mxu2 }
 0x5f2   : > { %v11594_v48 = vpop.permute.xlu0 %5577 }
 0x5f3   : > { %5597 = vrot.lane.b32.xlu2 %v11555_v27, %s8030_s26  ;;  %5593 = vrot.lane.b32.xlu0 %v11560_v37, %s8030_s26  ;;  %v5220_v19 = vadd.f32 %v5219_v40, %v5111_v24 }
 0x5f5   : > { %v5326_v36 = vadd.f32 %v5325_v32, %v5220_v19 }
 0x5f6   : > { %v5440_v46 = vpop.f32.mrf.mxu0  ;;  %v5529_v31 = vpop.f32.mrf.mxu1 }
 0x5f7   : > { %v5441_v8 = vadd.f32 %v5440_v46, %v5308_v49 }
 0x5f9   : > { %v5526_v57 = vadd.f32 %v5525_v11, %v5441_v8  ;;  %v5115_v11 = vadd.f32 %v11499_v9, %v4950_v52  ;;  %v5119_v9 = vadd.f32 %v11505_v61, %v4958_v12  ;;  %v5337_v46 = vpop.f32.mrf.mxu3  ;;  %v5234_v25 = vpop.f32.mrf.mxu2 }
 0x5fb   : > { %5644 = vrot.lane.b32.xlu2 %v5522_v23, %s8031_s29  ;;  %5646 = vrot.lane.b32.xlu1 %v5526_v57, %s8031_s29  ;;  %v5225_v39 = vadd.f32 %v5224_v30, %v5115_v11  ;;  %v5230_v50 = vadd.f32 %v5229_v0, %v5119_v9  ;;  %v11612_v0 = vpop.permute.xlu1 %5587 }
 0x5fc   : > { %6173 = vrot.lane.b32.xlu0 %v6171_v29, %s8030_s26 }
 0x5fd   : > { %v5332_v20 = vadd.f32 %v5331_v62, %v5225_v39  ;;  %v5338_v57 = vadd.f32 %v5337_v46, %v5230_v50 }
 0x5fe   : > { %v5444_v53 = vpop.f32.mrf.mxu0  ;;  %v5533_v42 = vpop.f32.mrf.mxu1 }
 0x5ff   : > { %v5445_v16 = vadd.f32 %v5444_v53, %v5314_v35  ;;  %v5123_v35 = vadd.f32 %v11511_v33, %v4966_v58 }
 0x601   : > { %v5530_v63 = vadd.f32 %v5529_v31, %v5445_v16  ;;  %v5343_v61 = vpop.f32.mrf.mxu3  ;;  %v5235_v53 = vadd.f32 %v5234_v25, %v5123_v35  ;;  %v5239_v32 = vpop.f32.mrf.mxu2 }
 0x603   : > { %5648 = vrot.lane.b32.xlu2 %v5530_v63, %s8031_s29  ;;  %v5344_v55 = vadd.f32 %v5343_v61, %v5235_v53 }
 0x606   : > { %v5448_v2 = vpop.f32.mrf.mxu0  ;;  %v5537_v56 = vpop.f32.mrf.mxu1 }
 0x607   : > { %v5449_v18 = vadd.f32 %v5448_v2, %v5320_v7  ;;  %v4982_v2 = vadd.f32 %v11531_v6, %v11524_v43 }
 0x609   : > { %v5534_v22 = vadd.f32 %v5533_v42, %v5449_v18  ;;  %v4974_v42 = vadd.f32 %v11526_v13, %v11524_v43  ;;  %v5349_v18 = vpop.f32.mrf.mxu3  ;;  %v11601_v13 = vpop.permute.xlu0 %5579  ;;  %v5131_v19 = vadd.f32 %v11528_v51, %v4982_v2 }
 0x60b   : > { %5650 = vrot.lane.b32.xlu2 %v5534_v22, %s8031_s29  ;;  %v5127_v63 = vadd.f32 %v11516_v47, %v4974_v42  ;;  %v5244_v47 = vpop.f32.mrf.mxu2 }
 0x60d   : > { %v5240_v33 = vadd.f32 %v5239_v32, %v5127_v63 }
 0x60e   : > { %v5452_v17 = vpop.f32.mrf.mxu0  ;;  %v5541_v59 = vpop.f32.mrf.mxu1 }
 0x60f   : > { %v5453_v1 = vadd.f32 %v5452_v17, %v5326_v36  ;;  %v5350_v30 = vadd.f32 %v5349_v18, %v5240_v33  ;;  %v5245_v36 = vadd.f32 %v5244_v47, %v5131_v19  ;;  %v11605_v17 = vpop.permute.xlu2 %5585 }
 0x611   : > { %v5538_v49 = vadd.f32 %v5537_v56, %v5453_v1  ;;  %v5355_v43 = vpop.f32.mrf.mxu3  ;;  %v11607_v1 = vpop.permute.xlu0 %5581 }
 0x612   : > { %v5356_v6 = vadd.f32 %v5355_v43, %v5245_v36 }
 0x613   : > { %5652 = vrot.lane.b32.xlu2 %v5538_v49, %s8031_s29 }
 0x616   : > { %v5456_v31 = vpop.f32.mrf.mxu0  ;;  %v5545_v23 = vpop.f32.mrf.mxu1 }
 0x617   : > { %v5457_v8 = vadd.f32 %v5456_v31, %v5332_v20 }
 0x619   : > { %v5542_v34 = vadd.f32 %v5541_v59, %v5457_v8  ;;  %v11610_v29 = vpop.permute.xlu0 %5583 }
 0x61b   : > { %5654 = vrot.lane.b32.xlu2 %v5542_v34, %s8031_s29 }
 0x61e   : > { %v5460_v4 = vpop.f32.mrf.mxu0  ;;  %v5549_v54 = vpop.f32.mrf.mxu1 }
 0x61f   : > { %v5461_v40 = vadd.f32 %v5460_v4, %v5338_v57 }
 0x621   : > { %v5546_v16 = vadd.f32 %v5545_v23, %v5461_v40  ;;  %v11616_v9 = vpop.permute.xlu0 %5589 }
 0x623   : > { %5656 = vrot.lane.b32.xlu2 %v5546_v16, %s8031_s29 }
 0x626   : > { %v5464_v7 = vpop.f32.mrf.mxu0  ;;  %v5553_v52 = vpop.f32.mrf.mxu1 }
 0x627   : > { %v5465_v24 = vadd.f32 %v5464_v7, %v5344_v55 }
 0x629   : > { %v5550_v56 = vadd.f32 %v5549_v54, %v5465_v24  ;;  %v11622_v50 = vpop.permute.xlu0 %5591 }
 0x62b   : > { %5658 = vrot.lane.b32.xlu2 %v5550_v56, %s8031_s29 }
 0x62e   : > { %v5468_v22 = vpop.f32.mrf.mxu0  ;;  %v5557_v12 = vpop.f32.mrf.mxu1 }
 0x62f   : > { %v5469_v62 = vadd.f32 %v5468_v22, %v5350_v30 }
 0x631   : > { %v5554_v11 = vadd.f32 %v5553_v52, %v5469_v62  ;;  %v5612_v62 = vmul.f32 %v11375_v60, %v11578_v10 }
 0x633   : > { %5660 = vrot.lane.b32.xlu1 %v5554_v11, %s8031_s29  ;;  %v5613_v11 = vmul.f32 %v11398_v15, %v11586_v41  ;;  %v5618_v41 = vmul.f32 %v11385_v3, %v11605_v17 }
 0x636   : > { %v5472_v59 = vpop.f32.mrf.mxu0 }
 0x637   : > { %v5473_v39 = vadd.f32 %v5472_v59, %v5356_v6 }
 0x639   : > { %v5558_v49 = vadd.f32 %v5557_v12, %v5473_v39  ;;  %v5614_v39 = vmul.f32 %v11413_v21, %v11594_v48 }
 0x63b   : > { %5662 = vrot.lane.b32.xlu0 %v5558_v49, %s8031_s29 }
 0x63d   : > { %v5641_v51 = vpop.permute.xlu2 %5640 }
 0x63e   : > { %v5678_v34 = vmul.f32 %v11398_v15, %v5641_v51  ;;  %v5615_v15 = vmul.f32 %v11428_v45, %v11601_v13 }
 0x645   : > { %v11614_v20 = vpop.permute.xlu2 %5595 }
 0x64d   : > { %v11618_v46 = vpop.permute.xlu2 %5597  ;;  %v5639_v31 = vpop.permute.xlu1 %5638 }
 0x64e   : > { %v5677_v8 = vmul.f32 %v11375_v60, %v5639_v31 }
 0x650   : > { %5703 = vrot.lane.b32.xlu1 %v5677_v8, %s8032_s8 }
 0x655   : > { %v5645_v58 = vpop.permute.xlu2 %5644  ;;  %v11628_v35 = vpop.permute.xlu1 %6155 }
 0x656   : > { %v5680_v40 = vmul.f32 %v11428_v45, %v5645_v58 }
 0x658   : > { %5705 = vrot.lane.b32.xlu1 %v5678_v34, %s8032_s8 }
 0x65d   : > { %v5649_v23 = vpop.permute.xlu2 %5648  ;;  %v5643_v25 = vpop.permute.xlu0 %5642 }
 0x65e   : > { %v5679_v57 = vmul.f32 %v11413_v21, %v5643_v25  ;;  %v5682_v63 = vmul.f32 %v11443_v26, %v5649_v23  ;;  %v5616_v21 = vmul.f32 %v11437_v38, %v11607_v1  ;;  %v5621_v25 = vmul.f32 %v11457_v14, %v11622_v50 }
 0x660   : > { %5707 = vrot.lane.b32.xlu1 %v5679_v57, %s8032_s8 }
 0x665   : > { %v5651_v4 = vpop.permute.xlu2 %5650  ;;  %v5594_v56 = vpop.permute.xlu0 %5593 }
 0x666   : > { %v5683_v61 = vmul.f32 %v11385_v3, %v5651_v4  ;;  %v5622_v45 = vmul.f32 %v11560_v37, %v5594_v56  ;;  %v5619_v3 = vmul.f32 %v11380_v5, %v11612_v0 }
 0x668   : > { %5715 = vrot.lane.b32.xlu0 %v5683_v61, %s8032_s8  ;;  %5709 = vrot.lane.b32.xlu1 %v5680_v40, %s8032_s8 }
 0x66d   : > { %v5653_v53 = vpop.permute.xlu2 %5652  ;;  %v5647_v42 = vpop.permute.xlu1 %5646 }
 0x66e   : > { %v5684_v16 = vmul.f32 %v11380_v5, %v5653_v53  ;;  %v5681_v54 = vmul.f32 %v11437_v38, %v5647_v42  ;;  %v11646_v18 = vpop.permute.xlu0 %6173  ;;  %v5617_v5 = vmul.f32 %v11443_v26, %v11610_v29  ;;  %v5620_v38 = vmul.f32 %v11450_v28, %v11616_v9 }
 0x66f   : > { %v5624_v26 = vmul.f32 %v11555_v27, %v11618_v46  ;;  %v5623_v9 = vmul.f32 %v11547_v44, %v11614_v20 }
 0x670   : > { %5717 = vrot.lane.b32.xlu2 %v5684_v16, %s8032_s8  ;;  %5711 = vrot.lane.b32.xlu1 %v5681_v54, %s8032_s8 }
 0x675   : > { %v5655_v55 = vpop.permute.xlu2 %5654 }
 0x676   : > { %v5685_v32 = vmul.f32 %v11450_v28, %v5655_v55 }
 0x678   : > { %5719 = vrot.lane.b32.xlu2 %v5685_v32, %s8032_s8  ;;  %5713 = vrot.lane.b32.xlu1 %v5682_v63, %s8032_s8 }
 0x67d   : > { %v5657_v7 = vpop.permute.xlu2 %5656 }
 0x67e   : > { %v5686_v24 = vmul.f32 %v11457_v14, %v5657_v7 }
 0x680   : > { %5721 = vrot.lane.b32.xlu2 %v5686_v24, %s8032_s8 }
 0x685   : > { %v5659_v33 = vpop.permute.xlu2 %5658 }
 0x686   : > { %v5687_v2 = vmul.f32 %v11560_v37, %v5659_v33 }
 0x688   : > { %5723 = vrot.lane.b32.xlu2 %v5687_v2, %s8032_s8 }
 0x6a5   : > { %v5661_v30 = vpop.permute.xlu1 %5660 }
 0x6a6   : > { %v5688_v19 = vmul.f32 %v11547_v44, %v5661_v30 }
 0x6a8   : > { %5725 = vrot.lane.b32.xlu1 %v5688_v19, %s8032_s8 }
 0x6ad   : > { %v5663_v52 = vpop.permute.xlu0 %5662 }
 0x6ae   : > { %v5689_v22 = vmul.f32 %v11555_v27, %v5663_v52 }
 0x6b0   : > { %5727 = vrot.lane.b32.xlu2 %v5689_v22, %s8032_s8 }
 0x6c2   : > { %v5704_v47 = vpop.permute.xlu1 %5703 }
 0x6c3   : > { %v11654_v36 = vadd.f32 %v5704_v47, %v5612_v62 }
 0x6c5   : > { %5768 = vrot.lane.b32.xlu0 %v11654_v36, %s8032_s8 }
 0x6ca   : > { %v5718_v43 = vpop.permute.xlu2 %5717  ;;  %v5706_v6 = vpop.permute.xlu1 %5705 }
 0x6cb   : > { %v11660_v59 = vadd.f32 %v5706_v6, %v5613_v11  ;;  %v11691_v23 = vadd.f32 %v5718_v43, %v5619_v3  ;;  %v8033_v43 = vmov 16.0  }
 0x6cc   : > { %7929 = vrcp.f32 %v8033_v43 }
 0x6cd   : > { %5770 = vrot.lane.b32.xlu2 %v11660_v59, %s8032_s8 }
 0x6d2   : > { %v5720_v60 = vpop.permute.xlu2 %5719  ;;  %v5708_v10 = vpop.permute.xlu1 %5707 }
 0x6d3   : > { %v11666_v12 = vadd.f32 %v5708_v10, %v5614_v39  ;;  %v11705_v0 = vadd.f32 %v5720_v60, %v5620_v38  ;;  %v7930_v6 = vpop.eup %7929 }
 0x6d4   : > { %v5848_v39 = vmul.f32 16.0, %v7930_v6  ;;  %vm5852_vm1 = vweird.f32 %v7930_v6 }
 0x6d5   : > { %5772 = vrot.lane.b32.xlu1 %v11666_v12, %s8032_s8 }
 0x6d6   : > { %v5849_v60 = vsub.f32 1.0, %v5848_v39 }
 0x6d8   : > { %v5850_v10 = vmul.f32 %v7930_v6, %v5849_v60 }
 0x6da   : > { %v5722_v49 = vpop.permute.xlu2 %5721  ;;  %v5710_v51 = vpop.permute.xlu1 %5709 }
 0x6db   : > { %v11674_v31 = vadd.f32 %v5710_v51, %v5615_v15  ;;  %v5716_v8 = vpop.permute.xlu0 %5715  ;;  %v11713_v57 = vadd.f32 %v5722_v49, %v5621_v25  ;;  %v5851_v15 = vadd.f32 %v7930_v6, %v5850_v10 }
 0x6dc   : > { %v11676_v58 = vadd.f32 %v5716_v8, %v5618_v41 }
 0x6dd   : > { %5774 = vrot.lane.b32.xlu1 %v11674_v31, %s8032_s8  ;;  %v11742_v41 = vsel %vm5852_vm1, %v7930_v6, %v5851_v15 }
 0x6de   : > { %5780 = vrot.lane.b32.xlu2 %v11676_v58, %s8032_s8 }
 0x6e2   : > { %v5724_v48 = vpop.permute.xlu2 %5723  ;;  %v5712_v13 = vpop.permute.xlu1 %5711 }
 0x6e3   : > { %v11687_v17 = vadd.f32 %v5724_v48, %v5622_v45  ;;  %v11689_v34 = vadd.f32 %v5712_v13, %v5616_v21 }
 0x6e5   : > { %5776 = vrot.lane.b32.xlu1 %v11689_v34, %s8032_s8  ;;  %5788 = vrot.lane.b32.xlu0 %v11687_v17, %s8032_s8 }
 0x6e6   : > { %5782 = vrot.lane.b32.xlu2 %v11691_v23, %s8032_s8 }
 0x6ea   : > { %v5714_v37 = vpop.permute.xlu1 %5713 }
 0x6eb   : > { %v11703_v1 = vadd.f32 %v5714_v37, %v5617_v5 }
 0x6ed   : > { %5778 = vrot.lane.b32.xlu1 %v11703_v1, %s8032_s8 }
 0x6ee   : > { %5784 = vrot.lane.b32.xlu2 %v11705_v0, %s8032_s8 }
 0x6f6   : > { %5786 = vrot.lane.b32.xlu2 %v11713_v57, %s8032_s8 }
 0x70a   : > { %v5728_v28 = vpop.permute.xlu2 %5727 }
 0x70b   : > { %v11719_v29 = vadd.f32 %v5728_v28, %v5624_v26 }
 0x70d   : > { %5792 = vrot.lane.b32.xlu1 %v11719_v29, %s8032_s8 }
 0x71a   : > { %v5726_v4 = vpop.permute.xlu1 %5725 }
 0x71b   : > { %v11725_v40 = vadd.f32 %v5726_v4, %v5623_v9 }
 0x71d   : > { %5790 = vrot.lane.b32.xlu0 %v11725_v40, %s8032_s8 }
 0x727   : > { %v5771_v14 = vpop.permute.xlu2 %5770 }
 0x728   : > { %v5811_v50 = vsel %vm5807_vm0, %v5771_v14, 0.0 }
 0x737   : > { %5812 = vadd.xlane.f32.xlu1 %v5811_v50  ;;  %v5769_v27 = vpop.permute.xlu0 %5768 }
 0x738   : > { %v5808_v46 = vsel %vm5807_vm0, %v5769_v27, 0.0  ;;  %v5781_v20 = vpop.permute.xlu2 %5780 }
 0x739   : > { %v5826_v55 = vsel %vm5807_vm0, %v5781_v20, 0.0 }
 0x740   : > { %v5783_v7 = vpop.permute.xlu2 %5782 }
 0x741   : > { %v5829_v24 = vsel %vm5807_vm0, %v5783_v7, 0.0 }
 0x747   : > { %v5773_v61 = vpop.permute.xlu1 %5772  ;;  %5809 = vadd.xlane.f32.xlu0 %v5808_v46 }
 0x748   : > { %v5814_v53 = vsel %vm5807_vm0, %v5773_v61, 0.0  ;;  %v5785_v33 = vpop.permute.xlu2 %5784 }
 0x749   : > { %v5832_v2 = vsel %vm5807_vm0, %v5785_v33, 0.0 }
 0x74f   : > { %v5775_v42 = vpop.permute.xlu1 %5774  ;;  %5815 = vadd.xlane.f32.xlu0 %v5814_v53 }
 0x750   : > { %v5817_v44 = vsel %vm5807_vm0, %v5775_v42, 0.0  ;;  %v5787_v56 = vpop.permute.xlu2 %5786 }
 0x751   : > { %v5835_v30 = vsel %vm5807_vm0, %v5787_v56, 0.0 }
 0x757   : > { %v5777_v16 = vpop.permute.xlu1 %5776  ;;  %5818 = vadd.xlane.f32.xlu0 %v5817_v44  ;;  %v5789_v19 = vpop.permute.xlu0 %5788 }
 0x758   : > { %v5820_v54 = vsel %vm5807_vm0, %v5777_v16, 0.0  ;;  %v5838_v52 = vsel %vm5807_vm0, %v5789_v19, 0.0 }
 0x759   : > { %5821 = vadd.xlane.f32.xlu1 %v5820_v54 }
 0x75f   : > { %v5779_v63 = vpop.permute.xlu1 %5778  ;;  %5827 = vadd.xlane.f32.xlu0 %v5826_v55 }
 0x760   : > { %v5823_v32 = vsel %vm5807_vm0, %v5779_v63, 0.0 }
 0x761   : > { %5824 = vadd.xlane.f32.xlu2 %v5823_v32 }
 0x769   : > { %5830 = vadd.xlane.f32.xlu2 %v5829_v24 }
 0x771   : > { %5833 = vadd.xlane.f32.xlu2 %v5832_v2 }
 0x779   : > { %5836 = vadd.xlane.f32.xlu2 %v5835_v30 }
 0x77f   : > { %v5793_v47 = vpop.permute.xlu1 %5792 }
 0x780   : > { %v5844_v11 = vsel %vm5807_vm0, %v5793_v47, 0.0 }
 0x781   : > { %5839 = vadd.xlane.f32.xlu2 %v5838_v52 }
 0x78f   : > { %v5791_v22 = vpop.permute.xlu0 %5790 }
 0x790   : > { %v5841_v62 = vsel %vm5807_vm0, %v5791_v22, 0.0 }
 0x791   : > { %5842 = vadd.xlane.f32.xlu2 %v5841_v62 }
 0x799   : > { %5845 = vadd.xlane.f32.xlu2 %v5844_v11 }
 0x7aa   : > { %v5813_v8 = vpop.xlane.xlu1 %5812 }
 0x7ab   : > { %v5855_v45 = vmul.f32 %v11742_v41, %v5813_v8 }
 0x7ad   : > { %v11753_v13 = vsub.f32 %v11660_v59, %v5855_v45 }
 0x7af   : > { %v5881_v38 = vmul.f32 %v11753_v13, %v11753_v13 }
 0x7ba   : > { %v5810_v49 = vpop.xlane.xlu0 %5809 }
 0x7bb   : > { %v5854_v51 = vmul.f32 %v11742_v41, %v5810_v49 }
 0x7bd   : > { %v11746_v21 = vsub.f32 %v11654_v36, %v5854_v51 }
 0x7bf   : > { %v5880_v3 = vmul.f32 %v11746_v21, %v11746_v21 }
 0x7c1   : > { %5906 = vrot.lane.b32.xlu1 %v5880_v3, %s8032_s8 }
 0x7c2   : > { %v5816_v48 = vpop.xlane.xlu0 %5815 }
 0x7c3   : > { %v5856_v5 = vmul.f32 %v11742_v41, %v5816_v48 }
 0x7c5   : > { %v11760_v37 = vsub.f32 %v11666_v12, %v5856_v5 }
 0x7c7   : > { %v5882_v26 = vmul.f32 %v11760_v37, %v11760_v37 }
 0x7c9   : > { %5908 = vrot.lane.b32.xlu1 %v5881_v38, %s8032_s8 }
 0x7ca   : > { %v5819_v36 = vpop.xlane.xlu0 %5818 }
 0x7cb   : > { %v5857_v25 = vmul.f32 %v11742_v41, %v5819_v36 }
 0x7cc   : > { %v5822_v4 = vpop.xlane.xlu1 %5821 }
 0x7cd   : > { %v11767_v28 = vsub.f32 %v11674_v31, %v5857_v25  ;;  %v5858_v27 = vmul.f32 %v11742_v41, %v5822_v4 }
 0x7cf   : > { %v5883_v61 = vmul.f32 %v11767_v28, %v11767_v28  ;;  %v11787_v53 = vsub.f32 %v11689_v34, %v5858_v27 }
 0x7d1   : > { %5910 = vrot.lane.b32.xlu1 %v5882_v26, %s8032_s8  ;;  %v5884_v44 = vmul.f32 %v11787_v53, %v11787_v53 }
 0x7d2   : > { %v5828_v59 = vpop.xlane.xlu0 %5827 }
 0x7d3   : > { %v5860_v9 = vmul.f32 %v11742_v41, %v5828_v59 }
 0x7d4   : > { %v5825_v14 = vpop.xlane.xlu2 %5824 }
 0x7d5   : > { %v11771_v50 = vsub.f32 %v11676_v58, %v5860_v9  ;;  %v5859_v12 = vmul.f32 %v11742_v41, %v5825_v14 }
 0x7d7   : > { %v11776_v46 = vsub.f32 %v11703_v1, %v5859_v12  ;;  %v5886_v31 = vmul.f32 %v11771_v50, %v11771_v50 }
 0x7d9   : > { %5912 = vrot.lane.b32.xlu1 %v5883_v61, %s8032_s8  ;;  %5918 = vrot.lane.b32.xlu2 %v5886_v31, %s8032_s8  ;;  %v5885_v58 = vmul.f32 %v11776_v46, %v11776_v46 }
 0x7db   : > { %5916 = vrot.lane.b32.xlu0 %v5885_v58, %s8032_s8 }
 0x7dc   : > { %v5831_v1 = vpop.xlane.xlu2 %5830 }
 0x7dd   : > { %v5861_v42 = vmul.f32 %v11742_v41, %v5831_v1 }
 0x7df   : > { %v11795_v20 = vsub.f32 %v11691_v23, %v5861_v42 }
 0x7e1   : > { %5914 = vrot.lane.b32.xlu1 %v5884_v44, %s8032_s8  ;;  %v5887_v34 = vmul.f32 %v11795_v20, %v11795_v20 }
 0x7e4   : > { %v5834_v16 = vpop.xlane.xlu2 %5833 }
 0x7e5   : > { %v5862_v54 = vmul.f32 %v11742_v41, %v5834_v16 }
 0x7e7   : > { %v11802_v55 = vsub.f32 %v11705_v0, %v5862_v54 }
 0x7e9   : > { %5920 = vrot.lane.b32.xlu1 %v5887_v34, %s8032_s8  ;;  %v5888_v23 = vmul.f32 %v11802_v55, %v11802_v55 }
 0x7ec   : > { %v5837_v63 = vpop.xlane.xlu2 %5836 }
 0x7ed   : > { %v5863_v32 = vmul.f32 %v11742_v41, %v5837_v63 }
 0x7ef   : > { %v11806_v7 = vsub.f32 %v11713_v57, %v5863_v32 }
 0x7f1   : > { %5922 = vrot.lane.b32.xlu1 %v5888_v23, %s8032_s8  ;;  %v5889_v24 = vmul.f32 %v11806_v7, %v11806_v7 }
 0x7f3   : > { %5924 = vrot.lane.b32.xlu2 %v5889_v24, %s8032_s8 }
 0x7f4   : > { %v5840_v33 = vpop.xlane.xlu2 %5839 }
 0x7f5   : > { %v5864_v0 = vmul.f32 %v11742_v41, %v5840_v33 }
 0x7f7   : > { %v11816_v2 = vsub.f32 %v11687_v17, %v5864_v0 }
 0x7f9   : > { %v5890_v57 = vmul.f32 %v11816_v2, %v11816_v2 }
 0x7fb   : > { %5926 = vrot.lane.b32.xlu0 %v5890_v57, %s8032_s8 }
 0x804   : > { %v5843_v56 = vpop.xlane.xlu2 %5842 }
 0x805   : > { %v5865_v30 = vmul.f32 %v11742_v41, %v5843_v56 }
 0x807   : > { %v11823_v19 = vsub.f32 %v11725_v40, %v5865_v30 }
 0x809   : > { %v5891_v52 = vmul.f32 %v11823_v19, %v11823_v19 }
 0x80b   : > { %5928 = vrot.lane.b32.xlu0 %v5891_v52, %s8032_s8 }
 0x80c   : > { %v5846_v6 = vpop.xlane.xlu2 %5845 }
 0x80d   : > { %v5866_v38 = vmul.f32 %v11742_v41, %v5846_v6 }
 0x80f   : > { %v11839_v36 = vsub.f32 %v11719_v29, %v5866_v38 }
 0x811   : > { %v5892_v25 = vmul.f32 %v11839_v36, %v11839_v36 }
 0x833   : > { %v5907_v22 = vpop.permute.xlu1 %5906  ;;  %v5919_v15 = vpop.permute.xlu2 %5918 }
 0x834   : > { %v5945_v17 = vsel %vm5807_vm0, %v5907_v22, 0.0  ;;  %v5963_v8 = vsel %vm5807_vm0, %v5919_v15, 0.0 }
 0x835   : > { %5946 = vadd.xlane.f32.xlu1 %v5945_v17 }
 0x83b   : > { %v5909_v62 = vpop.permute.xlu1 %5908 }
 0x83c   : > { %v5948_v47 = vsel %vm5807_vm0, %v5909_v62, 0.0 }
 0x83d   : > { %5949 = vadd.xlane.f32.xlu0 %v5948_v47 }
 0x843   : > { %v5911_v11 = vpop.permute.xlu1 %5910 }
 0x844   : > { %v5951_v43 = vsel %vm5807_vm0, %v5911_v11, 0.0 }
 0x845   : > { %5952 = vadd.xlane.f32.xlu0 %v5951_v43 }
 0x84b   : > { %v5913_v40 = vpop.permute.xlu1 %5912 }
 0x84c   : > { %v5954_v39 = vsel %vm5807_vm0, %v5913_v40, 0.0 }
 0x84d   : > { %5955 = vadd.xlane.f32.xlu0 %v5954_v39  ;;  %v5917_v60 = vpop.permute.xlu0 %5916  ;;  %v5925_v45 = vpop.permute.xlu2 %5924 }
 0x84e   : > { %v5960_v10 = vsel %vm5807_vm0, %v5917_v60, 0.0  ;;  %v5972_v48 = vsel %vm5807_vm0, %v5925_v45, 0.0 }
 0x84f   : > { %5961 = vadd.xlane.f32.xlu2 %v5960_v10 }
 0x853   : > { %v5915_v49 = vpop.permute.xlu1 %5914 }
 0x854   : > { %v5957_v51 = vsel %vm5807_vm0, %v5915_v49, 0.0 }
 0x855   : > { %5958 = vadd.xlane.f32.xlu1 %v5957_v51  ;;  %5964 = vadd.xlane.f32.xlu0 %v5963_v8 }
 0x85b   : > { %v5921_v3 = vpop.permute.xlu1 %5920 }
 0x85c   : > { %v5966_v5 = vsel %vm5807_vm0, %v5921_v3, 0.0 }
 0x85d   : > { %5973 = vadd.xlane.f32.xlu0 %v5972_v48  ;;  %5967 = vadd.xlane.f32.xlu2 %v5966_v5 }
 0x863   : > { %v5923_v9 = vpop.permute.xlu1 %5922 }
 0x864   : > { %v5969_v4 = vsel %vm5807_vm0, %v5923_v9, 0.0 }
 0x86d   : > { %v5927_v26 = vpop.permute.xlu0 %5926 }
 0x86e   : > { %5930 = vrot.lane.b32.xlu1 %v5892_v25, %s8032_s8  ;;  %v5975_v59 = vsel %vm5807_vm0, %v5927_v26, 0.0 }
 0x86f   : > { %5976 = vadd.xlane.f32.xlu2 %v5975_v59 }
 0x87d   : > { %v11846_v14 = vpop.permute.xlu0 %5928 }
 0x898   : > { %5970 = vadd.xlane.f32.xlu1 %v5969_v4 }
 0x8a8   : > { %v5947_v12 = vpop.xlane.xlu1 %5946 }
 0x8a9   : > { %v5984_v27 = vmul.f32 %v5947_v12, %v11742_v41 }
 0x8ab   : > { %v5997_v29 = vadd.f32 1e-05, %v5984_v27 }
 0x8ad   : > { %7931 = vrsqrt.f32 %v5997_v29  ;;  %vm6016_vm3 = vweird.f32 %v5997_v29 }
 0x8b0   : > { %v5950_v61 = vpop.xlane.xlu0 %5949 }
 0x8b1   : > { %v5985_v31 = vmul.f32 %v5950_v61, %v11742_v41 }
 0x8b3   : > { %v7932_v58 = vpop.eup %7931  ;;  %v5998_v1 = vadd.f32 1e-05, %v5985_v31 }
 0x8b4   : > { %v6011_v42 = vmul.f32 %v7932_v58, %v5997_v29  ;;  %vm6017_vm2 = vweird.f32 %v7932_v58 }
 0x8b5   : > { %7933 = vrsqrt.f32 %v5998_v1  ;;  %vm6018_vm4 = vmor %vm6016_vm3, %vm6017_vm2  ;;  %vm6026_vm6 = vweird.f32 %v5998_v1 }
 0x8b6   : > { %v6012_v44 = vmul.f32 %v7932_v58, %v6011_v42 }
 0x8b8   : > { %v6013_v16 = vmul.f32 0.5, %v6012_v44  ;;  %v5953_v54 = vpop.xlane.xlu0 %5952 }
 0x8b9   : > { %v5986_v34 = vmul.f32 %v5953_v54, %v11742_v41 }
 0x8ba   : > { %v6014_v63 = vsub.f32 1.5, %v6013_v16 }
 0x8bb   : > { %v7934_v32 = vpop.eup %7933  ;;  %v5999_v23 = vadd.f32 1e-05, %v5986_v34 }
 0x8bc   : > { %v6015_v24 = vmul.f32 %v7932_v58, %v6014_v63  ;;  %v6021_v33 = vmul.f32 %v7934_v32, %v5998_v1  ;;  %vm6027_vm5 = vweird.f32 %v7934_v32 }
 0x8bd   : > { %7935 = vrsqrt.f32 %v5999_v23  ;;  %vm6028_vm7 = vmor %vm6026_vm6, %vm6027_vm5  ;;  %vm6036_vm9 = vweird.f32 %v5999_v23 }
 0x8be   : > { %v6019_v0 = vsel %vm6018_vm4, %v7932_v58, %v6015_v24  ;;  %v6022_v57 = vmul.f32 %v7934_v32, %v6021_v33 }
 0x8bf   : > { %v6140_v56 = vmul.f32 %v6019_v0, %v11746_v21 }
 0x8c0   : > { %v6023_v30 = vmul.f32 0.5, %v6022_v57  ;;  %v5956_v52 = vpop.xlane.xlu0 %5955 }
 0x8c1   : > { %v5987_v22 = vmul.f32 %v5956_v52, %v11742_v41  ;;  %v6158_v17 = vmul.f32 %v11628_v35, %v6140_v56 }
 0x8c2   : > { %v6024_v62 = vsub.f32 1.5, %v6023_v30  ;;  %v5962_v60 = vpop.xlane.xlu2 %5961 }
 0x8c3   : > { %v7936_v47 = vpop.eup %7935  ;;  %v6000_v11 = vadd.f32 1e-05, %v5987_v22  ;;  %v11855_v43 = vadd.f32 %v11646_v18, %v6158_v17  ;;  %v5989_v16 = vmul.f32 %v5962_v60, %v11742_v41 }
 0x8c4   : > { %v6025_v6 = vmul.f32 %v7934_v32, %v6024_v62  ;;  %v6031_v40 = vmul.f32 %v7936_v47, %v5999_v23  ;;  %vm6037_vm8 = vweird.f32 %v7936_v47 }
 0x8c5   : > { %13363 = vst [vmem:[#allocation11_spill] sm:$0xff] %v11855_v43  ;;  %7937 = vrsqrt.f32 %v6000_v11  ;;  %6205 = vrot.lane.b32.xlu2 %v11855_v43, %s8032_s8  ;;  %vm6038_vm10 = vmor %vm6036_vm9, %vm6037_vm8  ;;  %vm6046_vm12 = vweird.f32 %v6000_v11  ;;  %v11880_v57 = vadd.f32 1e-05, %v5989_v16 }
 0x8c6   : > { %v6029_v21 = vsel %vm6028_vm7, %v7934_v32, %v6025_v6  ;;  %v6032_v39 = vmul.f32 %v7936_v47, %v6031_v40 }
 0x8c7   : > { %v6141_v10 = vmul.f32 %v6029_v21, %v11753_v13 }
 0x8c8   : > { %v6033_v15 = vmul.f32 0.5, %v6032_v39  ;;  %v5959_v49 = vpop.xlane.xlu1 %5958  ;;  %v5965_v51 = vpop.xlane.xlu0 %5964 }
 0x8c9   : > { %v5988_v8 = vmul.f32 %v5959_v49, %v11742_v41  ;;  %v5990_v45 = vmul.f32 %v5965_v51, %v11742_v41  ;;  %v6159_v3 = vmul.f32 %v11628_v35, %v6141_v10 }
 0x8ca   : > { %v6034_v48 = vsub.f32 1.5, %v6033_v15 }
 0x8cb   : > { %v7938_v5 = vpop.eup %7937  ;;  %v6001_v38 = vadd.f32 1e-05, %v5988_v8  ;;  %v6003_v25 = vadd.f32 1e-05, %v5990_v45  ;;  %v11864_v26 = vadd.f32 %v11646_v18, %v6159_v3 }
 0x8cc   : > { %v6035_v59 = vmul.f32 %v7936_v47, %v6034_v48  ;;  %v6041_v13 = vmul.f32 %v7938_v5, %v6000_v11  ;;  %vm6047_vm11 = vweird.f32 %v7938_v5 }
 0x8cd   : > { %13364 = vst [vmem:[#allocation8_spill] sm:$0xff] %v11864_v26  ;;  %7939 = vrsqrt.f32 %v6001_v38  ;;  %6207 = vrot.lane.b32.xlu0 %v11864_v26, %s8032_s8  ;;  %vm6048_vm13 = vmor %vm6046_vm12, %vm6047_vm11  ;;  %vm6056_vm15 = vweird.f32 %v6001_v38  ;;  %vm6076_vm3 = vweird.f32 %v6003_v25  ;;  %vm6066_vm12 = vweird.f32 %v11880_v57 }
 0x8ce   : > { %v6039_v9 = vsel %vm6038_vm10, %v7936_v47, %v6035_v59  ;;  %v6042_v4 = vmul.f32 %v7938_v5, %v6041_v13  ;;  %7941 = vrsqrt.f32 %v6003_v25 }
 0x8cf   : > { %v6142_v12 = vmul.f32 %v6039_v9, %v11760_v37 }
 0x8d0   : > { %v6043_v27 = vmul.f32 0.5, %v6042_v4  ;;  %v5968_v29 = vpop.xlane.xlu2 %5967  ;;  %v5974_v61 = vpop.xlane.xlu0 %5973 }
 0x8d1   : > { %v5991_v31 = vmul.f32 %v5968_v29, %v11742_v41  ;;  %v5993_v58 = vmul.f32 %v5974_v61, %v11742_v41  ;;  %v6160_v1 = vmul.f32 %v11628_v35, %v6142_v12 }
 0x8d2   : > { %v6044_v42 = vsub.f32 1.5, %v6043_v27 }
 0x8d3   : > { %v7940_v44 = vpop.eup %7939  ;;  %v6004_v54 = vadd.f32 1e-05, %v5991_v31  ;;  %v11873_v34 = vadd.f32 1e-05, %v5993_v58  ;;  %v11876_v63 = vadd.f32 %v11646_v18, %v6160_v1 }
 0x8d4   : > { %v6045_v37 = vmul.f32 %v7938_v5, %v6044_v42  ;;  %v6051_v32 = vmul.f32 %v7940_v44, %v6001_v38  ;;  %v7942_v23 = vpop.eup %7941  ;;  %vm6057_vm14 = vweird.f32 %v7940_v44 }
 0x8d5   : > { %13365 = vst [vmem:[#allocation17_spill] sm:$0xff] %v11876_v63  ;;  %7943 = vrsqrt.f32 %v6004_v54  ;;  %6209 = vrot.lane.b32.xlu0 %v11876_v63, %s8032_s8  ;;  %v6071_v0 = vmul.f32 %v7942_v23, %v6003_v25  ;;  %vm6077_vm1 = vweird.f32 %v7942_v23  ;;  %vm6058_vm2 = vmor %vm6056_vm15, %vm6057_vm14  ;;  %vm6086_vm6 = vweird.f32 %v6004_v54 }
 0x8d6   : > { %v6049_v24 = vsel %vm6048_vm13, %v7938_v5, %v6045_v37  ;;  %v6052_v33 = vmul.f32 %v7940_v44, %v6051_v32  ;;  %7945 = vrsqrt.f32 %v11873_v34  ;;  %vm6078_vm4 = vmor %vm6076_vm3, %vm6077_vm1  ;;  %vm6106_vm9 = vweird.f32 %v11873_v34 }
 0x8d7   : > { %v6143_v56 = vmul.f32 %v6049_v24, %v11767_v28  ;;  %v6072_v52 = vmul.f32 %v7942_v23, %v6071_v0  ;;  %7947 = vrsqrt.f32 %v11880_v57 }
 0x8d8   : > { %v6053_v30 = vmul.f32 0.5, %v6052_v33 }
 0x8d9   : > { %v6161_v22 = vmul.f32 %v11628_v35, %v6143_v56  ;;  %v6073_v62 = vmul.f32 0.5, %v6072_v52  ;;  %v6190_v52 = vld [vmem:[%s12673_s3 + $0x8] sm:$0xff] }
 0x8da   : > { %v6054_v17 = vsub.f32 1.5, %v6053_v30 }
 0x8db   : > { %v7944_v47 = vpop.eup %7943  ;;  %v11887_v11 = vadd.f32 %v11646_v18, %v6161_v22  ;;  %v6074_v40 = vsub.f32 1.5, %v6073_v62  ;;  %v6271_v62 = vand.u32 4294901760, %v6190_v52 }
 0x8dc   : > { %v6055_v6 = vmul.f32 %v7940_v44, %v6054_v17  ;;  %v6081_v21 = vmul.f32 %v7944_v47, %v6004_v54  ;;  %v7946_v39 = vpop.eup %7945  ;;  %vm6087_vm5 = vweird.f32 %v7944_v47 }
 0x8dd   : > { %13366 = vst [vmem:[#allocation44_spill] sm:$0xff] %v11887_v11  ;;  %6211 = vrot.lane.b32.xlu1 %v11887_v11, %s8032_s8  ;;  %v6075_v60 = vmul.f32 %v7942_v23, %v6074_v40  ;;  %v6101_v15 = vmul.f32 %v7946_v39, %v11873_v34  ;;  %v7948_v3 = vpop.eup %7947  ;;  %vm6088_vm7 = vmor %vm6086_vm6, %vm6087_vm5  ;;  %vm6107_vm8 = vweird.f32 %v7946_v39  ;;  %6560 = vmatpush.msrb.mxu1 %v6271_v62 }
 0x8de   : > { %v6059_v28 = vsel %vm6058_vm2, %v7940_v44, %v6055_v6  ;;  %v6082_v10 = vmul.f32 %v7944_v47, %v6081_v21  ;;  %vm6108_vm10 = vmor %vm6106_vm9, %vm6107_vm8  ;;  %vm6067_vm11 = vweird.f32 %v7948_v3  ;;  %v6395_v6 = vsub.f32 %v6190_v52, %v6271_v62  ;;  %6272 = vmatpush.msrb.mxu2 %v6271_v62 }
 0x8df   : > { %v6144_v49 = vmul.f32 %v6059_v28, %v11787_v53  ;;  %v6079_v51 = vsel %vm6078_vm4, %v7942_v23, %v6075_v60  ;;  %v6102_v45 = vmul.f32 %v7946_v39, %v6101_v15  ;;  %v6061_v53 = vmul.f32 %v7948_v3, %v11880_v57  ;;  %vm6068_vm13 = vmor %vm6066_vm12, %vm6067_vm11 }
 0x8e0   : > { %v6083_v8 = vmul.f32 0.5, %v6082_v10  ;;  %v6146_v13 = vmul.f32 %v6079_v51, %v11771_v50  ;;  %v5931_v58 = vpop.permute.xlu1 %5930  ;;  %6475 = vmatpush.msrb.mxu0 %v6395_v6  ;;  %v5978_v60 = vsel %vm5807_vm0, %v11846_v14, 0.0 }
 0x8e1   : > { %v6162_v48 = vmul.f32 %v11628_v35, %v6144_v49  ;;  %v6103_v4 = vmul.f32 0.5, %v6102_v45  ;;  %v6062_v31 = vmul.f32 %v7948_v3, %v6061_v53  ;;  %v5981_v54 = vsel %vm5807_vm0, %v5931_v58, 0.0 }
 0x8e2   : > { %v6084_v5 = vsub.f32 1.5, %v6083_v8  ;;  %v5977_v38 = vpop.xlane.xlu2 %5976  ;;  %v6164_v27 = vmul.f32 %v11628_v35, %v6146_v13 }
 0x8e3   : > { %v5994_v25 = vmul.f32 %v5977_v38, %v11742_v41  ;;  %v11896_v59 = vadd.f32 %v11646_v18, %v6162_v48  ;;  %v6104_v61 = vsub.f32 1.5, %v6103_v4  ;;  %v6063_v16 = vmul.f32 0.5, %v6062_v31 }
 0x8e4   : > { %v6085_v9 = vmul.f32 %v7944_v47, %v6084_v5  ;;  %v11904_v50 = vadd.f32 %v11646_v18, %v6164_v27 }
 0x8e5   : > { %13367 = vst [vmem:[#allocation29_spill] sm:$0xff] %v11896_v59  ;;  %v6007_v12 = vadd.f32 1e-05, %v5994_v25  ;;  %6213 = vrot.lane.b32.xlu1 %v11896_v59, %s8032_s8  ;;  %v6105_v42 = vmul.f32 %v7946_v39, %v6104_v61  ;;  %v6064_v24 = vsub.f32 1.5, %v6063_v16 }
 0x8e6   : > { %v6089_v29 = vsel %vm6088_vm7, %v7944_v47, %v6085_v9  ;;  %13368 = vst [vmem:[#allocation15_spill] sm:$0xff] %v11904_v50 }
 0x8e7   : > { %7949 = vrsqrt.f32 %v6007_v12  ;;  %v6147_v1 = vmul.f32 %v6089_v29, %v11795_v20  ;;  %v6109_v23 = vsel %vm6108_vm10, %v7946_v39, %v6105_v42  ;;  %v6065_v56 = vmul.f32 %v7948_v3, %v6064_v24 }
 0x8e8   : > { %v6149_v0 = vmul.f32 %v6109_v23, %v11806_v7  ;;  %v6189_v7 = vld [vmem:[%s12673_s3] sm:$0xff]  ;;  %v6396_v39 = vand.u32 4294901760, %v6395_v6  ;;  %vm6116_vm15 = vweird.f32 %v6007_v12 }
 0x8e9   : > { %v6165_v32 = vmul.f32 %v11628_v35, %v6147_v1  ;;  %v6069_v22 = vsel %vm6068_vm13, %v7948_v3, %v6065_v56  ;;  %v6273_v40 = vand.u32 4294901760, %v6189_v7 }
 0x8ea   : > { %v6167_v34 = vmul.f32 %v11628_v35, %v6149_v0  ;;  %v6145_v57 = vmul.f32 %v6069_v22, %v11776_v46  ;;  %v6397_v10 = vsub.f32 %v6395_v6, %v6396_v39 }
 0x8eb   : > { %v11913_v20 = vadd.f32 %v11646_v18, %v6165_v32  ;;  %v6401_v28 = vsub.f32 %v6189_v7, %v6273_v40  ;;  %6562 = vmatpush.msrb.mxu1 %v6273_v40  ;;  %6274 = vmatpush.msrb.mxu2 %v6273_v40 }
 0x8ec   : > { %v11927_v47 = vadd.f32 %v11646_v18, %v6167_v34  ;;  %v6163_v46 = vmul.f32 %v11628_v35, %v6145_v57  ;;  %v6398_v51 = vand.u32 4294901760, %v6397_v10 }
 0x8ed   : > { %v7950_v44 = vpop.eup %7949  ;;  %6217 = vrot.lane.b32.xlu1 %v11904_v50, %s8032_s8  ;;  %13369 = vst [vmem:[#allocation38_spill] sm:$0xff] %v11913_v20  ;;  %v6402_v15 = vand.u32 4294901760, %v6401_v28  ;;  %6478 = vmatpush.msrb.mxu0 %v6401_v28 }
 0x8ee   : > { %v6111_v37 = vmul.f32 %v7950_v44, %v6007_v12  ;;  %5982 = vadd.xlane.f32.xlu2 %v5981_v54  ;;  %13370 = vst [vmem:[#allocation36_spill] sm:$0xff] %v11927_v47  ;;  %vm6117_vm14 = vweird.f32 %v7950_v44  ;;  %6659 = vmatpush.msra.mxu2 %v6396_v39  ;;  %v11936_v3 = vadd.f32 %v11646_v18, %v6163_v46 }
 0x8ef   : > { %vm6118_vm1 = vmor %vm6116_vm15, %vm6117_vm14  ;;  %v6403_v8 = vsub.f32 %v6401_v28, %v6402_v15  ;;  %6399 = vmatpush.msrb.mxu3 %v6398_v51 }
 0x8f0   : > { %v6112_v33 = vmul.f32 %v7950_v44, %v6111_v37  ;;  %6663 = vmatpush.msra.mxu2 %v6402_v15  ;;  %13371 = vst [vmem:[#allocation23_spill] sm:$0xff] %v11936_v3 }
 0x8f1   : > { %v6404_v45 = vand.u32 4294901760, %v6403_v8 }
 0x8f2   : > { %v6113_v30 = vmul.f32 0.5, %v6112_v33 }
 0x8f3   : > { %6405 = vmatpush.msrb.mxu3 %v6404_v45 }
 0x8f4   : > { %v6114_v17 = vsub.f32 1.5, %v6113_v30 }
 0x8f5   : > { %6219 = vrot.lane.b32.xlu1 %v11913_v20, %s8032_s8  ;;  %6732 = vmatpush.msra.mxu3 %v6271_v62 }
 0x8f6   : > { %v6115_v21 = vmul.f32 %v7950_v44, %v6114_v17 }
 0x8f7   : > { %6734 = vmatpush.msra.mxu3 %v6273_v40 }
 0x8f8   : > { %v6119_v49 = vsel %vm6118_vm1, %v7950_v44, %v6115_v21 }
 0x8f9   : > { %v6150_v14 = vmul.f32 %v6119_v49, %v11816_v2 }
 0x8fb   : > { %v6168_v48 = vmul.f32 %v11628_v35, %v6150_v14 }
 0x8fd   : > { %6223 = vrot.lane.b32.xlu1 %v11927_v47, %s8032_s8  ;;  %v11944_v25 = vadd.f32 %v11646_v18, %v6168_v48 }
 0x8ff   : > { %5979 = vadd.xlane.f32.xlu0 %v5978_v60  ;;  %13372 = vst [vmem:[#allocation7_spill] sm:$0xff] %v11944_v25 }
 0x906   : > { %6215 = vrot.lane.b32.xlu2 %v11936_v3, %s8032_s8 }
 0x90b   : > { %v5971_v5 = vpop.xlane.xlu1 %5970 }
 0x90c   : > { %v5992_v38 = vmul.f32 %v5971_v5, %v11742_v41 }
 0x90e   : > { %v6005_v13 = vadd.f32 1e-05, %v5992_v38  ;;  %6225 = vrot.lane.b32.xlu2 %v11944_v25, %s8032_s8 }
 0x910   : > { %7951 = vrsqrt.f32 %v6005_v13  ;;  %vm6096_vm3 = vweird.f32 %v6005_v13 }
 0x916   : > { %v7952_v2 = vpop.eup %7951 }
 0x917   : > { %v6091_v9 = vmul.f32 %v7952_v2, %v6005_v13  ;;  %vm6097_vm2 = vweird.f32 %v7952_v2 }
 0x918   : > { %vm6098_vm4 = vmor %vm6096_vm3, %vm6097_vm2 }
 0x919   : > { %v6092_v4 = vmul.f32 %v7952_v2, %v6091_v9 }
 0x91b   : > { %v6093_v53 = vmul.f32 0.5, %v6092_v4 }
 0x91d   : > { %v6094_v12 = vsub.f32 1.5, %v6093_v53 }
 0x91f   : > { %v6095_v27 = vmul.f32 %v7952_v2, %v6094_v12  ;;  %v6206_v29 = vpop.permute.xlu2 %6205 }
 0x920   : > { %v6231_v61 = vsel %vm5807_vm0, %v6206_v29, 0 }
 0x921   : > { %v6099_v31 = vsel %vm6098_vm4, %v7952_v2, %v6095_v27  ;;  %v11949_v58 = vand.u32 4294901760, %v6231_v61 }
 0x922   : > { %v6148_v1 = vmul.f32 %v6099_v31, %v11802_v55 }
 0x923   : > { %v6276_v42 = vsub.f32 %v6231_v61, %v11949_v58  ;;  %6407 = vmatmul.f32.vlgmr.msrb.gmra.mxu3 %v11949_v58 }
 0x924   : > { %v6166_v44 = vmul.f32 %v11628_v35, %v6148_v1 }
 0x925   : > { %v6277_v16 = vand.u32 4294901760, %v6276_v42  ;;  %6481 = vmatmul.f32.vlgmr.msrb.gmra.mxu0 %v6276_v42 }
 0x926   : > { %v11956_v54 = vadd.f32 %v11646_v18, %v6166_v44 }
 0x927   : > { %v6278_v37 = vsub.f32 %v6276_v42, %v6277_v16  ;;  %6566 = vmatmul.f32.vlgmr.msrb.gmra.mxu1 %v6277_v16 }
 0x928   : > { %13373 = vst [vmem:[#allocation19_spill] sm:$0xff] %v11956_v54  ;;  %6221 = vrot.lane.b32.xlu0 %v11956_v54, %s8032_s8 }
 0x929   : > { %v6279_v32 = vand.u32 4294901760, %v6278_v37 }
 0x92b   : > { %6280 = vmatmul.f32.vlgmr.msrb.gmra.mxu2 %v6279_v32 }
 0x93f   : > { %v6208_v23 = vpop.permute.xlu0 %6207 }
 0x940   : > { %v6233_v55 = vsel %vm5807_vm0, %v6208_v23, 0 }
 0x941   : > { %v11961_v24 = vand.u32 4294901760, %v6233_v55 }
 0x943   : > { %v6284_v33 = vsub.f32 %v6233_v55, %v11961_v24  ;;  %6411 = vmatmul.f32.gmra.mxu3 %v11961_v24 }
 0x945   : > { %6486 = vmatmul.f32.gmra.mxu0 %v6284_v33  ;;  %v6285_v0 = vand.u32 4294901760, %v6284_v33 }
 0x947   : > { %6572 = vmatmul.f32.gmra.mxu1 %v6285_v0  ;;  %v6210_v56 = vpop.permute.xlu0 %6209  ;;  %v6286_v30 = vsub.f32 %v6284_v33, %v6285_v0 }
 0x948   : > { %v6235_v34 = vsel %vm5807_vm0, %v6210_v56, 0 }
 0x949   : > { %v11966_v52 = vand.u32 4294901760, %v6235_v34  ;;  %v6287_v22 = vand.u32 4294901760, %v6286_v30 }
 0x94b   : > { %v6292_v17 = vsub.f32 %v6235_v34, %v11966_v52  ;;  %6288 = vmatmul.f32.gmra.mxu2 %v6287_v22  ;;  %6415 = vmatmul.f32.gmra.mxu3 %v11966_v52 }
 0x94d   : > { %6491 = vmatmul.f32.gmra.mxu0 %v6292_v17  ;;  %v6293_v62 = vand.u32 4294901760, %v6292_v17 }
 0x94f   : > { %v6212_v7 = vpop.permute.xlu1 %6211  ;;  %6578 = vmatmul.f32.gmra.mxu1 %v6293_v62  ;;  %v6294_v6 = vsub.f32 %v6292_v17, %v6293_v62 }
 0x950   : > { %v6237_v40 = vsel %vm5807_vm0, %v6212_v7, 0 }
 0x951   : > { %v11971_v57 = vand.u32 4294901760, %v6237_v40  ;;  %v6295_v21 = vand.u32 4294901760, %v6294_v6 }
 0x953   : > { %v6300_v39 = vsub.f32 %v6237_v40, %v11971_v57  ;;  %6296 = vmatmul.f32.gmra.mxu2 %v6295_v21  ;;  %6419 = vmatmul.f32.gmra.mxu3 %v11971_v57 }
 0x955   : > { %6496 = vmatmul.f32.gmra.mxu0 %v6300_v39  ;;  %v6301_v28 = vand.u32 4294901760, %v6300_v39 }
 0x957   : > { %v6214_v60 = vpop.permute.xlu1 %6213  ;;  %6584 = vmatmul.f32.gmra.mxu1 %v6301_v28  ;;  %v6302_v10 = vsub.f32 %v6300_v39, %v6301_v28 }
 0x958   : > { %v6239_v15 = vsel %vm5807_vm0, %v6214_v60, 0 }
 0x959   : > { %v11976_v46 = vand.u32 4294901760, %v6239_v15  ;;  %v6303_v49 = vand.u32 4294901760, %v6302_v10 }
 0x95b   : > { %v6308_v51 = vsub.f32 %v6239_v15, %v11976_v46  ;;  %6304 = vmatmul.f32.gmra.mxu2 %v6303_v49  ;;  %6423 = vmatmul.f32.gmra.mxu3 %v11976_v46 }
 0x95d   : > { %6501 = vmatmul.f32.gmra.mxu0 %v6308_v51  ;;  %v6309_v8 = vand.u32 4294901760, %v6308_v51 }
 0x95f   : > { %6590 = vmatmul.f32.gmra.mxu1 %v6309_v8  ;;  %v6310_v45 = vsub.f32 %v6308_v51, %v6309_v8  ;;  %v6218_v38 = vpop.permute.xlu1 %6217 }
 0x960   : > { %v6243_v2 = vsel %vm5807_vm0, %v6218_v38, 0 }
 0x961   : > { %v5983_v14 = vpop.xlane.xlu2 %5982  ;;  %v6311_v48 = vand.u32 4294901760, %v6310_v45  ;;  %v11985_v27 = vand.u32 4294901760, %v6243_v2 }
 0x962   : > { %v5996_v5 = vmul.f32 %v5983_v14, %v11742_v41 }
 0x963   : > { %6312 = vmatmul.f32.gmra.mxu2 %v6311_v48  ;;  %v6324_v44 = vsub.f32 %v6243_v2, %v11985_v27 }
 0x964   : > { %v6009_v13 = vadd.f32 1e-05, %v5996_v5 }
 0x965   : > { %v6325_v30 = vand.u32 4294901760, %v6324_v44 }
 0x966   : > { %7953 = vrsqrt.f32 %v6009_v13  ;;  %vm6136_vm6 = vweird.f32 %v6009_v13 }
 0x967   : > { %v6220_v31 = vpop.permute.xlu1 %6219  ;;  %v6326_v7 = vsub.f32 %v6324_v44, %v6325_v30 }
 0x968   : > { %v6245_v37 = vsel %vm5807_vm0, %v6220_v31, 0 }
 0x969   : > { %v6216_v9 = vpop.permute.xlu2 %6215  ;;  %v11992_v0 = vand.u32 4294901760, %v6245_v37  ;;  %v6327_v40 = vand.u32 4294901760, %v6326_v7 }
 0x96a   : > { %v6241_v4 = vsel %vm5807_vm0, %v6216_v9, 0 }
 0x96b   : > { %v11983_v53 = vand.u32 4294901760, %v6241_v4  ;;  %v6332_v62 = vsub.f32 %v6245_v37, %v11992_v0 }
 0x96c   : > { %v7954_v12 = vpop.eup %7953 }
 0x96d   : > { %v6131_v29 = vmul.f32 %v7954_v12, %v6009_v13  ;;  %v6316_v61 = vsub.f32 %v6241_v4, %v11983_v53  ;;  %6427 = vmatmul.f32.gmra.mxu3 %v11983_v53  ;;  %vm6137_vm5 = vweird.f32 %v7954_v12  ;;  %v6333_v39 = vand.u32 4294901760, %v6332_v62 }
 0x96e   : > { %vm6138_vm7 = vmor %vm6136_vm6, %vm6137_vm5 }
 0x96f   : > { %v6132_v1 = vmul.f32 %v7954_v12, %v6131_v29  ;;  %6506 = vmatmul.f32.gmra.mxu0 %v6316_v61  ;;  %v6317_v42 = vand.u32 4294901760, %v6316_v61  ;;  %v6334_v15 = vsub.f32 %v6332_v62, %v6333_v39  ;;  %v6224_v38 = vpop.permute.xlu1 %6223 }
 0x970   : > { %v6249_v13 = vsel %vm5807_vm0, %v6224_v38, 0 }
 0x971   : > { %v6133_v16 = vmul.f32 0.5, %v6132_v1  ;;  %6596 = vmatmul.f32.gmra.mxu1 %v6317_v42  ;;  %v6318_v32 = vsub.f32 %v6316_v61, %v6317_v42  ;;  %v6335_v51 = vand.u32 4294901760, %v6334_v15  ;;  %v12013_v4 = vand.u32 4294901760, %v6249_v13  ;;  %v6226_v29 = vpop.permute.xlu2 %6225 }
 0x972   : > { %v5980_v23 = vpop.xlane.xlu0 %5979  ;;  %v6251_v61 = vsel %vm5807_vm0, %v6226_v29, 0 }
 0x973   : > { %v6134_v55 = vsub.f32 1.5, %v6133_v16  ;;  %v5995_v33 = vmul.f32 %v5980_v23, %v11742_v41  ;;  %v6319_v56 = vand.u32 4294901760, %v6318_v32  ;;  %v12021_v1 = vand.u32 4294901760, %v6251_v61 }
 0x975   : > { %v6135_v34 = vmul.f32 %v7954_v12, %v6134_v55  ;;  %v6008_v22 = vadd.f32 1e-05, %v5995_v33  ;;  %6431 = vmatmul.f32.gmra.mxu3 %v11985_v27  ;;  %6320 = vmatmul.f32.gmra.mxu2 %v6319_v56  ;;  %v6356_v16 = vsub.f32 %v6251_v61, %v12021_v1 }
 0x977   : > { %v6139_v17 = vsel %vm6138_vm7, %v7954_v12, %v6135_v34  ;;  %7955 = vrsqrt.f32 %v6008_v22  ;;  %6511 = vmatmul.f32.gmra.mxu0 %v6324_v44  ;;  %vm6126_vm9 = vweird.f32 %v6008_v22  ;;  %v6357_v23 = vand.u32 4294901760, %v6356_v16 }
 0x978   : > { %v6152_v6 = vmul.f32 %v6139_v17, %v11839_v36 }
 0x979   : > { %6602 = vmatmul.f32.gmra.mxu1 %v6325_v30  ;;  %v6358_v55 = vsub.f32 %v6356_v16, %v6357_v23 }
 0x97a   : > { %v6170_v41 = vmul.f32 %v11628_v35, %v6152_v6 }
 0x97b   : > { %v6359_v33 = vand.u32 4294901760, %v6358_v55 }
 0x97c   : > { %v11999_v21 = vadd.f32 %v11646_v18, %v6170_v41 }
 0x97d   : > { %v7956_v28 = vpop.eup %7955  ;;  %6435 = vmatmul.f32.gmra.mxu3 %v11992_v0  ;;  %6328 = vmatmul.f32.gmra.mxu2 %v6327_v40 }
 0x97e   : > { %13374 = vst [vmem:[#allocation41_spill] sm:$0xff] %v11999_v21  ;;  %v6121_v60 = vmul.f32 %v7956_v28, %v6008_v22  ;;  %6229 = vrot.lane.b32.xlu0 %v11999_v21, %s8032_s8  ;;  %vm6127_vm8 = vweird.f32 %v7956_v28 }
 0x97f   : > { %6516 = vmatmul.f32.gmra.mxu0 %v6332_v62  ;;  %vm6128_vm10 = vmor %vm6126_vm9, %vm6127_vm8 }
 0x980   : > { %v6122_v10 = vmul.f32 %v7956_v28, %v6121_v60 }
 0x981   : > { %6608 = vmatmul.f32.gmra.mxu1 %v6333_v39 }
 0x982   : > { %v6123_v36 = vmul.f32 0.5, %v6122_v10 }
 0x984   : > { %v6124_v49 = vsub.f32 1.5, %v6123_v36  ;;  %v6816_v36 = vld [vmem:[%s12674_s4 + $0x78] sm:$0xff] }
 0x985   : > { %6336 = vmatmul.f32.gmra.mxu2 %v6335_v51 }
 0x986   : > { %v6125_v8 = vmul.f32 %v7956_v28, %v6124_v49  ;;  %v12046_v49 = vand.u32 4294901760, %v6816_v36 }
 0x988   : > { %v6129_v45 = vsel %vm6128_vm10, %v7956_v28, %v6125_v8  ;;  %6819 = vmatpush.msra.mxu0 %v12046_v49  ;;  %v12050_v51 = vsub.f32 %v6816_v36, %v12046_v49  ;;  %7219 = vmatpush.msrb.mxu3 %v12046_v49  ;;  %v6810_v36 = vld [vmem:[%s12674_s4 + $0x48] sm:$0xff] }
 0x989   : > { %v6151_v14 = vmul.f32 %v6129_v45, %v11823_v19 }
 0x98a   : > { %7106 = vmatpush.msrb.mxu2 %v12050_v51 }
 0x98b   : > { %v6169_v48 = vmul.f32 %v11628_v35, %v6151_v14  ;;  %v6348_v35 = vsub.f32 %v6249_v13, %v12013_v4  ;;  %v6815_v14 = vld [vmem:[%s12674_s4 + $0x70] sm:$0xff] }
 0x98c   : > { %v12067_v38 = vand.u32 4294901760, %v6815_v14 }
 0x98d   : > { %v12007_v5 = vadd.f32 %v11646_v18, %v6169_v48  ;;  %v6349_v44 = vand.u32 4294901760, %v6348_v35 }
 0x98e   : > { %6821 = vmatpush.msra.mxu0 %v12067_v38  ;;  %v12071_v13 = vsub.f32 %v6815_v14, %v12067_v38  ;;  %7221 = vmatpush.msrb.mxu3 %v12067_v38  ;;  %v12162_v14 = vand.u32 4294901760, %v6810_v36 }
 0x98f   : > { %13375 = vst [vmem:[#allocation32_spill] sm:$0xff] %v12007_v5  ;;  %6227 = vrot.lane.b32.xlu1 %v12007_v5, %s8032_s8  ;;  %v6350_v37 = vsub.f32 %v6348_v35, %v6349_v44 }
 0x990   : > { %7109 = vmatpush.msrb.mxu2 %v12071_v13  ;;  %v13378_v11 = vand.u32 4294901760, %v12071_v13 }
 0x991   : > { %v6351_v32 = vand.u32 4294901760, %v6350_v37 }
 0x99a   : > { %v6222_v2 = vpop.permute.xlu0 %6221 }
 0x99b   : > { %v6247_v9 = vsel %vm5807_vm0, %v6222_v2, 0 }
 0x99c   : > { %v12015_v12 = vand.u32 4294901760, %v6247_v9 }
 0x99e   : > { %v6340_v19 = vsub.f32 %v6247_v9, %v12015_v12  ;;  %6439 = vmatmul.f32.gmra.mxu3 %v12015_v12 }
 0x9a0   : > { %6521 = vmatmul.f32.gmra.mxu0 %v6340_v19  ;;  %v6341_v18 = vand.u32 4294901760, %v6340_v19 }
 0x9a2   : > { %6614 = vmatmul.f32.gmra.mxu1 %v6341_v18  ;;  %v6342_v31 = vsub.f32 %v6340_v19, %v6341_v18  ;;  %v6814_v19 = vld [vmem:[%s12674_s4 + $0x68] sm:$0xff]  ;;  %v6482_v43 = vpop.f32.mrf.mxu0 }
 0x9a3   : > { %v12088_v18 = vand.u32 4294901760, %v6814_v19 }
 0x9a4   : > { %v6343_v42 = vand.u32 4294901760, %v6342_v31 }
 0x9a5   : > { %6823 = vmatpush.msra.mxu0 %v12088_v18  ;;  %v12092_v61 = vsub.f32 %v6814_v19, %v12088_v18  ;;  %7223 = vmatpush.msrb.mxu3 %v12088_v18  ;;  %v12170_v19 = vsub.f32 %v6810_v36, %v12162_v14 }
 0x9a6   : > { %6344 = vmatmul.f32.gmra.mxu2 %v6343_v42  ;;  %6443 = vmatmul.f32.gmra.mxu3 %v12013_v4  ;;  %v12039_v15 = vpop.f32.mrf.mxu3 }
 0x9a7   : > { %v12882_v31 = vand.u32 4294901760, %v12092_v61  ;;  %7112 = vmatpush.msrb.mxu2 %v12092_v61 }
 0x9a8   : > { %6526 = vmatmul.f32.gmra.mxu0 %v6348_v35 }
 0x9a9   : > { %v6970_v42 = vsub.f32 %v12092_v61, %v12882_v31 }
 0x9aa   : > { %6620 = vmatmul.f32.gmra.mxu1 %v6349_v44  ;;  %v6813_v44 = vld [vmem:[%s12674_s4 + $0x60] sm:$0xff] }
 0x9ae   : > { %6352 = vmatmul.f32.gmra.mxu2 %v6351_v32  ;;  %6447 = vmatmul.f32.gmra.mxu3 %v12021_v1  ;;  %v6971_v32 = vand.u32 4294901760, %v6970_v42  ;;  %v6809_v42 = vld [vmem:[%s12674_s4 + $0x40] sm:$0xff] }
 0x9b0   : > { %6531 = vmatmul.f32.gmra.mxu0 %v6356_v16  ;;  %v6812_v16 = vld [vmem:[%s12674_s4 + $0x58] sm:$0xff] }
 0x9b1   : > { %v12118_v55 = vand.u32 4294901760, %v6812_v16 }
 0x9b2   : > { %6626 = vmatmul.f32.gmra.mxu1 %v6357_v23  ;;  %v12112_v23 = vand.u32 4294901760, %v6813_v44 }
 0x9b4   : > { %6825 = vmatpush.msra.mxu0 %v12112_v23  ;;  %7225 = vmatpush.msrb.mxu3 %v12112_v23 }
 0x9b6   : > { %6360 = vmatmul.f32.gmra.mxu2 %v6359_v33  ;;  %6827 = vmatpush.msra.mxu0 %v12118_v55 }
 0x9b7   : > { %7227 = vmatpush.msrb.mxu3 %v12118_v55 }
 0x9c6   : > { %v12055_v8 = vpop.f32.mrf.mxu3 }
 0x9ce   : > { %v12078_v9 = vpop.f32.mrf.mxu3 }
 0x9d6   : > { %v12110_v37 = vpop.f32.mrf.mxu3 }
 0x9f0   : > { %v6230_v56 = vpop.permute.xlu0 %6229 }
 0x9f1   : > { %v6255_v30 = vsel %vm5807_vm0, %v6230_v56, 0 }
 0x9f2   : > { %v12028_v17 = vand.u32 4294901760, %v6255_v30 }
 0x9f4   : > { %v6372_v6 = vsub.f32 %v6255_v30, %v12028_v17  ;;  %v12131_v30 = vsub.f32 %v6812_v16, %v12118_v55  ;;  %v12183_v16 = vand.u32 4294901760, %v6809_v42 }
 0x9f6   : > { %v6373_v28 = vand.u32 4294901760, %v6372_v6 }
 0x9f8   : > { %v6374_v60 = vsub.f32 %v6372_v6, %v6373_v28 }
 0x9fa   : > { %v6375_v10 = vand.u32 4294901760, %v6374_v60 }
 0xa01   : > { %v6228_v34 = vpop.permute.xlu1 %6227 }
 0xa02   : > { %v6253_v22 = vsel %vm5807_vm0, %v6228_v34, 0  ;;  %v6811_v34 = vld [vmem:[%s12674_s4 + $0x50] sm:$0xff] }
 0xa03   : > { %v12030_v62 = vand.u32 4294901760, %v6253_v22 }
 0xa05   : > { %v6364_v7 = vsub.f32 %v6253_v22, %v12030_v62  ;;  %6451 = vmatmul.f32.gmra.mxu3 %v12030_v62 }
 0xa07   : > { %6536 = vmatmul.f32.gmra.mxu0 %v6364_v7  ;;  %v6365_v41 = vand.u32 4294901760, %v6364_v7 }
 0xa09   : > { %6632 = vmatmul.f32.gmra.mxu1 %v6365_v41  ;;  %v6366_v40 = vsub.f32 %v6364_v7, %v6365_v41  ;;  %v12879_v41 = vand.u32 4294901760, %v12131_v30 }
 0xa0b   : > { %v6367_v39 = vand.u32 4294901760, %v6366_v40  ;;  %v12142_v40 = vpop.f32.mrf.mxu3 }
 0xa0d   : > { %6368 = vmatmul.f32.gmra.mxu2 %v6367_v39  ;;  %6455 = vmatmul.f32.gmra.mxu3 %v12028_v17  ;;  %v6982_v39 = vsub.f32 %v12131_v30, %v12879_v41 }
 0xa0f   : > { %6541 = vmatmul.f32.gmra.mxu0 %v6372_v6  ;;  %v12138_v6 = vand.u32 4294901760, %v6811_v34  ;;  %v6983_v60 = vand.u32 4294901760, %v6982_v39  ;;  %v6808_v39 = vld [vmem:[%s12674_s4 + $0x38] sm:$0xff] }
 0xa11   : > { %6638 = vmatmul.f32.gmra.mxu1 %v6373_v28  ;;  %6829 = vmatpush.msra.mxu0 %v12138_v6 }
 0xa12   : > { %7229 = vmatpush.msrb.mxu3 %v12138_v6 }
 0xa13   : > { %6831 = vmatpush.msra.mxu0 %v12162_v14 }
 0xa14   : > { %7231 = vmatpush.msrb.mxu3 %v12162_v14 }
 0xa15   : > { %6376 = vmatmul.f32.gmra.mxu2 %v6375_v10  ;;  %6736 = vmatmul.f32.vlgmr.msra.gmra.mxu3 %v11949_v58 }
 0xa16   : > { %6833 = vmatpush.msra.mxu0 %v12183_v16  ;;  %7233 = vmatpush.msrb.mxu3 %v12183_v16 }
 0xa1d   : > { %6665 = vmatmul.f32.vlgmr.msra.gmra.mxu2 %v11949_v58  ;;  %6740 = vmatmul.f32.gmra.mxu3 %v11961_v24  ;;  %v12053_v58 = vpop.f32.mrf.mxu2 }
 0xa25   : > { %6669 = vmatmul.f32.gmra.mxu2 %v11961_v24  ;;  %6744 = vmatmul.f32.gmra.mxu3 %v11966_v52  ;;  %v12885_v24 = vand.u32 4294901760, %v12050_v51  ;;  %v12074_v2 = vpop.f32.mrf.mxu2 }
 0xa27   : > { %v6958_v45 = vsub.f32 %v12050_v51, %v12885_v24 }
 0xa29   : > { %v6959_v48 = vand.u32 4294901760, %v6958_v45 }
 0xa2b   : > { %6960 = vmatpush.msra.mxu1 %v6959_v48 }
 0xa2d   : > { %6673 = vmatmul.f32.gmra.mxu2 %v11966_v52  ;;  %6748 = vmatmul.f32.gmra.mxu3 %v11971_v57  ;;  %v12884_v52 = vand.u32 4294901760, %v12071_v13 }
 0xa2f   : > { %v6964_v29 = vsub.f32 %v12071_v13, %v12884_v52 }
 0xa31   : > { %v6965_v35 = vand.u32 4294901760, %v6964_v29  ;;  %v12166_v29 = vpop.f32.mrf.mxu3 }
 0xa33   : > { %6966 = vmatpush.msra.mxu1 %v6965_v35 }
 0xa35   : > { %6677 = vmatmul.f32.gmra.mxu2 %v11971_v57  ;;  %6752 = vmatmul.f32.gmra.mxu3 %v11976_v46  ;;  %v12097_v57 = vpop.f32.mrf.mxu2 }
 0xa36   : > { %6972 = vmatpush.msra.mxu1 %v6971_v32 }
 0xa3d   : > { %6681 = vmatmul.f32.gmra.mxu2 %v11976_v46  ;;  %6756 = vmatmul.f32.gmra.mxu3 %v11983_v53  ;;  %v12116_v46 = vsub.f32 %v6813_v44, %v12112_v23  ;;  %v12136_v22 = vpop.f32.mrf.mxu2 }
 0xa3f   : > { %v12881_v33 = vand.u32 4294901760, %v12116_v46  ;;  %7115 = vmatpush.msrb.mxu2 %v12116_v46 }
 0xa41   : > { %v6976_v56 = vsub.f32 %v12116_v46, %v12881_v33  ;;  %7118 = vmatpush.msrb.mxu2 %v12131_v30 }
 0xa43   : > { %v6977_v7 = vand.u32 4294901760, %v6976_v56  ;;  %v12189_v56 = vsub.f32 %v6809_v42, %v12183_v16 }
 0xa45   : > { %6685 = vmatmul.f32.gmra.mxu2 %v11983_v53  ;;  %6760 = vmatmul.f32.gmra.mxu3 %v11985_v27  ;;  %v12146_v53 = vsub.f32 %v6811_v34, %v12138_v6  ;;  %v12164_v48 = vpop.f32.mrf.mxu2  ;;  %v12876_v34 = vand.u32 4294901760, %v12189_v56 }
 0xa46   : > { %6978 = vmatpush.msra.mxu1 %v6977_v7 }
 0xa47   : > { %v12878_v28 = vand.u32 4294901760, %v12146_v53  ;;  %7121 = vmatpush.msrb.mxu2 %v12146_v53  ;;  %v7000_v7 = vsub.f32 %v12189_v56, %v12876_v34  ;;  %v13382_v13 = vand.u32 4294901760, %v12146_v53 }
 0xa48   : > { %6984 = vmatpush.msra.mxu1 %v6983_v60 }
 0xa49   : > { %v6988_v10 = vsub.f32 %v12146_v53, %v12878_v28  ;;  %7124 = vmatpush.msrb.mxu2 %v12170_v19  ;;  %v7001_v60 = vand.u32 4294901760, %v7000_v7 }
 0xa4b   : > { %v6989_v45 = vand.u32 4294901760, %v6988_v10  ;;  %7127 = vmatpush.msrb.mxu2 %v12189_v56  ;;  %v12204_v10 = vand.u32 4294901760, %v6808_v39 }
 0xa4d   : > { %6689 = vmatmul.f32.gmra.mxu2 %v11985_v27  ;;  %6764 = vmatmul.f32.gmra.mxu3 %v11992_v0  ;;  %v12877_v27 = vand.u32 4294901760, %v12170_v19  ;;  %v12185_v32 = vpop.f32.mrf.mxu2  ;;  %v12208_v36 = vsub.f32 %v6808_v39, %v12204_v10 }
 0xa4e   : > { %6990 = vmatpush.msra.mxu1 %v6989_v45  ;;  %6835 = vmatpush.msra.mxu0 %v12204_v10 }
 0xa4f   : > { %v6994_v35 = vsub.f32 %v12170_v19, %v12877_v27  ;;  %7235 = vmatpush.msrb.mxu3 %v12204_v10  ;;  %7130 = vmatpush.msrb.mxu2 %v12208_v36 }
 0xa51   : > { %v6995_v44 = vand.u32 4294901760, %v6994_v35 }
 0xa53   : > { %6996 = vmatpush.msra.mxu1 %v6995_v44  ;;  %v6807_v44 = vld [vmem:[%s12674_s4 + $0x30] sm:$0xff] }
 0xa54   : > { %v12225_v7 = vand.u32 4294901760, %v6807_v44 }
 0xa55   : > { %6693 = vmatmul.f32.gmra.mxu2 %v11992_v0  ;;  %6768 = vmatmul.f32.gmra.mxu3 %v12015_v12  ;;  %v12192_v0 = vpop.f32.mrf.mxu3  ;;  %v12211_v45 = vpop.f32.mrf.mxu2 }
 0xa56   : > { %7002 = vmatpush.msra.mxu1 %v7001_v60  ;;  %6837 = vmatpush.msra.mxu0 %v12225_v7  ;;  %v12229_v60 = vsub.f32 %v6807_v44, %v12225_v7 }
 0xa57   : > { %7237 = vmatpush.msrb.mxu3 %v12225_v7 }
 0xa58   : > { %v12880_v34 = vand.u32 4294901760, %v12229_v60  ;;  %7133 = vmatpush.msrb.mxu2 %v12229_v60 }
 0xa5d   : > { %6697 = vmatmul.f32.gmra.mxu2 %v12015_v12  ;;  %6772 = vmatmul.f32.gmra.mxu3 %v12013_v4  ;;  %v12875_v12 = vand.u32 4294901760, %v12208_v36  ;;  %v12215_v35 = vpop.f32.mrf.mxu3  ;;  %v12244_v44 = vpop.f32.mrf.mxu2 }
 0xa5f   : > { %v7006_v42 = vsub.f32 %v12208_v36, %v12875_v12  ;;  %v6806_v12 = vld [vmem:[%s12674_s4 + $0x28] sm:$0xff] }
 0xa61   : > { %v7007_v39 = vand.u32 4294901760, %v7006_v42  ;;  %v7012_v42 = vsub.f32 %v12229_v60, %v12880_v34 }
 0xa63   : > { %7008 = vmatpush.msra.mxu1 %v7007_v39  ;;  %v7013_v28 = vand.u32 4294901760, %v7012_v42 }
 0xa65   : > { %6701 = vmatmul.f32.gmra.mxu2 %v12013_v4  ;;  %6776 = vmatmul.f32.gmra.mxu3 %v12021_v1  ;;  %v12236_v4 = vand.u32 4294901760, %v6806_v12  ;;  %v12246_v39 = vpop.f32.mrf.mxu3  ;;  %v12264_v31 = vpop.f32.mrf.mxu2 }
 0xa66   : > { %7014 = vmatpush.msra.mxu1 %v7013_v28 }
 0xa67   : > { %6839 = vmatpush.msra.mxu0 %v12236_v4  ;;  %7239 = vmatpush.msrb.mxu3 %v12236_v4  ;;  %v12249_v27 = vsub.f32 %v6806_v12, %v12236_v4  ;;  %v6805_v12 = vld [vmem:[%s12674_s4 + $0x20] sm:$0xff] }
 0xa68   : > { %v12266_v42 = vand.u32 4294901760, %v6805_v12 }
 0xa69   : > { %v12883_v41 = vand.u32 4294901760, %v12249_v27  ;;  %7136 = vmatpush.msrb.mxu2 %v12249_v27 }
 0xa6a   : > { %6841 = vmatpush.msra.mxu0 %v12266_v42  ;;  %7241 = vmatpush.msrb.mxu3 %v12266_v42 }
 0xa6b   : > { %v7018_v34 = vsub.f32 %v12249_v27, %v12883_v41 }
 0xa6d   : > { %6705 = vmatmul.f32.gmra.mxu2 %v12021_v1  ;;  %6780 = vmatmul.f32.gmra.mxu3 %v12030_v62  ;;  %v7019_v33 = vand.u32 4294901760, %v7018_v34  ;;  %v6804_v1 = vld [vmem:[%s12674_s4 + $0x18] sm:$0xff]  ;;  %v12270_v28 = vpop.f32.mrf.mxu3  ;;  %v12274_v34 = vsub.f32 %v6805_v12, %v12266_v42  ;;  %v6803_v12 = vld [vmem:[%s12674_s4 + $0x10] sm:$0xff]  ;;  %v12296_v5 = vpop.f32.mrf.mxu2 }
 0xa6e   : > { %v12276_v41 = vand.u32 4294901760, %v6804_v1  ;;  %v12292_v25 = vand.u32 4294901760, %v6803_v12 }
 0xa6f   : > { %7020 = vmatpush.msra.mxu1 %v7019_v33  ;;  %v12889_v52 = vand.u32 4294901760, %v12274_v34  ;;  %7139 = vmatpush.msrb.mxu2 %v12274_v34 }
 0xa70   : > { %6843 = vmatpush.msra.mxu0 %v12276_v41  ;;  %7243 = vmatpush.msrb.mxu3 %v12276_v41  ;;  %v12287_v33 = vsub.f32 %v6804_v1, %v12276_v41  ;;  %v6802_v1 = vld [vmem:[%s12674_s4 + $0x8] sm:$0xff] }
 0xa71   : > { %v12308_v20 = vand.u32 4294901760, %v6802_v1 }
 0xa72   : > { %v12893_v21 = vand.u32 4294901760, %v12287_v33  ;;  %6845 = vmatpush.msra.mxu0 %v12292_v25  ;;  %7142 = vmatpush.msrb.mxu2 %v12287_v33 }
 0xa73   : > { %7245 = vmatpush.msrb.mxu3 %v12292_v25 }
 0xa74   : > { %6847 = vmatpush.msra.mxu0 %v12308_v20 }
 0xa75   : > { %6709 = vmatmul.f32.gmra.mxu2 %v12030_v62  ;;  %6784 = vmatmul.f32.gmra.mxu3 %v12028_v17  ;;  %v7024_v62 = vsub.f32 %v12274_v34, %v12889_v52  ;;  %v7030_v52 = vsub.f32 %v12287_v33, %v12893_v21  ;;  %v12346_v63 = vpop.f32.mrf.mxu2 }
 0xa76   : > { %7247 = vmatpush.msrb.mxu3 %v12308_v20 }
 0xa77   : > { %v7025_v24 = vand.u32 4294901760, %v7024_v62  ;;  %v12306_v62 = vsub.f32 %v6803_v12, %v12292_v25  ;;  %v7031_v47 = vand.u32 4294901760, %v7030_v52  ;;  %v12320_v12 = vsub.f32 %v6802_v1, %v12308_v20 }
 0xa79   : > { %7026 = vmatpush.msra.mxu1 %v7025_v24  ;;  %v6801_v24 = vld [vmem:[%s12674_s4] sm:$0xff]  ;;  %v12897_v54 = vand.u32 4294901760, %v12306_v62  ;;  %7145 = vmatpush.msrb.mxu2 %v12306_v62  ;;  %v12902_v52 = vand.u32 4294901760, %v12320_v12 }
 0xa7a   : > { %v12323_v21 = vand.u32 4294901760, %v6801_v24 }
 0xa7b   : > { %7032 = vmatpush.msra.mxu1 %v7031_v47  ;;  %v7036_v59 = vsub.f32 %v12306_v62, %v12897_v54  ;;  %7148 = vmatpush.msrb.mxu2 %v12320_v12  ;;  %v7042_v47 = vsub.f32 %v12320_v12, %v12902_v52  ;;  %v13377_v54 = vand.u32 4294901760, %v12050_v51  ;;  %v13381_v51 = vand.u32 4294901760, %v12131_v30 }
 0xa7c   : > { %v12331_v50 = vsub.f32 %v6801_v24, %v12323_v21  ;;  %6849 = vmatpush.msra.mxu0 %v12323_v21  ;;  %7249 = vmatpush.msrb.mxu3 %v12323_v21 }
 0xa7d   : > { %6713 = vmatmul.f32.gmra.mxu2 %v12028_v17  ;;  %v12312_v17 = vpop.f32.mrf.mxu3  ;;  %v7037_v1 = vand.u32 4294901760, %v7036_v59  ;;  %v7043_v24 = vand.u32 4294901760, %v7042_v47 }
 0xa7e   : > { %13376 = vst [vmem:[#allocation26_spill] sm:$0xff] %v12312_v17  ;;  %v7047_v3 = vand.u32 4294901760, %v12331_v50  ;;  %7151 = vmatpush.msrb.mxu2 %v12331_v50  ;;  %7332 = vmatpush.msrb.mxu0 %v13377_v54  ;;  %v13379_v17 = vand.u32 4294901760, %v12092_v61  ;;  %v13380_v54 = vand.u32 4294901760, %v12116_v46  ;;  %v6487_v46 = vpop.f32.mrf.mxu0 }
 0xa7f   : > { %7038 = vmatpush.msra.mxu1 %v7037_v1 }
 0xa80   : > { %v7048_v26 = vsub.f32 %v12331_v50, %v7047_v3  ;;  %7336 = vmatpush.msrb.mxu0 %v13378_v11  ;;  %v6567_v50 = vpop.f32.mrf.mxu1  ;;  %v12361_v11 = vld [vmem:[%s12675_s5] sm:$0xff] }
 0xa81   : > { %7044 = vmatpush.msra.mxu1 %v7043_v24 }
 0xa82   : > { %v7049_v52 = vand.u32 4294901760, %v7048_v26  ;;  %7340 = vmatpush.msrb.mxu0 %v13379_v17  ;;  %v12364_v26 = vperm.slane %v12361_v11, 1  ;;  %v13384_v17 = vand.u32 4294901760, %v12189_v56 }
 0xa84   : > { %7050 = vmatpush.msra.mxu1 %v7049_v52  ;;  %7344 = vmatpush.msrb.mxu0 %v13380_v54  ;;  %v6282_v30 = vadd.f32 %v12053_v58, %v12364_v26  ;;  %v13385_v52 = vand.u32 4294901760, %v12208_v36  ;;  %v13387_v58 = vand.u32 4294901760, %v12249_v27  ;;  %v6290_v56 = vadd.f32 %v12074_v2, %v12364_v26 }
 0xa85   : > { %v13389_v36 = vand.u32 4294901760, %v12287_v33 }
 0xa86   : > { %7447 = vmatpush.msrb.mxu1 %v12046_v49  ;;  %7348 = vmatpush.msrb.mxu0 %v13381_v51  ;;  %v6413_v27 = vadd.f32 %v12055_v8, %v6290_v56 }
 0xa88   : > { %v12348_v59 = vpop.f32.mrf.mxu3  ;;  %7449 = vmatpush.msrb.mxu1 %v12067_v38  ;;  %7352 = vmatpush.msrb.mxu0 %v13382_v13  ;;  %v13383_v38 = vand.u32 4294901760, %v12170_v19  ;;  %v6573_v53 = vpop.f32.mrf.mxu1  ;;  %v13386_v19 = vand.u32 4294901760, %v12229_v60  ;;  %v6488_v33 = vadd.f32 %v6487_v46, %v6413_v27 }
 0xa8a   : > { %7451 = vmatpush.msrb.mxu1 %v12088_v18  ;;  %7356 = vmatpush.msrb.mxu0 %v13383_v38  ;;  %v6409_v18 = vadd.f32 %v12039_v15, %v6282_v30  ;;  %v13388_v15 = vand.u32 4294901760, %v12274_v34  ;;  %v13391_v34 = vand.u32 4294901760, %v12320_v12  ;;  %v6574_v12 = vadd.f32 %v6573_v53, %v6488_v33 }
 0xa8c   : > { %7453 = vmatpush.msrb.mxu1 %v12112_v23  ;;  %7360 = vmatpush.msrb.mxu0 %v13384_v17 }
 0xa8e   : > { %7455 = vmatpush.msrb.mxu1 %v12118_v55  ;;  %7364 = vmatpush.msrb.mxu0 %v13385_v52  ;;  %v6492_v55 = vpop.f32.mrf.mxu0 }
 0xa90   : > { %v12368_v61 = vpop.f32.mrf.mxu2  ;;  %v12370_v49 = vpop.f32.mrf.mxu3  ;;  %7457 = vmatpush.msrb.mxu1 %v12138_v6  ;;  %7368 = vmatpush.msrb.mxu0 %v13386_v19  ;;  %v6483_v6 = vadd.f32 %v6482_v43, %v6409_v18 }
 0xa92   : > { %7459 = vmatpush.msrb.mxu1 %v12162_v14  ;;  %7372 = vmatpush.msrb.mxu0 %v13387_v58  ;;  %v6579_v14 = vpop.f32.mrf.mxu1  ;;  %v6568_v60 = vadd.f32 %v6567_v50, %v6483_v6 }
 0xa94   : > { %7461 = vmatpush.msrb.mxu1 %v12183_v16  ;;  %7376 = vmatpush.msrb.mxu0 %v13388_v15  ;;  %v13390_v16 = vand.u32 4294901760, %v12306_v62 }
 0xa96   : > { %7463 = vmatpush.msrb.mxu1 %v12204_v10  ;;  %7380 = vmatpush.msrb.mxu0 %v13389_v36  ;;  %v6298_v10 = vadd.f32 %v12097_v57, %v12364_v26  ;;  %v6497_v8 = vpop.f32.mrf.mxu0 }
 0xa98   : > { %v12387_v23 = vpop.f32.mrf.mxu2  ;;  %v6737_v1 = vpop.f32.mrf.mxu3  ;;  %7465 = vmatpush.msrb.mxu1 %v12225_v7  ;;  %7384 = vmatpush.msrb.mxu0 %v13390_v16 }
 0xa9a   : > { %7467 = vmatpush.msrb.mxu1 %v12236_v4  ;;  %7388 = vmatpush.msrb.mxu0 %v13391_v34  ;;  %v6417_v4 = vadd.f32 %v12078_v9, %v6298_v10  ;;  %v6322_v34 = vadd.f32 %v12185_v32, %v12364_v26 }
 0xa9c   : > { %7469 = vmatpush.msrb.mxu1 %v12266_v42  ;;  %7392 = vmatpush.msrb.mxu0 %v7047_v3  ;;  %v6585_v42 = vpop.f32.mrf.mxu1  ;;  %v6306_v3 = vadd.f32 %v12136_v22, %v12364_v26 }
 0xa9e   : > { %7471 = vmatpush.msrb.mxu1 %v12276_v41  ;;  %v6493_v41 = vadd.f32 %v6492_v55, %v6417_v4  ;;  %v6502_v38 = vpop.f32.mrf.mxu0 }
 0xaa0   : > { %v6666_v47 = vpop.f32.mrf.mxu2  ;;  %v6741_v2 = vpop.f32.mrf.mxu3  ;;  %7473 = vmatpush.msrb.mxu1 %v12292_v25  ;;  %v6580_v53 = vadd.f32 %v6579_v14, %v6493_v41 }
 0xaa1   : > { %v6667_v43 = vadd.f32 %v6666_v47, %v6568_v60 }
 0xaa2   : > { %7475 = vmatpush.msrb.mxu1 %v12308_v20  ;;  %v6421_v20 = vadd.f32 %v12110_v37, %v6306_v3  ;;  %v6330_v3 = vadd.f32 %v12211_v45, %v12364_v26 }
 0xaa3   : > { %v6738_v7 = vadd.f32 %v6737_v1, %v6667_v43  ;;  %v6314_v1 = vadd.f32 %v12164_v48, %v12364_v26 }
 0xaa4   : > { %7477 = vmatpush.msrb.mxu1 %v12323_v21  ;;  %v6591_v19 = vpop.f32.mrf.mxu1  ;;  %v6498_v37 = vadd.f32 %v6497_v8, %v6421_v20 }
 0xaa5   : > { %v6788_v62 = vmax.f32 %v6738_v7, 0.0  ;;  %v6425_v15 = vadd.f32 %v12142_v40, %v6314_v1 }
 0xaa6   : > { %v6507_v36 = vpop.f32.mrf.mxu0  ;;  %v6586_v27 = vadd.f32 %v6585_v42, %v6498_v37 }
 0xaa7   : > { %v12413_v24 = vand.u32 4294901760, %v6788_v62  ;;  %v6503_v7 = vadd.f32 %v6502_v38, %v6425_v15  ;;  %v6433_v38 = vadd.f32 %v12192_v0, %v6330_v3 }
 0xaa8   : > { %v6670_v54 = vpop.f32.mrf.mxu2  ;;  %v6745_v50 = vpop.f32.mrf.mxu3 }
 0xaa9   : > { %v6851_v57 = vsub.f32 %v6788_v62, %v12413_v24  ;;  %v6671_v51 = vadd.f32 %v6670_v54, %v6574_v12  ;;  %7052 = vmatmul.f32.vlgmr.msra.gmra.mxu1 %v12413_v24  ;;  %v6429_v62 = vadd.f32 %v12166_v29, %v6322_v34  ;;  %v6592_v12 = vadd.f32 %v6591_v19, %v6503_v7 }
 0xaab   : > { %v6852_v25 = vand.u32 4294901760, %v6851_v57  ;;  %v6742_v9 = vadd.f32 %v6741_v2, %v6671_v51  ;;  %7154 = vmatmul.f32.vlgmr.msrb.gmra.mxu2 %v6851_v57  ;;  %v6508_v29 = vadd.f32 %v6507_v36, %v6429_v62 }
 0xaac   : > { %v6597_v43 = vpop.f32.mrf.mxu1 }
 0xaad   : > { %v6853_v13 = vsub.f32 %v6851_v57, %v6852_v25  ;;  %v6789_v46 = vmax.f32 %v6742_v9, 0.0  ;;  %7253 = vmatmul.f32.vlgmr.msrb.gmra.mxu3 %v6852_v25 }
 0xaae   : > { %v6512_v51 = vpop.f32.mrf.mxu0 }
 0xaaf   : > { %v6854_v30 = vand.u32 4294901760, %v6853_v13  ;;  %v12422_v17 = vand.u32 4294901760, %v6789_v46 }
 0xab0   : > { %v6674_v52 = vpop.f32.mrf.mxu2  ;;  %v6749_v18 = vpop.f32.mrf.mxu3 }
 0xab1   : > { %v6675_v21 = vadd.f32 %v6674_v52, %v6580_v53  ;;  %6855 = vmatmul.f32.vlgmr.msra.gmra.mxu0 %v6854_v30  ;;  %7056 = vmatmul.f32.gmra.mxu1 %v12422_v17  ;;  %v6859_v22 = vsub.f32 %v6789_v46, %v12422_v17  ;;  %v6598_v30 = vadd.f32 %v6597_v43, %v6508_v29 }
 0xab3   : > { %v6746_v58 = vadd.f32 %v6745_v50, %v6675_v21  ;;  %7159 = vmatmul.f32.gmra.mxu2 %v6859_v22  ;;  %v6860_v55 = vand.u32 4294901760, %v6859_v22 }
 0xab4   : > { %v6603_v41 = vpop.f32.mrf.mxu1 }
 0xab5   : > { %v6790_v56 = vmax.f32 %v6746_v58, 0.0  ;;  %7259 = vmatmul.f32.gmra.mxu3 %v6860_v55  ;;  %v6861_v6 = vsub.f32 %v6859_v22, %v6860_v55  ;;  %v6338_v22 = vadd.f32 %v12244_v44, %v12364_v26  ;;  %v6513_v58 = vadd.f32 %v6512_v51, %v6433_v38 }
 0xab6   : > { %v6517_v0 = vpop.f32.mrf.mxu0 }
 0xab7   : > { %v12429_v14 = vand.u32 4294901760, %v6790_v56  ;;  %v6862_v60 = vand.u32 4294901760, %v6861_v6  ;;  %v6437_v6 = vadd.f32 %v12215_v35, %v6338_v22  ;;  %v6604_v36 = vadd.f32 %v6603_v41, %v6513_v58 }
 0xab8   : > { %v6678_v16 = vpop.f32.mrf.mxu2  ;;  %v6753_v47 = vpop.f32.mrf.mxu3 }
 0xab9   : > { %v6679_v2 = vadd.f32 %v6678_v16, %v6586_v27  ;;  %6863 = vmatmul.f32.gmra.mxu0 %v6862_v60  ;;  %7060 = vmatmul.f32.gmra.mxu1 %v12429_v14  ;;  %v6867_v48 = vsub.f32 %v6790_v56, %v12429_v14  ;;  %v6518_v34 = vadd.f32 %v6517_v0, %v6437_v6 }
 0xabb   : > { %v6750_v10 = vadd.f32 %v6749_v18, %v6679_v2  ;;  %7164 = vmatmul.f32.gmra.mxu2 %v6867_v48  ;;  %v6868_v40 = vand.u32 4294901760, %v6867_v48  ;;  %v6346_v2 = vadd.f32 %v12264_v31, %v12364_v26 }
 0xabc   : > { %v6609_v56 = vpop.f32.mrf.mxu1 }
 0xabd   : > { %v6791_v33 = vmax.f32 %v6750_v10, 0.0  ;;  %7265 = vmatmul.f32.gmra.mxu3 %v6868_v40  ;;  %v6869_v8 = vsub.f32 %v6867_v48, %v6868_v40  ;;  %v6441_v7 = vadd.f32 %v12246_v39, %v6346_v2 }
 0xabe   : > { %v6522_v35 = vpop.f32.mrf.mxu0 }
 0xabf   : > { %v12436_v4 = vand.u32 4294901760, %v6791_v33  ;;  %v6870_v54 = vand.u32 4294901760, %v6869_v8  ;;  %v6610_v8 = vadd.f32 %v6609_v56, %v6518_v34  ;;  %v6523_v39 = vadd.f32 %v6522_v35, %v6441_v7 }
 0xac0   : > { %v6682_v50 = vpop.f32.mrf.mxu2  ;;  %v6757_v42 = vpop.f32.mrf.mxu3 }
 0xac1   : > { %v6683_v57 = vadd.f32 %v6682_v50, %v6592_v12  ;;  %6871 = vmatmul.f32.gmra.mxu0 %v6870_v54  ;;  %7064 = vmatmul.f32.gmra.mxu1 %v12436_v4  ;;  %v6875_v32 = vsub.f32 %v6791_v33, %v12436_v4 }
 0xac3   : > { %v6754_v25 = vadd.f32 %v6753_v47, %v6683_v57  ;;  %7169 = vmatmul.f32.gmra.mxu2 %v6875_v32  ;;  %v6876_v9 = vand.u32 4294901760, %v6875_v32  ;;  %v6354_v57 = vadd.f32 %v12296_v5, %v12364_v26 }
 0xac4   : > { %v6615_v12 = vpop.f32.mrf.mxu1 }
 0xac5   : > { %v6792_v13 = vmax.f32 %v6754_v25, 0.0  ;;  %7271 = vmatmul.f32.gmra.mxu3 %v6876_v9  ;;  %v6877_v46 = vsub.f32 %v6875_v32, %v6876_v9  ;;  %v6445_v29 = vadd.f32 %v12270_v28, %v6354_v57 }
 0xac6   : > { %v6527_v9 = vpop.f32.mrf.mxu0 }
 0xac7   : > { %v12443_v20 = vand.u32 4294901760, %v6792_v13  ;;  %v6878_v53 = vand.u32 4294901760, %v6877_v46 }
 0xac8   : > { %v6686_v52 = vpop.f32.mrf.mxu2  ;;  %v6761_v18 = vpop.f32.mrf.mxu3 }
 0xac9   : > { %v6687_v21 = vadd.f32 %v6686_v52, %v6598_v30  ;;  %6879 = vmatmul.f32.gmra.mxu0 %v6878_v53  ;;  %7068 = vmatmul.f32.gmra.mxu1 %v12443_v20  ;;  %v6883_v45 = vsub.f32 %v6792_v13, %v12443_v20  ;;  %v6616_v13 = vadd.f32 %v6615_v12, %v6523_v39 }
 0xaca   : > { %v6362_v52 = vadd.f32 %v12346_v63, %v12364_v26  ;;  %v6378_v12 = vadd.f32 %v12387_v23, %v12364_v26 }
 0xacb   : > { %v6758_v19 = vadd.f32 %v6757_v42, %v6687_v21  ;;  %7174 = vmatmul.f32.gmra.mxu2 %v6883_v45  ;;  %v6884_v1 = vand.u32 4294901760, %v6883_v45 }
 0xacc   : > { %v6621_v53 = vpop.f32.mrf.mxu1 }
 0xacd   : > { %v6793_v55 = vmax.f32 %v6758_v19, 0.0  ;;  %7277 = vmatmul.f32.gmra.mxu3 %v6884_v1  ;;  %v6885_v37 = vsub.f32 %v6883_v45, %v6884_v1  ;;  %v6528_v45 = vadd.f32 %v6527_v9, %v6445_v29  ;;  %v13392_v1 = vld [vmem:[#allocation26_spill] sm:$0xff] }
 0xace   : > { %v6449_v58 = vadd.f32 %v13392_v1, %v6362_v52  ;;  %v6532_v56 = vpop.f32.mrf.mxu0 }
 0xacf   : > { %v12450_v15 = vand.u32 4294901760, %v6793_v55  ;;  %v6886_v27 = vand.u32 4294901760, %v6885_v37 }
 0xad0   : > { %v6690_v60 = vpop.f32.mrf.mxu2  ;;  %v6765_v16 = vpop.f32.mrf.mxu3 }
 0xad1   : > { %v6691_v47 = vadd.f32 %v6690_v60, %v6604_v36  ;;  %6887 = vmatmul.f32.gmra.mxu0 %v6886_v27  ;;  %7072 = vmatmul.f32.gmra.mxu1 %v12450_v15  ;;  %v6891_v44 = vsub.f32 %v6793_v55, %v12450_v15  ;;  %v6622_v55 = vadd.f32 %v6621_v53, %v6528_v45 }
 0xad2   : > { %v6370_v27 = vadd.f32 %v12368_v61, %v12364_v26 }
 0xad3   : > { %v6762_v48 = vadd.f32 %v6761_v18, %v6691_v47  ;;  %7179 = vmatmul.f32.gmra.mxu2 %v6891_v44  ;;  %v6892_v43 = vand.u32 4294901760, %v6891_v44  ;;  %v6533_v47 = vadd.f32 %v6532_v56, %v6449_v58 }
 0xad4   : > { %v6453_v34 = vadd.f32 %v12348_v59, %v6370_v27 }
 0xad5   : > { %v6794_v10 = vmax.f32 %v6762_v48, 0.0  ;;  %7283 = vmatmul.f32.gmra.mxu3 %v6892_v43  ;;  %v6893_v40 = vsub.f32 %v6891_v44, %v6892_v43  ;;  %v6627_v44 = vpop.f32.mrf.mxu1 }
 0xad6   : > { %v6537_v7 = vpop.f32.mrf.mxu0 }
 0xad7   : > { %v12457_v33 = vand.u32 4294901760, %v6794_v10  ;;  %v6894_v62 = vand.u32 4294901760, %v6893_v40 }
 0xad8   : > { %v6694_v54 = vpop.f32.mrf.mxu2  ;;  %v6769_v42 = vpop.f32.mrf.mxu3 }
 0xad9   : > { %v6695_v50 = vadd.f32 %v6694_v54, %v6610_v8  ;;  %6895 = vmatmul.f32.gmra.mxu0 %v6894_v62  ;;  %7076 = vmatmul.f32.gmra.mxu1 %v12457_v33  ;;  %v6899_v31 = vsub.f32 %v6794_v10, %v12457_v33  ;;  %v6628_v10 = vadd.f32 %v6627_v44, %v6533_v47 }
 0xadb   : > { %v6766_v32 = vadd.f32 %v6765_v16, %v6695_v50  ;;  %7184 = vmatmul.f32.gmra.mxu2 %v6899_v31  ;;  %v6900_v51 = vand.u32 4294901760, %v6899_v31 }
 0xadd   : > { %v6795_v3 = vmax.f32 %v6766_v32, 0.0  ;;  %7289 = vmatmul.f32.gmra.mxu3 %v6900_v51  ;;  %v6901_v25 = vsub.f32 %v6899_v31, %v6900_v51  ;;  %v6538_v31 = vadd.f32 %v6537_v7, %v6453_v34  ;;  %v6633_v59 = vpop.f32.mrf.mxu1  ;;  %v6457_v32 = vadd.f32 %v12370_v49, %v6378_v12 }
 0xade   : > { %v6542_v23 = vpop.f32.mrf.mxu0 }
 0xadf   : > { %v12464_v41 = vand.u32 4294901760, %v6795_v3  ;;  %v6902_v46 = vand.u32 4294901760, %v6901_v25  ;;  %v6634_v39 = vadd.f32 %v6633_v59, %v6538_v31 }
 0xae0   : > { %v6698_v38 = vpop.f32.mrf.mxu2  ;;  %v6773_v28 = vpop.f32.mrf.mxu3 }
 0xae1   : > { %v6699_v30 = vadd.f32 %v6698_v38, %v6616_v13  ;;  %6903 = vmatmul.f32.gmra.mxu0 %v6902_v46  ;;  %7080 = vmatmul.f32.gmra.mxu1 %v12464_v41  ;;  %v6907_v5 = vsub.f32 %v6795_v3, %v12464_v41  ;;  %v6543_v38 = vadd.f32 %v6542_v23, %v6457_v32 }
 0xae3   : > { %v6770_v18 = vadd.f32 %v6769_v42, %v6699_v30  ;;  %7189 = vmatmul.f32.gmra.mxu2 %v6907_v5  ;;  %v6908_v21 = vand.u32 4294901760, %v6907_v5 }
 0xae5   : > { %v6796_v22 = vmax.f32 %v6770_v18, 0.0  ;;  %7295 = vmatmul.f32.gmra.mxu3 %v6908_v21  ;;  %v6909_v19 = vsub.f32 %v6907_v5, %v6908_v21  ;;  %v6639_v5 = vpop.f32.mrf.mxu1 }
 0xae6   : > { %v6640_v52 = vadd.f32 %v6639_v5, %v6543_v38 }
 0xae7   : > { %v12471_v0 = vand.u32 4294901760, %v6796_v22  ;;  %v6910_v37 = vand.u32 4294901760, %v6909_v19 }
 0xae8   : > { %v6702_v6 = vpop.f32.mrf.mxu2  ;;  %v6777_v43 = vpop.f32.mrf.mxu3 }
 0xae9   : > { %v6703_v36 = vadd.f32 %v6702_v6, %v6622_v55  ;;  %6911 = vmatmul.f32.gmra.mxu0 %v6910_v37  ;;  %7084 = vmatmul.f32.gmra.mxu1 %v12471_v0  ;;  %v6915_v63 = vsub.f32 %v6796_v22, %v12471_v0 }
 0xaeb   : > { %v6774_v60 = vadd.f32 %v6773_v28, %v6703_v36  ;;  %7194 = vmatmul.f32.gmra.mxu2 %v6915_v63  ;;  %v6916_v16 = vand.u32 4294901760, %v6915_v63 }
 0xaed   : > { %v6797_v2 = vmax.f32 %v6774_v60, 0.0  ;;  %7301 = vmatmul.f32.gmra.mxu3 %v6916_v16  ;;  %v6917_v48 = vsub.f32 %v6915_v63, %v6916_v16 }
 0xaef   : > { %v12478_v35 = vand.u32 4294901760, %v6797_v2  ;;  %v6918_v40 = vand.u32 4294901760, %v6917_v48 }
 0xaf0   : > { %v6706_v8 = vpop.f32.mrf.mxu2  ;;  %v6781_v25 = vpop.f32.mrf.mxu3 }
 0xaf1   : > { %v6707_v62 = vadd.f32 %v6706_v8, %v6628_v10  ;;  %6919 = vmatmul.f32.gmra.mxu0 %v6918_v40  ;;  %7088 = vmatmul.f32.gmra.mxu1 %v12478_v35  ;;  %v6923_v61 = vsub.f32 %v6797_v2, %v12478_v35 }
 0xaf3   : > { %v6778_v54 = vadd.f32 %v6777_v43, %v6707_v62  ;;  %7199 = vmatmul.f32.gmra.mxu2 %v6923_v61  ;;  %v6924_v50 = vand.u32 4294901760, %v6923_v61 }
 0xaf5   : > { %v6798_v42 = vmax.f32 %v6778_v54, 0.0  ;;  %7307 = vmatmul.f32.gmra.mxu3 %v6924_v50  ;;  %v6925_v57 = vsub.f32 %v6923_v61, %v6924_v50 }
 0xaf7   : > { %v12485_v51 = vand.u32 4294901760, %v6798_v42  ;;  %v6926_v3 = vand.u32 4294901760, %v6925_v57 }
 0xaf8   : > { %v6710_v9 = vpop.f32.mrf.mxu2  ;;  %v6785_v22 = vpop.f32.mrf.mxu3 }
 0xaf9   : > { %v6711_v29 = vadd.f32 %v6710_v9, %v6634_v39  ;;  %6927 = vmatmul.f32.gmra.mxu0 %v6926_v3  ;;  %7092 = vmatmul.f32.gmra.mxu1 %v12485_v51  ;;  %v6931_v26 = vsub.f32 %v6798_v42, %v12485_v51 }
 0xafb   : > { %v6782_v13 = vadd.f32 %v6781_v25, %v6711_v29  ;;  %7204 = vmatmul.f32.gmra.mxu2 %v6931_v26  ;;  %v6932_v46 = vand.u32 4294901760, %v6931_v26 }
 0xafd   : > { %v6799_v30 = vmax.f32 %v6782_v13, 0.0  ;;  %7313 = vmatmul.f32.gmra.mxu3 %v6932_v46  ;;  %v6933_v49 = vsub.f32 %v6931_v26, %v6932_v46 }
 0xaff   : > { %v12489_v53 = vand.u32 4294901760, %v6799_v30  ;;  %v6934_v18 = vand.u32 4294901760, %v6933_v49 }
 0xb00   : > { %v6714_v21 = vpop.f32.mrf.mxu2 }
 0xb01   : > { %v6715_v45 = vadd.f32 %v6714_v21, %v6640_v52  ;;  %6935 = vmatmul.f32.gmra.mxu0 %v6934_v18  ;;  %7096 = vmatmul.f32.gmra.mxu1 %v12489_v53  ;;  %v6939_v28 = vsub.f32 %v6799_v30, %v12489_v53 }
 0xb03   : > { %v6786_v19 = vadd.f32 %v6785_v22, %v6715_v45  ;;  %7209 = vmatmul.f32.gmra.mxu2 %v6939_v28  ;;  %v6940_v1 = vand.u32 4294901760, %v6939_v28 }
 0xb05   : > { %v6800_v58 = vmax.f32 %v6786_v19, 0.0  ;;  %7319 = vmatmul.f32.gmra.mxu3 %v6940_v1  ;;  %v6941_v55 = vsub.f32 %v6939_v28, %v6940_v1 }
 0xb07   : > { %v12493_v37 = vand.u32 4294901760, %v6800_v58  ;;  %v6942_v56 = vand.u32 4294901760, %v6941_v55 }
 0xb09   : > { %6943 = vmatmul.f32.gmra.mxu0 %v6942_v56  ;;  %7100 = vmatmul.f32.gmra.mxu1 %v12493_v37  ;;  %v6947_v6 = vsub.f32 %v6800_v58, %v12493_v37 }
 0xb0b   : > { %7214 = vmatmul.f32.gmra.mxu2 %v6947_v6  ;;  %v6948_v36 = vand.u32 4294901760, %v6947_v6 }
 0xb0d   : > { %7325 = vmatmul.f32.gmra.mxu3 %v6948_v36  ;;  %v6949_v63 = vsub.f32 %v6947_v6, %v6948_v36 }
 0xb0f   : > { %v6950_v27 = vand.u32 4294901760, %v6949_v63 }
 0xb11   : > { %6951 = vmatmul.f32.gmra.mxu0 %v6950_v27  ;;  %7479 = vmatmul.f32.vlgmr.msrb.gmra.mxu1 %v12413_v24 }
 0xb19   : > { %7394 = vmatmul.f32.vlgmr.msrb.gmra.mxu0 %v12413_v24  ;;  %7483 = vmatmul.f32.gmra.mxu1 %v12422_v17 }
 0xb21   : > { %7398 = vmatmul.f32.gmra.mxu0 %v12422_v17  ;;  %7487 = vmatmul.f32.gmra.mxu1 %v12429_v14  ;;  %v12517_v17 = vperm.slane %v12361_v11, 5 }
 0xb26   : > { %v12502_v60 = vpop.f32.mrf.mxu1 }
 0xb29   : > { %7402 = vmatmul.f32.gmra.mxu0 %v12429_v14  ;;  %7491 = vmatmul.f32.gmra.mxu1 %v12436_v4 }
 0xb2e   : > { %v12506_v16 = vpop.f32.mrf.mxu0  ;;  %v12508_v47 = vpop.f32.mrf.mxu1 }
 0xb2f   : > { %v7155_v9 = vpop.f32.mrf.mxu2  ;;  %v6857_v18 = vadd.f32 %v12506_v16, %v12517_v17 }
 0xb31   : > { %7406 = vmatmul.f32.gmra.mxu0 %v12436_v4  ;;  %7495 = vmatmul.f32.gmra.mxu1 %v12443_v20  ;;  %v7054_v28 = vadd.f32 %v12502_v60, %v6857_v18 }
 0xb33   : > { %v7156_v55 = vadd.f32 %v7155_v9, %v7054_v28 }
 0xb36   : > { %v12512_v24 = vpop.f32.mrf.mxu0  ;;  %v7061_v44 = vpop.f32.mrf.mxu1 }
 0xb37   : > { %v7160_v38 = vpop.f32.mrf.mxu2 }
 0xb39   : > { %7410 = vmatmul.f32.gmra.mxu0 %v12443_v20  ;;  %7499 = vmatmul.f32.gmra.mxu1 %v12450_v15 }
 0xb3e   : > { %v6872_v14 = vpop.f32.mrf.mxu0  ;;  %v7065_v2 = vpop.f32.mrf.mxu1 }
 0xb3f   : > { %v6873_v48 = vadd.f32 %v6872_v14, %v12517_v17  ;;  %v7165_v45 = vpop.f32.mrf.mxu2 }
 0xb41   : > { %v12520_v43 = vadd.f32 %v7061_v44, %v6873_v48  ;;  %7414 = vmatmul.f32.gmra.mxu0 %v12450_v15  ;;  %7503 = vmatmul.f32.gmra.mxu1 %v12457_v33 }
 0xb46   : > { %v6880_v4 = vpop.f32.mrf.mxu0  ;;  %v7069_v34 = vpop.f32.mrf.mxu1 }
 0xb47   : > { %v6881_v10 = vadd.f32 %v6880_v4, %v12517_v17  ;;  %v7170_v63 = vpop.f32.mrf.mxu2 }
 0xb49   : > { %v12525_v20 = vadd.f32 %v7065_v2, %v6881_v10  ;;  %7418 = vmatmul.f32.gmra.mxu0 %v12457_v33  ;;  %7507 = vmatmul.f32.gmra.mxu1 %v12464_v41 }
 0xb4e   : > { %v6888_v11 = vpop.f32.mrf.mxu0  ;;  %v7073_v40 = vpop.f32.mrf.mxu1 }
 0xb4f   : > { %v6889_v7 = vadd.f32 %v6888_v11, %v12517_v17  ;;  %v7166_v11 = vadd.f32 %v7165_v45, %v12520_v43 }
 0xb51   : > { %v12530_v8 = vadd.f32 %v7069_v34, %v6889_v7  ;;  %7422 = vmatmul.f32.gmra.mxu0 %v12464_v41  ;;  %7511 = vmatmul.f32.gmra.mxu1 %v12471_v0 }
 0xb56   : > { %v6896_v15 = vpop.f32.mrf.mxu0  ;;  %v7077_v62 = vpop.f32.mrf.mxu1 }
 0xb57   : > { %v6897_v61 = vadd.f32 %v6896_v15, %v12517_v17 }
 0xb59   : > { %v12535_v12 = vadd.f32 %v7073_v40, %v6897_v61  ;;  %7426 = vmatmul.f32.gmra.mxu0 %v12471_v0  ;;  %7515 = vmatmul.f32.gmra.mxu1 %v12478_v35 }
 0xb5e   : > { %v6904_v33 = vpop.f32.mrf.mxu0  ;;  %v7081_v54 = vpop.f32.mrf.mxu1 }
 0xb5f   : > { %v6905_v50 = vadd.f32 %v6904_v33, %v12517_v17 }
 0xb61   : > { %v12540_v31 = vadd.f32 %v7077_v62, %v6905_v50  ;;  %7430 = vmatmul.f32.gmra.mxu0 %v12478_v35  ;;  %7519 = vmatmul.f32.gmra.mxu1 %v12485_v51 }
 0xb66   : > { %v6912_v41 = vpop.f32.mrf.mxu0  ;;  %v7085_v59 = vpop.f32.mrf.mxu1 }
 0xb67   : > { %v6913_v42 = vadd.f32 %v6912_v41, %v12517_v17 }
 0xb69   : > { %v12545_v57 = vadd.f32 %v7081_v54, %v6913_v42  ;;  %7434 = vmatmul.f32.gmra.mxu0 %v12485_v51  ;;  %7523 = vmatmul.f32.gmra.mxu1 %v12489_v53  ;;  %v7254_v51 = vpop.f32.mrf.mxu3  ;;  %v7171_v54 = vadd.f32 %v7170_v63, %v12525_v20 }
 0xb6a   : > { %v7255_v6 = vadd.f32 %v7254_v51, %v7156_v55 }
 0xb6e   : > { %v6920_v0 = vpop.f32.mrf.mxu0  ;;  %v7089_v32 = vpop.f32.mrf.mxu1 }
 0xb6f   : > { %v6921_v39 = vadd.f32 %v6920_v0, %v12517_v17 }
 0xb71   : > { %v12550_v3 = vadd.f32 %v7085_v59, %v6921_v39  ;;  %7438 = vmatmul.f32.gmra.mxu0 %v12489_v53  ;;  %7527 = vmatmul.f32.gmra.mxu1 %v12493_v37  ;;  %v7260_v49 = vpop.f32.mrf.mxu3 }
 0xb76   : > { %v6928_v35 = vpop.f32.mrf.mxu0  ;;  %v7093_v25 = vpop.f32.mrf.mxu1 }
 0xb77   : > { %v6929_v29 = vadd.f32 %v6928_v35, %v12517_v17 }
 0xb79   : > { %v12555_v26 = vadd.f32 %v7089_v32, %v6929_v29  ;;  %7442 = vmatmul.f32.gmra.mxu0 %v12493_v37  ;;  %v7266_v1 = vpop.f32.mrf.mxu3  ;;  %v6865_v37 = vadd.f32 %v12512_v24, %v12517_v17  ;;  %v7175_v24 = vpop.f32.mrf.mxu2 }
 0xb7a   : > { %v7267_v15 = vadd.f32 %v7266_v1, %v7166_v11  ;;  %v7176_v35 = vadd.f32 %v7175_v24, %v12530_v8 }
 0xb7b   : > { %v7058_v36 = vadd.f32 %v12508_v47, %v6865_v37 }
 0xb7d   : > { %v7161_v14 = vadd.f32 %v7160_v38, %v7058_v36 }
 0xb7e   : > { %v6936_v23 = vpop.f32.mrf.mxu0  ;;  %v7097_v13 = vpop.f32.mrf.mxu1 }
 0xb7f   : > { %v6937_v46 = vadd.f32 %v6936_v23, %v12517_v17  ;;  %v7261_v4 = vadd.f32 %v7260_v49, %v7161_v14 }
 0xb81   : > { %v12559_v30 = vadd.f32 %v7093_v25, %v6937_v46  ;;  %v7272_v60 = vpop.f32.mrf.mxu3  ;;  %v7180_v50 = vpop.f32.mrf.mxu2 }
 0xb82   : > { %v7273_v42 = vadd.f32 %v7272_v60, %v7171_v54  ;;  %v7181_v38 = vadd.f32 %v7180_v50, %v12535_v12 }
 0xb86   : > { %v6944_v5 = vpop.f32.mrf.mxu0  ;;  %v7101_v53 = vpop.f32.mrf.mxu1 }
 0xb87   : > { %v6945_v52 = vadd.f32 %v6944_v5, %v12517_v17 }
 0xb89   : > { %v12564_v21 = vadd.f32 %v7097_v13, %v6945_v52  ;;  %v7278_v47 = vpop.f32.mrf.mxu3  ;;  %v7185_v9 = vpop.f32.mrf.mxu2 }
 0xb8a   : > { %v7279_v51 = vadd.f32 %v7278_v47, %v7176_v35  ;;  %v7186_v28 = vadd.f32 %v7185_v9, %v12540_v31 }
 0xb8e   : > { %v6952_v22 = vpop.f32.mrf.mxu0  ;;  %v7480_v19 = vpop.f32.mrf.mxu1 }
 0xb8f   : > { %v6953_v58 = vadd.f32 %v6952_v22, %v12517_v17 }
 0xb91   : > { %v12570_v56 = vadd.f32 %v7101_v53, %v6953_v58  ;;  %v7284_v0 = vpop.f32.mrf.mxu3  ;;  %v7190_v52 = vpop.f32.mrf.mxu2 }
 0xb92   : > { %v7285_v53 = vadd.f32 %v7284_v0, %v7181_v38  ;;  %v7191_v36 = vadd.f32 %v7190_v52, %v12545_v57 }
 0xb96   : > { %v7395_v27 = vpop.f32.mrf.mxu0  ;;  %v7484_v16 = vpop.f32.mrf.mxu1 }
 0xb97   : > { %v7396_v44 = vadd.f32 %v7395_v27, %v7255_v6 }
 0xb99   : > { %v7481_v2 = vadd.f32 %v7480_v19, %v7396_v44  ;;  %v7290_v46 = vpop.f32.mrf.mxu3  ;;  %v7195_v6 = vpop.f32.mrf.mxu2 }
 0xb9a   : > { %v7291_v58 = vadd.f32 %v7290_v46, %v7186_v28 }
 0xb9b   : > { %v7531_v48 = vmax.f32 %v7481_v2, 0.0  ;;  %v7196_v2 = vadd.f32 %v7195_v6, %v12550_v3 }
 0xb9d   : > { %7557 = vrot.lane.b32.xlu2 %v7531_v48, %s8034_s9 }
 0xb9e   : > { %v7399_v34 = vpop.f32.mrf.mxu0  ;;  %v7488_v10 = vpop.f32.mrf.mxu1 }
 0xb9f   : > { %v7400_v17 = vadd.f32 %v7399_v34, %v7261_v4 }
 0xba1   : > { %v7485_v40 = vadd.f32 %v7484_v16, %v7400_v17  ;;  %v7296_v19 = vpop.f32.mrf.mxu3  ;;  %v7200_v4 = vpop.f32.mrf.mxu2 }
 0xba2   : > { %v7297_v44 = vadd.f32 %v7296_v19, %v7191_v36  ;;  %v7201_v11 = vadd.f32 %v7200_v4, %v12555_v26  ;;  %v7979_v4 = vld [vmem:[%s8149_s10 + $0x48] sm:$0xff] }
 0xba3   : > { %v7532_v7 = vmax.f32 %v7485_v40, 0.0 }
 0xba5   : > { %7559 = vrot.lane.b32.xlu1 %v7532_v7, %s8034_s9 }
 0xba6   : > { %v7403_v62 = vpop.f32.mrf.mxu0  ;;  %v7492_v61 = vpop.f32.mrf.mxu1 }
 0xba7   : > { %v7404_v33 = vadd.f32 %v7403_v62, %v7267_v15 }
 0xba9   : > { %v7489_v41 = vadd.f32 %v7488_v10, %v7404_v33  ;;  %v7302_v16 = vpop.f32.mrf.mxu3  ;;  %v7205_v15 = vpop.f32.mrf.mxu2 }
 0xbaa   : > { %v7303_v10 = vadd.f32 %v7302_v16, %v7196_v2  ;;  %v7206_v54 = vadd.f32 %v7205_v15, %v12559_v30 }
 0xbab   : > { %v7533_v59 = vmax.f32 %v7489_v41, 0.0 }
 0xbad   : > { %7561 = vrot.lane.b32.xlu0 %v7533_v59, %s8034_s9 }
 0xbae   : > { %v7407_v32 = vpop.f32.mrf.mxu0  ;;  %v7496_v43 = vpop.f32.mrf.mxu1 }
 0xbaf   : > { %v7408_v39 = vadd.f32 %v7407_v32, %v7273_v42 }
 0xbb1   : > { %v7493_v25 = vadd.f32 %v7492_v61, %v7408_v39  ;;  %v7308_v24 = vpop.f32.mrf.mxu3  ;;  %v7210_v0 = vpop.f32.mrf.mxu2 }
 0xbb2   : > { %v7309_v62 = vadd.f32 %v7308_v24, %v7201_v11  ;;  %v7980_v24 = vld [vmem:[%s8149_s10 + $0x38] sm:$0xff]  ;;  %v7981_v11 = vld [vmem:[%s8149_s10 + $0x40] sm:$0xff] }
 0xbb3   : > { %v7534_v29 = vmax.f32 %v7493_v25, 0.0 }
 0xbb5   : > { %7563 = vrot.lane.b32.xlu2 %v7534_v29, %s8034_s9 }
 0xbb6   : > { %v7411_v23 = vpop.f32.mrf.mxu0  ;;  %v7500_v20 = vpop.f32.mrf.mxu1 }
 0xbb7   : > { %v7412_v13 = vadd.f32 %v7411_v23, %v7279_v51 }
 0xbb9   : > { %v7497_v49 = vadd.f32 %v7496_v43, %v7412_v13  ;;  %v7314_v33 = vpop.f32.mrf.mxu3  ;;  %v7211_v43 = vadd.f32 %v7210_v0, %v12564_v21  ;;  %v7215_v23 = vpop.f32.mrf.mxu2 }
 0xbba   : > { %v7315_v42 = vadd.f32 %v7314_v33, %v7206_v54  ;;  %v7984_v54 = vld [vmem:[%s8149_s10 + $0x58] sm:$0xff] }
 0xbbb   : > { %v7535_v5 = vmax.f32 %v7497_v49, 0.0 }
 0xbbd   : > { %7565 = vrot.lane.b32.xlu1 %v7535_v5, %s8034_s9 }
 0xbbe   : > { %v7415_v18 = vpop.f32.mrf.mxu0  ;;  %v7504_v8 = vpop.f32.mrf.mxu1 }
 0xbbf   : > { %v7416_v45 = vadd.f32 %v7415_v18, %v7285_v53  ;;  %v7972_v18 = vld [vmem:[%s8149_s10] sm:$0xff] }
 0xbc1   : > { %v7501_v22 = vadd.f32 %v7500_v20, %v7416_v45  ;;  %v7320_v35 = vpop.f32.mrf.mxu3  ;;  %v7216_v20 = vadd.f32 %v7215_v23, %v12570_v56 }
 0xbc2   : > { %v7321_v9 = vadd.f32 %v7320_v35, %v7211_v43 }
 0xbc3   : > { %v7536_v1 = vmax.f32 %v7501_v22, 0.0  ;;  %v7973_v22 = vld [vmem:[%s8149_s10 + $0x18] sm:$0xff] }
 0xbc5   : > { %7567 = vrot.lane.b32.xlu0 %v7536_v1, %s8034_s9 }
 0xbc6   : > { %v7419_v55 = vpop.f32.mrf.mxu0  ;;  %v7508_v37 = vpop.f32.mrf.mxu1 }
 0xbc7   : > { %v7420_v12 = vadd.f32 %v7419_v55, %v7291_v58  ;;  %v7974_v58 = vld [vmem:[%s8149_s10 + $0x8] sm:$0xff] }
 0xbc9   : > { %v7505_v63 = vadd.f32 %v7504_v8, %v7420_v12  ;;  %v7326_v38 = vpop.f32.mrf.mxu3  ;;  %v7975_v12 = vld [vmem:[%s8149_s10 + $0x10] sm:$0xff] }
 0xbca   : > { %v7327_v49 = vadd.f32 %v7326_v38, %v7216_v20 }
 0xbcb   : > { %v7537_v27 = vmax.f32 %v7505_v63, 0.0  ;;  %v7976_v63 = vld [vmem:[%s8149_s10 + $0x30] sm:$0xff] }
 0xbcd   : > { %7569 = vrot.lane.b32.xlu2 %v7537_v27, %s8034_s9 }
 0xbce   : > { %v7423_v14 = vpop.f32.mrf.mxu0  ;;  %v7512_v60 = vpop.f32.mrf.mxu1 }
 0xbcf   : > { %v7424_v31 = vadd.f32 %v7423_v14, %v7297_v44  ;;  %v7977_v44 = vld [vmem:[%s8149_s10 + $0x20] sm:$0xff] }
 0xbd1   : > { %v7509_v48 = vadd.f32 %v7508_v37, %v7424_v31 }
 0xbd3   : > { %v7538_v34 = vmax.f32 %v7509_v48, 0.0 }
 0xbd5   : > { %7571 = vrot.lane.b32.xlu1 %v7538_v34, %s8034_s9 }
 0xbd6   : > { %v7427_v17 = vpop.f32.mrf.mxu0  ;;  %v7516_v47 = vpop.f32.mrf.mxu1 }
 0xbd7   : > { %v7428_v57 = vadd.f32 %v7427_v17, %v7303_v10 }
 0xbd9   : > { %v7513_v40 = vadd.f32 %v7512_v60, %v7428_v57  ;;  %v7978_v60 = vld [vmem:[%s8149_s10 + $0x28] sm:$0xff] }
 0xbdb   : > { %v7539_v7 = vmax.f32 %v7513_v40, 0.0 }
 0xbdd   : > { %7573 = vrot.lane.b32.xlu0 %v7539_v7, %s8034_s9  ;;  %v7982_v7 = vld [vmem:[%s8149_s10 + $0x60] sm:$0xff] }
 0xbde   : > { %v7431_v61 = vpop.f32.mrf.mxu0  ;;  %v7520_v59 = vpop.f32.mrf.mxu1 }
 0xbdf   : > { %v7432_v3 = vadd.f32 %v7431_v61, %v7309_v62  ;;  %v7983_v61 = vld [vmem:[%s8149_s10 + $0x50] sm:$0xff] }
 0xbe1   : > { %v7517_v50 = vadd.f32 %v7516_v47, %v7432_v3 }
 0xbe3   : > { %v7540_v41 = vmax.f32 %v7517_v50, 0.0 }
 0xbe5   : > { %7575 = vrot.lane.b32.xlu2 %v7540_v41, %s8034_s9 }
 0xbe6   : > { %v7435_v26 = vpop.f32.mrf.mxu0  ;;  %v7524_v29 = vpop.f32.mrf.mxu1 }
 0xbe7   : > { %v7436_v32 = vadd.f32 %v7435_v26, %v7315_v42  ;;  %v13394_v26 = vld [vmem:[#allocation17_spill] sm:$0xff] }
 0xbe9   : > { %v7521_v39 = vadd.f32 %v7520_v59, %v7436_v32  ;;  %v13393_v59 = vld [vmem:[#allocation11_spill] sm:$0xff] }
 0xbeb   : > { %v7541_v25 = vmax.f32 %v7521_v39, 0.0  ;;  %v13395_v39 = vld [vmem:[#allocation44_spill] sm:$0xff] }
 0xbed   : > { %7577 = vrot.lane.b32.xlu1 %v7541_v25, %s8034_s9 }
 0xbee   : > { %v7439_v30 = vpop.f32.mrf.mxu0  ;;  %v7528_v52 = vpop.f32.mrf.mxu1 }
 0xbef   : > { %v7440_v51 = vadd.f32 %v7439_v30, %v7321_v9  ;;  %v13396_v9 = vld [vmem:[#allocation8_spill] sm:$0xff] }
 0xbf1   : > { %v7525_v13 = vadd.f32 %v7524_v29, %v7440_v51  ;;  %v13397_v51 = vld [vmem:[#allocation23_spill] sm:$0xff] }
 0xbf3   : > { %v7542_v46 = vmax.f32 %v7525_v13, 0.0  ;;  %v13398_v13 = vld [vmem:[#allocation15_spill] sm:$0xff] }
 0xbf5   : > { %7579 = vrot.lane.b32.xlu0 %v7542_v46, %s8034_s9 }
 0xbf6   : > { %v7443_v21 = vpop.f32.mrf.mxu0 }
 0xbf7   : > { %v7444_v5 = vadd.f32 %v7443_v21, %v7327_v49  ;;  %v7558_v53 = vpop.permute.xlu2 %7557  ;;  %v13399_v49 = vld [vmem:[#allocation29_spill] sm:$0xff] }
 0xbf8   : > { %v7596_v8 = vmul.f32 %v7972_v18, %v7558_v53  ;;  %v13400_v53 = vld [vmem:[#allocation19_spill] sm:$0xff] }
 0xbf9   : > { %v7529_v45 = vadd.f32 %v7528_v52, %v7444_v5 }
 0xbfa   : > { %7622 = vrot.lane.b32.xlu1 %v7596_v8, %s8035_s11  ;;  %v13401_v8 = vld [vmem:[#allocation36_spill] sm:$0xff] }
 0xbfb   : > { %v7543_v56 = vmax.f32 %v7529_v45, 0.0 }
 0xbfd   : > { %7581 = vrot.lane.b32.xlu2 %v7543_v56, %s8034_s9 }
 0xc0f   : > { %v7564_v28 = vpop.permute.xlu2 %7563 }
 0xc10   : > { %v7599_v19 = vmul.f32 %v7973_v22, %v7564_v28  ;;  %v13402_v28 = vld [vmem:[#allocation38_spill] sm:$0xff] }
 0xc12   : > { %7628 = vrot.lane.b32.xlu1 %v7599_v19, %s8035_s11 }
 0xc17   : > { %v7560_v1 = vpop.permute.xlu1 %7559 }
 0xc18   : > { %v7597_v55 = vmul.f32 %v7974_v58, %v7560_v1  ;;  %v13403_v1 = vld [vmem:[#allocation32_spill] sm:$0xff] }
 0xc1a   : > { %7624 = vrot.lane.b32.xlu0 %v7597_v55, %s8035_s11 }
 0xc1f   : > { %v7562_v37 = vpop.permute.xlu0 %7561 }
 0xc20   : > { %v7598_v6 = vmul.f32 %v7975_v12, %v7562_v37  ;;  %v13404_v37 = vld [vmem:[#allocation41_spill] sm:$0xff] }
 0xc22   : > { %7626 = vrot.lane.b32.xlu2 %v7598_v6, %s8035_s11 }
 0xc27   : > { %v7570_v36 = vpop.permute.xlu2 %7569 }
 0xc28   : > { %v7602_v27 = vmul.f32 %v7976_v63, %v7570_v36  ;;  %v13405_v36 = vld [vmem:[#allocation7_spill] sm:$0xff] }
 0xc2a   : > { %7634 = vrot.lane.b32.xlu1 %v7602_v27, %s8035_s11 }
 0xc2f   : > { %v7566_v16 = vpop.permute.xlu1 %7565 }
 0xc30   : > { %v7600_v14 = vmul.f32 %v7977_v44, %v7566_v16 }
 0xc32   : > { %7630 = vrot.lane.b32.xlu0 %v7600_v14, %s8035_s11 }
 0xc37   : > { %v7568_v31 = vpop.permute.xlu0 %7567 }
 0xc38   : > { %v7601_v2 = vmul.f32 %v7978_v60, %v7568_v31 }
 0xc3a   : > { %7632 = vrot.lane.b32.xlu2 %v7601_v2, %s8035_s11 }
 0xc3f   : > { %v7576_v48 = vpop.permute.xlu2 %7575 }
 0xc40   : > { %v7605_v34 = vmul.f32 %v7979_v4, %v7576_v48 }
 0xc42   : > { %7640 = vrot.lane.b32.xlu1 %v7605_v34, %s8035_s11 }
 0xc47   : > { %v7572_v10 = vpop.permute.xlu1 %7571 }
 0xc48   : > { %v7603_v17 = vmul.f32 %v7980_v24, %v7572_v10 }
 0xc4a   : > { %7636 = vrot.lane.b32.xlu0 %v7603_v17, %s8035_s11 }
 0xc4f   : > { %v7574_v57 = vpop.permute.xlu0 %7573 }
 0xc50   : > { %v7604_v40 = vmul.f32 %v7981_v11, %v7574_v57 }
 0xc52   : > { %7638 = vrot.lane.b32.xlu2 %v7604_v40, %s8035_s11 }
 0xc57   : > { %v7582_v47 = vpop.permute.xlu2 %7581 }
 0xc58   : > { %v7608_v15 = vmul.f32 %v7982_v7, %v7582_v47 }
 0xc5a   : > { %7646 = vrot.lane.b32.xlu1 %v7608_v15, %s8035_s11 }
 0xc5f   : > { %v7578_v62 = vpop.permute.xlu1 %7577 }
 0xc60   : > { %v7606_v3 = vmul.f32 %v7983_v61, %v7578_v62 }
 0xc62   : > { %7642 = vrot.lane.b32.xlu0 %v7606_v3, %s8035_s11 }
 0xc67   : > { %v7580_v33 = vpop.permute.xlu0 %7579 }
 0xc68   : > { %v7607_v50 = vmul.f32 %v7984_v54, %v7580_v33 }
 0xc6a   : > { %7644 = vrot.lane.b32.xlu2 %v7607_v50, %s8035_s11 }
 0xc6c   : > { %v7623_v41 = vpop.permute.xlu1 %7622 }
 0xc6d   : > { %v7661_v42 = vadd.f32 %v7623_v41, %v13393_v59 }
 0xc6f   : > { %7687 = vrot.lane.b32.xlu0 %v7661_v42, %s8032_s8 }
 0xc7c   : > { %v7627_v0 = vpop.permute.xlu2 %7626 }
 0xc7d   : > { %v7663_v32 = vadd.f32 %v7627_v0, %v13394_v26 }
 0xc7f   : > { %7691 = vrot.lane.b32.xlu1 %v7663_v32, %s8032_s8 }
 0xc84   : > { %v7629_v43 = vpop.permute.xlu1 %7628 }
 0xc85   : > { %v7664_v35 = vadd.f32 %v7629_v43, %v13395_v39 }
 0xc87   : > { %7693 = vrot.lane.b32.xlu0 %v7664_v35, %s8032_s8 }
 0xc8c   : > { %v7625_v25 = vpop.permute.xlu0 %7624 }
 0xc8d   : > { %v7662_v29 = vadd.f32 %v7625_v25, %v13396_v9 }
 0xc8f   : > { %7689 = vrot.lane.b32.xlu2 %v7662_v29, %s8032_s8 }
 0xc94   : > { %v7633_v30 = vpop.permute.xlu2 %7632 }
 0xc95   : > { %v7666_v23 = vadd.f32 %v7633_v30, %v13397_v51 }
 0xc97   : > { %7697 = vrot.lane.b32.xlu1 %v7666_v23, %s8032_s8 }
 0xc9c   : > { %v7635_v20 = vpop.permute.xlu1 %7634 }
 0xc9d   : > { %v7667_v46 = vadd.f32 %v7635_v20, %v13398_v13 }
 0xc9f   : > { %7699 = vrot.lane.b32.xlu0 %v7667_v46, %s8032_s8 }
 0xca4   : > { %v7631_v38 = vpop.permute.xlu0 %7630 }
 0xca5   : > { %v7665_v21 = vadd.f32 %v7631_v38, %v13399_v49 }
 0xca7   : > { %7695 = vrot.lane.b32.xlu2 %v7665_v21, %s8032_s8 }
 0xcac   : > { %v7639_v5 = vpop.permute.xlu2 %7638 }
 0xcad   : > { %v7669_v52 = vadd.f32 %v7639_v5, %v13400_v53 }
 0xcaf   : > { %7703 = vrot.lane.b32.xlu1 %v7669_v52, %s8032_s8 }
 0xcb4   : > { %v7641_v18 = vpop.permute.xlu1 %7640 }
 0xcb5   : > { %v7670_v45 = vadd.f32 %v7641_v18, %v13401_v8 }
 0xcb7   : > { %7705 = vrot.lane.b32.xlu0 %v7670_v45, %s8032_s8 }
 0xcbc   : > { %v7637_v56 = vpop.permute.xlu0 %7636 }
 0xcbd   : > { %v7668_v22 = vadd.f32 %v7637_v56, %v13402_v28 }
 0xcbf   : > { %7701 = vrot.lane.b32.xlu2 %v7668_v22, %s8032_s8 }
 0xcc4   : > { %v7645_v19 = vpop.permute.xlu2 %7644 }
 0xcc5   : > { %v7672_v58 = vadd.f32 %v7645_v19, %v13403_v1 }
 0xcc7   : > { %7709 = vrot.lane.b32.xlu1 %v7672_v58, %s8032_s8 }
 0xccc   : > { %v7647_v55 = vpop.permute.xlu1 %7646 }
 0xccd   : > { %v7673_v12 = vadd.f32 %v7647_v55, %v13404_v37 }
 0xccf   : > { %7711 = vrot.lane.b32.xlu0 %v7673_v12, %s8032_s8 }
 0xcd4   : > { %v7643_v6 = vpop.permute.xlu0 %7642 }
 0xcd5   : > { %v7671_v63 = vadd.f32 %v7643_v6, %v13405_v36 }
 0xcd7   : > { %7707 = vrot.lane.b32.xlu2 %v7671_v63, %s8032_s8 }
 0xce1   : > { %v7688_v27 = vpop.permute.xlu0 %7687 }
 0xce2   : > { %7726 = vst.msk [vmem:[%s270_s13] sm:$0xff] %vm5807_vm0, %v7688_v27 }
 0xce9   : > { %v7690_v16 = vpop.permute.xlu2 %7689 }
 0xcea   : > { %7727 = vst.msk [vmem:[%s270_s13 + $0x8] sm:$0xff] %vm5807_vm0, %v7690_v16 }
 0xcf1   : > { %v7692_v44 = vpop.permute.xlu1 %7691 }
 0xcf2   : > { %7728 = vst.msk [vmem:[%s270_s13 + $0x10] sm:$0xff] %vm5807_vm0, %v7692_v44 }
 0xcf9   : > { %v7694_v14 = vpop.permute.xlu0 %7693 }
 0xcfa   : > { %7729 = vst.msk [vmem:[%s270_s13 + $0x18] sm:$0xff] %vm5807_vm0, %v7694_v14 }
 0xd01   : > { %v7696_v31 = vpop.permute.xlu2 %7695 }
 0xd02   : > { %7730 = vst.msk [vmem:[%s270_s13 + $0x20] sm:$0xff] %vm5807_vm0, %v7696_v31 }
 0xd09   : > { %v7698_v60 = vpop.permute.xlu1 %7697 }
 0xd0a   : > { %7731 = vst.msk [vmem:[%s270_s13 + $0x28] sm:$0xff] %vm5807_vm0, %v7698_v60 }
 0xd11   : > { %v7700_v2 = vpop.permute.xlu0 %7699 }
 0xd12   : > { %7732 = vst.msk [vmem:[%s270_s13 + $0x30] sm:$0xff] %vm5807_vm0, %v7700_v2 }
 0xd19   : > { %v7702_v48 = vpop.permute.xlu2 %7701 }
 0xd1a   : > { %7733 = vst.msk [vmem:[%s270_s13 + $0x38] sm:$0xff] %vm5807_vm0, %v7702_v48 }
 0xd21   : > { %v7704_v4 = vpop.permute.xlu1 %7703 }
 0xd22   : > { %7734 = vst.msk [vmem:[%s270_s13 + $0x40] sm:$0xff] %vm5807_vm0, %v7704_v4 }
 0xd29   : > { %v7706_v34 = vpop.permute.xlu0 %7705 }
 0xd2a   : > { %7735 = vst.msk [vmem:[%s270_s13 + $0x48] sm:$0xff] %vm5807_vm0, %v7706_v34 }
 0xd31   : > { %v7708_v10 = vpop.permute.xlu2 %7707 }
 0xd32   : > { %7736 = vst.msk [vmem:[%s270_s13 + $0x50] sm:$0xff] %vm5807_vm0, %v7708_v10 }
 0xd39   : > { %v7710_v24 = vpop.permute.xlu1 %7709 }
 0xd3a   : > { %7737 = vst.msk [vmem:[%s270_s13 + $0x58] sm:$0xff] %vm5807_vm0, %v7710_v24 }
 0xd41   : > { %v7712_v17 = vpop.permute.xlu0 %7711 }
 0xd42   : > { %7738 = vst.msk [vmem:[%s270_s13 + $0x60] sm:$0xff] %vm5807_vm0, %v7712_v17 }
 0xd43 PF: > { %s17_s21 = sadd.s32 1, %s8025_s21  }
 0xd44   : > { %p14_p7 = scmp.ge.s32.totalorder %s17_s21, 4  }
 0xd46   :  { %16 = sbr.rel (!%p14_p7) target bundleno = 1 (0x1), region = 79 }
 0xd4b   :  { %7761 = vsyncpa [#allocation3], 1 }
 0xd4c   :  { %7763 = vsyncpa [#allocation3 + $0x1], 1 }

</bundles_post_ra>
